<compile_context>
chip_gen: v7x
topology: tpu7x:2x2x1
jax: 0.10.0
libtpu: 0.0.40
codegen_flags: <defaults>
</compile_context>

<pallas_src>
import jax
import jax.numpy as jnp
from jax.experimental import pallas as pl
from jax.experimental.pallas import tpu as pltpu

N_CLUSTERS = 10
_LANE = 128


def _pad_dim(d, lane=_LANE):
    # Pad hidden feature dims to a lane multiple (500->512, 2000->2048);
    # small dims (64, latent, clusters) are left as-is.
    return d if d <= lane else ((d + lane - 1) // lane) * lane


# ----------------------------------------------------------------------------- kernel

def _fused_forward_kernel(x_ref,
                          ew0, ew1, ew2, ew3,
                          bias_ref, cent_ref,
                          dw0_hbm, dw1_hbm, dw2_hbm, dw3_hbm,
                          out_ref,
                          dw0_v, dw1_v, dw2_v, dw3_v, dma_sem):
    """Fused encoder -> DEC clustering -> decoder forward (single grid point)."""
    n = x_ref.shape[0]
    latent = ew3.shape[1]
    k = N_CLUSTERS

    # -- start streaming the decoder weights HBM -> VMEM immediately so the DMA
    #    overlaps with the encoder + clustering compute.
    dec_copies = []
    for i, (hbm, vmem) in enumerate(((dw0_hbm, dw0_v), (dw1_hbm, dw1_v),
                                     (dw2_hbm, dw2_v), (dw3_hbm, dw3_v))):
        cp = pltpu.make_async_copy(hbm, vmem, dma_sem.at[i])
        cp.start()
        dec_copies.append(cp)

    def dense_relu(h_bf16, w, bias_row, out_d):
        # bf16 x bf16 on the MXU, f32 accumulation, f32 bias + ReLU.
        y = jnp.dot(h_bf16, w, preferred_element_type=jnp.float32)
        return jnp.maximum(y + bias_ref[bias_row:bias_row + 1, 0:out_d], 0.0)

    # ---- encoder: 64 -> 512 -> 512 -> 2048 -> latent (ReLU after every layer)
    h = x_ref[...].astype(jnp.bfloat16)
    a = None
    for li, w_ref in enumerate((ew0, ew1, ew2, ew3)):
        a = dense_relu(h, w_ref[...], li, w_ref.shape[1])
        h = a.astype(jnp.bfloat16)            # carry activations in bf16
    z_f32, z_bf16 = a, h                      # (n, latent)

    # ---- DEC soft assignment; reproduces the PyTorch clustering() exactly:
    #   q = 1 / (1 + cdist(centers, z)**2)        (K, N)
    #   q = (q / q.sum(axis=0)).T                 (N, K) normalise over clusters
    #   p = (exp(q) / q.sum(axis=0)).T            f = per-cluster batch sum
    #   p = (p / p.sum(axis=0)).T                 (N, K) normalise over clusters
    ct = cent_ref[0:latent, 0:k].astype(jnp.bfloat16)        # centers^T  (L, K)
    c2 = cent_ref[latent:latent + 1, 0:k]                    # sum(c^2)   (1, K)
    z2 = jnp.sum(z_f32 * z_f32, axis=1, keepdims=True)       # (n, 1)
    zc = jnp.dot(z_bf16, ct, preferred_element_type=jnp.float32)   # (n, K)
    d2 = jnp.maximum(z2 + c2 - 2.0 * zc, 0.0)
    q0 = 1.0 / (1.0 + d2)
    q = q0 / jnp.sum(q0, axis=1, keepdims=True)              # over clusters
    f = jnp.sum(q, axis=0, keepdims=True)                    # (1, K) batch sum
    p1 = jnp.exp(q) / f
    p = p1 / jnp.sum(p1, axis=1, keepdims=True)              # over clusters

    # ---- decoder: latent -> 2048 -> 512 -> 512 -> 64 (ReLU after every layer)
    for cp in dec_copies:
        cp.wait()
    h = z_bf16
    for li, w_ref in enumerate((dw0_v, dw1_v, dw2_v, dw3_v)):
        a = dense_relu(h, w_ref[...], 4 + li, w_ref.shape[1])
        h = a.astype(jnp.bfloat16)
    recon = a                                                # (n, 64) f32

    # ---- single lane-dense output slab: recon | latent | p | q | zero-pad
    used = recon.shape[1] + latent + 2 * k
    pieces = [recon, z_f32, p, q]
    pad = out_ref.shape[1] - used
    if pad:
        pieces.append(jnp.zeros((n, pad), jnp.float32))
    out_ref[...] = jnp.concatenate(pieces, axis=1)


# ----------------------------------------------------------------------------- wrapper

_VMEM = pl.BlockSpec(memory_space=pltpu.MemorySpace.VMEM)
_HBM = pl.BlockSpec(memory_space=pl.ANY)


@jax.jit
def dec_exp_forward(x, params):
    enc_w, dec_w = params["enc_w"], params["dec_w"]
    bias_slab, cent_slab = params["bias_slab"], params["cent_slab"]

    n = x.shape[0]
    latent = enc_w[-1].shape[1]
    k = N_CLUSTERS
    out_features = dec_w[-1].shape[1]
    slab_w = ((out_features + latent + 2 * k + _LANE - 1) // _LANE) * _LANE

    args = [x, *enc_w, bias_slab, cent_slab, *dec_w]
    in_specs = [_VMEM] * (3 + len(enc_w)) + [_HBM] * len(dec_w)
    scratch_shapes = [pltpu.VMEM(w.shape, w.dtype) for w in dec_w]
    scratch_shapes.append(pltpu.SemaphoreType.DMA((len(dec_w),)))

    # Advisory cost estimate so XLA schedules around this mem-bound call.
    flops = 2 * n * latent * k
    bytes_accessed = x.size * x.dtype.itemsize
    for w in (*enc_w, *dec_w):
        flops += 2 * n * w.shape[0] * w.shape[1]
        bytes_accessed += w.size * w.dtype.itemsize
    bytes_accessed += (bias_slab.size + cent_slab.size + n * slab_w) * 4
    cost = pl.CostEstimate(flops=int(flops), transcendentals=int(n * k),
                           bytes_accessed=int(bytes_accessed))

    slab = pl.pallas_call(
        _fused_forward_kernel,
        out_shape=jax.ShapeDtypeStruct((n, slab_w), jnp.float32),
        in_specs=in_specs,
        out_specs=_VMEM,
        scratch_shapes=scratch_shapes,
        compiler_params=pltpu.CompilerParams(
            vmem_limit_bytes=32 * 1024 * 1024),
        cost_estimate=cost,
    )(*args)

    recon = slab[:, 0:out_features]
    latent_space = slab[:, out_features:out_features + latent]
    p = slab[:, out_features + latent:out_features + latent + k]
    q = slab[:, out_features + latent + k:out_features + latent + 2 * k]
    return recon, latent_space, p, q


# ----------------------------------------------------------------------------- params

def _init_linear(key, fan_in, fan_out):
    """torch.nn.Linear-style init at the logical shape, zero-padded to lane
    multiples; weight stored (in, out) in bf16, bias (1, out) in f32."""
    kw, kb = jax.random.split(key)
    bound = float(fan_in) ** -0.5
    w = jax.random.uniform(kw, (fan_in, fan_out), jnp.float32, -bound, bound)
    b = jax.random.uniform(kb, (fan_out,), jnp.float32, -bound, bound)
    fi, fo = _pad_dim(fan_in), _pad_dim(fan_out)
    w = jnp.pad(w, ((0, fi - fan_in), (0, fo - fan_out)))
    b = jnp.pad(b, (0, fo - fan_out))
    return w.astype(jnp.bfloat16), b.reshape(1, fo).astype(jnp.float32)


def init_params(key, latent_size):
    enc_dims = [(64, 500), (500, 500), (500, 2000), (2000, latent_size)]
    dec_dims = [(latent_size, 2000), (2000, 500), (500, 500), (500, 64)]
    keys = jax.random.split(key, len(enc_dims) + len(dec_dims) + 1)

    enc = [_init_linear(keys[i], fi, fo) for i, (fi, fo) in enumerate(enc_dims)]
    dec = [_init_linear(keys[len(enc_dims) + i], fi, fo)
           for i, (fi, fo) in enumerate(dec_dims)]
    # nn.Parameter(torch.empty(...)) is uninitialized in the PyTorch module;
    # use a deterministic normal init here (synthetic kernel).
    centers = 0.1 * jax.random.normal(keys[-1], (N_CLUSTERS, latent_size),
                                      jnp.float32)

    enc_w = [w for w, _ in enc]
    enc_b = [b for _, b in enc]
    dec_w = [w for w, _ in dec]
    dec_b = [b for _, b in dec]

    # Pre-packed f32 bias slab: one row per layer, lane-padded to the widest
    # layer, so the kernel prologue issues 1 DMA instead of 8.
    biases = enc_b + dec_b
    bias_cols = max(b.shape[1] for b in biases)
    bias_slab = jnp.zeros((len(biases), bias_cols), jnp.float32)
    for i, b in enumerate(biases):
        bias_slab = bias_slab.at[i, :b.shape[1]].set(b[0])

    # Pre-packed centers slab: rows 0..L-1 = centers^T, row L = sum(centers^2).
    rows = ((latent_size + 1 + 7) // 8) * 8
    cent_slab = jnp.zeros((rows, _LANE), jnp.float32)
    cent_slab = cent_slab.at[:latent_size, :N_CLUSTERS].set(centers.T)
    cent_slab = cent_slab.at[latent_size, :N_CLUSTERS].set(
        jnp.sum(centers * centers, axis=1))

    return {"enc_w": enc_w, "enc_b": enc_b, "dec_w": dec_w, "dec_b": dec_b,
            "centers": centers, "bias_slab": bias_slab, "cent_slab": cent_slab}


# ----------------------------------------------------------------------------- reference

def dec_exp_reference(x, params):
    """Plain-JAX reference using the same (padded, bf16) weights / casts."""
    def dense_relu(h_bf16, w, b):
        y = jnp.dot(h_bf16, w, preferred_element_type=jnp.float32)
        return jnp.maximum(y + b, 0.0)

    h = x.astype(jnp.bfloat16)
    a = None
    for w, b in zip(params["enc_w"], params["enc_b"]):
        a = dense_relu(h, w, b)
        h = a.astype(jnp.bfloat16)
    z_f32, z_bf16 = a, h

    c = params["centers"]
    ct = c.T.astype(jnp.bfloat16)
    c2 = jnp.sum(c * c, axis=1)[None, :]
    z2 = jnp.sum(z_f32 * z_f32, axis=1, keepdims=True)
    zc = jnp.dot(z_bf16, ct, preferred_element_type=jnp.float32)
    d2 = jnp.maximum(z2 + c2 - 2.0 * zc, 0.0)
    q0 = 1.0 / (1.0 + d2)
    q = q0 / jnp.sum(q0, axis=1, keepdims=True)
    f = jnp.sum(q, axis=0, keepdims=True)
    p1 = jnp.exp(q) / f
    p = p1 / jnp.sum(p1, axis=1, keepdims=True)

    h = z_bf16
    for w, b in zip(params["dec_w"], params["dec_b"]):
        a = dense_relu(h, w, b)
        h = a.astype(jnp.bfloat16)
    return a, z_f32, p, q


# ----------------------------------------------------------------------------- main

if __name__ == "__main__":
    latent_size = 32
    batch = 8

    key = jax.random.PRNGKey(0)
    k_params, k_x = jax.random.split(key)

    params = init_params(k_params, latent_size)
    x = jax.random.normal(k_x, (batch, 64), jnp.float32)

    recon, latent_space, p, q = dec_exp_forward(x, params)
    jax.block_until_ready((recon, latent_space, p, q))

    assert recon.shape == (batch, 64)
    assert latent_space.shape == (batch, latent_size)
    assert p.shape == (batch, N_CLUSTERS)
    assert q.shape == (batch, N_CLUSTERS)

    # Loose numerical check against a plain-JAX reference (same bf16 weights).
    r_ref, z_ref, p_ref, q_ref = jax.jit(dec_exp_reference)(x, params)
    for got, ref in ((recon, r_ref), (latent_space, z_ref),
                     (p, p_ref), (q, q_ref)):
        assert bool(jnp.allclose(got, ref, rtol=5e-2, atol=5e-3)), \
            "Pallas output mismatch vs reference"

    print("KERNEL_OK")
</pallas_src>

<mosaic_0001>
module attributes {stable_mosaic.version = 11 : i64} {
  func.func @_fused_forward_kernel(%arg0: memref<8x64xf32, #tpu.memory_space<vmem>>, %arg1: memref<64x512xbf16, #tpu.memory_space<vmem>>, %arg2: memref<512x512xbf16, #tpu.memory_space<vmem>>, %arg3: memref<512x2048xbf16, #tpu.memory_space<vmem>>, %arg4: memref<2048x32xbf16, #tpu.memory_space<vmem>>, %arg5: memref<8x2048xf32, #tpu.memory_space<vmem>>, %arg6: memref<40x128xf32, #tpu.memory_space<vmem>>, %arg7: memref<32x2048xbf16, #tpu.memory_space<any>>, %arg8: memref<2048x512xbf16, #tpu.memory_space<any>>, %arg9: memref<512x512xbf16, #tpu.memory_space<any>>, %arg10: memref<512x64xbf16, #tpu.memory_space<any>>, %arg11: memref<8x128xf32, #tpu.memory_space<vmem>>, %arg12: memref<32x2048xbf16, #tpu.memory_space<vmem>>, %arg13: memref<2048x512xbf16, #tpu.memory_space<vmem>>, %arg14: memref<512x512xbf16, #tpu.memory_space<vmem>>, %arg15: memref<512x64xbf16, #tpu.memory_space<vmem>>, %arg16: memref<4x!tpu.dma_semaphore, #tpu.memory_space<semaphore_mem>>) attributes {dimension_semantics = [], scalar_prefetch = 0 : i64, scratch_operands = 5 : i64, tpu.core_type = #tpu.core_type<tc>} {
    %c0_i32 = arith.constant 0 : i32
    %0 = tpu.memref_slice %arg16[%c0_i32] : memref<4x!tpu.dma_semaphore, #tpu.memory_space<semaphore_mem>> -> memref<1x!tpu.dma_semaphore, #tpu.memory_space<semaphore_mem>>
    %1 = tpu.memref_squeeze %0 : memref<1x!tpu.dma_semaphore, #tpu.memory_space<semaphore_mem>> -> memref<!tpu.dma_semaphore, #tpu.memory_space<semaphore_mem>>
    tpu.enqueue_dma source(%arg7 : memref<32x2048xbf16, #tpu.memory_space<any>>) target(%arg12 : memref<32x2048xbf16, #tpu.memory_space<vmem>>) target_semaphore(%1 : memref<!tpu.dma_semaphore, #tpu.memory_space<semaphore_mem>>)
    %c1_i32 = arith.constant 1 : i32
    %2 = tpu.memref_slice %arg16[%c1_i32] : memref<4x!tpu.dma_semaphore, #tpu.memory_space<semaphore_mem>> -> memref<1x!tpu.dma_semaphore, #tpu.memory_space<semaphore_mem>>
    %3 = tpu.memref_squeeze %2 : memref<1x!tpu.dma_semaphore, #tpu.memory_space<semaphore_mem>> -> memref<!tpu.dma_semaphore, #tpu.memory_space<semaphore_mem>>
    tpu.enqueue_dma source(%arg8 : memref<2048x512xbf16, #tpu.memory_space<any>>) target(%arg13 : memref<2048x512xbf16, #tpu.memory_space<vmem>>) target_semaphore(%3 : memref<!tpu.dma_semaphore, #tpu.memory_space<semaphore_mem>>)
    %c2_i32 = arith.constant 2 : i32
    %4 = tpu.memref_slice %arg16[%c2_i32] : memref<4x!tpu.dma_semaphore, #tpu.memory_space<semaphore_mem>> -> memref<1x!tpu.dma_semaphore, #tpu.memory_space<semaphore_mem>>
    %5 = tpu.memref_squeeze %4 : memref<1x!tpu.dma_semaphore, #tpu.memory_space<semaphore_mem>> -> memref<!tpu.dma_semaphore, #tpu.memory_space<semaphore_mem>>
    tpu.enqueue_dma source(%arg9 : memref<512x512xbf16, #tpu.memory_space<any>>) target(%arg14 : memref<512x512xbf16, #tpu.memory_space<vmem>>) target_semaphore(%5 : memref<!tpu.dma_semaphore, #tpu.memory_space<semaphore_mem>>)
    %c3_i32 = arith.constant 3 : i32
    %6 = tpu.memref_slice %arg16[%c3_i32] : memref<4x!tpu.dma_semaphore, #tpu.memory_space<semaphore_mem>> -> memref<1x!tpu.dma_semaphore, #tpu.memory_space<semaphore_mem>>
    %7 = tpu.memref_squeeze %6 : memref<1x!tpu.dma_semaphore, #tpu.memory_space<semaphore_mem>> -> memref<!tpu.dma_semaphore, #tpu.memory_space<semaphore_mem>>
    tpu.enqueue_dma source(%arg10 : memref<512x64xbf16, #tpu.memory_space<any>>) target(%arg15 : memref<512x64xbf16, #tpu.memory_space<vmem>>) target_semaphore(%7 : memref<!tpu.dma_semaphore, #tpu.memory_space<semaphore_mem>>)
    %c0 = arith.constant 0 : index
    %c0_0 = arith.constant 0 : index
    %8 = vector.load %arg0[%c0, %c0_0] : memref<8x64xf32, #tpu.memory_space<vmem>>, vector<8x64xf32>
    %9 = arith.truncf %8 : vector<8x64xf32> to vector<8x64xbf16>
    %c0_1 = arith.constant 0 : index
    %c0_2 = arith.constant 0 : index
    %10 = vector.load %arg1[%c0_1, %c0_2] : memref<64x512xbf16, #tpu.memory_space<vmem>>, vector<64x512xbf16>
    %cst = arith.constant dense<0.000000e+00> : vector<8x512xf32>
    %11 = tpu.matmul %9, %10, %cst {dimension_numbers = #tpu.dot_dimension_numbers<[1], [0], [0], [1], [0, 0, 1, 1], [], []>} : vector<8x64xbf16>, vector<64x512xbf16>, vector<8x512xf32> -> vector<8x512xf32>
    %c0_3 = arith.constant 0 : index
    %c0_4 = arith.constant 0 : index
    %12 = vector.load %arg5[%c0_3, %c0_4] : memref<8x2048xf32, #tpu.memory_space<vmem>>, vector<1x512xf32>
    %13 = vector.broadcast %12 : vector<1x512xf32> to vector<8x512xf32>
    %14 = arith.addf %11, %13 : vector<8x512xf32>
    %cst_5 = arith.constant 0.000000e+00 : f32
    %15 = vector.broadcast %cst_5 : f32 to vector<8x512xf32>
    %16 = arith.maximumf %14, %15 : vector<8x512xf32>
    %17 = arith.truncf %16 : vector<8x512xf32> to vector<8x512xbf16>
    %c0_6 = arith.constant 0 : index
    %c0_7 = arith.constant 0 : index
    %18 = vector.load %arg2[%c0_6, %c0_7] : memref<512x512xbf16, #tpu.memory_space<vmem>>, vector<512x512xbf16>
    %cst_8 = arith.constant dense<0.000000e+00> : vector<8x512xf32>
    %19 = tpu.matmul %17, %18, %cst_8 {dimension_numbers = #tpu.dot_dimension_numbers<[1], [0], [0], [1], [0, 0, 1, 1], [], []>} : vector<8x512xbf16>, vector<512x512xbf16>, vector<8x512xf32> -> vector<8x512xf32>
    %c1 = arith.constant 1 : index
    %c0_9 = arith.constant 0 : index
    %20 = vector.load %arg5[%c1, %c0_9] : memref<8x2048xf32, #tpu.memory_space<vmem>>, vector<1x512xf32>
    %21 = vector.broadcast %20 : vector<1x512xf32> to vector<8x512xf32>
    %22 = arith.addf %19, %21 : vector<8x512xf32>
    %cst_10 = arith.constant 0.000000e+00 : f32
    %23 = vector.broadcast %cst_10 : f32 to vector<8x512xf32>
    %24 = arith.maximumf %22, %23 : vector<8x512xf32>
    %25 = arith.truncf %24 : vector<8x512xf32> to vector<8x512xbf16>
    %c0_11 = arith.constant 0 : index
    %c0_12 = arith.constant 0 : index
    %26 = vector.load %arg3[%c0_11, %c0_12] : memref<512x2048xbf16, #tpu.memory_space<vmem>>, vector<512x2048xbf16>
    %cst_13 = arith.constant dense<0.000000e+00> : vector<8x2048xf32>
    %27 = tpu.matmul %25, %26, %cst_13 {dimension_numbers = #tpu.dot_dimension_numbers<[1], [0], [0], [1], [0, 0, 1, 1], [], []>} : vector<8x512xbf16>, vector<512x2048xbf16>, vector<8x2048xf32> -> vector<8x2048xf32>
    %c2 = arith.constant 2 : index
    %c0_14 = arith.constant 0 : index
    %28 = vector.load %arg5[%c2, %c0_14] : memref<8x2048xf32, #tpu.memory_space<vmem>>, vector<1x2048xf32>
    %29 = vector.broadcast %28 : vector<1x2048xf32> to vector<8x2048xf32>
    %30 = arith.addf %27, %29 : vector<8x2048xf32>
    %cst_15 = arith.constant 0.000000e+00 : f32
    %31 = vector.broadcast %cst_15 : f32 to vector<8x2048xf32>
    %32 = arith.maximumf %30, %31 : vector<8x2048xf32>
    %33 = arith.truncf %32 : vector<8x2048xf32> to vector<8x2048xbf16>
    %c0_16 = arith.constant 0 : index
    %c0_17 = arith.constant 0 : index
    %34 = vector.load %arg4[%c0_16, %c0_17] : memref<2048x32xbf16, #tpu.memory_space<vmem>>, vector<2048x32xbf16>
    %cst_18 = arith.constant dense<0.000000e+00> : vector<8x32xf32>
    %35 = tpu.matmul %33, %34, %cst_18 {dimension_numbers = #tpu.dot_dimension_numbers<[1], [0], [0], [1], [0, 0, 1, 1], [], []>} : vector<8x2048xbf16>, vector<2048x32xbf16>, vector<8x32xf32> -> vector<8x32xf32>
    %c3 = arith.constant 3 : index
    %c0_19 = arith.constant 0 : index
    %36 = vector.load %arg5[%c3, %c0_19] : memref<8x2048xf32, #tpu.memory_space<vmem>>, vector<1x32xf32>
    %37 = vector.broadcast %36 : vector<1x32xf32> to vector<8x32xf32>
    %38 = arith.addf %35, %37 : vector<8x32xf32>
    %cst_20 = arith.constant 0.000000e+00 : f32
    %39 = vector.broadcast %cst_20 : f32 to vector<8x32xf32>
    %40 = arith.maximumf %38, %39 : vector<8x32xf32>
    %41 = arith.truncf %40 : vector<8x32xf32> to vector<8x32xbf16>
    %c0_21 = arith.constant 0 : index
    %c0_22 = arith.constant 0 : index
    %42 = vector.load %arg6[%c0_21, %c0_22] : memref<40x128xf32, #tpu.memory_space<vmem>>, vector<32x10xf32>
    %43 = arith.truncf %42 : vector<32x10xf32> to vector<32x10xbf16>
    %c32 = arith.constant 32 : index
    %c0_23 = arith.constant 0 : index
    %44 = vector.load %arg6[%c32, %c0_23] : memref<40x128xf32, #tpu.memory_space<vmem>>, vector<1x10xf32>
    %45 = arith.mulf %40, %40 : vector<8x32xf32>
    %cst_24 = arith.constant dense<0.000000e+00> : vector<8xf32>
    %46 = vector.multi_reduction <add>, %45, %cst_24 [1] : vector<8x32xf32> to vector<8xf32>
    %47 = vector.shape_cast %46 : vector<8xf32> to vector<8x1xf32>
    %cst_25 = arith.constant dense<0.000000e+00> : vector<8x10xf32>
    %48 = tpu.matmul %41, %43, %cst_25 {dimension_numbers = #tpu.dot_dimension_numbers<[1], [0], [0], [1], [0, 0, 1, 1], [], []>} : vector<8x32xbf16>, vector<32x10xbf16>, vector<8x10xf32> -> vector<8x10xf32>
    %49 = vector.broadcast %47 : vector<8x1xf32> to vector<8x10xf32>
    %50 = vector.broadcast %44 : vector<1x10xf32> to vector<8x10xf32>
    %51 = arith.addf %49, %50 : vector<8x10xf32>
    %cst_26 = arith.constant 2.000000e+00 : f32
    %52 = vector.broadcast %cst_26 : f32 to vector<8x10xf32>
    %53 = arith.mulf %52, %48 : vector<8x10xf32>
    %54 = arith.subf %51, %53 : vector<8x10xf32>
    %cst_27 = arith.constant 0.000000e+00 : f32
    %55 = vector.broadcast %cst_27 : f32 to vector<8x10xf32>
    %56 = arith.maximumf %54, %55 : vector<8x10xf32>
    %cst_28 = arith.constant 1.000000e+00 : f32
    %57 = vector.broadcast %cst_28 : f32 to vector<8x10xf32>
    %58 = arith.addf %57, %56 : vector<8x10xf32>
    %cst_29 = arith.constant 1.000000e+00 : f32
    %59 = vector.broadcast %cst_29 : f32 to vector<8x10xf32>
    %60 = arith.divf %59, %58 : vector<8x10xf32>
    %cst_30 = arith.constant dense<0.000000e+00> : vector<8xf32>
    %61 = vector.multi_reduction <add>, %60, %cst_30 [1] : vector<8x10xf32> to vector<8xf32>
    %62 = vector.shape_cast %61 : vector<8xf32> to vector<8x1xf32>
    %63 = vector.broadcast %62 : vector<8x1xf32> to vector<8x10xf32>
    %64 = arith.divf %60, %63 : vector<8x10xf32>
    %cst_31 = arith.constant dense<0.000000e+00> : vector<10xf32>
    %65 = vector.multi_reduction <add>, %64, %cst_31 [0] : vector<8x10xf32> to vector<10xf32>
    %66 = vector.shape_cast %65 : vector<10xf32> to vector<1x10xf32>
    %67 = math.exp %64 : vector<8x10xf32>
    %68 = vector.broadcast %66 : vector<1x10xf32> to vector<8x10xf32>
    %69 = arith.divf %67, %68 : vector<8x10xf32>
    %cst_32 = arith.constant dense<0.000000e+00> : vector<8xf32>
    %70 = vector.multi_reduction <add>, %69, %cst_32 [1] : vector<8x10xf32> to vector<8xf32>
    %71 = vector.shape_cast %70 : vector<8xf32> to vector<8x1xf32>
    %72 = vector.broadcast %71 : vector<8x1xf32> to vector<8x10xf32>
    %73 = arith.divf %69, %72 : vector<8x10xf32>
    %c0_i32_33 = arith.constant 0 : i32
    %74 = tpu.memref_slice %arg16[%c0_i32_33] : memref<4x!tpu.dma_semaphore, #tpu.memory_space<semaphore_mem>> -> memref<1x!tpu.dma_semaphore, #tpu.memory_space<semaphore_mem>>
    %75 = tpu.memref_squeeze %74 : memref<1x!tpu.dma_semaphore, #tpu.memory_space<semaphore_mem>> -> memref<!tpu.dma_semaphore, #tpu.memory_space<semaphore_mem>>
    tpu.wait_dma2 semaphore(%75 : memref<!tpu.dma_semaphore, #tpu.memory_space<semaphore_mem>>) src(%arg7 : memref<32x2048xbf16, #tpu.memory_space<any>>) dst(%arg12 : memref<32x2048xbf16, #tpu.memory_space<vmem>>)
    %c1_i32_34 = arith.constant 1 : i32
    %76 = tpu.memref_slice %arg16[%c1_i32_34] : memref<4x!tpu.dma_semaphore, #tpu.memory_space<semaphore_mem>> -> memref<1x!tpu.dma_semaphore, #tpu.memory_space<semaphore_mem>>
    %77 = tpu.memref_squeeze %76 : memref<1x!tpu.dma_semaphore, #tpu.memory_space<semaphore_mem>> -> memref<!tpu.dma_semaphore, #tpu.memory_space<semaphore_mem>>
    tpu.wait_dma2 semaphore(%77 : memref<!tpu.dma_semaphore, #tpu.memory_space<semaphore_mem>>) src(%arg8 : memref<2048x512xbf16, #tpu.memory_space<any>>) dst(%arg13 : memref<2048x512xbf16, #tpu.memory_space<vmem>>)
    %c2_i32_35 = arith.constant 2 : i32
    %78 = tpu.memref_slice %arg16[%c2_i32_35] : memref<4x!tpu.dma_semaphore, #tpu.memory_space<semaphore_mem>> -> memref<1x!tpu.dma_semaphore, #tpu.memory_space<semaphore_mem>>
    %79 = tpu.memref_squeeze %78 : memref<1x!tpu.dma_semaphore, #tpu.memory_space<semaphore_mem>> -> memref<!tpu.dma_semaphore, #tpu.memory_space<semaphore_mem>>
    tpu.wait_dma2 semaphore(%79 : memref<!tpu.dma_semaphore, #tpu.memory_space<semaphore_mem>>) src(%arg9 : memref<512x512xbf16, #tpu.memory_space<any>>) dst(%arg14 : memref<512x512xbf16, #tpu.memory_space<vmem>>)
    %c3_i32_36 = arith.constant 3 : i32
    %80 = tpu.memref_slice %arg16[%c3_i32_36] : memref<4x!tpu.dma_semaphore, #tpu.memory_space<semaphore_mem>> -> memref<1x!tpu.dma_semaphore, #tpu.memory_space<semaphore_mem>>
    %81 = tpu.memref_squeeze %80 : memref<1x!tpu.dma_semaphore, #tpu.memory_space<semaphore_mem>> -> memref<!tpu.dma_semaphore, #tpu.memory_space<semaphore_mem>>
    tpu.wait_dma2 semaphore(%81 : memref<!tpu.dma_semaphore, #tpu.memory_space<semaphore_mem>>) src(%arg10 : memref<512x64xbf16, #tpu.memory_space<any>>) dst(%arg15 : memref<512x64xbf16, #tpu.memory_space<vmem>>)
    %c0_37 = arith.constant 0 : index
    %c0_38 = arith.constant 0 : index
    %82 = vector.load %arg12[%c0_37, %c0_38] : memref<32x2048xbf16, #tpu.memory_space<vmem>>, vector<32x2048xbf16>
    %cst_39 = arith.constant dense<0.000000e+00> : vector<8x2048xf32>
    %83 = tpu.matmul %41, %82, %cst_39 {dimension_numbers = #tpu.dot_dimension_numbers<[1], [0], [0], [1], [0, 0, 1, 1], [], []>} : vector<8x32xbf16>, vector<32x2048xbf16>, vector<8x2048xf32> -> vector<8x2048xf32>
    %c4 = arith.constant 4 : index
    %c0_40 = arith.constant 0 : index
    %84 = vector.load %arg5[%c4, %c0_40] : memref<8x2048xf32, #tpu.memory_space<vmem>>, vector<1x2048xf32>
    %85 = vector.broadcast %84 : vector<1x2048xf32> to vector<8x2048xf32>
    %86 = arith.addf %83, %85 : vector<8x2048xf32>
    %cst_41 = arith.constant 0.000000e+00 : f32
    %87 = vector.broadcast %cst_41 : f32 to vector<8x2048xf32>
    %88 = arith.maximumf %86, %87 : vector<8x2048xf32>
    %89 = arith.truncf %88 : vector<8x2048xf32> to vector<8x2048xbf16>
    %c0_42 = arith.constant 0 : index
    %c0_43 = arith.constant 0 : index
    %90 = vector.load %arg13[%c0_42, %c0_43] : memref<2048x512xbf16, #tpu.memory_space<vmem>>, vector<2048x512xbf16>
    %cst_44 = arith.constant dense<0.000000e+00> : vector<8x512xf32>
    %91 = tpu.matmul %89, %90, %cst_44 {dimension_numbers = #tpu.dot_dimension_numbers<[1], [0], [0], [1], [0, 0, 1, 1], [], []>} : vector<8x2048xbf16>, vector<2048x512xbf16>, vector<8x512xf32> -> vector<8x512xf32>
    %c5 = arith.constant 5 : index
    %c0_45 = arith.constant 0 : index
    %92 = vector.load %arg5[%c5, %c0_45] : memref<8x2048xf32, #tpu.memory_space<vmem>>, vector<1x512xf32>
    %93 = vector.broadcast %92 : vector<1x512xf32> to vector<8x512xf32>
    %94 = arith.addf %91, %93 : vector<8x512xf32>
    %cst_46 = arith.constant 0.000000e+00 : f32
    %95 = vector.broadcast %cst_46 : f32 to vector<8x512xf32>
    %96 = arith.maximumf %94, %95 : vector<8x512xf32>
    %97 = arith.truncf %96 : vector<8x512xf32> to vector<8x512xbf16>
    %c0_47 = arith.constant 0 : index
    %c0_48 = arith.constant 0 : index
    %98 = vector.load %arg14[%c0_47, %c0_48] : memref<512x512xbf16, #tpu.memory_space<vmem>>, vector<512x512xbf16>
    %cst_49 = arith.constant dense<0.000000e+00> : vector<8x512xf32>
    %99 = tpu.matmul %97, %98, %cst_49 {dimension_numbers = #tpu.dot_dimension_numbers<[1], [0], [0], [1], [0, 0, 1, 1], [], []>} : vector<8x512xbf16>, vector<512x512xbf16>, vector<8x512xf32> -> vector<8x512xf32>
    %c6 = arith.constant 6 : index
    %c0_50 = arith.constant 0 : index
    %100 = vector.load %arg5[%c6, %c0_50] : memref<8x2048xf32, #tpu.memory_space<vmem>>, vector<1x512xf32>
    %101 = vector.broadcast %100 : vector<1x512xf32> to vector<8x512xf32>
    %102 = arith.addf %99, %101 : vector<8x512xf32>
    %cst_51 = arith.constant 0.000000e+00 : f32
    %103 = vector.broadcast %cst_51 : f32 to vector<8x512xf32>
    %104 = arith.maximumf %102, %103 : vector<8x512xf32>
    %105 = arith.truncf %104 : vector<8x512xf32> to vector<8x512xbf16>
    %c0_52 = arith.constant 0 : index
    %c0_53 = arith.constant 0 : index
    %106 = vector.load %arg15[%c0_52, %c0_53] : memref<512x64xbf16, #tpu.memory_space<vmem>>, vector<512x64xbf16>
    %cst_54 = arith.constant dense<0.000000e+00> : vector<8x64xf32>
    %107 = tpu.matmul %105, %106, %cst_54 {dimension_numbers = #tpu.dot_dimension_numbers<[1], [0], [0], [1], [0, 0, 1, 1], [], []>} : vector<8x512xbf16>, vector<512x64xbf16>, vector<8x64xf32> -> vector<8x64xf32>
    %c7 = arith.constant 7 : index
    %c0_55 = arith.constant 0 : index
    %108 = vector.load %arg5[%c7, %c0_55] : memref<8x2048xf32, #tpu.memory_space<vmem>>, vector<1x64xf32>
    %109 = vector.broadcast %108 : vector<1x64xf32> to vector<8x64xf32>
    %110 = arith.addf %107, %109 : vector<8x64xf32>
    %cst_56 = arith.constant 0.000000e+00 : f32
    %111 = vector.broadcast %cst_56 : f32 to vector<8x64xf32>
    %112 = arith.maximumf %110, %111 : vector<8x64xf32>
    %cst_57 = arith.constant 0.000000e+00 : f32
    %113 = vector.broadcast %cst_57 : f32 to vector<8x12xf32>
    %114 = tpu.concatenate %112, %40, %73, %64, %113 in 1 : vector<8x64xf32>, vector<8x32xf32>, vector<8x10xf32>, vector<8x10xf32>, vector<8x12xf32> -> vector<8x128xf32>
    %c0_58 = arith.constant 0 : index
    %c0_59 = arith.constant 0 : index
    %115 = vector.load %arg11[%c0_58, %c0_59] : memref<8x128xf32, #tpu.memory_space<vmem>>, vector<8x128xf32>
    tpu.vector_store %arg11[%c0_58, %c0_59], %114 {strides = array<i32>} : memref<8x128xf32, #tpu.memory_space<vmem>>, vector<8x128xf32>,
    return
  }
}

</mosaic_0001>

<bundles_post_ra>
// kernel: dec_exp_forward.1
= control target key start
LH: loop header
LB: loop body
LE: loop exit
PB: predicated region body
PF: predicated region fallthrough
CT: control target
= control target key end

     0   :  { %16 = vsyncpa [#allocation8], 0  ;;  %s11766_s0 = inlined_call_operand.hbm [shape: f32[8,64], index: 0, kind: input, shape index: {}]   ;;  %s11767_s1 = inlined_call_operand.hbm [shape: bf16[64,512], index: 1, kind: input, shape index: {}]   ;;  %s11768_s2 = inlined_call_operand.hbm [shape: bf16[512,512], index: 2, kind: input, shape index: {}]   ;;  %s11769_s3 = inlined_call_operand.hbm [shape: bf16[512,2048], index: 3, kind: input, shape index: {}]   ;;  %s11770_s4 = inlined_call_operand.vmem [shape: bf16[2048,32], index: 4, kind: input, shape index: {}]   ;;  %s11771_s5 = inlined_call_operand.hbm [shape: f32[8,2048], index: 5, kind: input, shape index: {}]   ;;  %s11772_s6 = inlined_call_operand.hbm [shape: f32[40,128], index: 6, kind: input, shape index: {}]   ;;  %s11773_s7 = inlined_call_operand.hbm [shape: bf16[32,2048], index: 7, kind: input, shape index: {}]   ;;  %s11774_s8 = inlined_call_operand.hbm [shape: bf16[2048,512], index: 8, kind: input, shape index: {}]   ;;  %s11775_s9 = inlined_call_operand.hbm [shape: bf16[512,512], index: 9, kind: input, shape index: {}]   ;;  %s11776_s10 = inlined_call_operand.vmem [shape: bf16[512,64], index: 10, kind: input, shape index: {}]   ;;  %s11777_s11 = inlined_call_operand.vmem [shape: f32[8,128], index: 11, kind: output, shape index: {}]  }
   0x1   :  { %17 = vsyncpa [#allocation10], 0 }
   0x2   :  { %18 = vsyncpa [#allocation13], 0 }
   0x3   :  { %19 = vsyncpa [#allocation16], 0  ;;  %s10678_s17 = smov [#allocation9]   ;;  %s10530_s21 = scalar_lea.hbm %s11767_s1, 2048 }
   0x4   :  { %s35_s18 = sshll.u32 %s10678_s17, 4  ;;  %p10531_p0 = scmp.ne.s32.totalorder %s11767_s1, %s10530_s21  ;;  %s36_s18 = int_to_ptr.vmem [resolvable:$true] %s35_s18 }
   0x5   :  { %p10534_p1 = scmp.lt.u32.totalorder %s10530_s21, %s11767_s1 }
   0x7   :  { %p10536_p2 = pnand %p10534_p1, %p10531_p0 }
   0x9   :  { %10539 = shalt.err (!%p10536_p2)
}
   0xa   :  { %s10540_s26 = scalar_lea.vmem %s36_s18, 2048  ;;  %p10545_p4 = scmp.lt.s32.totalorder %s36_s18, %s36_s18 }
   0xb   :  { %p10541_p3 = scmp.ne.s32.totalorder %s36_s18, %s10540_s26  ;;  %p10546_p5 = scmp.lt.s32.totalorder %s10540_s26, %s10540_s26 }
   0xd   :  { %p10547_p6 = por %p10546_p5, %p10545_p4 }
   0xf   :  { %p10548_p7 = pnand %p10547_p6, %p10541_p3 }
  0x11   :  { %10551 = shalt.err (!%p10548_p7)
}
  0x12   :  { %s10679_s27 = smov 256   ;;  %s10680_s28 = smov 16  }
  0x13   :  { %41 = dma.hbm_to_vmem [thread:$0]  %s11767_s1, 2048, %s36_s18, [#allocation10], %s10679_s27, %s10679_s27, %s10680_s28  }
  0x14   :  { %s10681_s12 = smov [#allocation12]   ;;  %s10552_s16 = scalar_lea.hbm %s11769_s3, 65536 }
  0x15   :  { %s59_s13 = sshll.u32 %s10681_s12, 4  ;;  %p10553_p8 = scmp.ne.s32.totalorder %s11769_s3, %s10552_s16  ;;  %s60_s13 = int_to_ptr.vmem [resolvable:$true] %s59_s13 }
  0x16   :  { %p10556_p9 = scmp.lt.u32.totalorder %s10552_s16, %s11769_s3 }
  0x18   :  { %p10558_p10 = pnand %p10556_p9, %p10553_p8 }
  0x1a   :  { %10561 = shalt.err (!%p10558_p10)
}
  0x1b   :  { %s10562_s22 = scalar_lea.vmem %s60_s13, 65536  ;;  %p10567_p12 = scmp.lt.s32.totalorder %s60_s13, %s60_s13 }
  0x1c   :  { %p10563_p11 = scmp.ne.s32.totalorder %s60_s13, %s10562_s22  ;;  %p10568_p13 = scmp.lt.s32.totalorder %s10562_s22, %s10562_s22 }
  0x1e   :  { %p10569_p0 = por %p10568_p13, %p10567_p12 }
  0x20   :  { %p10570_p1 = pnand %p10569_p0, %p10563_p11 }
  0x22   :  { %10573 = shalt.err (!%p10570_p1)
}
  0x23   :  { %s10682_s1 = smov 1024   ;;  %s10683_s18 = smov 64  }
  0x24   :  { %65 = dma.hbm_to_vmem [thread:$0]  %s11769_s3, 65536, %s60_s13, [#allocation13], %s10682_s1, %s10682_s1, %s10683_s18  }
  0x25   :  { %s10684_s25 = smov [#allocation7]   ;;  %s10685_s29 = smov [#allocation11]  }
  0x26   :  { %s26_s26 = sshll.u32 %s10684_s25, 4  ;;  %s47_s30 = sshll.u32 %s10685_s29, 4  ;;  %s27_s26 = int_to_ptr.vmem [resolvable:$true] %s26_s26  ;;  %s10798_s30 = int_to_ptr.vmem [resolvable:$true] %s47_s30 }
  0x27   :  { %s10574_s15 = scalar_lea.hbm %s11766_s0, 128 }
  0x28   :  { %p10575_p2 = scmp.ne.s32.totalorder %s11766_s0, %s10574_s15  ;;  %p10578_p3 = scmp.lt.u32.totalorder %s10574_s15, %s11766_s0 }
  0x2a   :  { %p10580_p4 = pnand %p10578_p3, %p10575_p2 }
  0x2c   :  { %10583 = shalt.err (!%p10580_p4)
}
  0x2d   :  { %s10584_s3 = scalar_lea.vmem %s27_s26, 128  ;;  %p10589_p6 = scmp.lt.s32.totalorder %s27_s26, %s27_s26 }
  0x2e   :  { %p10585_p5 = scmp.ne.s32.totalorder %s27_s26, %s10584_s3  ;;  %p10590_p7 = scmp.lt.s32.totalorder %s10584_s3, %s10584_s3 }
  0x30   :  { %p10591_p8 = por %p10590_p7, %p10589_p6 }
  0x32   :  { %p10592_p9 = pnand %p10591_p8, %p10585_p5 }
  0x34   :  { %10595 = shalt.err (!%p10592_p9)
}
  0x35   :  { %29 = dma.hbm_to_vmem [thread:$0]  %s11766_s0, 128, %s27_s26, [#allocation8]  }
  0x36   :  { %s10596_s24 = scalar_lea.hbm %s11768_s2, 16384 }
  0x37   :  { %p10597_p10 = scmp.ne.s32.totalorder %s11768_s2, %s10596_s24  ;;  %p10600_p11 = scmp.lt.u32.totalorder %s10596_s24, %s11768_s2 }
  0x39   :  { %p10602_p12 = pnand %p10600_p11, %p10597_p10 }
  0x3b   :  { %10605 = shalt.err (!%p10602_p12)
}
  0x3c   :  { %s10606_s15 = scalar_lea.vmem %s10798_s30, 16384  ;;  %p10611_p0 = scmp.lt.s32.totalorder %s10798_s30, %s10798_s30 }
  0x3d   :  { %p10607_p13 = scmp.ne.s32.totalorder %s10798_s30, %s10606_s15  ;;  %p10612_p1 = scmp.lt.s32.totalorder %s10606_s15, %s10606_s15 }
  0x3f   :  { %p10613_p2 = por %p10612_p1, %p10611_p0 }
  0x41   :  { %p10614_p3 = pnand %p10613_p2, %p10607_p13 }
  0x43   :  { %10617 = shalt.err (!%p10614_p3)
}
  0x44   :  { %53 = dma.hbm_to_vmem [thread:$0]  %s11768_s2, 16384, %s10798_s30, [#allocation10], %s10679_s27, %s10679_s27, %s10680_s28  }
  0x45   :  { %s10686_s16 = smov [#allocation14]   ;;  %s10687_s19 = smov [#allocation15]  }
  0x46   :  { %s74_s17 = sshll.u32 %s10686_s16, 4  ;;  %s83_s20 = sshll.u32 %s10687_s19, 4  ;;  %s75_s17 = int_to_ptr.vmem [resolvable:$true] %s74_s17  ;;  %s10832_s20 = int_to_ptr.vmem [resolvable:$true] %s83_s20 }
  0x47   :  { %s10618_s21 = scalar_lea.hbm %s11771_s5, 2048 }
  0x48   :  { %p10619_p4 = scmp.ne.s32.totalorder %s11771_s5, %s10618_s21  ;;  %p10622_p5 = scmp.lt.u32.totalorder %s10618_s21, %s11771_s5 }
  0x4a   :  { %p10624_p6 = pnand %p10622_p5, %p10619_p4 }
  0x4c   :  { %10627 = shalt.err (!%p10624_p6)
}
  0x4d   :  { %s10628_s2 = scalar_lea.vmem %s75_s17, 2048  ;;  %p10633_p8 = scmp.lt.s32.totalorder %s75_s17, %s75_s17 }
  0x4e   :  { %p10629_p7 = scmp.ne.s32.totalorder %s75_s17, %s10628_s2  ;;  %p10634_p9 = scmp.lt.s32.totalorder %s10628_s2, %s10628_s2 }
  0x50   :  { %p10635_p10 = por %p10634_p9, %p10633_p8 }
  0x52   :  { %p10636_p11 = pnand %p10635_p10, %p10629_p7 }
  0x54   :  { %10639 = shalt.err (!%p10636_p11)
}
  0x55   :  { %77 = dma.hbm_to_vmem [thread:$0]  %s11771_s5, 2048, %s75_s17, [#allocation13]  }
  0x56   :  { %s10640_s15 = scalar_lea.hbm %s11772_s6, 640 }
  0x57   :  { %p10641_p12 = scmp.ne.s32.totalorder %s11772_s6, %s10640_s15  ;;  %p10644_p13 = scmp.lt.u32.totalorder %s10640_s15, %s11772_s6 }
  0x59   :  { %p10646_p0 = pnand %p10644_p13, %p10641_p12 }
  0x5b   :  { %10649 = shalt.err (!%p10646_p0)
}
  0x5c   :  { %s10650_s3 = scalar_lea.vmem %s10832_s20, 640  ;;  %p10655_p2 = scmp.lt.s32.totalorder %s10832_s20, %s10832_s20 }
  0x5d   :  { %p10651_p1 = scmp.ne.s32.totalorder %s10832_s20, %s10650_s3  ;;  %p10656_p3 = scmp.lt.s32.totalorder %s10650_s3, %s10650_s3 }
  0x5f   :  { %p10657_p4 = por %p10656_p3, %p10655_p2 }
  0x61   :  { %p10658_p5 = pnand %p10657_p4, %p10651_p1 }
  0x63   :  { %10661 = shalt.err (!%p10658_p5)
}
  0x64   :  { %s10688_s5 = smov 128   ;;  %s10689_s17 = smov 8  }
  0x65   :  { %89 = dma.hbm_to_vmem [thread:$0]  %s11772_s6, 640, %s10832_s20, [#allocation16], %s10688_s5, %s10688_s5, %s10689_s17  }
  0x66   :  { %10662 = dma.done.wait [#allocation8], 128  }
  0x67   :  { %10663 = vsyncadd [#allocation8], 4294967168 }
  0x68   :  { %10664 = dma.done.wait [#allocation10], 18432  }
  0x69   :  { %10665 = vsyncadd [#allocation10], 4294948864 }
  0x6a   :  { %10666 = dma.done.wait [#allocation13], 67584  }
  0x6b   :  { %10667 = vsyncadd [#allocation13], 4294899712 }
  0x6c   :  { %10668 = dma.done.wait [#allocation16], 640  }
  0x6d   :  { %10669 = vsyncadd [#allocation16], 4294966656  ;;  %s113_s22 = sld [smem:[#allocation0]]   ;;  %s10690_s23 = smov 2048  }
  0x6e   :  { %125 = sst [smem:[#allocation18]] %s10690_s23  ;;  %s10691_s24 = smov [#allocation2]  }
  0x6f   :  { %127 = sst [smem:[#allocation18 + $0x1]] %s10690_s23  ;;  %s121_s25 = sshll.u32 %s10691_s24, 4  ;;  %s122_s25 = int_to_ptr.vmem [resolvable:$true] %s121_s25 }
  0x70   :  { %129 = sst [smem:[#allocation18 + $0x2]] %s10680_s28  ;;  %s10692_s2 = smov 4  }
  0x71   :  { %131 = sst [smem:[#allocation18 + $0x3]] %s10683_s18  ;;  %s10693_s30 = smov 2  }
  0x72   :  { %133 = sst [smem:[#allocation18 + $0x4]] %s10688_s5  ;;  %s10694_s28 = smov [#allocation6]  }
  0x73   :  { %137 = sst [smem:[#allocation18 + $0x6]] %s10682_s1  ;;  %s8977_s6 = sshll.u32 %s113_s22, 26 }
  0x74   :  { %139 = sst [smem:[#allocation18 + $0x7]] %s10683_s18  ;;  %s10870_s20 = sadd.s32 134217728, %s8977_s6 }
  0x75   :  { %141 = sst [smem:[#allocation18 + $0x8]] %s10692_s2  ;;  %s10695_s29 = smov [#allocation17]  }
  0x76   :  { %135 = sst [smem:[#allocation18 + $0x5]] %s10693_s30  ;;  %s10696_s1 = smov 512  }
  0x77   :  { %143 = dma.general %s11773_s7, 4096, %s122_s25, %s10694_s28, %s10695_s29, [#allocation18], %s10870_s20, 0  }
  0x78   :  { %164 = sst [smem:[#allocation20 + $0x2]] %s10692_s2  ;;  %s10697_s15 = smov [#allocation3]  }
  0x79   :  { %160 = sst [smem:[#allocation20]] %s10696_s1  ;;  %s156_s0 = sshll.u32 %s10697_s15, 4  ;;  %s157_s0 = int_to_ptr.vmem [resolvable:$true] %s156_s0 }
  0x7a   :  { %162 = sst [smem:[#allocation20 + $0x1]] %s10696_s1  ;;  %s10698_s7 = smov [#allocation6 + $0x1]  }
  0x7b   :  { %166 = sst [smem:[#allocation20 + $0x3]] %s10683_s18  ;;  %s10699_s26 = smov [#allocation19]  }
  0x7c   :  { %168 = sst [smem:[#allocation20 + $0x4]] %s10688_s5  ;;  %s10700_s3 = smov [#allocation4]  }
  0x7d   :  { %170 = sst [smem:[#allocation20 + $0x5]] %s10693_s30  ;;  %s191_s17 = sshll.u32 %s10700_s3, 4  ;;  %s192_s17 = int_to_ptr.vmem [resolvable:$true] %s191_s17 }
  0x7e   :  { %172 = sst [smem:[#allocation20 + $0x6]] %s10679_s27  ;;  %s10701_s13 = smov [#allocation6 + $0x2]  }
  0x7f   :  { %174 = sst [smem:[#allocation20 + $0x7]] %s10683_s18 }
  0x80   :  { %176 = sst [smem:[#allocation20 + $0x8]] %s10692_s2 }
  0x81   :  { %178 = dma.general %s11774_s8, 65536, %s157_s0, %s10698_s7, %s10699_s26, [#allocation20], %s10870_s20, 0  }
  0x82   :  { %195 = sst [smem:[#allocation22]] %s10696_s1  ;;  %s10702_s8 = smov [#allocation21]  }
  0x83   :  { %197 = sst [smem:[#allocation22 + $0x1]] %s10696_s1 }
  0x84   :  { %199 = sst [smem:[#allocation22 + $0x2]] %s10692_s2 }
  0x85   :  { %201 = sst [smem:[#allocation22 + $0x3]] %s10683_s18 }
  0x86   :  { %203 = sst [smem:[#allocation22 + $0x4]] %s10688_s5 }
  0x87   :  { %205 = sst [smem:[#allocation22 + $0x5]] %s10693_s30 }
  0x88   :  { %207 = sst [smem:[#allocation22 + $0x6]] %s10679_s27 }
  0x89   :  { %209 = sst [smem:[#allocation22 + $0x7]] %s10683_s18 }
  0x8a   :  { %211 = sst [smem:[#allocation22 + $0x8]] %s10692_s2 }
  0x8b   :  { %213 = dma.general %s11775_s9, 16384, %s192_s17, %s10701_s13, %s10702_s8, [#allocation22], %s10870_s20, 0  }
  0x8c   :  { %v10900_v0 = vld [vmem:[%s11776_s10] sm:$0xff]  ;;  %v10905_v1 = vld [vmem:[%s11776_s10 + $0x8] sm:$0xff]  ;;  %v10910_v2 = vld [vmem:[%s11776_s10 + $0x10] sm:$0xff] }
  0x8d   :  { %v10915_v3 = vld [vmem:[%s11776_s10 + $0x18] sm:$0xff]  ;;  %v10920_v4 = vld [vmem:[%s11776_s10 + $0x20] sm:$0xff]  ;;  %v10925_v5 = vld [vmem:[%s11776_s10 + $0x28] sm:$0xff] }
  0x8e   :  { %11780 = vst [vmem:[#allocation32_spill] sm:$0xff] %v10925_v5  ;;  %v10930_v6 = vld [vmem:[%s11776_s10 + $0x30] sm:$0xff]  ;;  %v10935_v7 = vld [vmem:[%s11776_s10 + $0x38] sm:$0xff]  ;;  %v10940_v8 = vld [vmem:[%s11776_s10 + $0x40] sm:$0xff] }
  0x8f   :  { %11781 = vst [vmem:[#allocation33_spill] sm:$0xff] %v10930_v6  ;;  %11782 = vst [vmem:[#allocation34_spill] sm:$0xff] %v10935_v7  ;;  %v10945_v9 = vld [vmem:[%s11776_s10 + $0x48] sm:$0xff]  ;;  %v10950_v10 = vld [vmem:[%s11776_s10 + $0x50] sm:$0xff] }
  0x90   :  { %v10955_v11 = vld [vmem:[%s11776_s10 + $0x58] sm:$0xff]  ;;  %v10960_v12 = vld [vmem:[%s11776_s10 + $0x60] sm:$0xff]  ;;  %v10965_v13 = vld [vmem:[%s11776_s10 + $0x68] sm:$0xff] }
  0x91   :  { %v10970_v14 = vld [vmem:[%s11776_s10 + $0x70] sm:$0xff]  ;;  %v10975_v15 = vld [vmem:[%s11776_s10 + $0x78] sm:$0xff]  ;;  %v10980_v16 = vld [vmem:[%s11776_s10 + $0x80] sm:$0xff] }
  0x92   :  { %11783 = vst [vmem:[#allocation35_spill] sm:$0xff] %v10970_v14  ;;  %11784 = vst [vmem:[#allocation36_spill] sm:$0xff] %v10975_v15  ;;  %v10985_v17 = vld [vmem:[%s11776_s10 + $0x88] sm:$0xff]  ;;  %v10990_v18 = vld [vmem:[%s11776_s10 + $0x90] sm:$0xff] }
  0x93   :  { %v10995_v19 = vld [vmem:[%s11776_s10 + $0x98] sm:$0xff]  ;;  %v11000_v20 = vld [vmem:[%s11776_s10 + $0xa0] sm:$0xff]  ;;  %v11005_v21 = vld [vmem:[%s11776_s10 + $0xa8] sm:$0xff] }
  0x94   :  { %11785 = vst [vmem:[#allocation37_spill] sm:$0xff] %v11005_v21  ;;  %v11010_v22 = vld [vmem:[%s11776_s10 + $0xb0] sm:$0xff]  ;;  %v11015_v23 = vld [vmem:[%s11776_s10 + $0xb8] sm:$0xff]  ;;  %v11020_v24 = vld [vmem:[%s11776_s10 + $0xc0] sm:$0xff] }
  0x95   :  { %11786 = vst [vmem:[#allocation38_spill] sm:$0xff] %v11010_v22  ;;  %11787 = vst [vmem:[#allocation39_spill] sm:$0xff] %v11015_v23  ;;  %v11025_v25 = vld [vmem:[%s11776_s10 + $0xc8] sm:$0xff]  ;;  %v11030_v26 = vld [vmem:[%s11776_s10 + $0xd0] sm:$0xff] }
  0x96   :  { %v11035_v27 = vld [vmem:[%s11776_s10 + $0xd8] sm:$0xff]  ;;  %v11040_v28 = vld [vmem:[%s11776_s10 + $0xe0] sm:$0xff]  ;;  %v11045_v29 = vld [vmem:[%s11776_s10 + $0xe8] sm:$0xff] }
  0x97   :  { %v11050_v30 = vld [vmem:[%s11776_s10 + $0xf0] sm:$0xff]  ;;  %v11055_v31 = vld [vmem:[%s11776_s10 + $0xf8] sm:$0xff] }
  0x98   :  { %11788 = vst [vmem:[#allocation40_spill] sm:$0xff] %v11050_v30  ;;  %11789 = vst [vmem:[#allocation41_spill] sm:$0xff] %v11055_v31 }
  0x99   :  { %318 = vsyncadd [#allocation6 + $0x3], 4096  ;;  %v10176_v32 = vld [vmem:[#allocation9 + $0x4] ss:$16 sps:$4 sm:$0xff]   ;;  %v10178_v33 = vld [vmem:[#allocation9] ss:$16 sps:$4 sm:$0xff]  }
  0x9a   :  { %v11778_v34 = vmov 0   ;;  %v10179_v35 = vld [vmem:[#allocation9 + $0x24] ss:$16 sps:$4 sm:$0xff]   ;;  %443 = vmatprep.subr.bf16.mxu0 %v10176_v32  ;;  %v10181_v36 = vld [vmem:[#allocation9 + $0x20] ss:$16 sps:$4 sm:$0xff]   ;;  %v319_v46 = vld [vmem:[#allocation7] sm:$0xff] }
  0x9b   :  { %475 = vmatprep.mubr.bf16.mxu0 %v11778_v34  ;;  %516 = vmatprep.mubr.bf16.mxu1 %v11778_v34  ;;  %v10182_v37 = vld [vmem:[#allocation9 + $0x44] ss:$16 sps:$4 sm:$0xff]   ;;  %v10188_v38 = vld [vmem:[#allocation9 + $0xc] ss:$16 sps:$4 sm:$0xff]   ;;  %v10190_v39 = vld [vmem:[#allocation9 + $0x8] ss:$16 sps:$4 sm:$0xff]   ;;  %v320_v50 = vpack.c.bf16 %v319_v46, %v319_v46 }
  0x9c   :  { %444 = vmatpush1.bf16.msra.mxu0 %v10178_v33  ;;  %v10184_v40 = vld [vmem:[#allocation9 + $0x40] ss:$16 sps:$4 sm:$0xff]   ;;  %484 = vmatprep.subr.bf16.mxu1 %v10188_v38  ;;  %v10191_v41 = vld [vmem:[#allocation9 + $0x2c] ss:$16 sps:$4 sm:$0xff]   ;;  %v10185_v42 = vld [vmem:[#allocation9 + $0x64] ss:$16 sps:$4 sm:$0xff]  }
  0x9d   :  { %445 = vmatprep.subr.bf16.mxu0 %v10179_v35  ;;  %485 = vmatpush1.bf16.msra.mxu1 %v10190_v39  ;;  %v10193_v43 = vld [vmem:[#allocation9 + $0x28] ss:$16 sps:$4 sm:$0xff]   ;;  %v10194_v44 = vld [vmem:[#allocation9 + $0x4c] ss:$16 sps:$4 sm:$0xff]   ;;  %v10187_v45 = vld [vmem:[#allocation9 + $0x60] ss:$16 sps:$4 sm:$0xff]  }
  0x9e   :  { %486 = vmatprep.subr.bf16.mxu1 %v10191_v41  ;;  %v10196_v47 = vld [vmem:[#allocation9 + $0x48] ss:$16 sps:$4 sm:$0xff]   ;;  %v10202_v48 = vld [vmem:[#allocation11 + $0x4] ss:$16 sps:$4 sm:$0xff]   ;;  %v10197_v49 = vld [vmem:[#allocation9 + $0x6c] ss:$16 sps:$4 sm:$0xff]  }
  0x9f   :  { %vm439_vm0 = vcmask 523264   ;;  %v10200_v51 = vld [vmem:[#allocation11] ss:$16 sps:$4 sm:$0xff]   ;;  %v10199_v52 = vld [vmem:[#allocation9 + $0x68] ss:$16 sps:$4 sm:$0xff]   ;;  %vm10705_vm1 = vmmov 0  }
  0xa0   :  { %446 = vmatpush1.bf16.msra.mxu0 %v10181_v36  ;;  %v10208_v53 = vld [vmem:[#allocation11 + $0x24] ss:$16 sps:$4 sm:$0xff]   ;;  %v10205_v54 = vld [vmem:[#allocation11 + $0xc] ss:$16 sps:$4 sm:$0xff]   ;;  %v10206_v55 = vld [vmem:[#allocation11 + $0x20] ss:$16 sps:$4 sm:$0xff]  }
  0xa1   :  { %447 = vmatprep.subr.bf16.mxu0 %v10182_v37  ;;  %487 = vmatpush1.bf16.msra.mxu1 %v10193_v43  ;;  %v10203_v56 = vld [vmem:[#allocation11 + $0x8] ss:$16 sps:$4 sm:$0xff]   ;;  %v10214_v57 = vld [vmem:[#allocation11 + $0x44] ss:$16 sps:$4 sm:$0xff]   ;;  %v10211_v58 = vld [vmem:[#allocation11 + $0x2c] ss:$16 sps:$4 sm:$0xff]  }
  0xa2   :  { %488 = vmatprep.subr.bf16.mxu1 %v10194_v44  ;;  %v10212_v59 = vld [vmem:[#allocation11 + $0x40] ss:$16 sps:$4 sm:$0xff]   ;;  %v10209_v60 = vld [vmem:[#allocation11 + $0x28] ss:$16 sps:$4 sm:$0xff]   ;;  %v10220_v61 = vld [vmem:[#allocation11 + $0x64] ss:$16 sps:$4 sm:$0xff]  }
  0xa3   :  { %v10217_v62 = vld [vmem:[#allocation11 + $0x4c] ss:$16 sps:$4 sm:$0xff]   ;;  %v10218_v63 = vld [vmem:[#allocation11 + $0x60] ss:$16 sps:$4 sm:$0xff]   ;;  %v10215_v32 = vld [vmem:[#allocation11 + $0x48] ss:$16 sps:$4 sm:$0xff]  }
  0xa4   :  { %448 = vmatpush1.bf16.msra.mxu0 %v10184_v40  ;;  %v10226_v33 = vld [vmem:[#allocation11 + $0x84] ss:$16 sps:$4 sm:$0xff]   ;;  %v10223_v35 = vld [vmem:[#allocation11 + $0x6c] ss:$16 sps:$4 sm:$0xff]   ;;  %v10224_v36 = vld [vmem:[#allocation11 + $0x80] ss:$16 sps:$4 sm:$0xff]  }
  0xa5   :  { %449 = vmatprep.subr.bf16.mxu0 %v10185_v42  ;;  %489 = vmatpush1.bf16.msra.mxu1 %v10196_v47  ;;  %v10221_v37 = vld [vmem:[#allocation11 + $0x68] ss:$16 sps:$4 sm:$0xff]   ;;  %v10232_v38 = vld [vmem:[#allocation11 + $0xa4] ss:$16 sps:$4 sm:$0xff]   ;;  %v10229_v39 = vld [vmem:[#allocation11 + $0x8c] ss:$16 sps:$4 sm:$0xff]  }
  0xa6   :  { %490 = vmatprep.subr.bf16.mxu1 %v10197_v49  ;;  %v10230_v40 = vld [vmem:[#allocation11 + $0xa0] ss:$16 sps:$4 sm:$0xff]   ;;  %v10227_v41 = vld [vmem:[#allocation11 + $0x88] ss:$16 sps:$4 sm:$0xff]   ;;  %v10238_v42 = vld [vmem:[#allocation11 + $0xc4] ss:$16 sps:$4 sm:$0xff]  }
  0xa7   :  { %v10235_v43 = vld [vmem:[#allocation11 + $0xac] ss:$16 sps:$4 sm:$0xff]   ;;  %v10236_v44 = vld [vmem:[#allocation11 + $0xc0] ss:$16 sps:$4 sm:$0xff]   ;;  %v10244_v46 = vld [vmem:[#allocation11 + $0xe4] ss:$16 sps:$4 sm:$0xff]  }
  0xa8   :  { %450 = vmatpush1.bf16.msra.mxu0 %v10187_v45  ;;  %v10233_v45 = vld [vmem:[#allocation11 + $0xa8] ss:$16 sps:$4 sm:$0xff]   ;;  %v10241_v47 = vld [vmem:[#allocation11 + $0xcc] ss:$16 sps:$4 sm:$0xff]   ;;  %v1892_v31 = vld [vmem:[#allocation12 + $0xc60] sm:$0xff]  ;;  %vm6701_vm2 = vcmask 261120  }
  0xa9   :  { %1324 = vmatprep.subr.bf16.mxu0 %v10202_v48  ;;  %491 = vmatpush1.bf16.msra.mxu1 %v10199_v52  ;;  %v10242_v48 = vld [vmem:[#allocation11 + $0xe0] ss:$16 sps:$4 sm:$0xff]   ;;  %v10239_v49 = vld [vmem:[#allocation11 + $0xc8] ss:$16 sps:$4 sm:$0xff]   ;;  %vm6759_vm3 = vcmask 80896  }
  0xaa   :  { %1406 = vmatprep.subr.bf16.mxu1 %v10205_v54  ;;  %v10245_v52 = vld [vmem:[#allocation11 + $0xe8] ss:$16 sps:$4 sm:$0xff]   ;;  %v10253_v54 = vld [vmem:[#allocation11 + $0x10c] ss:$16 sps:$4 sm:$0xff]   ;;  %v1886_v30 = vld [vmem:[#allocation12 + $0xc30] sm:$0xff] }
  0xab   :  { %8999 = vmatmul.mubr.msk.bf16.vlgmr.msra.gmra.mrb[0].mxu0 %vm439_vm0, %v320_v50  ;;  %v1885_v15 = vld [vmem:[#allocation12 + $0xc28] sm:$0xff]  ;;  %v1894_v14 = vld [vmem:[#allocation12 + $0xc70] sm:$0xff]  ;;  %v1887_v21 = vld [vmem:[#allocation12 + $0xc38] sm:$0xff] }
  0xac   :  { %1325 = vmatpush1.bf16.msra.mxu0 %v10200_v51  ;;  %9000 = vmatmul.mubr.msk.bf16.vlgmr.msra.gmra.mrb[0].mxu1 %vm439_vm0, %v320_v50  ;;  %v10250_v50 = vld [vmem:[#allocation11 + $0x104] ss:$16 sps:$4 sm:$0xff]   ;;  %v10247_v51 = vld [vmem:[#allocation11 + $0xec] ss:$16 sps:$4 sm:$0xff]  }
  0xad   :  { %1326 = vmatprep.subr.bf16.mxu0 %v10208_v53  ;;  %1407 = vmatpush1.bf16.msra.mxu1 %v10203_v56  ;;  %v10248_v53 = vld [vmem:[#allocation11 + $0x100] ss:$16 sps:$4 sm:$0xff]   ;;  %v1893_v22 = vld [vmem:[#allocation12 + $0xc68] sm:$0xff]  ;;  %v1895_v5 = vld [vmem:[#allocation12 + $0xc78] sm:$0xff] }
  0xae   :  { %1408 = vmatprep.subr.bf16.mxu1 %v10211_v58  ;;  %v10254_v56 = vld [vmem:[#allocation11 + $0x120] ss:$16 sps:$4 sm:$0xff]   ;;  %v10262_v58 = vld [vmem:[#allocation11 + $0x144] ss:$16 sps:$4 sm:$0xff]  }
  0xb0   :  { %1327 = vmatpush1.bf16.msra.mxu0 %v10206_v55  ;;  %v10256_v55 = vld [vmem:[#allocation11 + $0x124] ss:$16 sps:$4 sm:$0xff]  }
  0xb1   :  { %1328 = vmatprep.subr.bf16.mxu0 %v10214_v57  ;;  %1409 = vmatpush1.bf16.msra.mxu1 %v10209_v60  ;;  %v10251_v57 = vld [vmem:[#allocation11 + $0x108] ss:$16 sps:$4 sm:$0xff]   ;;  %v10260_v60 = vld [vmem:[#allocation11 + $0x140] ss:$16 sps:$4 sm:$0xff]  }
  0xb2   :  { %1410 = vmatprep.subr.bf16.mxu1 %v10217_v62  ;;  %v10268_v62 = vld [vmem:[#allocation11 + $0x164] ss:$16 sps:$4 sm:$0xff]  }
  0xb4   :  { %1329 = vmatpush1.bf16.msra.mxu0 %v10212_v59  ;;  %v10259_v59 = vld [vmem:[#allocation11 + $0x12c] ss:$16 sps:$4 sm:$0xff]  }
  0xb5   :  { %1330 = vmatprep.subr.bf16.mxu0 %v10220_v61  ;;  %1411 = vmatpush1.bf16.msra.mxu1 %v10215_v32  ;;  %v10257_v61 = vld [vmem:[#allocation11 + $0x128] ss:$16 sps:$4 sm:$0xff]   ;;  %v10266_v32 = vld [vmem:[#allocation11 + $0x160] ss:$16 sps:$4 sm:$0xff]  }
  0xb6   :  { %1412 = vmatprep.subr.bf16.mxu1 %v10223_v35  ;;  %v10274_v35 = vld [vmem:[#allocation11 + $0x184] ss:$16 sps:$4 sm:$0xff]  }
  0xb8   :  { %1331 = vmatpush1.bf16.msra.mxu0 %v10218_v63  ;;  %v10265_v63 = vld [vmem:[#allocation11 + $0x14c] ss:$16 sps:$4 sm:$0xff]  }
  0xb9   :  { %1332 = vmatprep.subr.bf16.mxu0 %v10226_v33  ;;  %1413 = vmatpush1.bf16.msra.mxu1 %v10221_v37  ;;  %v10263_v33 = vld [vmem:[#allocation11 + $0x148] ss:$16 sps:$4 sm:$0xff]   ;;  %v10272_v37 = vld [vmem:[#allocation11 + $0x180] ss:$16 sps:$4 sm:$0xff]  }
  0xba   :  { %1414 = vmatprep.subr.bf16.mxu1 %v10229_v39  ;;  %v10280_v39 = vld [vmem:[#allocation11 + $0x1a4] ss:$16 sps:$4 sm:$0xff]  }
  0xbc   :  { %1333 = vmatpush1.bf16.msra.mxu0 %v10224_v36  ;;  %v10271_v36 = vld [vmem:[#allocation11 + $0x16c] ss:$16 sps:$4 sm:$0xff]  }
  0xbd   :  { %1334 = vmatprep.subr.bf16.mxu0 %v10232_v38  ;;  %1415 = vmatpush1.bf16.msra.mxu1 %v10227_v41  ;;  %v10269_v38 = vld [vmem:[#allocation11 + $0x168] ss:$16 sps:$4 sm:$0xff]   ;;  %v10278_v41 = vld [vmem:[#allocation11 + $0x1a0] ss:$16 sps:$4 sm:$0xff]  }
  0xbe   :  { %1416 = vmatprep.subr.bf16.mxu1 %v10235_v43  ;;  %v10283_v43 = vld [vmem:[#allocation11 + $0x1ac] ss:$16 sps:$4 sm:$0xff]  }
  0xc0   :  { %1335 = vmatpush1.bf16.msra.mxu0 %v10230_v40  ;;  %v10277_v40 = vld [vmem:[#allocation11 + $0x18c] ss:$16 sps:$4 sm:$0xff]  }
  0xc1   :  { %1336 = vmatprep.subr.bf16.mxu0 %v10238_v42  ;;  %1417 = vmatpush1.bf16.msra.mxu1 %v10233_v45  ;;  %v10275_v42 = vld [vmem:[#allocation11 + $0x188] ss:$16 sps:$4 sm:$0xff]   ;;  %v10286_v45 = vld [vmem:[#allocation11 + $0x1c4] ss:$16 sps:$4 sm:$0xff]  }
  0xc2   :  { %1418 = vmatprep.subr.bf16.mxu1 %v10241_v47  ;;  %v10284_v47 = vld [vmem:[#allocation11 + $0x1c0] ss:$16 sps:$4 sm:$0xff]  }
  0xc4   :  { %1337 = vmatpush1.bf16.msra.mxu0 %v10236_v44  ;;  %v10281_v44 = vld [vmem:[#allocation11 + $0x1a8] ss:$16 sps:$4 sm:$0xff]  }
  0xc5   :  { %1338 = vmatprep.subr.bf16.mxu0 %v10244_v46  ;;  %1419 = vmatpush1.bf16.msra.mxu1 %v10239_v49  ;;  %v10289_v46 = vld [vmem:[#allocation11 + $0x1cc] ss:$16 sps:$4 sm:$0xff]   ;;  %v10292_v49 = vld [vmem:[#allocation11 + $0x1e4] ss:$16 sps:$4 sm:$0xff]  }
  0xc6   :  { %1420 = vmatprep.subr.bf16.mxu1 %v10247_v51  ;;  %v10290_v51 = vld [vmem:[#allocation11 + $0x1e0] ss:$16 sps:$4 sm:$0xff]  }
  0xc8   :  { %1339 = vmatpush1.bf16.msra.mxu0 %v10242_v48  ;;  %v10287_v48 = vld [vmem:[#allocation11 + $0x1c8] ss:$16 sps:$4 sm:$0xff]  }
  0xc9   :  { %1340 = vmatprep.subr.bf16.mxu0 %v10250_v50  ;;  %1421 = vmatpush1.bf16.msra.mxu1 %v10245_v52  ;;  %v10295_v50 = vld [vmem:[#allocation11 + $0x1ec] ss:$16 sps:$4 sm:$0xff]   ;;  %v10293_v52 = vld [vmem:[#allocation11 + $0x1e8] ss:$16 sps:$4 sm:$0xff]  }
  0xca   :  { %1422 = vmatprep.subr.bf16.mxu1 %v10253_v54  ;;  %v10301_v54 = vld [vmem:[#allocation11 + $0x20c] ss:$16 sps:$4 sm:$0xff]  }
  0xcc   :  { %1341 = vmatpush1.bf16.msra.mxu0 %v10248_v53  ;;  %v10298_v53 = vld [vmem:[#allocation11 + $0x204] ss:$16 sps:$4 sm:$0xff]  }
  0xcd   :  { %1342 = vmatprep.subr.bf16.mxu0 %v10256_v55  ;;  %1423 = vmatpush1.bf16.msra.mxu1 %v10251_v57  ;;  %v339_v55 = vlaneseq }
  0xce   :  { %1424 = vmatprep.subr.bf16.mxu1 %v10259_v59 }
  0xd0   :  { %1343 = vmatpush1.bf16.msra.mxu0 %v10254_v56  ;;  %v11061_v56 = vshrl.u32 %v339_v55, 7  ;;  %v10310_v55 = vld [vmem:[#allocation11 + $0x244] ss:$16 sps:$4 sm:$0xff]  }
  0xd1   :  { %1344 = vmatprep.subr.bf16.mxu0 %v10262_v58  ;;  %1425 = vmatpush1.bf16.msra.mxu1 %v10257_v61  ;;  %v11066_v58 = vld [vmem:[#allocation14] ss:$8 sm:$0xf] }
  0xd2   :  { %1426 = vmatprep.subr.bf16.mxu1 %v10265_v63  ;;  %v11064_v57 = vsub.s32 0, %v11061_v56  ;;  %v11069_v59 = vsub.s32 1, %v11061_v56 }
  0xd4   :  { %1345 = vmatpush1.bf16.msra.mxu0 %v10260_v60  ;;  %v342_v60 = vrot.slane %v11066_v58, %v11064_v57  ;;  %v346_v61 = vrot.slane %v11066_v58, %v11069_v59 }
  0xd5   :  { %1346 = vmatprep.subr.bf16.mxu0 %v10268_v62  ;;  %1427 = vmatpush1.bf16.msra.mxu1 %v10263_v33  ;;  %v11076_v62 = vsub.s32 3, %v11061_v56 }
  0xd6   :  { %1428 = vmatprep.subr.bf16.mxu1 %v10271_v36 }
  0xd8   :  { %1347 = vmatpush1.bf16.msra.mxu0 %v10266_v32 }
  0xd9   :  { %1348 = vmatprep.subr.bf16.mxu0 %v10274_v35  ;;  %1429 = vmatpush1.bf16.msra.mxu1 %v10269_v38 }
  0xda   :  { %1430 = vmatprep.subr.bf16.mxu1 %v10277_v40 }
  0xdc   :  { %1349 = vmatpush1.bf16.msra.mxu0 %v10272_v37 }
  0xdd   :  { %1350 = vmatprep.subr.bf16.mxu0 %v10280_v39  ;;  %1431 = vmatpush1.bf16.msra.mxu1 %v10275_v42  ;;  %v354_v39 = vrot.slane %v11066_v58, %v11076_v62 }
  0xde   :  { %1432 = vmatprep.subr.bf16.mxu1 %v10283_v43  ;;  %v10296_v43 = vld [vmem:[#allocation11 + $0x200] ss:$16 sps:$4 sm:$0xff]  }
  0xe0   :  { %1351 = vmatpush1.bf16.msra.mxu0 %v10278_v41 }
  0xe1   :  { %1433 = vmatpush1.bf16.msra.mxu1 %v10281_v44  ;;  %1352 = vmatprep.subr.bf16.mxu0 %v10286_v45  ;;  %v10299_v44 = vld [vmem:[#allocation11 + $0x208] ss:$16 sps:$4 sm:$0xff]  }
  0xe2   :  { %1434 = vmatprep.subr.bf16.mxu1 %v10289_v46 }
  0xe4   :  { %1353 = vmatpush1.bf16.msra.mxu0 %v10284_v47  ;;  %v10304_v47 = vld [vmem:[#allocation11 + $0x224] ss:$16 sps:$4 sm:$0xff]  }
  0xe5   :  { %1435 = vmatpush1.bf16.msra.mxu1 %v10287_v48  ;;  %1354 = vmatprep.subr.bf16.mxu0 %v10292_v49  ;;  %v10307_v48 = vld [vmem:[#allocation11 + $0x22c] ss:$16 sps:$4 sm:$0xff]  }
  0xe6   :  { %1436 = vmatprep.subr.bf16.mxu1 %v10295_v50 }
  0xe8   :  { %1355 = vmatpush1.bf16.msra.mxu0 %v10290_v51 }
  0xe9   :  { %1437 = vmatpush1.bf16.msra.mxu1 %v10293_v52  ;;  %1365 = vmatprep.subr.bf16.mxu0 %v10298_v53  ;;  %v10302_v53 = vld [vmem:[#allocation11 + $0x220] ss:$16 sps:$4 sm:$0xff]  }
  0xea   :  { %1447 = vmatprep.subr.bf16.mxu1 %v10301_v54  ;;  %v10305_v54 = vld [vmem:[#allocation11 + $0x228] ss:$16 sps:$4 sm:$0xff]  }
 0x17e   :  { %v477_v63 = vpop.f32.mrb[0].mxu0 }
 0x17f   :  { %v478_v32 = vadd.f32 %v477_v63, %v342_v60  ;;  %v479_v33 = vpop.f32.mrb[1].mxu0  ;;  %v11080_v41 = vpop.f32.mrb[0].mxu1  ;;  %v10313_v60 = vld [vmem:[#allocation11 + $0x24c] ss:$16 sps:$4 sm:$0xff]   ;;  %v10308_v63 = vld [vmem:[#allocation11 + $0x240] ss:$16 sps:$4 sm:$0xff]  }
 0x180   :  { %v480_v35 = vadd.f32 %v479_v33, %v346_v61  ;;  %v481_v36 = vpop.f32.mrb[2].mxu0  ;;  %v520_v45 = vpop.f32.mrb[1].mxu1  ;;  %v10316_v33 = vld [vmem:[#allocation11 + $0x264] ss:$16 sps:$4 sm:$0xff]  }
 0x181   :  { %v525_v37 = vmax.f32 %v478_v32, 0.0  ;;  %v482_v38 = vpop.f32.mrb[3].mxu0  ;;  %v521_v49 = vadd.f32 %v520_v45, %v354_v39  ;;  %v522_v50 = vpop.f32.mrb[2].mxu1  ;;  %v10311_v32 = vld [vmem:[#allocation11 + $0x248] ss:$16 sps:$4 sm:$0xff]  }
 0x182   :  { %v526_v40 = vmax.f32 %v480_v35, 0.0  ;;  %v523_v51 = vpop.f32.mrb[3].mxu1  ;;  %v10319_v35 = vld [vmem:[#allocation11 + $0x26c] ss:$16 sps:$4 sm:$0xff]   ;;  %v10314_v36 = vld [vmem:[#allocation11 + $0x260] ss:$16 sps:$4 sm:$0xff]  }
 0x183   :  { %v529_v46 = vpack.c.bf16 %v525_v37, %v525_v37  ;;  %v528_v52 = vmax.f32 %v521_v49, 0.0  ;;  %v10317_v37 = vld [vmem:[#allocation11 + $0x268] ss:$16 sps:$4 sm:$0xff]   ;;  %v10322_v38 = vld [vmem:[#allocation11 + $0x284] ss:$16 sps:$4 sm:$0xff]  }
 0x184   :  { %v530_v42 = vpack.c.bf16 %v526_v40, %v526_v40  ;;  %v10325_v39 = vld [vmem:[#allocation11 + $0x28c] ss:$16 sps:$4 sm:$0xff]   ;;  %v10320_v40 = vld [vmem:[#allocation11 + $0x280] ss:$16 sps:$4 sm:$0xff]   ;;  %v10335_v50 = vld [vmem:[#allocation11 + $0x2c8] ss:$16 sps:$4 sm:$0xff]  }
 0x185   :  { %v532_v61 = vpack.c.bf16 %v528_v52, %v528_v52  ;;  %v10326_v45 = vld [vmem:[#allocation11 + $0x2a0] ss:$16 sps:$4 sm:$0xff]   ;;  %v10340_v51 = vld [vmem:[#allocation11 + $0x2e4] ss:$16 sps:$4 sm:$0xff]   ;;  %v10343_v52 = vld [vmem:[#allocation11 + $0x2ec] ss:$16 sps:$4 sm:$0xff]  }
 0x186   :  { %1356 = vmatprep.mubr.bf16.mxu0 %v530_v42  ;;  %1438 = vmatprep.mubr.bf16.mxu1 %v530_v42  ;;  %v10323_v42 = vld [vmem:[#allocation11 + $0x288] ss:$16 sps:$4 sm:$0xff]   ;;  %v10332_v49 = vld [vmem:[#allocation11 + $0x2c0] ss:$16 sps:$4 sm:$0xff]  }
 0x187   :  { %1357 = vmatmul.mubr.bf16.vlgmr.msra.gmra.mrb[4].mxu0 %v529_v46  ;;  %1439 = vmatmul.mubr.bf16.vlgmr.msra.gmra.mrb[4].mxu1 %v529_v46  ;;  %v10329_v46 = vld [vmem:[#allocation11 + $0x2a8] ss:$16 sps:$4 sm:$0xff]  }
 0x188   :  { %1366 = vmatpush1.bf16.msra.mxu0 %v10296_v43  ;;  %1448 = vmatpush1.bf16.msra.mxu1 %v10299_v44  ;;  %v10328_v43 = vld [vmem:[#allocation11 + $0x2a4] ss:$16 sps:$4 sm:$0xff]   ;;  %v10331_v44 = vld [vmem:[#allocation11 + $0x2ac] ss:$16 sps:$4 sm:$0xff]  }
 0x189   :  { %1367 = vmatprep.subr.bf16.mxu0 %v10304_v47  ;;  %1449 = vmatprep.subr.bf16.mxu1 %v10307_v48  ;;  %v10334_v47 = vld [vmem:[#allocation11 + $0x2c4] ss:$16 sps:$4 sm:$0xff]   ;;  %v10337_v48 = vld [vmem:[#allocation11 + $0x2cc] ss:$16 sps:$4 sm:$0xff]  }
 0x18a   :  { %1397 = vmatprep.mubr.bf16.mxu0 %v532_v61  ;;  %1479 = vmatprep.mubr.bf16.mxu1 %v532_v61  ;;  %v10344_v61 = vld [vmem:[#allocation11 + $0x300] ss:$16 sps:$4 sm:$0xff]  }
 0x18c   :  { %1368 = vmatpush1.bf16.msra.mxu0 %v10302_v53  ;;  %1450 = vmatpush1.bf16.msra.mxu1 %v10305_v54  ;;  %v10338_v53 = vld [vmem:[#allocation11 + $0x2e0] ss:$16 sps:$4 sm:$0xff]   ;;  %v10341_v54 = vld [vmem:[#allocation11 + $0x2e8] ss:$16 sps:$4 sm:$0xff]  }
 0x18d   :  { %1369 = vmatprep.subr.bf16.mxu0 %v10310_v55  ;;  %1451 = vmatprep.subr.bf16.mxu1 %v10313_v60  ;;  %v10346_v55 = vld [vmem:[#allocation11 + $0x304] ss:$16 sps:$4 sm:$0xff]   ;;  %v10349_v60 = vld [vmem:[#allocation11 + $0x30c] ss:$16 sps:$4 sm:$0xff]  }
 0x190   :  { %1370 = vmatpush1.bf16.msra.mxu0 %v10308_v63  ;;  %1452 = vmatpush1.bf16.msra.mxu1 %v10311_v32  ;;  %v10347_v63 = vld [vmem:[#allocation11 + $0x308] ss:$16 sps:$4 sm:$0xff]   ;;  %v10352_v32 = vld [vmem:[#allocation11 + $0x324] ss:$16 sps:$4 sm:$0xff]  }
 0x191   :  { %1371 = vmatprep.subr.bf16.mxu0 %v10316_v33  ;;  %1453 = vmatprep.subr.bf16.mxu1 %v10319_v35  ;;  %v10355_v33 = vld [vmem:[#allocation11 + $0x32c] ss:$16 sps:$4 sm:$0xff]   ;;  %v10350_v35 = vld [vmem:[#allocation11 + $0x320] ss:$16 sps:$4 sm:$0xff]  }
 0x194   :  { %1372 = vmatpush1.bf16.msra.mxu0 %v10314_v36  ;;  %1454 = vmatpush1.bf16.msra.mxu1 %v10317_v37  ;;  %v10353_v36 = vld [vmem:[#allocation11 + $0x328] ss:$16 sps:$4 sm:$0xff]   ;;  %v10358_v37 = vld [vmem:[#allocation11 + $0x344] ss:$16 sps:$4 sm:$0xff]  }
 0x195   :  { %1373 = vmatprep.subr.bf16.mxu0 %v10322_v38  ;;  %1455 = vmatprep.subr.bf16.mxu1 %v10325_v39  ;;  %v10361_v38 = vld [vmem:[#allocation11 + $0x34c] ss:$16 sps:$4 sm:$0xff]   ;;  %v10356_v39 = vld [vmem:[#allocation11 + $0x340] ss:$16 sps:$4 sm:$0xff]  }
 0x198   :  { %1374 = vmatpush1.bf16.msra.mxu0 %v10320_v40  ;;  %1456 = vmatpush1.bf16.msra.mxu1 %v10323_v42  ;;  %v10359_v40 = vld [vmem:[#allocation11 + $0x348] ss:$16 sps:$4 sm:$0xff]   ;;  %v10364_v42 = vld [vmem:[#allocation11 + $0x364] ss:$16 sps:$4 sm:$0xff]  }
 0x199   :  { %1375 = vmatprep.subr.bf16.mxu0 %v10328_v43  ;;  %1457 = vmatprep.subr.bf16.mxu1 %v10331_v44  ;;  %v10367_v43 = vld [vmem:[#allocation11 + $0x36c] ss:$16 sps:$4 sm:$0xff]   ;;  %v10362_v44 = vld [vmem:[#allocation11 + $0x360] ss:$16 sps:$4 sm:$0xff]  }
 0x19c   :  { %1376 = vmatpush1.bf16.msra.mxu0 %v10326_v45  ;;  %1458 = vmatpush1.bf16.msra.mxu1 %v10329_v46  ;;  %v10365_v45 = vld [vmem:[#allocation11 + $0x368] ss:$16 sps:$4 sm:$0xff]   ;;  %v10370_v46 = vld [vmem:[#allocation11 + $0x384] ss:$16 sps:$4 sm:$0xff]  }
 0x19d   :  { %1377 = vmatprep.subr.bf16.mxu0 %v10334_v47  ;;  %1459 = vmatprep.subr.bf16.mxu1 %v10337_v48  ;;  %v10373_v47 = vld [vmem:[#allocation11 + $0x38c] ss:$16 sps:$4 sm:$0xff]   ;;  %v10368_v48 = vld [vmem:[#allocation11 + $0x380] ss:$16 sps:$4 sm:$0xff]  }
 0x1a0   :  { %1378 = vmatpush1.bf16.msra.mxu0 %v10332_v49  ;;  %1460 = vmatpush1.bf16.msra.mxu1 %v10335_v50  ;;  %v10371_v49 = vld [vmem:[#allocation11 + $0x388] ss:$16 sps:$4 sm:$0xff]   ;;  %v11083_v50 = vsub.s32 2, %v11061_v56 }
 0x1a1   :  { %1379 = vmatprep.subr.bf16.mxu0 %v10340_v51  ;;  %1461 = vmatprep.subr.bf16.mxu1 %v10343_v52  ;;  %v10376_v51 = vld [vmem:[#allocation11 + $0x3a4] ss:$16 sps:$4 sm:$0xff]   ;;  %v10379_v52 = vld [vmem:[#allocation11 + $0x3ac] ss:$16 sps:$4 sm:$0xff]  }
 0x1a4   :  { %1380 = vmatpush1.bf16.msra.mxu0 %v10338_v53  ;;  %1462 = vmatpush1.bf16.msra.mxu1 %v10341_v54  ;;  %v10374_v53 = vld [vmem:[#allocation11 + $0x3a0] ss:$16 sps:$4 sm:$0xff]   ;;  %v10377_v54 = vld [vmem:[#allocation11 + $0x3a8] ss:$16 sps:$4 sm:$0xff]  }
 0x1a5   :  { %1381 = vmatprep.subr.bf16.mxu0 %v10346_v55  ;;  %1463 = vmatprep.subr.bf16.mxu1 %v10349_v60  ;;  %v350_v55 = vrot.slane %v11066_v58, %v11083_v50  ;;  %v10382_v60 = vld [vmem:[#allocation11 + $0x3c4] ss:$16 sps:$4 sm:$0xff]   ;;  %v10386_v58 = vld [vmem:[#allocation11 + $0x3e0] ss:$16 sps:$4 sm:$0xff]  }
 0x1a8   :  { %1382 = vmatpush1.bf16.msra.mxu0 %v10344_v61  ;;  %1464 = vmatpush1.bf16.msra.mxu1 %v10347_v63  ;;  %v10385_v61 = vld [vmem:[#allocation11 + $0x3cc] ss:$16 sps:$4 sm:$0xff]   ;;  %v10380_v63 = vld [vmem:[#allocation11 + $0x3c0] ss:$16 sps:$4 sm:$0xff]  }
 0x1a9   :  { %1383 = vmatprep.subr.bf16.mxu0 %v10352_v32  ;;  %1465 = vmatprep.subr.bf16.mxu1 %v10355_v33  ;;  %v10383_v32 = vld [vmem:[#allocation11 + $0x3c8] ss:$16 sps:$4 sm:$0xff]   ;;  %v519_v33 = vadd.f32 %v11080_v41, %v350_v55  ;;  %v1528_v55 = vld [vmem:[#allocation12 + $0x100] sm:$0xff] }
 0x1aa   :  { %v1513_v41 = vld [vmem:[#allocation12 + $0x88] sm:$0xff] }
 0x1ac   :  { %1384 = vmatpush1.bf16.msra.mxu0 %v10350_v35  ;;  %1466 = vmatpush1.bf16.msra.mxu1 %v10353_v36  ;;  %v10388_v35 = vld [vmem:[#allocation11 + $0x3e4] ss:$16 sps:$4 sm:$0xff]   ;;  %v10391_v36 = vld [vmem:[#allocation11 + $0x3ec] ss:$16 sps:$4 sm:$0xff]  }
 0x1ad   :  { %1385 = vmatprep.subr.bf16.mxu0 %v10358_v37  ;;  %1467 = vmatprep.subr.bf16.mxu1 %v10361_v38  ;;  %v1496_v37 = vld [vmem:[#allocation12] sm:$0xff] }
 0x1ae   :  { %v1504_v38 = vld [vmem:[#allocation12 + $0x40] sm:$0xff] }
 0x1b0   :  { %1386 = vmatpush1.bf16.msra.mxu0 %v10356_v39  ;;  %1468 = vmatpush1.bf16.msra.mxu1 %v10359_v40  ;;  %v1497_v39 = vld [vmem:[#allocation12 + $0x8] sm:$0xff] }
 0x1b1   :  { %1387 = vmatprep.subr.bf16.mxu0 %v10364_v42  ;;  %1469 = vmatprep.subr.bf16.mxu1 %v10367_v43  ;;  %v1505_v40 = vld [vmem:[#allocation12 + $0x48] sm:$0xff]  ;;  %v527_v43 = vmax.f32 %v519_v33, 0.0 }
 0x1b2   :  { %v10389_v42 = vld [vmem:[#allocation11 + $0x3e8] ss:$16 sps:$4 sm:$0xff]  }
 0x1b4   :  { %1388 = vmatpush1.bf16.msra.mxu0 %v10362_v44  ;;  %1470 = vmatpush1.bf16.msra.mxu1 %v10365_v45  ;;  %v9130_v44 = vcombine.high %v1496_v37, %v1504_v38  ;;  %v9132_v45 = vcombine.high %v1497_v39, %v1505_v40 }
 0x1b5   :  { %1389 = vmatprep.subr.bf16.mxu0 %v10370_v46  ;;  %1471 = vmatprep.subr.bf16.mxu1 %v10373_v47  ;;  %v1512_v46 = vld [vmem:[#allocation12 + $0x80] sm:$0xff] }
 0x1b6   :  { %v1520_v47 = vld [vmem:[#allocation12 + $0xc0] sm:$0xff] }
 0x1b8   :  { %1390 = vmatpush1.bf16.msra.mxu0 %v10368_v48  ;;  %1472 = vmatpush1.bf16.msra.mxu1 %v10371_v49  ;;  %v1521_v48 = vld [vmem:[#allocation12 + $0xc8] sm:$0xff]  ;;  %v9129_v49 = vcombine.low %v1496_v37, %v1504_v38  ;;  %v1544_v37 = vld [vmem:[#allocation12 + $0x180] sm:$0xff] }
 0x1b9   :  { %1391 = vmatprep.subr.bf16.mxu0 %v10376_v51  ;;  %1473 = vmatprep.subr.bf16.mxu1 %v10379_v52  ;;  %v9131_v51 = vcombine.low %v1497_v39, %v1505_v40  ;;  %v531_v52 = vpack.c.bf16 %v527_v43, %v527_v43  ;;  %v9147_v33 = vcombine.low %v1513_v41, %v1521_v48  ;;  %v1552_v38 = vld [vmem:[#allocation12 + $0x1c0] sm:$0xff]  ;;  %v1545_v39 = vld [vmem:[#allocation12 + $0x188] sm:$0xff] }
 0x1ba   :  { %v1553_v40 = vld [vmem:[#allocation12 + $0x1c8] sm:$0xff]  ;;  %v9178_v43 = vcombine.high %v1544_v37, %v1552_v38 }
 0x1bc   :  { %1392 = vmatpush1.bf16.msra.mxu0 %v10374_v53  ;;  %1474 = vmatpush1.bf16.msra.mxu1 %v10377_v54  ;;  %v9146_v53 = vcombine.high %v1512_v46, %v1520_v47  ;;  %v9148_v54 = vcombine.high %v1513_v41, %v1521_v48  ;;  %v9177_v41 = vcombine.low %v1544_v37, %v1552_v38  ;;  %v1593_v37 = vld [vmem:[#allocation12 + $0x308] sm:$0xff] }
 0x1bd   :  { %1393 = vmatprep.subr.bf16.mxu0 %v10382_v60  ;;  %1475 = vmatprep.subr.bf16.mxu1 %v10385_v61  ;;  %v1536_v60 = vld [vmem:[#allocation12 + $0x140] sm:$0xff]  ;;  %v1529_v61 = vld [vmem:[#allocation12 + $0x108] sm:$0xff]  ;;  %v9179_v48 = vcombine.low %v1545_v39, %v1553_v40 }
 0x1be   :  { %v1601_v38 = vld [vmem:[#allocation12 + $0x348] sm:$0xff] }
 0x1c0   :  { %1394 = vmatpush1.bf16.msra.mxu0 %v10380_v63  ;;  %1476 = vmatpush1.bf16.msra.mxu1 %v10383_v32  ;;  %v1537_v63 = vld [vmem:[#allocation12 + $0x148] sm:$0xff]  ;;  %v9145_v32 = vcombine.low %v1512_v46, %v1520_v47 }
 0x1c1   :  { %1395 = vmatprep.subr.bf16.mxu0 %v10388_v35  ;;  %1477 = vmatprep.subr.bf16.mxu1 %v10391_v36  ;;  %v9162_v35 = vcombine.high %v1528_v55, %v1536_v60  ;;  %v9164_v36 = vcombine.high %v1529_v61, %v1537_v63  ;;  %v1561_v46 = vld [vmem:[#allocation12 + $0x208] sm:$0xff] }
 0x1c2   :  { %v1569_v47 = vld [vmem:[#allocation12 + $0x248] sm:$0xff] }
 0x1c4   :  { %1396 = vmatpush1.bf16.msra.mxu0 %v10386_v58  ;;  %1478 = vmatpush1.bf16.msra.mxu1 %v10389_v42  ;;  %v9161_v58 = vcombine.low %v1528_v55, %v1536_v60  ;;  %v9163_v42 = vcombine.low %v1529_v61, %v1537_v63  ;;  %v1577_v55 = vld [vmem:[#allocation12 + $0x288] sm:$0xff]  ;;  %v9195_v63 = vcombine.low %v1561_v46, %v1569_v47 }
 0x1c5   :  { %4658 = vmatprep.subr.bf16.mxu0 %v9130_v44  ;;  %4740 = vmatprep.subr.bf16.mxu1 %v9132_v45  ;;  %v9180_v44 = vcombine.high %v1545_v39, %v1553_v40  ;;  %v1560_v45 = vld [vmem:[#allocation12 + $0x200] sm:$0xff]  ;;  %v1585_v60 = vld [vmem:[#allocation12 + $0x2c8] sm:$0xff] }
 0x1c6   :  { %v9211_v40 = vcombine.low %v1577_v55, %v1585_v60 }
 0x1c7   :  { %1398 = vmatmul.mubr.bf16.vlgmr.msra.gmra.mrb[4].mxu0 %v531_v52  ;;  %1480 = vmatmul.mubr.bf16.vlgmr.msra.gmra.mrb[4].mxu1 %v531_v52  ;;  %v9196_v52 = vcombine.high %v1561_v46, %v1569_v47  ;;  %v9227_v47 = vcombine.low %v1593_v37, %v1601_v38 }
 0x1c8   :  { %4659 = vmatpush1.bf16.msra.mxu0 %v9129_v49  ;;  %4741 = vmatpush1.bf16.msra.mxu1 %v9131_v51  ;;  %v1568_v49 = vld [vmem:[#allocation12 + $0x240] sm:$0xff] }
 0x1c9   :  { %4660 = vmatprep.subr.bf16.mxu0 %v9146_v53  ;;  %4742 = vmatprep.subr.bf16.mxu1 %v9148_v54  ;;  %v9194_v51 = vcombine.high %v1560_v45, %v1568_v49  ;;  %v1576_v53 = vld [vmem:[#allocation12 + $0x280] sm:$0xff]  ;;  %v9193_v61 = vcombine.low %v1560_v45, %v1568_v49  ;;  %v1609_v45 = vld [vmem:[#allocation12 + $0x388] sm:$0xff] }
 0x1ca   :  { %v1584_v54 = vld [vmem:[#allocation12 + $0x2c0] sm:$0xff]  ;;  %v1617_v49 = vld [vmem:[#allocation12 + $0x3c8] sm:$0xff] }
 0x1cb   :  { %v9209_v39 = vcombine.low %v1576_v53, %v1584_v54 }
 0x1cc   :  { %4661 = vmatpush1.bf16.msra.mxu0 %v9145_v32  ;;  %4743 = vmatpush1.bf16.msra.mxu1 %v9147_v33  ;;  %v9210_v32 = vcombine.high %v1576_v53, %v1584_v54  ;;  %v9212_v33 = vcombine.high %v1577_v55, %v1585_v60  ;;  %v1625_v53 = vld [vmem:[#allocation12 + $0x408] sm:$0xff]  ;;  %v9243_v60 = vcombine.low %v1609_v45, %v1617_v49 }
 0x1cd   :  { %4662 = vmatprep.subr.bf16.mxu0 %v9162_v35  ;;  %4744 = vmatprep.subr.bf16.mxu1 %v9164_v36  ;;  %v1592_v35 = vld [vmem:[#allocation12 + $0x300] sm:$0xff]  ;;  %v1633_v54 = vld [vmem:[#allocation12 + $0x448] sm:$0xff] }
 0x1ce   :  { %v1600_v36 = vld [vmem:[#allocation12 + $0x340] sm:$0xff] }
 0x1cf   :  { %v9225_v46 = vcombine.low %v1592_v35, %v1600_v36 }
 0x1d0   :  { %4663 = vmatpush1.bf16.msra.mxu0 %v9161_v58  ;;  %4745 = vmatpush1.bf16.msra.mxu1 %v9163_v42  ;;  %v9226_v58 = vcombine.high %v1592_v35, %v1600_v36  ;;  %v9228_v42 = vcombine.high %v1593_v37, %v1601_v38  ;;  %v1641_v35 = vld [vmem:[#allocation12 + $0x488] sm:$0xff]  ;;  %v9259_v38 = vcombine.low %v1625_v53, %v1633_v54 }
 0x1d1   :  { %4664 = vmatprep.subr.bf16.mxu0 %v9178_v43  ;;  %4746 = vmatprep.subr.bf16.mxu1 %v9180_v44  ;;  %v1608_v43 = vld [vmem:[#allocation12 + $0x380] sm:$0xff]  ;;  %v1649_v36 = vld [vmem:[#allocation12 + $0x4c8] sm:$0xff] }
 0x1d2   :  { %v1616_v44 = vld [vmem:[#allocation12 + $0x3c0] sm:$0xff] }
 0x1d3   :  { %v9241_v55 = vcombine.low %v1608_v43, %v1616_v44 }
 0x1d4   :  { %4665 = vmatpush1.bf16.msra.mxu0 %v9177_v41  ;;  %4747 = vmatpush1.bf16.msra.mxu1 %v9179_v48  ;;  %v9242_v41 = vcombine.high %v1608_v43, %v1616_v44  ;;  %v9244_v48 = vcombine.high %v1609_v45, %v1617_v49  ;;  %v1657_v43 = vld [vmem:[#allocation12 + $0x508] sm:$0xff]  ;;  %v9275_v49 = vcombine.low %v1641_v35, %v1649_v36 }
 0x1d5   :  { %4666 = vmatprep.subr.bf16.mxu0 %v9194_v51  ;;  %4748 = vmatprep.subr.bf16.mxu1 %v9196_v52  ;;  %v1624_v51 = vld [vmem:[#allocation12 + $0x400] sm:$0xff]  ;;  %v1665_v44 = vld [vmem:[#allocation12 + $0x548] sm:$0xff] }
 0x1d6   :  { %v1632_v52 = vld [vmem:[#allocation12 + $0x440] sm:$0xff] }
 0x1d7   :  { %v9257_v37 = vcombine.low %v1624_v51, %v1632_v52 }
 0x1d8   :  { %4667 = vmatpush1.bf16.msra.mxu0 %v9193_v61  ;;  %4749 = vmatpush1.bf16.msra.mxu1 %v9195_v63  ;;  %v9258_v61 = vcombine.high %v1624_v51, %v1632_v52  ;;  %v9260_v63 = vcombine.high %v1625_v53, %v1633_v54  ;;  %v1673_v51 = vld [vmem:[#allocation12 + $0x588] sm:$0xff]  ;;  %v9291_v54 = vcombine.low %v1657_v43, %v1665_v44 }
 0x1d9   :  { %4668 = vmatprep.subr.bf16.mxu0 %v9210_v32  ;;  %4750 = vmatprep.subr.bf16.mxu1 %v9212_v33  ;;  %v1640_v32 = vld [vmem:[#allocation12 + $0x480] sm:$0xff]  ;;  %v1681_v52 = vld [vmem:[#allocation12 + $0x5c8] sm:$0xff] }
 0x1da   :  { %v1648_v33 = vld [vmem:[#allocation12 + $0x4c0] sm:$0xff] }
 0x1db   :  { %v9273_v45 = vcombine.low %v1640_v32, %v1648_v33 }
 0x1dc   :  { %4669 = vmatpush1.bf16.msra.mxu0 %v9209_v39  ;;  %4751 = vmatpush1.bf16.msra.mxu1 %v9211_v40  ;;  %v9274_v39 = vcombine.high %v1640_v32, %v1648_v33  ;;  %v9276_v40 = vcombine.high %v1641_v35, %v1649_v36  ;;  %v1689_v32 = vld [vmem:[#allocation12 + $0x608] sm:$0xff]  ;;  %v9307_v36 = vcombine.low %v1673_v51, %v1681_v52 }
 0x1dd   :  { %4670 = vmatprep.subr.bf16.mxu0 %v9226_v58  ;;  %4752 = vmatprep.subr.bf16.mxu1 %v9228_v42  ;;  %v1656_v58 = vld [vmem:[#allocation12 + $0x500] sm:$0xff]  ;;  %v1697_v33 = vld [vmem:[#allocation12 + $0x648] sm:$0xff] }
 0x1de   :  { %v1664_v42 = vld [vmem:[#allocation12 + $0x540] sm:$0xff] }
 0x1df   :  { %v9289_v53 = vcombine.low %v1656_v58, %v1664_v42 }
 0x1e0   :  { %4671 = vmatpush1.bf16.msra.mxu0 %v9225_v46  ;;  %4753 = vmatpush1.bf16.msra.mxu1 %v9227_v47  ;;  %v9290_v46 = vcombine.high %v1656_v58, %v1664_v42  ;;  %v9292_v47 = vcombine.high %v1657_v43, %v1665_v44  ;;  %v1705_v58 = vld [vmem:[#allocation12 + $0x688] sm:$0xff]  ;;  %v9323_v44 = vcombine.low %v1689_v32, %v1697_v33 }
 0x1e1   :  { %4672 = vmatprep.subr.bf16.mxu0 %v9242_v41  ;;  %4754 = vmatprep.subr.bf16.mxu1 %v9244_v48  ;;  %v1672_v41 = vld [vmem:[#allocation12 + $0x580] sm:$0xff]  ;;  %v1713_v42 = vld [vmem:[#allocation12 + $0x6c8] sm:$0xff] }
 0x1e2   :  { %v1680_v48 = vld [vmem:[#allocation12 + $0x5c0] sm:$0xff] }
 0x1e3   :  { %v9305_v35 = vcombine.low %v1672_v41, %v1680_v48 }
 0x1e4   :  { %4673 = vmatpush1.bf16.msra.mxu0 %v9241_v55  ;;  %4755 = vmatpush1.bf16.msra.mxu1 %v9243_v60  ;;  %v9306_v55 = vcombine.high %v1672_v41, %v1680_v48  ;;  %v9308_v60 = vcombine.high %v1673_v51, %v1681_v52  ;;  %v1720_v41 = vld [vmem:[#allocation12 + $0x700] sm:$0xff]  ;;  %v1721_v51 = vld [vmem:[#allocation12 + $0x708] sm:$0xff] }
 0x1e5   :  { %4674 = vmatprep.subr.bf16.mxu0 %v9258_v61  ;;  %4756 = vmatprep.subr.bf16.mxu1 %v9260_v63  ;;  %v1688_v61 = vld [vmem:[#allocation12 + $0x600] sm:$0xff] }
 0x1e6   :  { %v1696_v63 = vld [vmem:[#allocation12 + $0x640] sm:$0xff] }
 0x1e7   :  { %v9321_v43 = vcombine.low %v1688_v61, %v1696_v63  ;;  %v1728_v48 = vld [vmem:[#allocation12 + $0x740] sm:$0xff] }
 0x1e8   :  { %4675 = vmatpush1.bf16.msra.mxu0 %v9257_v37  ;;  %4757 = vmatpush1.bf16.msra.mxu1 %v9259_v38  ;;  %v9322_v37 = vcombine.high %v1688_v61, %v1696_v63  ;;  %v9324_v38 = vcombine.high %v1689_v32, %v1697_v33  ;;  %v9354_v52 = vcombine.high %v1720_v41, %v1728_v48  ;;  %v1736_v61 = vld [vmem:[#allocation12 + $0x780] sm:$0xff]  ;;  %v1737_v32 = vld [vmem:[#allocation12 + $0x788] sm:$0xff] }
 0x1e9   :  { %4676 = vmatprep.subr.bf16.mxu0 %v9274_v39  ;;  %4758 = vmatprep.subr.bf16.mxu1 %v9276_v40  ;;  %v1704_v39 = vld [vmem:[#allocation12 + $0x680] sm:$0xff] }
 0x1ea   :  { %v1712_v40 = vld [vmem:[#allocation12 + $0x6c0] sm:$0xff] }
 0x1eb   :  { %v1744_v63 = vld [vmem:[#allocation12 + $0x7c0] sm:$0xff] }
 0x1ec   :  { %4677 = vmatpush1.bf16.msra.mxu0 %v9273_v45  ;;  %4759 = vmatpush1.bf16.msra.mxu1 %v9275_v49  ;;  %v9338_v45 = vcombine.high %v1704_v39, %v1712_v40  ;;  %v9340_v49 = vcombine.high %v1705_v58, %v1713_v42  ;;  %v9370_v33 = vcombine.high %v1736_v61, %v1744_v63 }
 0x1ed   :  { %4678 = vmatprep.subr.bf16.mxu0 %v9290_v46  ;;  %4760 = vmatprep.subr.bf16.mxu1 %v9292_v47  ;;  %v9337_v46 = vcombine.low %v1704_v39, %v1712_v40  ;;  %v9339_v47 = vcombine.low %v1705_v58, %v1713_v42  ;;  %v1752_v39 = vld [vmem:[#allocation12 + $0x800] sm:$0xff]  ;;  %v1753_v58 = vld [vmem:[#allocation12 + $0x808] sm:$0xff] }
 0x1ee   :  { %v1760_v40 = vld [vmem:[#allocation12 + $0x840] sm:$0xff] }
 0x1ef   :  { %v9386_v42 = vcombine.high %v1752_v39, %v1760_v40 }
 0x1f0   :  { %4679 = vmatpush1.bf16.msra.mxu0 %v9289_v53  ;;  %4761 = vmatpush1.bf16.msra.mxu1 %v9291_v54  ;;  %v1729_v53 = vld [vmem:[#allocation12 + $0x748] sm:$0xff]  ;;  %v9353_v54 = vcombine.low %v1720_v41, %v1728_v48 }
 0x1f1   :  { %4680 = vmatprep.subr.bf16.mxu0 %v9306_v55  ;;  %4762 = vmatprep.subr.bf16.mxu1 %v9308_v60  ;;  %v9355_v55 = vcombine.low %v1721_v51, %v1729_v53  ;;  %v9356_v60 = vcombine.high %v1721_v51, %v1729_v53 }
 0x1f4   :  { %4681 = vmatpush1.bf16.msra.mxu0 %v9305_v35  ;;  %4763 = vmatpush1.bf16.msra.mxu1 %v9307_v36  ;;  %v1745_v35 = vld [vmem:[#allocation12 + $0x7c8] sm:$0xff]  ;;  %v9369_v36 = vcombine.low %v1736_v61, %v1744_v63 }
 0x1f5   :  { %4682 = vmatprep.subr.bf16.mxu0 %v9322_v37  ;;  %4764 = vmatprep.subr.bf16.mxu1 %v9324_v38  ;;  %v9371_v37 = vcombine.low %v1737_v32, %v1745_v35  ;;  %v9372_v38 = vcombine.high %v1737_v32, %v1745_v35 }
 0x1f8   :  { %4683 = vmatpush1.bf16.msra.mxu0 %v9321_v43  ;;  %4765 = vmatpush1.bf16.msra.mxu1 %v9323_v44  ;;  %v1761_v43 = vld [vmem:[#allocation12 + $0x848] sm:$0xff]  ;;  %v9385_v44 = vcombine.low %v1752_v39, %v1760_v40  ;;  %v1776_v40 = vld [vmem:[#allocation12 + $0x8c0] sm:$0xff] }
 0x1f9   :  { %4684 = vmatprep.subr.bf16.mxu0 %v9338_v45  ;;  %4766 = vmatprep.subr.bf16.mxu1 %v9340_v49  ;;  %v9387_v45 = vcombine.low %v1753_v58, %v1761_v43  ;;  %v9388_v49 = vcombine.high %v1753_v58, %v1761_v43  ;;  %v1769_v58 = vld [vmem:[#allocation12 + $0x888] sm:$0xff] }
 0x1fc   :  { %4685 = vmatpush1.bf16.msra.mxu0 %v9337_v46  ;;  %4767 = vmatpush1.bf16.msra.mxu1 %v9339_v47  ;;  %v11088_v46 = vld [vmem:[#allocation14 + $0x1] ss:$8 sm:$0xf] }
 0x1fd   :  { %4686 = vmatprep.subr.bf16.mxu0 %v9354_v52  ;;  %4768 = vmatprep.subr.bf16.mxu1 %v9356_v60  ;;  %v667_v47 = vrot.slane %v11088_v46, %v11064_v57  ;;  %v671_v41 = vrot.slane %v11088_v46, %v11069_v59  ;;  %v679_v48 = vrot.slane %v11088_v46, %v11076_v62 }
 0x200   :  { %4687 = vmatpush1.bf16.msra.mxu0 %v9353_v54  ;;  %4769 = vmatpush1.bf16.msra.mxu1 %v9355_v55 }
 0x201   :  { %4688 = vmatprep.subr.bf16.mxu0 %v9370_v33  ;;  %4770 = vmatprep.subr.bf16.mxu1 %v9372_v38  ;;  %v1768_v38 = vld [vmem:[#allocation12 + $0x880] sm:$0xff] }
 0x204   :  { %4689 = vmatpush1.bf16.msra.mxu0 %v9369_v36  ;;  %4771 = vmatpush1.bf16.msra.mxu1 %v9371_v37 }
 0x205   :  { %4699 = vmatprep.subr.bf16.mxu0 %v9386_v42  ;;  %4781 = vmatprep.subr.bf16.mxu1 %v9388_v49  ;;  %v1777_v42 = vld [vmem:[#allocation12 + $0x8c8] sm:$0xff] }
 0x29a   :  { %v1399_v51 = vpop.f32.mrb[4].mxu0  ;;  %v11096_v52 = vpop.f32.mrb[4].mxu1 }
 0x29b   :  { %v10014_v53 = vadd.f32 %v1399_v51, %v667_v47  ;;  %v1401_v54 = vpop.f32.mrb[5].mxu0  ;;  %v1483_v55 = vpop.f32.mrb[5].mxu1  ;;  %v1784_v47 = vld [vmem:[#allocation12 + $0x900] sm:$0xff] }
 0x29c   :  { %v10015_v60 = vadd.f32 %v1401_v54, %v671_v41  ;;  %v10017_v61 = vadd.f32 %v1483_v55, %v679_v48  ;;  %v1403_v63 = vpop.f32.mrb[6].mxu0  ;;  %v1485_v32 = vpop.f32.mrb[6].mxu1  ;;  %v9402_v41 = vcombine.high %v1768_v38, %v1776_v40  ;;  %v9404_v48 = vcombine.high %v1769_v58, %v1777_v42  ;;  %v1792_v51 = vld [vmem:[#allocation12 + $0x940] sm:$0xff]  ;;  %v1793_v54 = vld [vmem:[#allocation12 + $0x948] sm:$0xff] }
 0x29d   :  { %v1488_v33 = vmax.f32 %v10014_v53, 0.0  ;;  %v1404_v35 = vpop.f32.mrb[7].mxu0  ;;  %v1486_v36 = vpop.f32.mrb[7].mxu1  ;;  %v1785_v53 = vld [vmem:[#allocation12 + $0x908] sm:$0xff]  ;;  %v9418_v63 = vcombine.high %v1784_v47, %v1792_v51 }
 0x29e   :  { %v1489_v37 = vmax.f32 %v10015_v60, 0.0  ;;  %v1491_v39 = vmax.f32 %v10017_v61, 0.0  ;;  %v9401_v60 = vcombine.low %v1768_v38, %v1776_v40  ;;  %v9403_v61 = vcombine.low %v1769_v58, %v1777_v42  ;;  %v1808_v35 = vld [vmem:[#allocation12 + $0x9c0] sm:$0xff]  ;;  %v1801_v36 = vld [vmem:[#allocation12 + $0x988] sm:$0xff] }
 0x29f   :  { %v11100_v49 = vpack.c.bf16 %v1488_v33, %v1488_v33  ;;  %v9420_v32 = vcombine.high %v1785_v53, %v1793_v54  ;;  %v1800_v33 = vld [vmem:[#allocation12 + $0x980] sm:$0xff]  ;;  %v9419_v34 = vcombine.low %v1785_v53, %v1793_v54  ;;  %v1817_v58 = vld [vmem:[#allocation12 + $0xa08] sm:$0xff] }
 0x2a0   :  { %v11098_v43 = vpack.c.bf16 %v1489_v37, %v1489_v37  ;;  %v11104_v55 = vpack.c.bf16 %v1491_v39, %v1491_v39  ;;  %v1809_v37 = vld [vmem:[#allocation12 + $0x9c8] sm:$0xff]  ;;  %v9417_v39 = vcombine.low %v1784_v47, %v1792_v51  ;;  %v1816_v38 = vld [vmem:[#allocation12 + $0xa00] sm:$0xff]  ;;  %v9433_v23 = vcombine.low %v1800_v33, %v1808_v35 }
 0x2a1   :  { %v1824_v40 = vld [vmem:[#allocation12 + $0xa40] sm:$0xff]  ;;  %v1825_v42 = vld [vmem:[#allocation12 + $0xa48] sm:$0xff] }
 0x2a2   :  { %4690 = vmatprep.mubr.bf16.mxu0 %v11098_v43  ;;  %4772 = vmatprep.mubr.bf16.mxu1 %v11098_v43  ;;  %v9452_v7 = vcombine.high %v1817_v58, %v1825_v42  ;;  %v1833_v47 = vld [vmem:[#allocation12 + $0xa88] sm:$0xff]  ;;  %v9449_v53 = vcombine.low %v1816_v38, %v1824_v40  ;;  %v9451_v54 = vcombine.low %v1817_v58, %v1825_v42 }
 0x2a3   :  { %4691 = vmatmul.mubr.bf16.vlgmr.msra.gmra.mrb[8].mxu0 %v11100_v49  ;;  %4773 = vmatmul.mubr.bf16.vlgmr.msra.gmra.mrb[8].mxu1 %v11100_v49  ;;  %v1841_v51 = vld [vmem:[#allocation12 + $0xac8] sm:$0xff] }
 0x2a4   :  { %4700 = vmatpush1.bf16.msra.mxu0 %v9385_v44  ;;  %4782 = vmatpush1.bf16.msra.mxu1 %v9387_v45  ;;  %v9434_v44 = vcombine.high %v1800_v33, %v1808_v35  ;;  %v9436_v45 = vcombine.high %v1801_v36, %v1809_v37  ;;  %v1849_v33 = vld [vmem:[#allocation12 + $0xb08] sm:$0xff] }
 0x2a5   :  { %4731 = vmatprep.mubr.bf16.mxu0 %v11104_v55  ;;  %4813 = vmatprep.mubr.bf16.mxu1 %v11104_v55  ;;  %v1857_v35 = vld [vmem:[#allocation12 + $0xb48] sm:$0xff] }
 0x2a6   :  { %4701 = vmatprep.subr.bf16.mxu0 %v9402_v41  ;;  %4783 = vmatprep.subr.bf16.mxu1 %v9404_v48  ;;  %v9435_v41 = vcombine.low %v1801_v36, %v1809_v37  ;;  %v9450_v48 = vcombine.high %v1816_v38, %v1824_v40  ;;  %v9467_v37 = vcombine.low %v1833_v47, %v1841_v51  ;;  %v1865_v38 = vld [vmem:[#allocation12 + $0xb88] sm:$0xff] }
 0x2a7   :  { %v1873_v40 = vld [vmem:[#allocation12 + $0xbc8] sm:$0xff]  ;;  %v9483_v58 = vcombine.low %v1849_v33, %v1857_v35 }
 0x2a8   :  { %4702 = vmatpush1.bf16.msra.mxu0 %v9401_v60  ;;  %4784 = vmatpush1.bf16.msra.mxu1 %v9403_v61  ;;  %v1832_v60 = vld [vmem:[#allocation12 + $0xa80] sm:$0xff] }
 0x2a9   :  { %4703 = vmatprep.subr.bf16.mxu0 %v9418_v63  ;;  %4785 = vmatprep.subr.bf16.mxu1 %v9420_v32  ;;  %v1840_v61 = vld [vmem:[#allocation12 + $0xac0] sm:$0xff]  ;;  %v9468_v32 = vcombine.high %v1833_v47, %v1841_v51  ;;  %v9499_v51 = vcombine.low %v1865_v38, %v1873_v40 }
 0x2aa   :  { %v9466_v63 = vcombine.high %v1832_v60, %v1840_v61  ;;  %v9465_v36 = vcombine.low %v1832_v60, %v1840_v61  ;;  %v1881_v60 = vld [vmem:[#allocation12 + $0xc08] sm:$0xff] }
 0x2ab   :  { %v1889_v61 = vld [vmem:[#allocation12 + $0xc48] sm:$0xff] }
 0x2ac   :  { %4704 = vmatpush1.bf16.msra.mxu0 %v9417_v39  ;;  %4786 = vmatpush1.bf16.msra.mxu1 %v9419_v34  ;;  %v1848_v39 = vld [vmem:[#allocation12 + $0xb00] sm:$0xff] }
 0x2ad   :  { %4705 = vmatprep.subr.bf16.mxu0 %v9434_v44  ;;  %4787 = vmatprep.subr.bf16.mxu1 %v9436_v45  ;;  %v1856_v34 = vld [vmem:[#allocation12 + $0xb40] sm:$0xff]  ;;  %v9484_v45 = vcombine.high %v1849_v33, %v1857_v35  ;;  %v9515_v35 = vcombine.low %v1881_v60, %v1889_v61 }
 0x2ae   :  { %v9482_v44 = vcombine.high %v1848_v39, %v1856_v34 }
 0x2b0   :  { %4706 = vmatpush1.bf16.msra.mxu0 %v9433_v23  ;;  %4788 = vmatpush1.bf16.msra.mxu1 %v9435_v41  ;;  %v1864_v23 = vld [vmem:[#allocation12 + $0xb80] sm:$0xff] }
 0x2b1   :  { %4707 = vmatprep.subr.bf16.mxu0 %v9450_v48  ;;  %4789 = vmatprep.subr.bf16.mxu1 %v9452_v7  ;;  %v1872_v41 = vld [vmem:[#allocation12 + $0xbc0] sm:$0xff]  ;;  %v9481_v7 = vcombine.low %v1848_v39, %v1856_v34  ;;  %v9500_v48 = vcombine.high %v1865_v38, %v1873_v40  ;;  %v1897_v39 = vld [vmem:[#allocation12 + $0xc88] sm:$0xff] }
 0x2b2   :  { %v9498_v42 = vcombine.high %v1864_v23, %v1872_v41  ;;  %v9497_v47 = vcombine.low %v1864_v23, %v1872_v41  ;;  %v1905_v34 = vld [vmem:[#allocation12 + $0xcc8] sm:$0xff] }
 0x2b3   :  { %v1913_v23 = vld [vmem:[#allocation12 + $0xd08] sm:$0xff]  ;;  %v9531_v40 = vcombine.low %v1897_v39, %v1905_v34 }
 0x2b4   :  { %4708 = vmatpush1.bf16.msra.mxu0 %v9449_v53  ;;  %4790 = vmatpush1.bf16.msra.mxu1 %v9451_v54  ;;  %v1880_v53 = vld [vmem:[#allocation12 + $0xc00] sm:$0xff]  ;;  %v1921_v41 = vld [vmem:[#allocation12 + $0xd48] sm:$0xff] }
 0x2b5   :  { %4709 = vmatprep.subr.bf16.mxu0 %v9466_v63  ;;  %4791 = vmatprep.subr.bf16.mxu1 %v9468_v32  ;;  %v1888_v54 = vld [vmem:[#allocation12 + $0xc40] sm:$0xff]  ;;  %v9516_v32 = vcombine.high %v1881_v60, %v1889_v61  ;;  %v9547_v61 = vcombine.low %v1913_v23, %v1921_v41 }
 0x2b6   :  { %v9514_v63 = vcombine.high %v1880_v53, %v1888_v54  ;;  %v9513_v33 = vcombine.low %v1880_v53, %v1888_v54  ;;  %v1929_v53 = vld [vmem:[#allocation12 + $0xd88] sm:$0xff] }
 0x2b7   :  { %v1937_v54 = vld [vmem:[#allocation12 + $0xdc8] sm:$0xff] }
 0x2b8   :  { %4710 = vmatpush1.bf16.msra.mxu0 %v9465_v36  ;;  %4792 = vmatpush1.bf16.msra.mxu1 %v9467_v37  ;;  %v1896_v36 = vld [vmem:[#allocation12 + $0xc80] sm:$0xff] }
 0x2b9   :  { %4711 = vmatprep.subr.bf16.mxu0 %v9482_v44  ;;  %4793 = vmatprep.subr.bf16.mxu1 %v9484_v45  ;;  %v1904_v37 = vld [vmem:[#allocation12 + $0xcc0] sm:$0xff]  ;;  %v9532_v45 = vcombine.high %v1897_v39, %v1905_v34  ;;  %v9563_v34 = vcombine.low %v1929_v53, %v1937_v54 }
 0x2ba   :  { %v9530_v44 = vcombine.high %v1896_v36, %v1904_v37  ;;  %v9529_v38 = vcombine.low %v1896_v36, %v1904_v37  ;;  %v1945_v36 = vld [vmem:[#allocation12 + $0xe08] sm:$0xff] }
 0x2bb   :  { %v1953_v37 = vld [vmem:[#allocation12 + $0xe48] sm:$0xff] }
 0x2bc   :  { %4712 = vmatpush1.bf16.msra.mxu0 %v9481_v7  ;;  %4794 = vmatpush1.bf16.msra.mxu1 %v9483_v58  ;;  %v1912_v7 = vld [vmem:[#allocation12 + $0xd00] sm:$0xff] }
 0x2bd   :  { %4713 = vmatprep.subr.bf16.mxu0 %v9498_v42  ;;  %4795 = vmatprep.subr.bf16.mxu1 %v9500_v48  ;;  %v1920_v58 = vld [vmem:[#allocation12 + $0xd40] sm:$0xff]  ;;  %v9548_v48 = vcombine.high %v1913_v23, %v1921_v41  ;;  %v9579_v41 = vcombine.low %v1945_v36, %v1953_v37 }
 0x2be   :  { %v9546_v42 = vcombine.high %v1912_v7, %v1920_v58  ;;  %v9545_v60 = vcombine.low %v1912_v7, %v1920_v58  ;;  %v1961_v7 = vld [vmem:[#allocation12 + $0xe88] sm:$0xff] }
 0x2bf   :  { %v1969_v58 = vld [vmem:[#allocation12 + $0xec8] sm:$0xff] }
 0x2c0   :  { %4714 = vmatpush1.bf16.msra.mxu0 %v9497_v47  ;;  %4796 = vmatpush1.bf16.msra.mxu1 %v9499_v51  ;;  %v1928_v47 = vld [vmem:[#allocation12 + $0xd80] sm:$0xff] }
 0x2c1   :  { %4715 = vmatprep.subr.bf16.mxu0 %v9514_v63  ;;  %4797 = vmatprep.subr.bf16.mxu1 %v9516_v32  ;;  %v1936_v51 = vld [vmem:[#allocation12 + $0xdc0] sm:$0xff]  ;;  %v9564_v32 = vcombine.high %v1929_v53, %v1937_v54  ;;  %v9595_v54 = vcombine.low %v1961_v7, %v1969_v58 }
 0x2c2   :  { %v9562_v63 = vcombine.high %v1928_v47, %v1936_v51  ;;  %v9561_v39 = vcombine.low %v1928_v47, %v1936_v51  ;;  %v1977_v47 = vld [vmem:[#allocation12 + $0xf08] sm:$0xff] }
 0x2c3   :  { %v1985_v51 = vld [vmem:[#allocation12 + $0xf48] sm:$0xff] }
 0x2c4   :  { %4716 = vmatpush1.bf16.msra.mxu0 %v9513_v33  ;;  %4798 = vmatpush1.bf16.msra.mxu1 %v9515_v35  ;;  %v1944_v33 = vld [vmem:[#allocation12 + $0xe00] sm:$0xff] }
 0x2c5   :  { %4717 = vmatprep.subr.bf16.mxu0 %v9530_v44  ;;  %4799 = vmatprep.subr.bf16.mxu1 %v9532_v45  ;;  %v1952_v35 = vld [vmem:[#allocation12 + $0xe40] sm:$0xff]  ;;  %v9580_v45 = vcombine.high %v1945_v36, %v1953_v37  ;;  %v1993_v37 = vld [vmem:[#allocation12 + $0xf88] sm:$0xff] }
 0x2c6   :  { %v9578_v44 = vcombine.high %v1944_v33, %v1952_v35  ;;  %v9577_v23 = vcombine.low %v1944_v33, %v1952_v35  ;;  %v9612_v33 = vcombine.high %v1977_v47, %v1985_v51  ;;  %v1992_v35 = vld [vmem:[#allocation12 + $0xf80] sm:$0xff] }
 0x2c7   :  { %v2000_v36 = vld [vmem:[#allocation12 + $0xfc0] sm:$0xff] }
 0x2c8   :  { %4718 = vmatpush1.bf16.msra.mxu0 %v9529_v38  ;;  %4800 = vmatpush1.bf16.msra.mxu1 %v9531_v40  ;;  %v1960_v38 = vld [vmem:[#allocation12 + $0xe80] sm:$0xff] }
 0x2c9   :  { %4719 = vmatprep.subr.bf16.mxu0 %v9546_v42  ;;  %4801 = vmatprep.subr.bf16.mxu1 %v9548_v48  ;;  %v1968_v40 = vld [vmem:[#allocation12 + $0xec0] sm:$0xff]  ;;  %v9596_v48 = vcombine.high %v1961_v7, %v1969_v58  ;;  %v1498_v7 = vld [vmem:[#allocation12 + $0x10] sm:$0xff]  ;;  %v1499_v58 = vld [vmem:[#allocation12 + $0x18] sm:$0xff] }
 0x2ca   :  { %v9594_v42 = vcombine.high %v1960_v38, %v1968_v40  ;;  %v9593_v53 = vcombine.low %v1960_v38, %v1968_v40  ;;  %v9626_v38 = vcombine.high %v1992_v35, %v2000_v36 }
 0x2cc   :  { %4720 = vmatpush1.bf16.msra.mxu0 %v9545_v60  ;;  %4802 = vmatpush1.bf16.msra.mxu1 %v9547_v61  ;;  %v1976_v60 = vld [vmem:[#allocation12 + $0xf00] sm:$0xff] }
 0x2cd   :  { %4721 = vmatprep.subr.bf16.mxu0 %v9562_v63  ;;  %4803 = vmatprep.subr.bf16.mxu1 %v9564_v32  ;;  %v1984_v61 = vld [vmem:[#allocation12 + $0xf40] sm:$0xff]  ;;  %v675_v63 = vrot.slane %v11088_v46, %v11083_v50  ;;  %v1506_v46 = vld [vmem:[#allocation12 + $0x50] sm:$0xff] }
 0x2ce   :  { %v9610_v32 = vcombine.high %v1976_v60, %v1984_v61 }
 0x2d0   :  { %4722 = vmatpush1.bf16.msra.mxu0 %v9561_v39  ;;  %4804 = vmatpush1.bf16.msra.mxu1 %v9563_v34  ;;  %v2001_v39 = vld [vmem:[#allocation12 + $0xfc8] sm:$0xff]  ;;  %v9609_v34 = vcombine.low %v1976_v60, %v1984_v61  ;;  %v1514_v61 = vld [vmem:[#allocation12 + $0x90] sm:$0xff] }
 0x2d1   :  { %4723 = vmatprep.subr.bf16.mxu0 %v9578_v44  ;;  %4805 = vmatprep.subr.bf16.mxu1 %v9580_v45  ;;  %v9611_v44 = vcombine.low %v1977_v47, %v1985_v51  ;;  %v10016_v45 = vadd.f32 %v11096_v52, %v675_v63  ;;  %v9628_v40 = vcombine.high %v1993_v37, %v2001_v39  ;;  %v1522_v47 = vld [vmem:[#allocation12 + $0xd0] sm:$0xff]  ;;  %v1515_v52 = vld [vmem:[#allocation12 + $0x98] sm:$0xff] }
 0x2d2   :  { %v1523_v51 = vld [vmem:[#allocation12 + $0xd8] sm:$0xff] }
 0x2d4   :  { %4724 = vmatpush1.bf16.msra.mxu0 %v9577_v23  ;;  %4806 = vmatpush1.bf16.msra.mxu1 %v9579_v41  ;;  %v1507_v23 = vld [vmem:[#allocation12 + $0x58] sm:$0xff]  ;;  %v9625_v41 = vcombine.low %v1992_v35, %v2000_v36  ;;  %v9152_v35 = vcombine.high %v1515_v52, %v1523_v51  ;;  %v1530_v36 = vld [vmem:[#allocation12 + $0x110] sm:$0xff] }
 0x2d5   :  { %4725 = vmatprep.subr.bf16.mxu0 %v9594_v42  ;;  %4807 = vmatprep.subr.bf16.mxu1 %v9596_v48  ;;  %v9627_v42 = vcombine.low %v1993_v37, %v2001_v39  ;;  %v1490_v48 = vmax.f32 %v10016_v45, 0.0  ;;  %v9136_v60 = vcombine.high %v1499_v58, %v1507_v23  ;;  %v1538_v37 = vld [vmem:[#allocation12 + $0x150] sm:$0xff]  ;;  %v1531_v39 = vld [vmem:[#allocation12 + $0x118] sm:$0xff]  ;;  %v9151_v45 = vcombine.low %v1515_v52, %v1523_v51 }
 0x2d6   :  { %v1571_v52 = vld [vmem:[#allocation12 + $0x258] sm:$0xff] }
 0x2d7   :  { %v11113_v63 = vpack.c.bf16 %v1490_v48, %v1490_v48 }
 0x2d8   :  { %4726 = vmatpush1.bf16.msra.mxu0 %v9593_v53  ;;  %4808 = vmatpush1.bf16.msra.mxu1 %v9595_v54  ;;  %v9134_v53 = vcombine.high %v1498_v7, %v1506_v46  ;;  %v9133_v54 = vcombine.low %v1498_v7, %v1506_v46  ;;  %v1546_v7 = vld [vmem:[#allocation12 + $0x190] sm:$0xff] }
 0x2d9   :  { %4727 = vmatprep.subr.bf16.mxu0 %v9610_v32  ;;  %4809 = vmatprep.subr.bf16.mxu1 %v9612_v33  ;;  %v9135_v32 = vcombine.low %v1499_v58, %v1507_v23  ;;  %v9150_v33 = vcombine.high %v1514_v61, %v1522_v47  ;;  %v1554_v46 = vld [vmem:[#allocation12 + $0x1d0] sm:$0xff]  ;;  %v1547_v58 = vld [vmem:[#allocation12 + $0x198] sm:$0xff] }
 0x2da   :  { %v1555_v23 = vld [vmem:[#allocation12 + $0x1d8] sm:$0xff]  ;;  %v9182_v48 = vcombine.high %v1546_v7, %v1554_v46  ;;  %v9181_v51 = vcombine.low %v1546_v7, %v1554_v46  ;;  %v1602_v7 = vld [vmem:[#allocation12 + $0x350] sm:$0xff] }
 0x2db   :  { %v1595_v46 = vld [vmem:[#allocation12 + $0x318] sm:$0xff] }
 0x2dc   :  { %4728 = vmatpush1.bf16.msra.mxu0 %v9609_v34  ;;  %4810 = vmatpush1.bf16.msra.mxu1 %v9611_v44  ;;  %v1539_v34 = vld [vmem:[#allocation12 + $0x158] sm:$0xff]  ;;  %v9149_v44 = vcombine.low %v1514_v61, %v1522_v47  ;;  %v1570_v61 = vld [vmem:[#allocation12 + $0x250] sm:$0xff] }
 0x2dd   :  { %4729 = vmatprep.subr.bf16.mxu0 %v9626_v38  ;;  %4811 = vmatprep.subr.bf16.mxu1 %v9628_v40  ;;  %v9166_v38 = vcombine.high %v1530_v36, %v1538_v37  ;;  %v9168_v40 = vcombine.high %v1531_v39, %v1539_v34  ;;  %v1563_v47 = vld [vmem:[#allocation12 + $0x218] sm:$0xff] }
 0x2e0   :  { %4730 = vmatpush1.bf16.msra.mxu0 %v9625_v41  ;;  %4812 = vmatpush1.bf16.msra.mxu1 %v9627_v42  ;;  %v9165_v41 = vcombine.low %v1530_v36, %v1538_v37  ;;  %v9167_v42 = vcombine.low %v1531_v39, %v1539_v34  ;;  %v1586_v36 = vld [vmem:[#allocation12 + $0x2d0] sm:$0xff]  ;;  %v1579_v37 = vld [vmem:[#allocation12 + $0x298] sm:$0xff]  ;;  %v9199_v34 = vcombine.low %v1563_v47, %v1571_v52 }
 0x2e1   :  { %4822 = vmatprep.subr.bf16.mxu0 %v9134_v53  ;;  %4904 = vmatprep.subr.bf16.mxu1 %v9136_v60  ;;  %v9184_v53 = vcombine.high %v1547_v58, %v1555_v23  ;;  %v1562_v60 = vld [vmem:[#allocation12 + $0x210] sm:$0xff] }
 0x2e2   :  { %v9197_v39 = vcombine.low %v1562_v60, %v1570_v61 }
 0x2e3   :  { %4732 = vmatmul.mubr.bf16.vlgmr.msra.gmra.mrb[8].mxu0 %v11113_v63  ;;  %4814 = vmatmul.mubr.bf16.vlgmr.msra.gmra.mrb[8].mxu1 %v11113_v63 }
 0x2e4   :  { %4823 = vmatpush1.bf16.msra.mxu0 %v9133_v54  ;;  %4854 = vmatprep.mubr.bf16.mxu0 %v11098_v43  ;;  %v9183_v54 = vcombine.low %v1547_v58, %v1555_v23 }
 0x2e5   :  { %4905 = vmatpush1.bf16.msra.mxu1 %v9135_v32  ;;  %4936 = vmatprep.mubr.bf16.mxu1 %v11098_v43  ;;  %v9198_v32 = vcombine.high %v1562_v60, %v1570_v61  ;;  %v1618_v60 = vld [vmem:[#allocation12 + $0x3d0] sm:$0xff]  ;;  %v1611_v61 = vld [vmem:[#allocation12 + $0x398] sm:$0xff] }
 0x2e6   :  { %4824 = vmatprep.subr.bf16.mxu0 %v9150_v33  ;;  %4906 = vmatprep.subr.bf16.mxu1 %v9152_v35  ;;  %v9200_v33 = vcombine.high %v1563_v47, %v1571_v52  ;;  %v1578_v35 = vld [vmem:[#allocation12 + $0x290] sm:$0xff] }
 0x2e7   :  { %v9213_v58 = vcombine.low %v1578_v35, %v1586_v36 }
 0x2e8   :  { %4825 = vmatpush1.bf16.msra.mxu0 %v9149_v44  ;;  %v1587_v44 = vld [vmem:[#allocation12 + $0x2d8] sm:$0xff] }
 0x2e9   :  { %4907 = vmatpush1.bf16.msra.mxu1 %v9151_v45  ;;  %4826 = vmatprep.subr.bf16.mxu0 %v9166_v38  ;;  %v9214_v45 = vcombine.high %v1578_v35, %v1586_v36  ;;  %v9216_v38 = vcombine.high %v1579_v37, %v1587_v44  ;;  %v9215_v23 = vcombine.low %v1579_v37, %v1587_v44  ;;  %v1634_v35 = vld [vmem:[#allocation12 + $0x450] sm:$0xff]  ;;  %v1627_v36 = vld [vmem:[#allocation12 + $0x418] sm:$0xff] }
 0x2ea   :  { %4908 = vmatprep.subr.bf16.mxu1 %v9168_v40  ;;  %v1594_v40 = vld [vmem:[#allocation12 + $0x310] sm:$0xff] }
 0x2eb   :  { %v9229_v47 = vcombine.low %v1594_v40, %v1602_v7 }
 0x2ec   :  { %4827 = vmatpush1.bf16.msra.mxu0 %v9165_v41  ;;  %v1603_v41 = vld [vmem:[#allocation12 + $0x358] sm:$0xff] }
 0x2ed   :  { %4909 = vmatpush1.bf16.msra.mxu1 %v9167_v42  ;;  %4828 = vmatprep.subr.bf16.mxu0 %v9182_v48  ;;  %v9230_v42 = vcombine.high %v1594_v40, %v1602_v7  ;;  %v9232_v48 = vcombine.high %v1595_v46, %v1603_v41  ;;  %v9231_v52 = vcombine.low %v1595_v46, %v1603_v41  ;;  %v1650_v40 = vld [vmem:[#allocation12 + $0x4d0] sm:$0xff]  ;;  %v1643_v7 = vld [vmem:[#allocation12 + $0x498] sm:$0xff] }
 0x2ee   :  { %4910 = vmatprep.subr.bf16.mxu1 %v9184_v53  ;;  %v1610_v53 = vld [vmem:[#allocation12 + $0x390] sm:$0xff] }
 0x2ef   :  { %v9245_v37 = vcombine.low %v1610_v53, %v1618_v60 }
 0x2f0   :  { %4829 = vmatpush1.bf16.msra.mxu0 %v9181_v51  ;;  %v1619_v51 = vld [vmem:[#allocation12 + $0x3d8] sm:$0xff] }
 0x2f1   :  { %4911 = vmatpush1.bf16.msra.mxu1 %v9183_v54  ;;  %4830 = vmatprep.subr.bf16.mxu0 %v9198_v32  ;;  %v9246_v54 = vcombine.high %v1610_v53, %v1618_v60  ;;  %v9248_v32 = vcombine.high %v1611_v61, %v1619_v51  ;;  %v9247_v44 = vcombine.low %v1611_v61, %v1619_v51  ;;  %v1666_v53 = vld [vmem:[#allocation12 + $0x550] sm:$0xff]  ;;  %v1659_v60 = vld [vmem:[#allocation12 + $0x518] sm:$0xff] }
 0x2f2   :  { %4912 = vmatprep.subr.bf16.mxu1 %v9200_v33  ;;  %v1626_v33 = vld [vmem:[#allocation12 + $0x410] sm:$0xff] }
 0x2f3   :  { %v9261_v46 = vcombine.low %v1626_v33, %v1634_v35 }
 0x2f4   :  { %4831 = vmatpush1.bf16.msra.mxu0 %v9197_v39  ;;  %v1635_v39 = vld [vmem:[#allocation12 + $0x458] sm:$0xff] }
 0x2f5   :  { %4913 = vmatpush1.bf16.msra.mxu1 %v9199_v34  ;;  %4832 = vmatprep.subr.bf16.mxu0 %v9214_v45  ;;  %v9262_v34 = vcombine.high %v1626_v33, %v1634_v35  ;;  %v9264_v45 = vcombine.high %v1627_v36, %v1635_v39  ;;  %v9263_v41 = vcombine.low %v1627_v36, %v1635_v39  ;;  %v1682_v33 = vld [vmem:[#allocation12 + $0x5d0] sm:$0xff]  ;;  %v1675_v35 = vld [vmem:[#allocation12 + $0x598] sm:$0xff] }
 0x2f6   :  { %4914 = vmatprep.subr.bf16.mxu1 %v9216_v38  ;;  %v1642_v38 = vld [vmem:[#allocation12 + $0x490] sm:$0xff] }
 0x2f7   :  { %v9277_v61 = vcombine.low %v1642_v38, %v1650_v40 }
 0x2f8   :  { %4833 = vmatpush1.bf16.msra.mxu0 %v9213_v58  ;;  %v1651_v58 = vld [vmem:[#allocation12 + $0x4d8] sm:$0xff] }
 0x2f9   :  { %4915 = vmatpush1.bf16.msra.mxu1 %v9215_v23  ;;  %4834 = vmatprep.subr.bf16.mxu0 %v9230_v42  ;;  %v9278_v23 = vcombine.high %v1642_v38, %v1650_v40  ;;  %v9280_v42 = vcombine.high %v1643_v7, %v1651_v58  ;;  %v9279_v51 = vcombine.low %v1643_v7, %v1651_v58  ;;  %v1698_v38 = vld [vmem:[#allocation12 + $0x650] sm:$0xff]  ;;  %v1691_v40 = vld [vmem:[#allocation12 + $0x618] sm:$0xff] }
 0x2fa   :  { %4916 = vmatprep.subr.bf16.mxu1 %v9232_v48  ;;  %v1658_v48 = vld [vmem:[#allocation12 + $0x510] sm:$0xff] }
 0x2fb   :  { %v9293_v36 = vcombine.low %v1658_v48, %v1666_v53 }
 0x2fc   :  { %4835 = vmatpush1.bf16.msra.mxu0 %v9229_v47  ;;  %v1667_v47 = vld [vmem:[#allocation12 + $0x558] sm:$0xff] }
 0x2fd   :  { %4917 = vmatpush1.bf16.msra.mxu1 %v9231_v52  ;;  %4836 = vmatprep.subr.bf16.mxu0 %v9246_v54  ;;  %v9294_v52 = vcombine.high %v1658_v48, %v1666_v53  ;;  %v9296_v54 = vcombine.high %v1659_v60, %v1667_v47  ;;  %v9295_v39 = vcombine.low %v1659_v60, %v1667_v47  ;;  %v1714_v48 = vld [vmem:[#allocation12 + $0x6d0] sm:$0xff]  ;;  %v1707_v53 = vld [vmem:[#allocation12 + $0x698] sm:$0xff] }
 0x2fe   :  { %4918 = vmatprep.subr.bf16.mxu1 %v9248_v32  ;;  %v1674_v32 = vld [vmem:[#allocation12 + $0x590] sm:$0xff] }
 0x2ff   :  { %v9309_v7 = vcombine.low %v1674_v32, %v1682_v33 }
 0x300   :  { %4837 = vmatpush1.bf16.msra.mxu0 %v9245_v37  ;;  %v1683_v37 = vld [vmem:[#allocation12 + $0x5d8] sm:$0xff] }
 0x301   :  { %4919 = vmatpush1.bf16.msra.mxu1 %v9247_v44  ;;  %4838 = vmatprep.subr.bf16.mxu0 %v9262_v34  ;;  %v9310_v44 = vcombine.high %v1674_v32, %v1682_v33  ;;  %v9312_v34 = vcombine.high %v1675_v35, %v1683_v37  ;;  %v9311_v58 = vcombine.low %v1675_v35, %v1683_v37  ;;  %v1730_v32 = vld [vmem:[#allocation12 + $0x750] sm:$0xff]  ;;  %v1723_v33 = vld [vmem:[#allocation12 + $0x718] sm:$0xff] }
 0x302   :  { %4920 = vmatprep.subr.bf16.mxu1 %v9264_v45  ;;  %v1690_v45 = vld [vmem:[#allocation12 + $0x610] sm:$0xff] }
 0x303   :  { %v9325_v60 = vcombine.low %v1690_v45, %v1698_v38 }
 0x304   :  { %4839 = vmatpush1.bf16.msra.mxu0 %v9261_v46  ;;  %v1699_v46 = vld [vmem:[#allocation12 + $0x658] sm:$0xff] }
 0x305   :  { %4921 = vmatpush1.bf16.msra.mxu1 %v9263_v41  ;;  %4840 = vmatprep.subr.bf16.mxu0 %v9278_v23  ;;  %v9326_v41 = vcombine.high %v1690_v45, %v1698_v38  ;;  %v9328_v23 = vcombine.high %v1691_v40, %v1699_v46  ;;  %v9327_v47 = vcombine.low %v1691_v40, %v1699_v46  ;;  %v1746_v45 = vld [vmem:[#allocation12 + $0x7d0] sm:$0xff]  ;;  %v1739_v38 = vld [vmem:[#allocation12 + $0x798] sm:$0xff] }
 0x306   :  { %4922 = vmatprep.subr.bf16.mxu1 %v9280_v42  ;;  %v1706_v42 = vld [vmem:[#allocation12 + $0x690] sm:$0xff] }
 0x307   :  { %v9341_v35 = vcombine.low %v1706_v42, %v1714_v48 }
 0x308   :  { %4841 = vmatpush1.bf16.msra.mxu0 %v9277_v61  ;;  %v1715_v61 = vld [vmem:[#allocation12 + $0x6d8] sm:$0xff] }
 0x309   :  { %4923 = vmatpush1.bf16.msra.mxu1 %v9279_v51  ;;  %4842 = vmatprep.subr.bf16.mxu0 %v9294_v52  ;;  %v9342_v51 = vcombine.high %v1706_v42, %v1714_v48  ;;  %v9344_v52 = vcombine.high %v1707_v53, %v1715_v61  ;;  %v9343_v37 = vcombine.low %v1707_v53, %v1715_v61  ;;  %v1762_v42 = vld [vmem:[#allocation12 + $0x850] sm:$0xff]  ;;  %v1755_v48 = vld [vmem:[#allocation12 + $0x818] sm:$0xff] }
 0x30a   :  { %4924 = vmatprep.subr.bf16.mxu1 %v9296_v54  ;;  %v1722_v54 = vld [vmem:[#allocation12 + $0x710] sm:$0xff] }
 0x30b   :  { %v9357_v40 = vcombine.low %v1722_v54, %v1730_v32 }
 0x30c   :  { %4843 = vmatpush1.bf16.msra.mxu0 %v9293_v36  ;;  %v1731_v36 = vld [vmem:[#allocation12 + $0x758] sm:$0xff] }
 0x30d   :  { %4925 = vmatpush1.bf16.msra.mxu1 %v9295_v39  ;;  %4844 = vmatprep.subr.bf16.mxu0 %v9310_v44  ;;  %v9358_v39 = vcombine.high %v1722_v54, %v1730_v32  ;;  %v9360_v44 = vcombine.high %v1723_v33, %v1731_v36  ;;  %v9359_v46 = vcombine.low %v1723_v33, %v1731_v36  ;;  %v1778_v54 = vld [vmem:[#allocation12 + $0x8d0] sm:$0xff]  ;;  %v1771_v33 = vld [vmem:[#allocation12 + $0x898] sm:$0xff] }
 0x30e   :  { %4926 = vmatprep.subr.bf16.mxu1 %v9312_v34  ;;  %v1738_v34 = vld [vmem:[#allocation12 + $0x790] sm:$0xff]  ;;  %v1779_v36 = vld [vmem:[#allocation12 + $0x8d8] sm:$0xff] }
 0x30f   :  { %v9373_v53 = vcombine.low %v1738_v34, %v1746_v45 }
 0x310   :  { %4845 = vmatpush1.bf16.msra.mxu0 %v9309_v7  ;;  %v1747_v7 = vld [vmem:[#allocation12 + $0x7d8] sm:$0xff] }
 0x311   :  { %4927 = vmatpush1.bf16.msra.mxu1 %v9311_v58  ;;  %4846 = vmatprep.subr.bf16.mxu0 %v9326_v41  ;;  %v9374_v58 = vcombine.high %v1738_v34, %v1746_v45  ;;  %v9376_v41 = vcombine.high %v1739_v38, %v1747_v7  ;;  %v9375_v61 = vcombine.low %v1739_v38, %v1747_v7  ;;  %v1787_v45 = vld [vmem:[#allocation12 + $0x918] sm:$0xff] }
 0x312   :  { %4928 = vmatprep.subr.bf16.mxu1 %v9328_v23  ;;  %v1754_v23 = vld [vmem:[#allocation12 + $0x810] sm:$0xff]  ;;  %v9408_v34 = vcombine.high %v1771_v33, %v1779_v36  ;;  %v1795_v38 = vld [vmem:[#allocation12 + $0x958] sm:$0xff] }
 0x313   :  { %v9389_v32 = vcombine.low %v1754_v23, %v1762_v42 }
 0x314   :  { %4847 = vmatpush1.bf16.msra.mxu0 %v9325_v60  ;;  %v1763_v60 = vld [vmem:[#allocation12 + $0x858] sm:$0xff] }
 0x315   :  { %4929 = vmatpush1.bf16.msra.mxu1 %v9327_v47  ;;  %4848 = vmatprep.subr.bf16.mxu0 %v9342_v51  ;;  %v9390_v47 = vcombine.high %v1754_v23, %v1762_v42  ;;  %v9392_v51 = vcombine.high %v1755_v48, %v1763_v60  ;;  %v1810_v23 = vld [vmem:[#allocation12 + $0x9d0] sm:$0xff]  ;;  %v1803_v42 = vld [vmem:[#allocation12 + $0x998] sm:$0xff] }
 0x316   :  { %4930 = vmatprep.subr.bf16.mxu1 %v9344_v52  ;;  %v1770_v52 = vld [vmem:[#allocation12 + $0x890] sm:$0xff] }
 0x317   :  { %v9405_v7 = vcombine.low %v1770_v52, %v1778_v54 }
 0x318   :  { %4849 = vmatpush1.bf16.msra.mxu0 %v9341_v35  ;;  %v9391_v35 = vcombine.low %v1755_v48, %v1763_v60  ;;  %v1811_v48 = vld [vmem:[#allocation12 + $0x9d8] sm:$0xff] }
 0x319   :  { %4931 = vmatpush1.bf16.msra.mxu1 %v9343_v37  ;;  %4850 = vmatprep.subr.bf16.mxu0 %v9358_v39  ;;  %v9406_v37 = vcombine.high %v1770_v52, %v1778_v54  ;;  %v1786_v39 = vld [vmem:[#allocation12 + $0x910] sm:$0xff]  ;;  %v1819_v54 = vld [vmem:[#allocation12 + $0xa18] sm:$0xff] }
 0x31a   :  { %4932 = vmatprep.subr.bf16.mxu1 %v9360_v44  ;;  %v1794_v44 = vld [vmem:[#allocation12 + $0x950] sm:$0xff] }
 0x31b   :  { %v9421_v60 = vcombine.low %v1786_v39, %v1794_v44  ;;  %v1826_v52 = vld [vmem:[#allocation12 + $0xa50] sm:$0xff] }
 0x31c   :  { %4851 = vmatpush1.bf16.msra.mxu0 %v9357_v40  ;;  %v9407_v40 = vcombine.low %v1771_v33, %v1779_v36  ;;  %v9439_v36 = vcombine.low %v1803_v42, %v1811_v48 }
 0x31d   :  { %4933 = vmatpush1.bf16.msra.mxu1 %v9359_v46  ;;  %4852 = vmatprep.subr.bf16.mxu0 %v9374_v58  ;;  %v9422_v46 = vcombine.high %v1786_v39, %v1794_v44  ;;  %v9424_v58 = vcombine.high %v1787_v45, %v1795_v38  ;;  %v1842_v39 = vld [vmem:[#allocation12 + $0xad0] sm:$0xff]  ;;  %v1835_v44 = vld [vmem:[#allocation12 + $0xa98] sm:$0xff] }
 0x31e   :  { %4934 = vmatprep.subr.bf16.mxu1 %v9376_v41  ;;  %v1802_v41 = vld [vmem:[#allocation12 + $0x990] sm:$0xff] }
 0x31f   :  { %v9437_v33 = vcombine.low %v1802_v41, %v1810_v23 }
 0x320   :  { %4853 = vmatpush1.bf16.msra.mxu0 %v9373_v53  ;;  %v9423_v53 = vcombine.low %v1787_v45, %v1795_v38 }
 0x321   :  { %4935 = vmatpush1.bf16.msra.mxu1 %v9375_v61  ;;  %4863 = vmatprep.subr.bf16.mxu0 %v9390_v47  ;;  %v9438_v61 = vcombine.high %v1802_v41, %v1810_v23  ;;  %v9440_v47 = vcombine.high %v1803_v42, %v1811_v48  ;;  %v1858_v41 = vld [vmem:[#allocation12 + $0xb50] sm:$0xff]  ;;  %v1851_v23 = vld [vmem:[#allocation12 + $0xb18] sm:$0xff] }
 0x322   :  { %4945 = vmatprep.subr.bf16.mxu1 %v9392_v51  ;;  %v1818_v51 = vld [vmem:[#allocation12 + $0xa10] sm:$0xff] }
 0x323   :  { %4855 = vmatmul.mubr.bf16.vlgmr.msra.gmra.mrb[12].mxu0 %v11100_v49  ;;  %v9453_v45 = vcombine.low %v1818_v51, %v1826_v52 }
 0x324   :  { %4937 = vmatmul.mubr.bf16.vlgmr.msra.gmra.mrb[12].mxu1 %v11100_v49  ;;  %4864 = vmatpush1.bf16.msra.mxu0 %v9389_v32  ;;  %v1827_v32 = vld [vmem:[#allocation12 + $0xa58] sm:$0xff] }
 0x325   :  { %4895 = vmatprep.mubr.bf16.mxu0 %v11104_v55  ;;  %4946 = vmatpush1.bf16.msra.mxu1 %v9391_v35  ;;  %v9454_v35 = vcombine.high %v1818_v51, %v1826_v52  ;;  %v9455_v38 = vcombine.low %v1819_v54, %v1827_v32  ;;  %v1874_v51 = vld [vmem:[#allocation12 + $0xbd0] sm:$0xff]  ;;  %v1867_v52 = vld [vmem:[#allocation12 + $0xb98] sm:$0xff] }
 0x326   :  { %4977 = vmatprep.mubr.bf16.mxu1 %v11104_v55  ;;  %4865 = vmatprep.subr.bf16.mxu0 %v9406_v37  ;;  %v9456_v37 = vcombine.high %v1819_v54, %v1827_v32 }
 0x327   :  { %4947 = vmatprep.subr.bf16.mxu1 %v9408_v34  ;;  %v1834_v34 = vld [vmem:[#allocation12 + $0xa90] sm:$0xff] }
 0x328   :  { %4866 = vmatpush1.bf16.msra.mxu0 %v9405_v7  ;;  %v1843_v7 = vld [vmem:[#allocation12 + $0xad8] sm:$0xff]  ;;  %v9469_v42 = vcombine.low %v1834_v34, %v1842_v39 }
 0x329   :  { %4948 = vmatpush1.bf16.msra.mxu1 %v9407_v40  ;;  %4867 = vmatprep.subr.bf16.mxu0 %v9422_v46  ;;  %v9470_v40 = vcombine.high %v1834_v34, %v1842_v39  ;;  %v9472_v46 = vcombine.high %v1835_v44, %v1843_v7  ;;  %v9471_v48 = vcombine.low %v1835_v44, %v1843_v7  ;;  %v1890_v34 = vld [vmem:[#allocation12 + $0xc50] sm:$0xff]  ;;  %v1883_v39 = vld [vmem:[#allocation12 + $0xc18] sm:$0xff] }
 0x32a   :  { %4949 = vmatprep.subr.bf16.mxu1 %v9424_v58  ;;  %v1850_v58 = vld [vmem:[#allocation12 + $0xb10] sm:$0xff] }
 0x32b   :  { %v9485_v54 = vcombine.low %v1850_v58, %v1858_v41 }
 0x32c   :  { %4868 = vmatpush1.bf16.msra.mxu0 %v9421_v60  ;;  %v1859_v60 = vld [vmem:[#allocation12 + $0xb58] sm:$0xff] }
 0x32d   :  { %4950 = vmatpush1.bf16.msra.mxu1 %v9423_v53  ;;  %4869 = vmatprep.subr.bf16.mxu0 %v9438_v61  ;;  %v9486_v53 = vcombine.high %v1850_v58, %v1858_v41  ;;  %v9488_v61 = vcombine.high %v1851_v23, %v1859_v60  ;;  %v9487_v32 = vcombine.low %v1851_v23, %v1859_v60  ;;  %v1906_v58 = vld [vmem:[#allocation12 + $0xcd0] sm:$0xff]  ;;  %v1899_v41 = vld [vmem:[#allocation12 + $0xc98] sm:$0xff] }
 0x32e   :  { %4951 = vmatprep.subr.bf16.mxu1 %v9440_v47  ;;  %v1866_v47 = vld [vmem:[#allocation12 + $0xb90] sm:$0xff] }
 0x32f   :  { %v9501_v44 = vcombine.low %v1866_v47, %v1874_v51 }
 0x330   :  { %4870 = vmatpush1.bf16.msra.mxu0 %v9437_v33  ;;  %v1875_v33 = vld [vmem:[#allocation12 + $0xbd8] sm:$0xff] }
 0x331   :  { %4952 = vmatpush1.bf16.msra.mxu1 %v9439_v36  ;;  %4871 = vmatprep.subr.bf16.mxu0 %v9454_v35  ;;  %v9502_v36 = vcombine.high %v1866_v47, %v1874_v51  ;;  %v9504_v35 = vcombine.high %v1867_v52, %v1875_v33  ;;  %v9503_v7 = vcombine.low %v1867_v52, %v1875_v33  ;;  %v1922_v47 = vld [vmem:[#allocation12 + $0xd50] sm:$0xff]  ;;  %v1915_v51 = vld [vmem:[#allocation12 + $0xd18] sm:$0xff] }
 0x332   :  { %4953 = vmatprep.subr.bf16.mxu1 %v9456_v37  ;;  %v1882_v37 = vld [vmem:[#allocation12 + $0xc10] sm:$0xff] }
 0x333   :  { %v9517_v23 = vcombine.low %v1882_v37, %v1890_v34 }
 0x334   :  { %4872 = vmatpush1.bf16.msra.mxu0 %v9453_v45  ;;  %v1891_v45 = vld [vmem:[#allocation12 + $0xc58] sm:$0xff] }
 0x335   :  { %4954 = vmatpush1.bf16.msra.mxu1 %v9455_v38  ;;  %4873 = vmatprep.subr.bf16.mxu0 %v9470_v40  ;;  %v9518_v38 = vcombine.high %v1882_v37, %v1890_v34  ;;  %v9520_v40 = vcombine.high %v1883_v39, %v1891_v45  ;;  %v9519_v60 = vcombine.low %v1883_v39, %v1891_v45  ;;  %v1938_v37 = vld [vmem:[#allocation12 + $0xdd0] sm:$0xff]  ;;  %v1931_v34 = vld [vmem:[#allocation12 + $0xd98] sm:$0xff] }
 0x336   :  { %4955 = vmatprep.subr.bf16.mxu1 %v9472_v46  ;;  %v1898_v46 = vld [vmem:[#allocation12 + $0xc90] sm:$0xff] }
 0x337   :  { %v9533_v52 = vcombine.low %v1898_v46, %v1906_v58 }
 0x338   :  { %4874 = vmatpush1.bf16.msra.mxu0 %v9469_v42  ;;  %v1907_v42 = vld [vmem:[#allocation12 + $0xcd8] sm:$0xff] }
 0x339   :  { %4956 = vmatpush1.bf16.msra.mxu1 %v9471_v48  ;;  %4875 = vmatprep.subr.bf16.mxu0 %v9486_v53  ;;  %v9534_v48 = vcombine.high %v1898_v46, %v1906_v58  ;;  %v9536_v53 = vcombine.high %v1899_v41, %v1907_v42  ;;  %v9535_v33 = vcombine.low %v1899_v41, %v1907_v42  ;;  %v1954_v46 = vld [vmem:[#allocation12 + $0xe50] sm:$0xff]  ;;  %v1947_v58 = vld [vmem:[#allocation12 + $0xe18] sm:$0xff] }
 0x33a   :  { %4957 = vmatprep.subr.bf16.mxu1 %v9488_v61  ;;  %v1914_v61 = vld [vmem:[#allocation12 + $0xd10] sm:$0xff] }
 0x33b   :  { %v9549_v39 = vcombine.low %v1914_v61, %v1922_v47 }
 0x33c   :  { %4876 = vmatpush1.bf16.msra.mxu0 %v9485_v54  ;;  %v1923_v54 = vld [vmem:[#allocation12 + $0xd58] sm:$0xff] }
 0x33d   :  { %4958 = vmatpush1.bf16.msra.mxu1 %v9487_v32  ;;  %4877 = vmatprep.subr.bf16.mxu0 %v9502_v36  ;;  %v9550_v32 = vcombine.high %v1914_v61, %v1922_v47  ;;  %v9552_v36 = vcombine.high %v1915_v51, %v1923_v54  ;;  %v9551_v45 = vcombine.low %v1915_v51, %v1923_v54  ;;  %v1970_v61 = vld [vmem:[#allocation12 + $0xed0] sm:$0xff]  ;;  %v1963_v47 = vld [vmem:[#allocation12 + $0xe98] sm:$0xff] }
 0x33e   :  { %4959 = vmatprep.subr.bf16.mxu1 %v9504_v35  ;;  %v1930_v35 = vld [vmem:[#allocation12 + $0xd90] sm:$0xff] }
 0x33f   :  { %v9565_v41 = vcombine.low %v1930_v35, %v1938_v37 }
 0x340   :  { %4878 = vmatpush1.bf16.msra.mxu0 %v9501_v44  ;;  %v1939_v44 = vld [vmem:[#allocation12 + $0xdd8] sm:$0xff] }
 0x341   :  { %4960 = vmatpush1.bf16.msra.mxu1 %v9503_v7  ;;  %4879 = vmatprep.subr.bf16.mxu0 %v9518_v38  ;;  %v9566_v7 = vcombine.high %v1930_v35, %v1938_v37  ;;  %v9568_v38 = vcombine.high %v1931_v34, %v1939_v44  ;;  %v9567_v42 = vcombine.low %v1931_v34, %v1939_v44  ;;  %v1986_v35 = vld [vmem:[#allocation12 + $0xf50] sm:$0xff]  ;;  %v1979_v37 = vld [vmem:[#allocation12 + $0xf18] sm:$0xff] }
 0x342   :  { %4961 = vmatprep.subr.bf16.mxu1 %v9520_v40  ;;  %v1946_v40 = vld [vmem:[#allocation12 + $0xe10] sm:$0xff] }
 0x343   :  { %v9581_v51 = vcombine.low %v1946_v40, %v1954_v46 }
 0x344   :  { %4880 = vmatpush1.bf16.msra.mxu0 %v9517_v23  ;;  %v1955_v23 = vld [vmem:[#allocation12 + $0xe58] sm:$0xff] }
 0x345   :  { %4962 = vmatpush1.bf16.msra.mxu1 %v9519_v60  ;;  %4881 = vmatprep.subr.bf16.mxu0 %v9534_v48  ;;  %v9582_v60 = vcombine.high %v1946_v40, %v1954_v46  ;;  %v9584_v48 = vcombine.high %v1947_v58, %v1955_v23  ;;  %v9583_v54 = vcombine.low %v1947_v58, %v1955_v23  ;;  %v2002_v40 = vld [vmem:[#allocation12 + $0xfd0] sm:$0xff]  ;;  %v1995_v46 = vld [vmem:[#allocation12 + $0xf98] sm:$0xff] }
 0x346   :  { %4963 = vmatprep.subr.bf16.mxu1 %v9536_v53  ;;  %v1962_v53 = vld [vmem:[#allocation12 + $0xe90] sm:$0xff] }
 0x347   :  { %v9597_v34 = vcombine.low %v1962_v53, %v1970_v61 }
 0x348   :  { %4882 = vmatpush1.bf16.msra.mxu0 %v9533_v52  ;;  %v1971_v52 = vld [vmem:[#allocation12 + $0xed8] sm:$0xff] }
 0x349   :  { %4964 = vmatpush1.bf16.msra.mxu1 %v9535_v33  ;;  %4883 = vmatprep.subr.bf16.mxu0 %v9550_v32  ;;  %v9598_v33 = vcombine.high %v1962_v53, %v1970_v61  ;;  %v9600_v32 = vcombine.high %v1963_v47, %v1971_v52  ;;  %v9599_v44 = vcombine.low %v1963_v47, %v1971_v52  ;;  %v1508_v53 = vld [vmem:[#allocation12 + $0x60] sm:$0xff]  ;;  %v1501_v61 = vld [vmem:[#allocation12 + $0x28] sm:$0xff] }
 0x34a   :  { %4965 = vmatprep.subr.bf16.mxu1 %v9552_v36  ;;  %v1978_v36 = vld [vmem:[#allocation12 + $0xf10] sm:$0xff] }
 0x34b   :  { %v9613_v58 = vcombine.low %v1978_v36, %v1986_v35 }
 0x34c   :  { %4884 = vmatpush1.bf16.msra.mxu0 %v9549_v39  ;;  %v1987_v39 = vld [vmem:[#allocation12 + $0xf58] sm:$0xff] }
 0x34d   :  { %4966 = vmatpush1.bf16.msra.mxu1 %v9551_v45  ;;  %4885 = vmatprep.subr.bf16.mxu0 %v9566_v7  ;;  %v9614_v45 = vcombine.high %v1978_v36, %v1986_v35  ;;  %v9616_v7 = vcombine.high %v1979_v37, %v1987_v39  ;;  %v9615_v23 = vcombine.low %v1979_v37, %v1987_v39  ;;  %v1524_v36 = vld [vmem:[#allocation12 + $0xe0] sm:$0xff]  ;;  %v1517_v37 = vld [vmem:[#allocation12 + $0xa8] sm:$0xff] }
 0x34e   :  { %4967 = vmatprep.subr.bf16.mxu1 %v9568_v38  ;;  %v1994_v38 = vld [vmem:[#allocation12 + $0xf90] sm:$0xff]  ;;  %v1525_v39 = vld [vmem:[#allocation12 + $0xe8] sm:$0xff] }
 0x34f   :  { %v9629_v47 = vcombine.low %v1994_v38, %v2002_v40 }
 0x350   :  { %4886 = vmatpush1.bf16.msra.mxu0 %v9565_v41  ;;  %v2003_v41 = vld [vmem:[#allocation12 + $0xfd8] sm:$0xff] }
 0x351   :  { %4968 = vmatpush1.bf16.msra.mxu1 %v9567_v42  ;;  %4887 = vmatprep.subr.bf16.mxu0 %v9582_v60  ;;  %v9630_v42 = vcombine.high %v1994_v38, %v2002_v40  ;;  %v9632_v60 = vcombine.high %v1995_v46, %v2003_v41  ;;  %v9631_v52 = vcombine.low %v1995_v46, %v2003_v41  ;;  %v1533_v40 = vld [vmem:[#allocation12 + $0x128] sm:$0xff] }
 0x352   :  { %4969 = vmatprep.subr.bf16.mxu1 %v9584_v48  ;;  %v1500_v48 = vld [vmem:[#allocation12 + $0x20] sm:$0xff]  ;;  %v9156_v38 = vcombine.high %v1517_v37, %v1525_v39  ;;  %v1541_v46 = vld [vmem:[#allocation12 + $0x168] sm:$0xff] }
 0x353   :  { %v9137_v35 = vcombine.low %v1500_v48, %v1508_v53 }
 0x354   :  { %4888 = vmatpush1.bf16.msra.mxu0 %v9581_v51  ;;  %v1509_v51 = vld [vmem:[#allocation12 + $0x68] sm:$0xff] }
 0x355   :  { %4970 = vmatpush1.bf16.msra.mxu1 %v9583_v54  ;;  %4889 = vmatprep.subr.bf16.mxu0 %v9598_v33  ;;  %v9138_v54 = vcombine.high %v1500_v48, %v1508_v53  ;;  %v9140_v33 = vcombine.high %v1501_v61, %v1509_v51  ;;  %v1556_v48 = vld [vmem:[#allocation12 + $0x1e0] sm:$0xff]  ;;  %v1549_v53 = vld [vmem:[#allocation12 + $0x1a8] sm:$0xff] }
 0x356   :  { %4971 = vmatprep.subr.bf16.mxu1 %v9600_v32  ;;  %v1516_v32 = vld [vmem:[#allocation12 + $0xa0] sm:$0xff] }
 0x357   :  { %v9153_v41 = vcombine.low %v1516_v32, %v1524_v36 }
 0x358   :  { %4890 = vmatpush1.bf16.msra.mxu0 %v9597_v34  ;;  %v9139_v34 = vcombine.low %v1501_v61, %v1509_v51  ;;  %v1557_v61 = vld [vmem:[#allocation12 + $0x1e8] sm:$0xff] }
 0x359   :  { %4972 = vmatpush1.bf16.msra.mxu1 %v9599_v44  ;;  %4891 = vmatprep.subr.bf16.mxu0 %v9614_v45  ;;  %v9154_v44 = vcombine.high %v1516_v32, %v1524_v36  ;;  %v1532_v45 = vld [vmem:[#allocation12 + $0x120] sm:$0xff]  ;;  %v1565_v36 = vld [vmem:[#allocation12 + $0x228] sm:$0xff] }
 0x35a   :  { %4973 = vmatprep.subr.bf16.mxu1 %v9616_v7  ;;  %v1540_v7 = vld [vmem:[#allocation12 + $0x160] sm:$0xff] }
 0x35b   :  { %v9169_v51 = vcombine.low %v1532_v45, %v1540_v7  ;;  %v1572_v32 = vld [vmem:[#allocation12 + $0x260] sm:$0xff] }
 0x35c   :  { %4892 = vmatpush1.bf16.msra.mxu0 %v9613_v58  ;;  %v9155_v58 = vcombine.low %v1517_v37, %v1525_v39  ;;  %v9187_v39 = vcombine.low %v1549_v53, %v1557_v61 }
 0x35d   :  { %4974 = vmatpush1.bf16.msra.mxu1 %v9615_v23  ;;  %4893 = vmatprep.subr.bf16.mxu0 %v9630_v42  ;;  %v9170_v23 = vcombine.high %v1532_v45, %v1540_v7  ;;  %v9172_v42 = vcombine.high %v1533_v40, %v1541_v46  ;;  %v1588_v45 = vld [vmem:[#allocation12 + $0x2e0] sm:$0xff]  ;;  %v1581_v7 = vld [vmem:[#allocation12 + $0x2a8] sm:$0xff] }
 0x35e   :  { %4975 = vmatprep.subr.bf16.mxu1 %v9632_v60  ;;  %v1548_v60 = vld [vmem:[#allocation12 + $0x1a0] sm:$0xff] }
 0x35f   :  { %v9185_v37 = vcombine.low %v1548_v60, %v1556_v48 }
 0x360   :  { %4894 = vmatpush1.bf16.msra.mxu0 %v9629_v47  ;;  %v9171_v47 = vcombine.low %v1533_v40, %v1541_v46 }
 0x361   :  { %4976 = vmatpush1.bf16.msra.mxu1 %v9631_v52  ;;  %4986 = vmatprep.subr.bf16.mxu0 %v9138_v54  ;;  %v9186_v52 = vcombine.high %v1548_v60, %v1556_v48  ;;  %v9188_v54 = vcombine.high %v1549_v53, %v1557_v61  ;;  %v1604_v60 = vld [vmem:[#allocation12 + $0x360] sm:$0xff]  ;;  %v1597_v48 = vld [vmem:[#allocation12 + $0x328] sm:$0xff] }
 0x362   :  { %5068 = vmatprep.subr.bf16.mxu1 %v9140_v33  ;;  %v1564_v33 = vld [vmem:[#allocation12 + $0x220] sm:$0xff] }
 0x363   :  { %4896 = vmatmul.mubr.bf16.vlgmr.msra.gmra.mrb[12].mxu0 %v11113_v63  ;;  %v9201_v40 = vcombine.low %v1564_v33, %v1572_v32 }
 0x364   :  { %4978 = vmatmul.mubr.bf16.vlgmr.msra.gmra.mrb[12].mxu1 %v11113_v63  ;;  %4987 = vmatpush1.bf16.msra.mxu0 %v9137_v35  ;;  %v1573_v35 = vld [vmem:[#allocation12 + $0x268] sm:$0xff] }
 0x365   :  { %5018 = vmatprep.mubr.bf16.mxu0 %v11098_v43  ;;  %5069 = vmatpush1.bf16.msra.mxu1 %v9139_v34  ;;  %v9202_v34 = vcombine.high %v1564_v33, %v1572_v32  ;;  %v9203_v46 = vcombine.low %v1565_v36, %v1573_v35  ;;  %v1620_v33 = vld [vmem:[#allocation12 + $0x3e0] sm:$0xff]  ;;  %v1613_v32 = vld [vmem:[#allocation12 + $0x3a8] sm:$0xff] }
 0x366   :  { %5100 = vmatprep.mubr.bf16.mxu1 %v11098_v43  ;;  %4988 = vmatprep.subr.bf16.mxu0 %v9154_v44  ;;  %v9204_v44 = vcombine.high %v1565_v36, %v1573_v35 }
 0x367   :  { %5070 = vmatprep.subr.bf16.mxu1 %v9156_v38  ;;  %v1580_v38 = vld [vmem:[#allocation12 + $0x2a0] sm:$0xff] }
 0x368   :  { %4989 = vmatpush1.bf16.msra.mxu0 %v9153_v41  ;;  %v1589_v41 = vld [vmem:[#allocation12 + $0x2e8] sm:$0xff]  ;;  %v9217_v53 = vcombine.low %v1580_v38, %v1588_v45 }
 0x369   :  { %5071 = vmatpush1.bf16.msra.mxu1 %v9155_v58  ;;  %4990 = vmatprep.subr.bf16.mxu0 %v9170_v23  ;;  %v9218_v58 = vcombine.high %v1580_v38, %v1588_v45  ;;  %v9220_v23 = vcombine.high %v1581_v7, %v1589_v41  ;;  %v9219_v61 = vcombine.low %v1581_v7, %v1589_v41  ;;  %v1636_v38 = vld [vmem:[#allocation12 + $0x460] sm:$0xff]  ;;  %v1629_v45 = vld [vmem:[#allocation12 + $0x428] sm:$0xff] }
 0x36a   :  { %5072 = vmatprep.subr.bf16.mxu1 %v9172_v42  ;;  %v1596_v42 = vld [vmem:[#allocation12 + $0x320] sm:$0xff] }
 0x36b   :  { %v9233_v36 = vcombine.low %v1596_v42, %v1604_v60 }
 0x36c   :  { %4991 = vmatpush1.bf16.msra.mxu0 %v9169_v51  ;;  %v1605_v51 = vld [vmem:[#allocation12 + $0x368] sm:$0xff] }
 0x36d   :  { %5073 = vmatpush1.bf16.msra.mxu1 %v9171_v47  ;;  %4992 = vmatprep.subr.bf16.mxu0 %v9186_v52  ;;  %v9234_v47 = vcombine.high %v1596_v42, %v1604_v60  ;;  %v9236_v52 = vcombine.high %v1597_v48, %v1605_v51  ;;  %v9235_v35 = vcombine.low %v1597_v48, %v1605_v51  ;;  %v1652_v42 = vld [vmem:[#allocation12 + $0x4e0] sm:$0xff]  ;;  %v1645_v60 = vld [vmem:[#allocation12 + $0x4a8] sm:$0xff] }
 0x36e   :  { %5074 = vmatprep.subr.bf16.mxu1 %v9188_v54  ;;  %v1612_v54 = vld [vmem:[#allocation12 + $0x3a0] sm:$0xff] }
 0x36f   :  { %v9249_v7 = vcombine.low %v1612_v54, %v1620_v33 }
 0x370   :  { %4993 = vmatpush1.bf16.msra.mxu0 %v9185_v37  ;;  %v1621_v37 = vld [vmem:[#allocation12 + $0x3e8] sm:$0xff] }
 0x371   :  { %5075 = vmatpush1.bf16.msra.mxu1 %v9187_v39  ;;  %4994 = vmatprep.subr.bf16.mxu0 %v9202_v34  ;;  %v9250_v39 = vcombine.high %v1612_v54, %v1620_v33  ;;  %v9252_v34 = vcombine.high %v1613_v32, %v1621_v37  ;;  %v9251_v41 = vcombine.low %v1613_v32, %v1621_v37  ;;  %v1668_v54 = vld [vmem:[#allocation12 + $0x560] sm:$0xff]  ;;  %v1661_v33 = vld [vmem:[#allocation12 + $0x528] sm:$0xff] }
 0x372   :  { %5076 = vmatprep.subr.bf16.mxu1 %v9204_v44  ;;  %v1628_v44 = vld [vmem:[#allocation12 + $0x420] sm:$0xff] }
 0x373   :  { %v9265_v48 = vcombine.low %v1628_v44, %v1636_v38 }
 0x374   :  { %4995 = vmatpush1.bf16.msra.mxu0 %v9201_v40  ;;  %v1637_v40 = vld [vmem:[#allocation12 + $0x468] sm:$0xff] }
 0x375   :  { %5077 = vmatpush1.bf16.msra.mxu1 %v9203_v46  ;;  %4996 = vmatprep.subr.bf16.mxu0 %v9218_v58  ;;  %v9266_v46 = vcombine.high %v1628_v44, %v1636_v38  ;;  %v9268_v58 = vcombine.high %v1629_v45, %v1637_v40  ;;  %v9267_v51 = vcombine.low %v1629_v45, %v1637_v40  ;;  %v1684_v44 = vld [vmem:[#allocation12 + $0x5e0] sm:$0xff]  ;;  %v1677_v38 = vld [vmem:[#allocation12 + $0x5a8] sm:$0xff] }
 0x376   :  { %5078 = vmatprep.subr.bf16.mxu1 %v9220_v23  ;;  %v1644_v23 = vld [vmem:[#allocation12 + $0x4a0] sm:$0xff] }
 0x377   :  { %v9281_v32 = vcombine.low %v1644_v23, %v1652_v42 }
 0x378   :  { %4997 = vmatpush1.bf16.msra.mxu0 %v9217_v53  ;;  %v1653_v53 = vld [vmem:[#allocation12 + $0x4e8] sm:$0xff] }
 0x379   :  { %5079 = vmatpush1.bf16.msra.mxu1 %v9219_v61  ;;  %4998 = vmatprep.subr.bf16.mxu0 %v9234_v47  ;;  %v9282_v61 = vcombine.high %v1644_v23, %v1652_v42  ;;  %v9284_v47 = vcombine.high %v1645_v60, %v1653_v53  ;;  %v9283_v37 = vcombine.low %v1645_v60, %v1653_v53  ;;  %v1700_v23 = vld [vmem:[#allocation12 + $0x660] sm:$0xff]  ;;  %v1693_v42 = vld [vmem:[#allocation12 + $0x628] sm:$0xff] }
 0x37a   :  { %5080 = vmatprep.subr.bf16.mxu1 %v9236_v52  ;;  %v1660_v52 = vld [vmem:[#allocation12 + $0x520] sm:$0xff] }
 0x37b   :  { %v9297_v45 = vcombine.low %v1660_v52, %v1668_v54 }
 0x37c   :  { %4999 = vmatpush1.bf16.msra.mxu0 %v9233_v36  ;;  %v1669_v36 = vld [vmem:[#allocation12 + $0x568] sm:$0xff] }
 0x37d   :  { %5081 = vmatpush1.bf16.msra.mxu1 %v9235_v35  ;;  %5000 = vmatprep.subr.bf16.mxu0 %v9250_v39  ;;  %v9298_v35 = vcombine.high %v1660_v52, %v1668_v54  ;;  %v9300_v39 = vcombine.high %v1661_v33, %v1669_v36  ;;  %v9299_v40 = vcombine.low %v1661_v33, %v1669_v36  ;;  %v1716_v52 = vld [vmem:[#allocation12 + $0x6e0] sm:$0xff]  ;;  %v1709_v54 = vld [vmem:[#allocation12 + $0x6a8] sm:$0xff] }
 0x37e   :  { %5082 = vmatprep.subr.bf16.mxu1 %v9252_v34  ;;  %v1676_v34 = vld [vmem:[#allocation12 + $0x5a0] sm:$0xff] }
 0x37f   :  { %v9313_v60 = vcombine.low %v1676_v34, %v1684_v44 }
 0x380   :  { %5001 = vmatpush1.bf16.msra.mxu0 %v9249_v7  ;;  %v1685_v7 = vld [vmem:[#allocation12 + $0x5e8] sm:$0xff] }
 0x381   :  { %5083 = vmatpush1.bf16.msra.mxu1 %v9251_v41  ;;  %5002 = vmatprep.subr.bf16.mxu0 %v9266_v46  ;;  %v9314_v41 = vcombine.high %v1676_v34, %v1684_v44  ;;  %v9316_v46 = vcombine.high %v1677_v38, %v1685_v7  ;;  %v9315_v53 = vcombine.low %v1677_v38, %v1685_v7  ;;  %v1732_v34 = vld [vmem:[#allocation12 + $0x760] sm:$0xff]  ;;  %v1725_v44 = vld [vmem:[#allocation12 + $0x728] sm:$0xff] }
 0x382   :  { %5084 = vmatprep.subr.bf16.mxu1 %v9268_v58  ;;  %v1692_v58 = vld [vmem:[#allocation12 + $0x620] sm:$0xff] }
 0x383   :  { %v9329_v33 = vcombine.low %v1692_v58, %v1700_v23 }
 0x384   :  { %5003 = vmatpush1.bf16.msra.mxu0 %v9265_v48  ;;  %v1701_v48 = vld [vmem:[#allocation12 + $0x668] sm:$0xff] }
 0x385   :  { %5085 = vmatpush1.bf16.msra.mxu1 %v9267_v51  ;;  %5004 = vmatprep.subr.bf16.mxu0 %v9282_v61  ;;  %v9330_v51 = vcombine.high %v1692_v58, %v1700_v23  ;;  %v9332_v61 = vcombine.high %v1693_v42, %v1701_v48  ;;  %v9331_v36 = vcombine.low %v1693_v42, %v1701_v48  ;;  %v1748_v58 = vld [vmem:[#allocation12 + $0x7e0] sm:$0xff]  ;;  %v1741_v23 = vld [vmem:[#allocation12 + $0x7a8] sm:$0xff] }
 0x386   :  { %5086 = vmatprep.subr.bf16.mxu1 %v9284_v47  ;;  %v1708_v47 = vld [vmem:[#allocation12 + $0x6a0] sm:$0xff] }
 0x387   :  { %v9345_v38 = vcombine.low %v1708_v47, %v1716_v52 }
 0x388   :  { %5005 = vmatpush1.bf16.msra.mxu0 %v9281_v32  ;;  %v1717_v32 = vld [vmem:[#allocation12 + $0x6e8] sm:$0xff] }
 0x389   :  { %5087 = vmatpush1.bf16.msra.mxu1 %v9283_v37  ;;  %5006 = vmatprep.subr.bf16.mxu0 %v9298_v35  ;;  %v9346_v37 = vcombine.high %v1708_v47, %v1716_v52  ;;  %v9348_v35 = vcombine.high %v1709_v54, %v1717_v32  ;;  %v9347_v7 = vcombine.low %v1709_v54, %v1717_v32  ;;  %v1764_v47 = vld [vmem:[#allocation12 + $0x860] sm:$0xff]  ;;  %v1757_v52 = vld [vmem:[#allocation12 + $0x828] sm:$0xff] }
 0x38a   :  { %5088 = vmatprep.subr.bf16.mxu1 %v9300_v39  ;;  %v1724_v39 = vld [vmem:[#allocation12 + $0x720] sm:$0xff] }
 0x38b   :  { %v9361_v42 = vcombine.low %v1724_v39, %v1732_v34 }
 0x38c   :  { %5007 = vmatpush1.bf16.msra.mxu0 %v9297_v45  ;;  %v1733_v45 = vld [vmem:[#allocation12 + $0x768] sm:$0xff] }
 0x38d   :  { %5089 = vmatpush1.bf16.msra.mxu1 %v9299_v40  ;;  %5008 = vmatprep.subr.bf16.mxu0 %v9314_v41  ;;  %v9362_v40 = vcombine.high %v1724_v39, %v1732_v34  ;;  %v9364_v41 = vcombine.high %v1725_v44, %v1733_v45  ;;  %v9363_v48 = vcombine.low %v1725_v44, %v1733_v45  ;;  %v1780_v39 = vld [vmem:[#allocation12 + $0x8e0] sm:$0xff]  ;;  %v1773_v44 = vld [vmem:[#allocation12 + $0x8a8] sm:$0xff] }
 0x38e   :  { %5090 = vmatprep.subr.bf16.mxu1 %v9316_v46  ;;  %v1740_v46 = vld [vmem:[#allocation12 + $0x7a0] sm:$0xff]  ;;  %v1781_v45 = vld [vmem:[#allocation12 + $0x8e8] sm:$0xff] }
 0x38f   :  { %v9377_v54 = vcombine.low %v1740_v46, %v1748_v58 }
 0x390   :  { %5009 = vmatpush1.bf16.msra.mxu0 %v9313_v60  ;;  %v1749_v60 = vld [vmem:[#allocation12 + $0x7e8] sm:$0xff] }
 0x391   :  { %5091 = vmatpush1.bf16.msra.mxu1 %v9315_v53  ;;  %5010 = vmatprep.subr.bf16.mxu0 %v9330_v51  ;;  %v9378_v53 = vcombine.high %v1740_v46, %v1748_v58  ;;  %v9380_v51 = vcombine.high %v1741_v23, %v1749_v60  ;;  %v9379_v32 = vcombine.low %v1741_v23, %v1749_v60  ;;  %v1789_v58 = vld [vmem:[#allocation12 + $0x928] sm:$0xff] }
 0x392   :  { %5092 = vmatprep.subr.bf16.mxu1 %v9332_v61  ;;  %v1756_v61 = vld [vmem:[#allocation12 + $0x820] sm:$0xff]  ;;  %v9412_v46 = vcombine.high %v1773_v44, %v1781_v45  ;;  %v1797_v23 = vld [vmem:[#allocation12 + $0x968] sm:$0xff] }
 0x393   :  { %v9393_v34 = vcombine.low %v1756_v61, %v1764_v47 }
 0x394   :  { %5011 = vmatpush1.bf16.msra.mxu0 %v9329_v33  ;;  %v1765_v33 = vld [vmem:[#allocation12 + $0x868] sm:$0xff] }
 0x395   :  { %5093 = vmatpush1.bf16.msra.mxu1 %v9331_v36  ;;  %5012 = vmatprep.subr.bf16.mxu0 %v9346_v37  ;;  %v9394_v36 = vcombine.high %v1756_v61, %v1764_v47  ;;  %v9396_v37 = vcombine.high %v1757_v52, %v1765_v33  ;;  %v1812_v61 = vld [vmem:[#allocation12 + $0x9e0] sm:$0xff]  ;;  %v1805_v47 = vld [vmem:[#allocation12 + $0x9a8] sm:$0xff] }
 0x396   :  { %5094 = vmatprep.subr.bf16.mxu1 %v9348_v35  ;;  %v1772_v35 = vld [vmem:[#allocation12 + $0x8a0] sm:$0xff] }
 0x397   :  { %v9409_v60 = vcombine.low %v1772_v35, %v1780_v39 }
 0x398   :  { %5013 = vmatpush1.bf16.msra.mxu0 %v9345_v38  ;;  %v9395_v38 = vcombine.low %v1757_v52, %v1765_v33  ;;  %v1813_v52 = vld [vmem:[#allocation12 + $0x9e8] sm:$0xff] }
 0x399   :  { %5095 = vmatpush1.bf16.msra.mxu1 %v9347_v7  ;;  %5014 = vmatprep.subr.bf16.mxu0 %v9362_v40  ;;  %v9410_v7 = vcombine.high %v1772_v35, %v1780_v39  ;;  %v1788_v40 = vld [vmem:[#allocation12 + $0x920] sm:$0xff]  ;;  %v1821_v39 = vld [vmem:[#allocation12 + $0xa28] sm:$0xff] }
 0x39a   :  { %5096 = vmatprep.subr.bf16.mxu1 %v9364_v41  ;;  %v1796_v41 = vld [vmem:[#allocation12 + $0x960] sm:$0xff] }
 0x39b   :  { %v9425_v33 = vcombine.low %v1788_v40, %v1796_v41  ;;  %v1828_v35 = vld [vmem:[#allocation12 + $0xa60] sm:$0xff] }
 0x39c   :  { %5015 = vmatpush1.bf16.msra.mxu0 %v9361_v42  ;;  %v9411_v42 = vcombine.low %v1773_v44, %v1781_v45  ;;  %v9443_v45 = vcombine.low %v1805_v47, %v1813_v52 }
 0x39d   :  { %5097 = vmatpush1.bf16.msra.mxu1 %v9363_v48  ;;  %5016 = vmatprep.subr.bf16.mxu0 %v9378_v53  ;;  %v9426_v48 = vcombine.high %v1788_v40, %v1796_v41  ;;  %v9428_v53 = vcombine.high %v1789_v58, %v1797_v23  ;;  %v1844_v40 = vld [vmem:[#allocation12 + $0xae0] sm:$0xff]  ;;  %v1837_v41 = vld [vmem:[#allocation12 + $0xaa8] sm:$0xff] }
 0x39e   :  { %5098 = vmatprep.subr.bf16.mxu1 %v9380_v51  ;;  %v1804_v51 = vld [vmem:[#allocation12 + $0x9a0] sm:$0xff] }
 0x39f   :  { %v9441_v44 = vcombine.low %v1804_v51, %v1812_v61 }
 0x3a0   :  { %5017 = vmatpush1.bf16.msra.mxu0 %v9377_v54  ;;  %v9427_v54 = vcombine.low %v1789_v58, %v1797_v23 }
 0x3a1   :  { %5099 = vmatpush1.bf16.msra.mxu1 %v9379_v32  ;;  %5027 = vmatprep.subr.bf16.mxu0 %v9394_v36  ;;  %v9442_v32 = vcombine.high %v1804_v51, %v1812_v61  ;;  %v9444_v36 = vcombine.high %v1805_v47, %v1813_v52  ;;  %v1860_v51 = vld [vmem:[#allocation12 + $0xb60] sm:$0xff]  ;;  %v1853_v61 = vld [vmem:[#allocation12 + $0xb28] sm:$0xff] }
 0x3a2   :  { %5109 = vmatprep.subr.bf16.mxu1 %v9396_v37  ;;  %v1820_v37 = vld [vmem:[#allocation12 + $0xa20] sm:$0xff] }
 0x3a3   :  { %5019 = vmatmul.mubr.bf16.vlgmr.msra.gmra.mrb[16].mxu0 %v11100_v49  ;;  %v9457_v58 = vcombine.low %v1820_v37, %v1828_v35 }
 0x3a4   :  { %5101 = vmatmul.mubr.bf16.vlgmr.msra.gmra.mrb[16].mxu1 %v11100_v49  ;;  %5028 = vmatpush1.bf16.msra.mxu0 %v9393_v34  ;;  %v1829_v34 = vld [vmem:[#allocation12 + $0xa68] sm:$0xff] }
 0x3a5   :  { %5059 = vmatprep.mubr.bf16.mxu0 %v11104_v55  ;;  %5110 = vmatpush1.bf16.msra.mxu1 %v9395_v38  ;;  %v9458_v38 = vcombine.high %v1820_v37, %v1828_v35  ;;  %v9459_v23 = vcombine.low %v1821_v39, %v1829_v34  ;;  %v1868_v35 = vld [vmem:[#allocation12 + $0xba0] sm:$0xff] }
 0x3a6   :  { %5141 = vmatprep.mubr.bf16.mxu1 %v11104_v55  ;;  %5029 = vmatprep.subr.bf16.mxu0 %v9410_v7  ;;  %v9460_v7 = vcombine.high %v1821_v39, %v1829_v34  ;;  %v1876_v39 = vld [vmem:[#allocation12 + $0xbe0] sm:$0xff] }
 0x3a7   :  { %5111 = vmatprep.subr.bf16.mxu1 %v9412_v46  ;;  %v1836_v46 = vld [vmem:[#allocation12 + $0xaa0] sm:$0xff]  ;;  %v9505_v6 = vcombine.low %v1868_v35, %v1876_v39 }
 0x3a8   :  { %5030 = vmatpush1.bf16.msra.mxu0 %v9409_v60  ;;  %v1845_v60 = vld [vmem:[#allocation12 + $0xae8] sm:$0xff]  ;;  %v9473_v47 = vcombine.low %v1836_v46, %v1844_v40 }
 0x3a9   :  { %5112 = vmatpush1.bf16.msra.mxu1 %v9411_v42  ;;  %5031 = vmatprep.subr.bf16.mxu0 %v9426_v48  ;;  %v9474_v42 = vcombine.high %v1836_v46, %v1844_v40  ;;  %v9476_v48 = vcombine.high %v1837_v41, %v1845_v60  ;;  %v9475_v52 = vcombine.low %v1837_v41, %v1845_v60 }
 0x3aa   :  { %5113 = vmatprep.subr.bf16.mxu1 %v9428_v53  ;;  %v1852_v53 = vld [vmem:[#allocation12 + $0xb20] sm:$0xff] }
 0x3ab   :  { %v9489_v40 = vcombine.low %v1852_v53, %v1860_v51 }
 0x3ac   :  { %5032 = vmatpush1.bf16.msra.mxu0 %v9425_v33  ;;  %v1861_v33 = vld [vmem:[#allocation12 + $0xb68] sm:$0xff] }
 0x3ad   :  { %5114 = vmatpush1.bf16.msra.mxu1 %v9427_v54  ;;  %5033 = vmatprep.subr.bf16.mxu0 %v9442_v32  ;;  %v9490_v54 = vcombine.high %v1852_v53, %v1860_v51  ;;  %v9492_v37 = vcombine.high %v1853_v61, %v1861_v33  ;;  %v9524_v53 = vcombine.high %v1885_v15, %v1893_v22  ;;  %v1900_v51 = vld [vmem:[#allocation12 + $0xca0] sm:$0xff] }
 0x3ae   :  { %5115 = vmatprep.subr.bf16.mxu1 %v9444_v36 }
 0x3b0   :  { %5034 = vmatpush1.bf16.msra.mxu0 %v9441_v44 }
 0x3b1   :  { %5116 = vmatpush1.bf16.msra.mxu1 %v9443_v45  ;;  %5035 = vmatprep.subr.bf16.mxu0 %v9458_v38  ;;  %v1869_v45 = vld [vmem:[#allocation12 + $0xba8] sm:$0xff] }
 0x3b2   :  { %5117 = vmatprep.subr.bf16.mxu1 %v9460_v7  ;;  %v1877_v38 = vld [vmem:[#allocation12 + $0xbe8] sm:$0xff] }
 0x3b4   :  { %5036 = vmatpush1.bf16.msra.mxu0 %v9457_v58  ;;  %v9491_v58 = vcombine.low %v1853_v61, %v1861_v33  ;;  %v9523_v33 = vcombine.low %v1885_v15, %v1893_v22 }
 0x3b5   :  { %5118 = vmatpush1.bf16.msra.mxu1 %v9459_v23  ;;  %5037 = vmatprep.subr.bf16.mxu0 %v9474_v42  ;;  %v9506_v23 = vcombine.high %v1868_v35, %v1876_v39  ;;  %v9508_v42 = vcombine.high %v1869_v45, %v1877_v38  ;;  %v1924_v35 = vld [vmem:[#allocation12 + $0xd60] sm:$0xff]  ;;  %v1917_v39 = vld [vmem:[#allocation12 + $0xd28] sm:$0xff] }
 0x3b6   :  { %v11131_v32 = vpop.f32.mrb[8].mxu0  ;;  %v11133_v36 = vpop.f32.mrb[8].mxu1  ;;  %5119 = vmatprep.subr.bf16.mxu1 %v9476_v48  ;;  %v1884_v48 = vld [vmem:[#allocation12 + $0xc20] sm:$0xff] }
 0x3b7   :  { %v11135_v34 = vpop.f32.mrb[9].mxu0  ;;  %v11137_v44 = vpop.f32.mrb[9].mxu1  ;;  %v9521_v61 = vcombine.low %v1884_v48, %v1892_v31 }
 0x3b8   :  { %v4737_v7 = vpop.f32.mrb[10].mxu0  ;;  %v4819_v46 = vpop.f32.mrb[10].mxu1  ;;  %5038 = vmatpush1.bf16.msra.mxu0 %v9473_v47  ;;  %v1908_v47 = vld [vmem:[#allocation12 + $0xce0] sm:$0xff] }
 0x3b9   :  { %5120 = vmatpush1.bf16.msra.mxu1 %v9475_v52  ;;  %v4738_v41 = vpop.f32.mrb[11].mxu0  ;;  %v4820_v60 = vpop.f32.mrb[11].mxu1  ;;  %5039 = vmatprep.subr.bf16.mxu0 %v9490_v54  ;;  %v9507_v7 = vcombine.low %v1869_v45, %v1877_v38  ;;  %v9522_v46 = vcombine.high %v1884_v48, %v1892_v31  ;;  %v1901_v52 = vld [vmem:[#allocation12 + $0xca8] sm:$0xff]  ;;  %v9537_v45 = vcombine.low %v1900_v51, %v1908_v47  ;;  %v1940_v31 = vld [vmem:[#allocation12 + $0xde0] sm:$0xff] }
 0x3ba   :  { %5121 = vmatprep.subr.bf16.mxu1 %v9492_v37  ;;  %v1909_v54 = vld [vmem:[#allocation12 + $0xce8] sm:$0xff]  ;;  %v9538_v37 = vcombine.high %v1900_v51, %v1908_v47  ;;  %v1956_v51 = vld [vmem:[#allocation12 + $0xe60] sm:$0xff] }
 0x3bb   :  { %v9540_v41 = vcombine.high %v1901_v52, %v1909_v54  ;;  %v1925_v60 = vld [vmem:[#allocation12 + $0xd68] sm:$0xff]  ;;  %v9539_v38 = vcombine.low %v1901_v52, %v1909_v54 }
 0x3bc   :  { %5040 = vmatpush1.bf16.msra.mxu0 %v9489_v40  ;;  %v1916_v40 = vld [vmem:[#allocation12 + $0xd20] sm:$0xff]  ;;  %v1941_v48 = vld [vmem:[#allocation12 + $0xde8] sm:$0xff]  ;;  %v9555_v22 = vcombine.low %v1917_v39, %v1925_v60 }
 0x3bd   :  { %5122 = vmatpush1.bf16.msra.mxu1 %v9491_v58  ;;  %5041 = vmatprep.subr.bf16.mxu0 %v9506_v23  ;;  %v9554_v58 = vcombine.high %v1916_v40, %v1924_v35  ;;  %v9556_v23 = vcombine.high %v1917_v39, %v1925_v60  ;;  %v9553_v15 = vcombine.low %v1916_v40, %v1924_v35  ;;  %v1949_v47 = vld [vmem:[#allocation12 + $0xe28] sm:$0xff]  ;;  %v1972_v40 = vld [vmem:[#allocation12 + $0xee0] sm:$0xff] }
 0x3be   :  { %5123 = vmatprep.subr.bf16.mxu1 %v9508_v42  ;;  %v1933_v42 = vld [vmem:[#allocation12 + $0xda8] sm:$0xff] }
 0x3bf   :  { %v9571_v54 = vcombine.low %v1933_v42, %v1941_v48  ;;  %v1965_v35 = vld [vmem:[#allocation12 + $0xea8] sm:$0xff] }
 0x3c0   :  { %5042 = vmatpush1.bf16.msra.mxu0 %v9505_v6  ;;  %v1932_v6 = vld [vmem:[#allocation12 + $0xda0] sm:$0xff] }
 0x3c1   :  { %5124 = vmatpush1.bf16.msra.mxu1 %v9507_v7  ;;  %5043 = vmatprep.subr.bf16.mxu0 %v9522_v46  ;;  %v9570_v7 = vcombine.high %v1932_v6, %v1940_v31  ;;  %v9572_v46 = vcombine.high %v1933_v42, %v1941_v48  ;;  %v9569_v52 = vcombine.low %v1932_v6, %v1940_v31  ;;  %v1988_v6 = vld [vmem:[#allocation12 + $0xf60] sm:$0xff]  ;;  %v1981_v31 = vld [vmem:[#allocation12 + $0xf28] sm:$0xff] }
 0x3c2   :  { %5125 = vmatprep.subr.bf16.mxu1 %v9524_v53  ;;  %v1948_v53 = vld [vmem:[#allocation12 + $0xe20] sm:$0xff] }
 0x3c3   :  { %v9585_v39 = vcombine.low %v1948_v53, %v1956_v51 }
 0x3c4   :  { %5044 = vmatpush1.bf16.msra.mxu0 %v9521_v61  ;;  %v1957_v61 = vld [vmem:[#allocation12 + $0xe68] sm:$0xff] }
 0x3c5   :  { %5126 = vmatpush1.bf16.msra.mxu1 %v9523_v33  ;;  %5045 = vmatprep.subr.bf16.mxu0 %v9538_v37  ;;  %v9586_v33 = vcombine.high %v1948_v53, %v1956_v51  ;;  %v9588_v37 = vcombine.high %v1949_v47, %v1957_v61  ;;  %v9587_v60 = vcombine.low %v1949_v47, %v1957_v61  ;;  %v2004_v53 = vld [vmem:[#allocation12 + $0xfe0] sm:$0xff]  ;;  %v1997_v51 = vld [vmem:[#allocation12 + $0xfa8] sm:$0xff] }
 0x3c6   :  { %5127 = vmatprep.subr.bf16.mxu1 %v9540_v41  ;;  %v1964_v41 = vld [vmem:[#allocation12 + $0xea0] sm:$0xff] }
 0x3c7   :  { %v9601_v42 = vcombine.low %v1964_v41, %v1972_v40 }
 0x3c8   :  { %5046 = vmatpush1.bf16.msra.mxu0 %v9537_v45  ;;  %v1973_v45 = vld [vmem:[#allocation12 + $0xee8] sm:$0xff] }
 0x3c9   :  { %5128 = vmatpush1.bf16.msra.mxu1 %v9539_v38  ;;  %5047 = vmatprep.subr.bf16.mxu0 %v9554_v58  ;;  %v9602_v38 = vcombine.high %v1964_v41, %v1972_v40  ;;  %v9604_v58 = vcombine.high %v1965_v35, %v1973_v45  ;;  %v9603_v48 = vcombine.low %v1965_v35, %v1973_v45  ;;  %v1510_v41 = vld [vmem:[#allocation12 + $0x70] sm:$0xff]  ;;  %v1503_v40 = vld [vmem:[#allocation12 + $0x38] sm:$0xff] }
 0x3ca   :  { %5129 = vmatprep.subr.bf16.mxu1 %v9556_v23  ;;  %v1980_v23 = vld [vmem:[#allocation12 + $0xf20] sm:$0xff] }
 0x3cb   :  { %v9617_v47 = vcombine.low %v1980_v23, %v1988_v6 }
 0x3cc   :  { %5048 = vmatpush1.bf16.msra.mxu0 %v9553_v15  ;;  %v1989_v15 = vld [vmem:[#allocation12 + $0xf68] sm:$0xff] }
 0x3cd   :  { %5130 = vmatpush1.bf16.msra.mxu1 %v9555_v22  ;;  %5049 = vmatprep.subr.bf16.mxu0 %v9570_v7  ;;  %v9618_v22 = vcombine.high %v1980_v23, %v1988_v6  ;;  %v9620_v7 = vcombine.high %v1981_v31, %v1989_v15  ;;  %v9619_v61 = vcombine.low %v1981_v31, %v1989_v15  ;;  %v1526_v23 = vld [vmem:[#allocation12 + $0xf0] sm:$0xff]  ;;  %v1519_v31 = vld [vmem:[#allocation12 + $0xb8] sm:$0xff] }
 0x3ce   :  { %5131 = vmatprep.subr.bf16.mxu1 %v9572_v46  ;;  %v1996_v46 = vld [vmem:[#allocation12 + $0xfa0] sm:$0xff]  ;;  %v1527_v15 = vld [vmem:[#allocation12 + $0xf8] sm:$0xff] }
 0x3cf   :  { %v9633_v35 = vcombine.low %v1996_v46, %v2004_v53 }
 0x3d0   :  { %5050 = vmatpush1.bf16.msra.mxu0 %v9569_v52  ;;  %v2005_v52 = vld [vmem:[#allocation12 + $0xfe8] sm:$0xff] }
 0x3d1   :  { %5132 = vmatpush1.bf16.msra.mxu1 %v9571_v54  ;;  %5051 = vmatprep.subr.bf16.mxu0 %v9586_v33  ;;  %v9634_v54 = vcombine.high %v1996_v46, %v2004_v53  ;;  %v9636_v33 = vcombine.high %v1997_v51, %v2005_v52  ;;  %v9635_v45 = vcombine.low %v1997_v51, %v2005_v52  ;;  %v1535_v53 = vld [vmem:[#allocation12 + $0x138] sm:$0xff] }
 0x3d2   :  { %5133 = vmatprep.subr.bf16.mxu1 %v9588_v37  ;;  %v1502_v37 = vld [vmem:[#allocation12 + $0x30] sm:$0xff]  ;;  %v9160_v46 = vcombine.high %v1519_v31, %v1527_v15  ;;  %v1543_v51 = vld [vmem:[#allocation12 + $0x178] sm:$0xff] }
 0x3d3   :  { %v9141_v6 = vcombine.low %v1502_v37, %v1510_v41 }
 0x3d4   :  { %5052 = vmatpush1.bf16.msra.mxu0 %v9585_v39  ;;  %v1511_v39 = vld [vmem:[#allocation12 + $0x78] sm:$0xff] }
 0x3d5   :  { %5134 = vmatpush1.bf16.msra.mxu1 %v9587_v60  ;;  %5053 = vmatprep.subr.bf16.mxu0 %v9602_v38  ;;  %v9142_v60 = vcombine.high %v1502_v37, %v1510_v41  ;;  %v9144_v38 = vcombine.high %v1503_v40, %v1511_v39  ;;  %v1558_v37 = vld [vmem:[#allocation12 + $0x1f0] sm:$0xff]  ;;  %v1551_v41 = vld [vmem:[#allocation12 + $0x1b8] sm:$0xff] }
 0x3d6   :  { %5135 = vmatprep.subr.bf16.mxu1 %v9604_v58  ;;  %v1518_v58 = vld [vmem:[#allocation12 + $0xb0] sm:$0xff] }
 0x3d7   :  { %v9157_v52 = vcombine.low %v1518_v58, %v1526_v23 }
 0x3d8   :  { %5054 = vmatpush1.bf16.msra.mxu0 %v9601_v42  ;;  %v9143_v42 = vcombine.low %v1503_v40, %v1511_v39  ;;  %v1559_v40 = vld [vmem:[#allocation12 + $0x1f8] sm:$0xff] }
 0x3d9   :  { %5136 = vmatpush1.bf16.msra.mxu1 %v9603_v48  ;;  %5055 = vmatprep.subr.bf16.mxu0 %v9618_v22  ;;  %v9158_v48 = vcombine.high %v1518_v58, %v1526_v23  ;;  %v1534_v22 = vld [vmem:[#allocation12 + $0x130] sm:$0xff]  ;;  %v1567_v23 = vld [vmem:[#allocation12 + $0x238] sm:$0xff] }
 0x3da   :  { %5137 = vmatprep.subr.bf16.mxu1 %v9620_v7  ;;  %v1542_v7 = vld [vmem:[#allocation12 + $0x170] sm:$0xff] }
 0x3db   :  { %v9173_v39 = vcombine.low %v1534_v22, %v1542_v7  ;;  %v1574_v58 = vld [vmem:[#allocation12 + $0x270] sm:$0xff] }
 0x3dc   :  { %5056 = vmatpush1.bf16.msra.mxu0 %v9617_v47  ;;  %v9159_v47 = vcombine.low %v1519_v31, %v1527_v15  ;;  %v9191_v31 = vcombine.low %v1551_v41, %v1559_v40 }
 0x3dd   :  { %5138 = vmatpush1.bf16.msra.mxu1 %v9619_v61  ;;  %5057 = vmatprep.subr.bf16.mxu0 %v9634_v54  ;;  %v9174_v61 = vcombine.high %v1534_v22, %v1542_v7  ;;  %v9176_v54 = vcombine.high %v1535_v53, %v1543_v51  ;;  %v1590_v22 = vld [vmem:[#allocation12 + $0x2f0] sm:$0xff]  ;;  %v1583_v7 = vld [vmem:[#allocation12 + $0x2b8] sm:$0xff] }
 0x3de   :  { %5139 = vmatprep.subr.bf16.mxu1 %v9636_v33  ;;  %v1550_v33 = vld [vmem:[#allocation12 + $0x1b0] sm:$0xff] }
 0x3e0   :  { %5058 = vmatpush1.bf16.msra.mxu0 %v9633_v35  ;;  %v9175_v35 = vcombine.low %v1535_v53, %v1543_v51 }
 0x3e1   :  { %5140 = vmatpush1.bf16.msra.mxu1 %v9635_v45  ;;  %5150 = vmatprep.subr.bf16.mxu0 %v9142_v60  ;;  %v9190_v45 = vcombine.high %v1550_v33, %v1558_v37  ;;  %v9192_v60 = vcombine.high %v1551_v41, %v1559_v40 }
 0x3e2   :  { %5232 = vmatprep.subr.bf16.mxu1 %v9144_v38  ;;  %v1566_v38 = vld [vmem:[#allocation12 + $0x230] sm:$0xff] }
 0x3e3   :  { %5060 = vmatmul.mubr.bf16.vlgmr.msra.gmra.mrb[16].mxu0 %v11113_v63  ;;  %v9206_v15 = vcombine.high %v1566_v38, %v1574_v58  ;;  %v9205_v53 = vcombine.low %v1566_v38, %v1574_v58  ;;  %v1615_v38 = vld [vmem:[#allocation12 + $0x3b8] sm:$0xff] }
 0x3e4   :  { %5142 = vmatmul.mubr.bf16.vlgmr.msra.gmra.mrb[16].mxu1 %v11113_v63  ;;  %5151 = vmatpush1.bf16.msra.mxu0 %v9141_v6  ;;  %v1575_v6 = vld [vmem:[#allocation12 + $0x278] sm:$0xff] }
 0x3e5   :  { %5182 = vmatprep.mubr.bf16.mxu0 %v11098_v43  ;;  %5233 = vmatpush1.bf16.msra.mxu1 %v9143_v42  ;;  %v9208_v42 = vcombine.high %v1567_v23, %v1575_v6  ;;  %v9207_v51 = vcombine.low %v1567_v23, %v1575_v6  ;;  %v1623_v58 = vld [vmem:[#allocation12 + $0x3f8] sm:$0xff] }
 0x3e6   :  { %5264 = vmatprep.mubr.bf16.mxu1 %v11098_v43  ;;  %5152 = vmatprep.subr.bf16.mxu0 %v9158_v48  ;;  %v9189_v43 = vcombine.low %v1550_v33, %v1558_v37  ;;  %v1582_v48 = vld [vmem:[#allocation12 + $0x2b0] sm:$0xff]  ;;  %v1599_v33 = vld [vmem:[#allocation12 + $0x338] sm:$0xff] }
 0x3e7   :  { %5234 = vmatprep.subr.bf16.mxu1 %v9160_v46  ;;  %v1591_v46 = vld [vmem:[#allocation12 + $0x2f8] sm:$0xff]  ;;  %v9221_v41 = vcombine.low %v1582_v48, %v1590_v22 }
 0x3e8   :  { %5153 = vmatpush1.bf16.msra.mxu0 %v9157_v52  ;;  %v9222_v52 = vcombine.high %v1582_v48, %v1590_v22  ;;  %v1607_v37 = vld [vmem:[#allocation12 + $0x378] sm:$0xff]  ;;  %v9223_v40 = vcombine.low %v1583_v7, %v1591_v46 }
 0x3e9   :  { %5235 = vmatpush1.bf16.msra.mxu1 %v9159_v47  ;;  %5154 = vmatprep.subr.bf16.mxu0 %v9174_v61  ;;  %v9224_v47 = vcombine.high %v1583_v7, %v1591_v46  ;;  %v1598_v61 = vld [vmem:[#allocation12 + $0x330] sm:$0xff]  ;;  %v9239_v6 = vcombine.low %v1599_v33, %v1607_v37  ;;  %v1631_v48 = vld [vmem:[#allocation12 + $0x438] sm:$0xff]  ;;  %v9255_v46 = vcombine.low %v1615_v38, %v1623_v58 }
 0x3ea   :  { %5236 = vmatprep.subr.bf16.mxu1 %v9176_v54  ;;  %v1606_v54 = vld [vmem:[#allocation12 + $0x370] sm:$0xff]  ;;  %v1639_v22 = vld [vmem:[#allocation12 + $0x478] sm:$0xff] }
 0x3eb   :  { %v9237_v23 = vcombine.low %v1598_v61, %v1606_v54 }
 0x3ec   :  { %5155 = vmatpush1.bf16.msra.mxu0 %v9173_v39  ;;  %v9238_v39 = vcombine.high %v1598_v61, %v1606_v54  ;;  %v1647_v61 = vld [vmem:[#allocation12 + $0x4b8] sm:$0xff] }
 0x3ed   :  { %5237 = vmatpush1.bf16.msra.mxu1 %v9175_v35  ;;  %5156 = vmatprep.subr.bf16.mxu0 %v9190_v45  ;;  %v9240_v35 = vcombine.high %v1599_v33, %v1607_v37  ;;  %v1614_v45 = vld [vmem:[#allocation12 + $0x3b0] sm:$0xff]  ;;  %v1655_v54 = vld [vmem:[#allocation12 + $0x4f8] sm:$0xff]  ;;  %v9271_v37 = vcombine.low %v1631_v48, %v1639_v22 }
 0x3ee   :  { %5238 = vmatprep.subr.bf16.mxu1 %v9192_v60  ;;  %v1622_v60 = vld [vmem:[#allocation12 + $0x3f0] sm:$0xff] }
 0x3ef   :  { %v9253_v7 = vcombine.low %v1614_v45, %v1622_v60 }
 0x3f0   :  { %5157 = vmatpush1.bf16.msra.mxu0 %v9189_v43  ;;  %v9254_v43 = vcombine.high %v1614_v45, %v1622_v60  ;;  %v1663_v45 = vld [vmem:[#allocation12 + $0x538] sm:$0xff] }
 0x3f1   :  { %5239 = vmatpush1.bf16.msra.mxu1 %v9191_v31  ;;  %5158 = vmatprep.subr.bf16.mxu0 %v9206_v15  ;;  %v9256_v31 = vcombine.high %v1615_v38, %v1623_v58  ;;  %v1630_v15 = vld [vmem:[#allocation12 + $0x430] sm:$0xff]  ;;  %v1671_v60 = vld [vmem:[#allocation12 + $0x578] sm:$0xff]  ;;  %v9287_v58 = vcombine.low %v1647_v61, %v1655_v54 }
 0x3f2   :  { %5240 = vmatprep.subr.bf16.mxu1 %v9208_v42  ;;  %v1638_v42 = vld [vmem:[#allocation12 + $0x470] sm:$0xff] }
 0x3f3   :  { %v9269_v33 = vcombine.low %v1630_v15, %v1638_v42 }
 0x3f4   :  { %5159 = vmatpush1.bf16.msra.mxu0 %v9205_v53  ;;  %v9270_v53 = vcombine.high %v1630_v15, %v1638_v42  ;;  %v1679_v15 = vld [vmem:[#allocation12 + $0x5b8] sm:$0xff] }
 0x3f5   :  { %5241 = vmatpush1.bf16.msra.mxu1 %v9207_v51  ;;  %5160 = vmatprep.subr.bf16.mxu0 %v9222_v52  ;;  %v9272_v51 = vcombine.high %v1631_v48, %v1639_v22  ;;  %v1646_v52 = vld [vmem:[#allocation12 + $0x4b0] sm:$0xff]  ;;  %v1687_v42 = vld [vmem:[#allocation12 + $0x5f8] sm:$0xff]  ;;  %v9303_v22 = vcombine.low %v1663_v45, %v1671_v60 }
 0x3f6   :  { %5242 = vmatprep.subr.bf16.mxu1 %v9224_v47  ;;  %v1654_v47 = vld [vmem:[#allocation12 + $0x4f0] sm:$0xff] }
 0x3f7   :  { %v9285_v38 = vcombine.low %v1646_v52, %v1654_v47 }
 0x3f8   :  { %5161 = vmatpush1.bf16.msra.mxu0 %v9221_v41  ;;  %v9286_v41 = vcombine.high %v1646_v52, %v1654_v47  ;;  %v1695_v52 = vld [vmem:[#allocation12 + $0x638] sm:$0xff] }
 0x3f9   :  { %5243 = vmatpush1.bf16.msra.mxu1 %v9223_v40  ;;  %5162 = vmatprep.subr.bf16.mxu0 %v9238_v39  ;;  %v9288_v40 = vcombine.high %v1647_v61, %v1655_v54  ;;  %v1662_v39 = vld [vmem:[#allocation12 + $0x530] sm:$0xff]  ;;  %v1703_v47 = vld [vmem:[#allocation12 + $0x678] sm:$0xff]  ;;  %v9319_v54 = vcombine.low %v1679_v15, %v1687_v42 }
 0x3fa   :  { %5244 = vmatprep.subr.bf16.mxu1 %v9240_v35  ;;  %v1670_v35 = vld [vmem:[#allocation12 + $0x570] sm:$0xff] }
 0x3fb   :  { %v9301_v48 = vcombine.low %v1662_v39, %v1670_v35 }
 0x3fc   :  { %5163 = vmatpush1.bf16.msra.mxu0 %v9237_v23  ;;  %v9302_v23 = vcombine.high %v1662_v39, %v1670_v35  ;;  %v1711_v39 = vld [vmem:[#allocation12 + $0x6b8] sm:$0xff] }
 0x3fd   :  { %5245 = vmatpush1.bf16.msra.mxu1 %v9239_v6  ;;  %5164 = vmatprep.subr.bf16.mxu0 %v9254_v43  ;;  %v9304_v6 = vcombine.high %v1663_v45, %v1671_v60  ;;  %v1678_v43 = vld [vmem:[#allocation12 + $0x5b0] sm:$0xff]  ;;  %v1719_v35 = vld [vmem:[#allocation12 + $0x6f8] sm:$0xff]  ;;  %v9335_v60 = vcombine.low %v1695_v52, %v1703_v47 }
 0x3fe   :  { %5246 = vmatprep.subr.bf16.mxu1 %v9256_v31  ;;  %v1686_v31 = vld [vmem:[#allocation12 + $0x5f0] sm:$0xff] }
 0x3ff   :  { %v9317_v61 = vcombine.low %v1678_v43, %v1686_v31 }
 0x400   :  { %5165 = vmatpush1.bf16.msra.mxu0 %v9253_v7  ;;  %v9318_v7 = vcombine.high %v1678_v43, %v1686_v31  ;;  %v1727_v43 = vld [vmem:[#allocation12 + $0x738] sm:$0xff] }
 0x401   :  { %5247 = vmatpush1.bf16.msra.mxu1 %v9255_v46  ;;  %5166 = vmatprep.subr.bf16.mxu0 %v9270_v53  ;;  %v9320_v46 = vcombine.high %v1679_v15, %v1687_v42  ;;  %v1694_v53 = vld [vmem:[#allocation12 + $0x630] sm:$0xff]  ;;  %v1735_v31 = vld [vmem:[#allocation12 + $0x778] sm:$0xff]  ;;  %v9351_v42 = vcombine.low %v1711_v39, %v1719_v35 }
 0x402   :  { %5248 = vmatprep.subr.bf16.mxu1 %v9272_v51  ;;  %v1702_v51 = vld [vmem:[#allocation12 + $0x670] sm:$0xff] }
 0x403   :  { %v9333_v45 = vcombine.low %v1694_v53, %v1702_v51 }
 0x404   :  { %5167 = vmatpush1.bf16.msra.mxu0 %v9269_v33  ;;  %v9334_v33 = vcombine.high %v1694_v53, %v1702_v51  ;;  %v1743_v53 = vld [vmem:[#allocation12 + $0x7b8] sm:$0xff] }
 0x405   :  { %5249 = vmatpush1.bf16.msra.mxu1 %v9271_v37  ;;  %5168 = vmatprep.subr.bf16.mxu0 %v9286_v41  ;;  %v9336_v37 = vcombine.high %v1695_v52, %v1703_v47  ;;  %v1710_v41 = vld [vmem:[#allocation12 + $0x6b0] sm:$0xff]  ;;  %v1751_v51 = vld [vmem:[#allocation12 + $0x7f8] sm:$0xff]  ;;  %v9367_v47 = vcombine.low %v1727_v43, %v1735_v31 }
 0x406   :  { %5250 = vmatprep.subr.bf16.mxu1 %v9288_v40  ;;  %v1718_v40 = vld [vmem:[#allocation12 + $0x6f0] sm:$0xff] }
 0x407   :  { %v9349_v15 = vcombine.low %v1710_v41, %v1718_v40 }
 0x408   :  { %5169 = vmatpush1.bf16.msra.mxu0 %v9285_v38  ;;  %v9350_v38 = vcombine.high %v1710_v41, %v1718_v40  ;;  %v1759_v41 = vld [vmem:[#allocation12 + $0x838] sm:$0xff] }
 0x409   :  { %5251 = vmatpush1.bf16.msra.mxu1 %v9287_v58  ;;  %5170 = vmatprep.subr.bf16.mxu0 %v9302_v23  ;;  %v9352_v58 = vcombine.high %v1711_v39, %v1719_v35  ;;  %v1726_v23 = vld [vmem:[#allocation12 + $0x730] sm:$0xff]  ;;  %v1767_v40 = vld [vmem:[#allocation12 + $0x878] sm:$0xff]  ;;  %v9383_v35 = vcombine.low %v1743_v53, %v1751_v51 }
 0x40a   :  { %5252 = vmatprep.subr.bf16.mxu1 %v9304_v6  ;;  %v1734_v6 = vld [vmem:[#allocation12 + $0x770] sm:$0xff] }
 0x40b   :  { %v9365_v52 = vcombine.low %v1726_v23, %v1734_v6 }
 0x40c   :  { %5171 = vmatpush1.bf16.msra.mxu0 %v9301_v48  ;;  %v9366_v48 = vcombine.high %v1726_v23, %v1734_v6  ;;  %v1775_v6 = vld [vmem:[#allocation12 + $0x8b8] sm:$0xff] }
 0x40d   :  { %5253 = vmatpush1.bf16.msra.mxu1 %v9303_v22  ;;  %5172 = vmatprep.subr.bf16.mxu0 %v9318_v7  ;;  %v9368_v22 = vcombine.high %v1727_v43, %v1735_v31  ;;  %v1742_v7 = vld [vmem:[#allocation12 + $0x7b0] sm:$0xff]  ;;  %v1783_v43 = vld [vmem:[#allocation12 + $0x8f8] sm:$0xff]  ;;  %v9399_v31 = vcombine.low %v1759_v41, %v1767_v40 }
 0x40e   :  { %5254 = vmatprep.subr.bf16.mxu1 %v9320_v46  ;;  %v1750_v46 = vld [vmem:[#allocation12 + $0x7f0] sm:$0xff] }
 0x40f   :  { %v9381_v39 = vcombine.low %v1742_v7, %v1750_v46 }
 0x410   :  { %5173 = vmatpush1.bf16.msra.mxu0 %v9317_v61  ;;  %v9382_v61 = vcombine.high %v1742_v7, %v1750_v46  ;;  %v1791_v7 = vld [vmem:[#allocation12 + $0x938] sm:$0xff] }
 0x411   :  { %5255 = vmatpush1.bf16.msra.mxu1 %v9319_v54  ;;  %5174 = vmatprep.subr.bf16.mxu0 %v9334_v33  ;;  %v9384_v54 = vcombine.high %v1743_v53, %v1751_v51  ;;  %v1758_v33 = vld [vmem:[#allocation12 + $0x830] sm:$0xff]  ;;  %v1799_v46 = vld [vmem:[#allocation12 + $0x978] sm:$0xff]  ;;  %v9415_v51 = vcombine.low %v1775_v6, %v1783_v43 }
 0x412   :  { %5256 = vmatprep.subr.bf16.mxu1 %v9336_v37  ;;  %v1766_v37 = vld [vmem:[#allocation12 + $0x870] sm:$0xff] }
 0x413   :  { %v9397_v23 = vcombine.low %v1758_v33, %v1766_v37 }
 0x414   :  { %5175 = vmatpush1.bf16.msra.mxu0 %v9333_v45  ;;  %v9398_v45 = vcombine.high %v1758_v33, %v1766_v37  ;;  %v1807_v33 = vld [vmem:[#allocation12 + $0x9b8] sm:$0xff] }
 0x415   :  { %5257 = vmatpush1.bf16.msra.mxu1 %v9335_v60  ;;  %5176 = vmatprep.subr.bf16.mxu0 %v9350_v38  ;;  %v9400_v60 = vcombine.high %v1759_v41, %v1767_v40  ;;  %v1774_v38 = vld [vmem:[#allocation12 + $0x8b0] sm:$0xff]  ;;  %v1815_v37 = vld [vmem:[#allocation12 + $0x9f8] sm:$0xff] }
 0x416   :  { %5258 = vmatprep.subr.bf16.mxu1 %v9352_v58  ;;  %v1782_v58 = vld [vmem:[#allocation12 + $0x8f0] sm:$0xff] }
 0x417   :  { %v9413_v53 = vcombine.low %v1774_v38, %v1782_v58 }
 0x418   :  { %5177 = vmatpush1.bf16.msra.mxu0 %v9349_v15  ;;  %v9414_v15 = vcombine.high %v1774_v38, %v1782_v58  ;;  %v1831_v38 = vld [vmem:[#allocation12 + $0xa78] sm:$0xff]  ;;  %v9447_v58 = vcombine.low %v1807_v33, %v1815_v37 }
 0x419   :  { %5259 = vmatpush1.bf16.msra.mxu1 %v9351_v42  ;;  %5178 = vmatprep.subr.bf16.mxu0 %v9366_v48  ;;  %v1790_v42 = vld [vmem:[#allocation12 + $0x930] sm:$0xff] }
 0x41a   :  { %5260 = vmatprep.subr.bf16.mxu1 %v9368_v22  ;;  %v1798_v48 = vld [vmem:[#allocation12 + $0x970] sm:$0xff]  ;;  %v9416_v22 = vcombine.high %v1775_v6, %v1783_v43 }
 0x41b   :  { %v9429_v41 = vcombine.low %v1790_v42, %v1798_v48  ;;  %v2009_v6 = vld [vmem:[#allocation14 + $0x2] ss:$8 sm:$0xf] }
 0x41c   :  { %5179 = vmatpush1.bf16.msra.mxu0 %v9365_v52  ;;  %v9430_v52 = vcombine.high %v1790_v42, %v1798_v48  ;;  %v2010_v42 = vld [vmem:[#allocation14 + $0x2] ss:$8 sm:$0xf0] }
 0x41d   :  { %5261 = vmatpush1.bf16.msra.mxu1 %v9367_v47  ;;  %5180 = vmatprep.subr.bf16.mxu0 %v9382_v61  ;;  %v9432_v47 = vcombine.high %v1791_v7, %v1799_v46  ;;  %v1806_v61 = vld [vmem:[#allocation12 + $0x9b0] sm:$0xff]  ;;  %v1839_v48 = vld [vmem:[#allocation12 + $0xab8] sm:$0xff] }
 0x41e   :  { %5262 = vmatprep.subr.bf16.mxu1 %v9384_v54  ;;  %v1814_v54 = vld [vmem:[#allocation12 + $0x9f0] sm:$0xff] }
 0x41f   :  { %v9446_v40 = vcombine.high %v1806_v61, %v1814_v54 }
 0x420   :  { %5181 = vmatpush1.bf16.msra.mxu0 %v9381_v39  ;;  %v9448_v39 = vcombine.high %v1807_v33, %v1815_v37  ;;  %v1855_v33 = vld [vmem:[#allocation12 + $0xb38] sm:$0xff] }
 0x421   :  { %5263 = vmatpush1.bf16.msra.mxu1 %v9383_v35  ;;  %5191 = vmatprep.subr.bf16.mxu0 %v9398_v45  ;;  %v1822_v35 = vld [vmem:[#allocation12 + $0xa30] sm:$0xff]  ;;  %v1863_v37 = vld [vmem:[#allocation12 + $0xb78] sm:$0xff] }
 0x422   :  { %5273 = vmatprep.subr.bf16.mxu1 %v9400_v60  ;;  %v1830_v45 = vld [vmem:[#allocation12 + $0xa70] sm:$0xff]  ;;  %v1823_v60 = vld [vmem:[#allocation12 + $0xa38] sm:$0xff] }
 0x423   :  { %5183 = vmatmul.mubr.bf16.vlgmr.msra.gmra.mrb[20].mxu0 %v11100_v49  ;;  %v9464_v43 = vcombine.high %v1823_v60, %v1831_v38 }
 0x424   :  { %5265 = vmatmul.mubr.bf16.vlgmr.msra.gmra.mrb[20].mxu1 %v11100_v49  ;;  %5192 = vmatpush1.bf16.msra.mxu0 %v9397_v23  ;;  %v9431_v49 = vcombine.low %v1791_v7, %v1799_v46  ;;  %v9462_v23 = vcombine.high %v1822_v35, %v1830_v45  ;;  %v9461_v7 = vcombine.low %v1822_v35, %v1830_v45  ;;  %v11148_v46 = vsub.s32 6, %v11061_v56 }
 0x425   :  { %5223 = vmatprep.mubr.bf16.mxu0 %v11104_v55  ;;  %5274 = vmatpush1.bf16.msra.mxu1 %v9399_v31  ;;  %v1838_v31 = vld [vmem:[#allocation12 + $0xab0] sm:$0xff]  ;;  %v9496_v45 = vcombine.high %v1855_v33, %v1863_v37 }
 0x426   :  { %5305 = vmatprep.mubr.bf16.mxu1 %v11104_v55  ;;  %5193 = vmatprep.subr.bf16.mxu0 %v9414_v15  ;;  %v9445_v55 = vcombine.low %v1806_v61, %v1814_v54  ;;  %v1846_v15 = vld [vmem:[#allocation12 + $0xaf0] sm:$0xff] }
 0x427   :  { %5275 = vmatprep.subr.bf16.mxu1 %v9416_v22  ;;  %v1847_v22 = vld [vmem:[#allocation12 + $0xaf8] sm:$0xff]  ;;  %v1854_v61 = vld [vmem:[#allocation12 + $0xb30] sm:$0xff] }
 0x428   :  { %5194 = vmatpush1.bf16.msra.mxu0 %v9413_v53  ;;  %v9463_v53 = vcombine.low %v1823_v60, %v1831_v38  ;;  %v1862_v54 = vld [vmem:[#allocation12 + $0xb70] sm:$0xff] }
 0x429   :  { %5276 = vmatpush1.bf16.msra.mxu1 %v9415_v51  ;;  %5195 = vmatprep.subr.bf16.mxu0 %v9430_v52  ;;  %v9478_v51 = vcombine.high %v1838_v31, %v1846_v15  ;;  %v11150_v52 = vor.u32 %v2010_v42, %v2009_v6  ;;  %v1870_v60 = vld [vmem:[#allocation12 + $0xbb0] sm:$0xff]  ;;  %v1879_v6 = vld [vmem:[#allocation12 + $0xbf8] sm:$0xff] }
 0x42a   :  { %5277 = vmatprep.subr.bf16.mxu1 %v9432_v47  ;;  %v9480_v47 = vcombine.high %v1839_v48, %v1847_v22  ;;  %v1878_v38 = vld [vmem:[#allocation12 + $0xbf0] sm:$0xff] }
 0x42c   :  { %5196 = vmatpush1.bf16.msra.mxu0 %v9429_v41  ;;  %v2045_v41 = vrot.slane %v11150_v52, %v11148_v46 }
 0x42d   :  { %5278 = vmatpush1.bf16.msra.mxu1 %v9431_v49  ;;  %5197 = vmatprep.subr.bf16.mxu0 %v9446_v40  ;;  %v9477_v49 = vcombine.low %v1838_v31, %v1846_v15  ;;  %v9479_v40 = vcombine.low %v1839_v48, %v1847_v22  ;;  %v9493_v15 = vcombine.low %v1854_v61, %v1862_v54 }
 0x42e   :  { %5279 = vmatprep.subr.bf16.mxu1 %v9448_v39  ;;  %v9494_v39 = vcombine.high %v1854_v61, %v1862_v54  ;;  %v9528_v61 = vcombine.high %v1887_v21, %v1895_v5  ;;  %v1902_v54 = vld [vmem:[#allocation12 + $0xcb0] sm:$0xff] }
 0x430   :  { %5198 = vmatpush1.bf16.msra.mxu0 %v9445_v55 }
 0x431   :  { %5280 = vmatpush1.bf16.msra.mxu1 %v9447_v58  ;;  %5199 = vmatprep.subr.bf16.mxu0 %v9462_v23  ;;  %v1871_v23 = vld [vmem:[#allocation12 + $0xbb8] sm:$0xff] }
 0x432   :  { %5281 = vmatprep.subr.bf16.mxu1 %v9464_v43 }
 0x434   :  { %5200 = vmatpush1.bf16.msra.mxu0 %v9461_v7  ;;  %v9495_v7 = vcombine.low %v1855_v33, %v1863_v37  ;;  %v1911_v33 = vld [vmem:[#allocation12 + $0xcf8] sm:$0xff]  ;;  %v9525_v37 = vcombine.low %v1886_v30, %v1894_v14 }
 0x435   :  { %5282 = vmatpush1.bf16.msra.mxu1 %v9463_v53  ;;  %5201 = vmatprep.subr.bf16.mxu0 %v9478_v51  ;;  %v9510_v53 = vcombine.high %v1870_v60, %v1878_v38 }
 0x436   :  { %v11154_v35 = vpop.f32.mrb[12].mxu0  ;;  %5283 = vmatprep.subr.bf16.mxu1 %v9480_v47  ;;  %v9512_v47 = vcombine.high %v1871_v23, %v1879_v6 }
 0x437   :  { %v4979_v55 = vpop.f32.mrb[12].mxu1  ;;  %v11156_v58 = vpop.f32.mrb[13].mxu0 }
 0x438   :  { %v11158_v43 = vadd.f32 %v4979_v55, %v2045_v41  ;;  %v11160_v42 = vpop.f32.mrb[13].mxu1  ;;  %v4901_v31 = vpop.f32.mrb[14].mxu0  ;;  %5202 = vmatpush1.bf16.msra.mxu0 %v9477_v49  ;;  %v9509_v41 = vcombine.low %v1870_v60, %v1878_v38  ;;  %v9511_v55 = vcombine.low %v1871_v23, %v1879_v6  ;;  %v9526_v49 = vcombine.high %v1886_v30, %v1894_v14  ;;  %v1926_v60 = vld [vmem:[#allocation12 + $0xd70] sm:$0xff]  ;;  %v1919_v38 = vld [vmem:[#allocation12 + $0xd38] sm:$0xff] }
 0x439   :  { %v4983_v48 = vpop.f32.mrb[14].mxu1  ;;  %5284 = vmatpush1.bf16.msra.mxu1 %v9479_v40  ;;  %v4902_v22 = vpop.f32.mrb[15].mxu0  ;;  %5203 = vmatprep.subr.bf16.mxu0 %v9494_v39  ;;  %v1910_v40 = vld [vmem:[#allocation12 + $0xcf0] sm:$0xff]  ;;  %v1903_v39 = vld [vmem:[#allocation12 + $0xcb8] sm:$0xff] }
 0x43a   :  { %v4984_v51 = vpop.f32.mrb[15].mxu1  ;;  %5285 = vmatprep.subr.bf16.mxu1 %v9496_v45  ;;  %v9527_v45 = vcombine.low %v1887_v21, %v1895_v5  ;;  %v9542_v31 = vcombine.high %v1902_v54, %v1910_v40  ;;  %v9544_v48 = vcombine.high %v1903_v39, %v1911_v33  ;;  %v1927_v22 = vld [vmem:[#allocation12 + $0xd78] sm:$0xff]  ;;  %v9541_v23 = vcombine.low %v1902_v54, %v1910_v40  ;;  %v1942_v14 = vld [vmem:[#allocation12 + $0xdf0] sm:$0xff] }
 0x43b   :  { %v9543_v6 = vcombine.low %v1903_v39, %v1911_v33  ;;  %v1934_v51 = vld [vmem:[#allocation12 + $0xdb0] sm:$0xff]  ;;  %v1935_v30 = vld [vmem:[#allocation12 + $0xdb8] sm:$0xff]  ;;  %v9559_v21 = vcombine.low %v1919_v38, %v1927_v22 }
 0x43c   :  { %5204 = vmatpush1.bf16.msra.mxu0 %v9493_v15  ;;  %v1918_v15 = vld [vmem:[#allocation12 + $0xd30] sm:$0xff]  ;;  %v1951_v54 = vld [vmem:[#allocation12 + $0xe38] sm:$0xff]  ;;  %v9573_v39 = vcombine.low %v1934_v51, %v1942_v14 }
 0x43d   :  { %5286 = vmatpush1.bf16.msra.mxu1 %v9495_v7  ;;  %5205 = vmatprep.subr.bf16.mxu0 %v9510_v53  ;;  %v9558_v7 = vcombine.high %v1918_v15, %v1926_v60  ;;  %v9560_v53 = vcombine.high %v1919_v38, %v1927_v22  ;;  %v9557_v5 = vcombine.low %v1918_v15, %v1926_v60  ;;  %v1959_v40 = vld [vmem:[#allocation12 + $0xe78] sm:$0xff] }
 0x43e   :  { %5287 = vmatprep.subr.bf16.mxu1 %v9512_v47  ;;  %v1943_v47 = vld [vmem:[#allocation12 + $0xdf8] sm:$0xff]  ;;  %v9591_v22 = vcombine.low %v1951_v54, %v1959_v40 }
 0x43f   :  { %v9575_v33 = vcombine.low %v1935_v30, %v1943_v47  ;;  %v1967_v15 = vld [vmem:[#allocation12 + $0xeb8] sm:$0xff] }
 0x440   :  { %5206 = vmatpush1.bf16.msra.mxu0 %v9509_v41  ;;  %v9574_v41 = vcombine.high %v1934_v51, %v1942_v14  ;;  %v1975_v60 = vld [vmem:[#allocation12 + $0xef8] sm:$0xff] }
 0x441   :  { %5288 = vmatpush1.bf16.msra.mxu1 %v9511_v55  ;;  %5207 = vmatprep.subr.bf16.mxu0 %v9526_v49  ;;  %v9576_v55 = vcombine.high %v1935_v30, %v1943_v47  ;;  %v1950_v49 = vld [vmem:[#allocation12 + $0xe30] sm:$0xff]  ;;  %v1983_v51 = vld [vmem:[#allocation12 + $0xf38] sm:$0xff]  ;;  %v9607_v47 = vcombine.low %v1967_v15, %v1975_v60 }
 0x442   :  { %5289 = vmatprep.subr.bf16.mxu1 %v9528_v61  ;;  %v1958_v61 = vld [vmem:[#allocation12 + $0xe70] sm:$0xff]  ;;  %v1991_v14 = vld [vmem:[#allocation12 + $0xf78] sm:$0xff] }
 0x443   :  { %v9589_v38 = vcombine.low %v1950_v49, %v1958_v61 }
 0x444   :  { %5208 = vmatpush1.bf16.msra.mxu0 %v9525_v37  ;;  %v9590_v37 = vcombine.high %v1950_v49, %v1958_v61  ;;  %v2025_v49 = vrot.slane %v11150_v52, %v11069_v59  ;;  %v1999_v61 = vld [vmem:[#allocation12 + $0xfb8] sm:$0xff] }
 0x445   :  { %5290 = vmatpush1.bf16.msra.mxu1 %v9527_v45  ;;  %5209 = vmatprep.subr.bf16.mxu0 %v9542_v31  ;;  %v9592_v45 = vcombine.high %v1951_v54, %v1959_v40  ;;  %v1966_v31 = vld [vmem:[#allocation12 + $0xeb0] sm:$0xff]  ;;  %v2007_v54 = vld [vmem:[#allocation12 + $0xff8] sm:$0xff]  ;;  %v2033_v40 = vrot.slane %v11150_v52, %v11076_v62 }
 0x446   :  { %5291 = vmatprep.subr.bf16.mxu1 %v9544_v48  ;;  %v1974_v48 = vld [vmem:[#allocation12 + $0xef0] sm:$0xff] }
 0x447   :  { %v9605_v30 = vcombine.low %v1966_v31, %v1974_v48 }
 0x448   :  { %5210 = vmatpush1.bf16.msra.mxu0 %v9541_v23  ;;  %v9606_v23 = vcombine.high %v1966_v31, %v1974_v48  ;;  %v10019_v31 = vadd.f32 %v11135_v34, %v2025_v49  ;;  %v10021_v48 = vadd.f32 %v11137_v44, %v2033_v40  ;;  %v10394_v34 = vld [vmem:[%s11770_s4] sm:$0xff]   ;;  %v10405_v49 = vld [vmem:[%s11770_s4 + $0xd8] sm:$0xff]  }
 0x449   :  { %5292 = vmatpush1.bf16.msra.mxu1 %v9543_v6  ;;  %5211 = vmatprep.subr.bf16.mxu0 %v9558_v7  ;;  %v9608_v6 = vcombine.high %v1967_v15, %v1975_v60  ;;  %v1982_v7 = vld [vmem:[#allocation12 + $0xf30] sm:$0xff]  ;;  %v9639_v60 = vcombine.low %v1999_v61, %v2007_v54  ;;  %v10395_v44 = vld [vmem:[%s11770_s4 + $0x80] sm:$0xff]  }
 0x44a   :  { %5293 = vmatprep.subr.bf16.mxu1 %v9560_v53  ;;  %v1990_v53 = vld [vmem:[#allocation12 + $0xf70] sm:$0xff]  ;;  %v10408_v40 = vld [vmem:[%s11770_s4 + $0x60] sm:$0xff]  }
 0x44c   :  { %5212 = vmatpush1.bf16.msra.mxu0 %v9557_v5  ;;  %v9622_v5 = vcombine.high %v1982_v7, %v1990_v53 }
 0x44d   :  { %5294 = vmatpush1.bf16.msra.mxu1 %v9559_v21  ;;  %5213 = vmatprep.subr.bf16.mxu0 %v9574_v41  ;;  %v9624_v21 = vcombine.high %v1983_v51, %v1991_v14  ;;  %v1998_v41 = vld [vmem:[#allocation12 + $0xfb0] sm:$0xff] }
 0x44e   :  { %5295 = vmatprep.subr.bf16.mxu1 %v9576_v55  ;;  %v2006_v55 = vld [vmem:[#allocation12 + $0xff0] sm:$0xff] }
 0x44f   :  { %v9637_v15 = vcombine.low %v1998_v41, %v2006_v55 }
 0x450   :  { %5214 = vmatpush1.bf16.msra.mxu0 %v9573_v39  ;;  %v9621_v39 = vcombine.low %v1982_v7, %v1990_v53  ;;  %v10396_v7 = vld [vmem:[%s11770_s4 + $0x48] sm:$0xff]  }
 0x451   :  { %5296 = vmatpush1.bf16.msra.mxu1 %v9575_v33  ;;  %5215 = vmatprep.subr.bf16.mxu0 %v9590_v37  ;;  %v9623_v33 = vcombine.low %v1983_v51, %v1991_v14  ;;  %v9638_v37 = vcombine.high %v1998_v41, %v2006_v55  ;;  %v10397_v51 = vld [vmem:[%s11770_s4 + $0xc8] sm:$0xff]   ;;  %v10403_v41 = vld [vmem:[%s11770_s4 + $0x90] sm:$0xff]   ;;  %v10404_v55 = vld [vmem:[%s11770_s4 + $0x58] sm:$0xff]  }
 0x452   :  { %5297 = vmatprep.subr.bf16.mxu1 %v9592_v45  ;;  %v9640_v45 = vcombine.high %v1999_v61, %v2007_v54  ;;  %v10406_v61 = vld [vmem:[%s11770_s4 + $0x18] sm:$0xff]  }
 0x453   :  { %v10407_v54 = vld [vmem:[%s11770_s4 + $0x98] sm:$0xff]  }
 0x454   :  { %5216 = vmatpush1.bf16.msra.mxu0 %v9589_v38  ;;  %v10392_v38 = vld [vmem:[%s11770_s4 + $0x40] sm:$0xff]  }
 0x455   :  { %5298 = vmatpush1.bf16.msra.mxu1 %v9591_v22  ;;  %5217 = vmatprep.subr.bf16.mxu0 %v9606_v23  ;;  %v10393_v22 = vld [vmem:[%s11770_s4 + $0xc0] sm:$0xff]   ;;  %v5315_v23 = vmax.f32 %v10019_v31, 0.0  ;;  %v10413_v31 = vld [vmem:[%s11770_s4 + $0xe8] sm:$0xff]  }
 0x456   :  { %5299 = vmatprep.subr.bf16.mxu1 %v9608_v6  ;;  %v5317_v6 = vmax.f32 %v10021_v48, 0.0  ;;  %v11237_v48 = vsub.s32 5, %v11061_v56 }
 0x457   :  { %v5331_v53 = vpack.c.bf16 %v5315_v23, %v5315_v23  ;;  %v10416_v23 = vld [vmem:[%s11770_s4 + $0x70] sm:$0xff]  }
 0x458   :  { %5218 = vmatpush1.bf16.msra.mxu0 %v9605_v30  ;;  %v5333_v14 = vpack.c.bf16 %v5317_v6, %v5317_v6  ;;  %v10398_v30 = vld [vmem:[%s11770_s4 + $0x8] sm:$0xff]   ;;  %v2029_v6 = vrot.slane %v11150_v52, %v11083_v50 }
 0x459   :  { %5300 = vmatpush1.bf16.msra.mxu1 %v9607_v47  ;;  %5219 = vmatprep.subr.bf16.mxu0 %v9622_v5  ;;  %v10399_v47 = vld [vmem:[%s11770_s4 + $0x88] sm:$0xff]   ;;  %v10400_v5 = vld [vmem:[%s11770_s4 + $0x50] sm:$0xff]  }
 0x45a   :  { %5301 = vmatprep.subr.bf16.mxu1 %v9624_v21  ;;  %v10402_v21 = vld [vmem:[%s11770_s4 + $0x10] sm:$0xff]  }
 0x45c   :  { %5220 = vmatpush1.bf16.msra.mxu0 %v9621_v39  ;;  %v10409_v39 = vld [vmem:[%s11770_s4 + $0xe0] sm:$0xff]  }
 0x45d   :  { %5302 = vmatpush1.bf16.msra.mxu1 %v9623_v33  ;;  %5221 = vmatprep.subr.bf16.mxu0 %v9638_v37  ;;  %v10410_v33 = vld [vmem:[%s11770_s4 + $0x20] sm:$0xff]  }
 0x45e   :  { %5303 = vmatprep.subr.bf16.mxu1 %v9640_v45  ;;  %v10411_v37 = vld [vmem:[%s11770_s4 + $0xa0] sm:$0xff]   ;;  %v10412_v45 = vld [vmem:[%s11770_s4 + $0x68] sm:$0xff]  }
 0x460   :  { %5222 = vmatpush1.bf16.msra.mxu0 %v9637_v15  ;;  %v11240_v15 = vsub.s32 7, %v11061_v56 }
 0x461   :  { %5304 = vmatpush1.bf16.msra.mxu1 %v9639_v60  ;;  %9783 = vmatprep.subr.bf16.mxu0 %v10392_v38  ;;  %v10414_v60 = vld [vmem:[%s11770_s4 + $0x28] sm:$0xff]   ;;  %v2021_v38 = vrot.slane %v11150_v52, %v11064_v57 }
 0x462   :  { %9805 = vmatprep.subr.bf16.mxu1 %v10393_v22  ;;  %v10415_v22 = vld [vmem:[%s11770_s4 + $0xa8] sm:$0xff]  }
 0x463   :  { %5224 = vmatmul.mubr.bf16.vlgmr.msra.gmra.mrb[20].mxu0 %v11113_v63 }
 0x464   :  { %5306 = vmatmul.mubr.bf16.vlgmr.msra.gmra.mrb[20].mxu1 %v11113_v63  ;;  %9784 = vmatpush3.bf16.msra.mxu0 %v10394_v34  ;;  %v10401_v63 = vld [vmem:[%s11770_s4 + $0xd0] sm:$0xff]  }
 0x465   :  { %6403 = vmatprep.mubr.bf16.mxu0 %v5331_v53  ;;  %9806 = vmatpush3.bf16.msra.mxu1 %v10395_v44  ;;  %v10417_v34 = vld [vmem:[%s11770_s4 + $0xf0] sm:$0xff]   ;;  %v2041_v44 = vrot.slane %v11150_v52, %v11237_v48 }
 0x466   :  { %6443 = vmatprep.mubr.bf16.mxu1 %v5333_v14  ;;  %9785 = vmatprep.subr.bf16.mxu0 %v10396_v7  ;;  %v2049_v7 = vrot.slane %v11150_v52, %v11240_v15  ;;  %v10418_v53 = vld [vmem:[%s11770_s4 + $0x30] sm:$0xff]  }
 0x467   :  { %9807 = vmatprep.subr.bf16.mxu1 %v10397_v51  ;;  %v10018_v51 = vadd.f32 %v11131_v32, %v2021_v38  ;;  %v10419_v14 = vld [vmem:[%s11770_s4 + $0xb0] sm:$0xff]   ;;  %v10430_v38 = vld [vmem:[%s11770_s4 + $0x108] sm:$0xff]  }
 0x468   :  { %9786 = vmatpush3.bf16.msra.mxu0 %v10398_v30  ;;  %v10420_v30 = vld [vmem:[%s11770_s4 + $0x78] sm:$0xff]   ;;  %v10025_v32 = vadd.f32 %v11160_v42, %v2049_v7 }
 0x469   :  { %9808 = vmatpush3.bf16.msra.mxu1 %v10399_v47  ;;  %9787 = vmatprep.subr.bf16.mxu0 %v10400_v5  ;;  %v10020_v47 = vadd.f32 %v11133_v36, %v2029_v6  ;;  %v10421_v5 = vld [vmem:[%s11770_s4 + $0xf8] sm:$0xff]   ;;  %v10433_v6 = vld [vmem:[%s11770_s4 + $0x1d0] sm:$0xff]  }
 0x46a   :  { %9809 = vmatprep.subr.bf16.mxu1 %v10401_v63  ;;  %v10023_v63 = vadd.f32 %v11156_v58, %v2041_v44  ;;  %v10423_v36 = vld [vmem:[%s11770_s4 + $0xb8] sm:$0xff]   ;;  %v10425_v58 = vld [vmem:[%s11770_s4 + $0x1c0] sm:$0xff]   ;;  %v10435_v44 = vld [vmem:[%s11770_s4 + $0x190] sm:$0xff]  }
 0x46b   :  { %v10436_v7 = vld [vmem:[%s11770_s4 + $0x158] sm:$0xff]  }
 0x46c   :  { %9788 = vmatpush3.bf16.msra.mxu0 %v10402_v21  ;;  %v10422_v21 = vld [vmem:[%s11770_s4 + $0x38] sm:$0xff]   ;;  %v5319_v42 = vmax.f32 %v10023_v63, 0.0  ;;  %v11342_v63 = vsub.s32 4, %v11061_v56  ;;  %v10446_v56 = vld [vmem:[%s11770_s4 + $0x128] sm:$0xff]  }
 0x46d   :  { %9810 = vmatpush3.bf16.msra.mxu1 %v10403_v41  ;;  %9789 = vmatprep.subr.bf16.mxu0 %v10404_v55  ;;  %v5314_v41 = vmax.f32 %v10018_v51, 0.0  ;;  %v10424_v55 = vld [vmem:[%s11770_s4 + $0x140] sm:$0xff]   ;;  %v10438_v51 = vld [vmem:[%s11770_s4 + $0x118] sm:$0xff]  }
 0x46e   :  { %9811 = vmatprep.subr.bf16.mxu1 %v10405_v49  ;;  %v5316_v49 = vmax.f32 %v10020_v47, 0.0  ;;  %v10441_v47 = vld [vmem:[%s11770_s4 + $0x1e0] sm:$0xff]  }
 0x470   :  { %9790 = vmatpush3.bf16.msra.mxu0 %v10406_v61  ;;  %v5321_v61 = vmax.f32 %v10025_v32, 0.0  ;;  %v10443_v32 = vld [vmem:[%s11770_s4 + $0x1a0] sm:$0xff]  }
 0x471   :  { %9812 = vmatpush3.bf16.msra.mxu1 %v10407_v54  ;;  %9791 = vmatprep.subr.bf16.mxu0 %v10408_v40  ;;  %v10426_v54 = vld [vmem:[%s11770_s4 + $0x100] sm:$0xff]   ;;  %v5330_v40 = vpack.c.bf16 %v5314_v41, %v5314_v41  ;;  %v10445_v41 = vld [vmem:[%s11770_s4 + $0x1e8] sm:$0xff]  }
 0x472   :  { %9813 = vmatprep.subr.bf16.mxu1 %v10409_v39  ;;  %v10427_v39 = vld [vmem:[%s11770_s4 + $0x180] sm:$0xff]  }
 0x474   :  { %9792 = vmatpush3.bf16.msra.mxu0 %v10410_v33  ;;  %v5332_v33 = vpack.c.bf16 %v5316_v49, %v5316_v49  ;;  %v10448_v49 = vld [vmem:[%s11770_s4 + $0x170] sm:$0xff]  }
 0x475   :  { %9814 = vmatpush3.bf16.msra.mxu1 %v10411_v37  ;;  %9793 = vmatprep.subr.bf16.mxu0 %v10412_v45  ;;  %v10428_v37 = vld [vmem:[%s11770_s4 + $0x148] sm:$0xff]   ;;  %v5335_v45 = vpack.c.bf16 %v5319_v42, %v5319_v42 }
 0x476   :  { %9815 = vmatprep.subr.bf16.mxu1 %v10413_v31  ;;  %v10429_v31 = vld [vmem:[%s11770_s4 + $0x1c8] sm:$0xff]  }
 0x478   :  { %9794 = vmatpush3.bf16.msra.mxu0 %v10414_v60  ;;  %v5337_v60 = vpack.c.bf16 %v5321_v61, %v5321_v61  ;;  %v10451_v61 = vld [vmem:[%s11770_s4 + $0x1b0] sm:$0xff]  }
 0x479   :  { %9816 = vmatpush3.bf16.msra.mxu1 %v10415_v22  ;;  %9795 = vmatprep.subr.bf16.mxu0 %v10416_v23  ;;  %v10431_v22 = vld [vmem:[%s11770_s4 + $0x188] sm:$0xff]   ;;  %v10432_v23 = vld [vmem:[%s11770_s4 + $0x150] sm:$0xff]  }
 0x47a   :  { %9817 = vmatprep.subr.bf16.mxu1 %v10417_v34  ;;  %v10434_v34 = vld [vmem:[%s11770_s4 + $0x110] sm:$0xff]  }
 0x47c   :  { %9796 = vmatpush3.bf16.msra.mxu0 %v10418_v53  ;;  %v10437_v53 = vld [vmem:[%s11770_s4 + $0x1d8] sm:$0xff]  }
 0x47d   :  { %9818 = vmatpush3.bf16.msra.mxu1 %v10419_v14  ;;  %9797 = vmatprep.subr.bf16.mxu0 %v10420_v30  ;;  %v10439_v14 = vld [vmem:[%s11770_s4 + $0x198] sm:$0xff]   ;;  %v10440_v30 = vld [vmem:[%s11770_s4 + $0x160] sm:$0xff]  }
 0x47e   :  { %9819 = vmatprep.subr.bf16.mxu1 %v10421_v5  ;;  %v10442_v5 = vld [vmem:[%s11770_s4 + $0x120] sm:$0xff]  }
 0x480   :  { %9798 = vmatpush3.bf16.msra.mxu0 %v10422_v21  ;;  %v10444_v21 = vld [vmem:[%s11770_s4 + $0x168] sm:$0xff]  }
 0x481   :  { %9820 = vmatpush3.bf16.msra.mxu1 %v10423_v36  ;;  %9827 = vmatprep.subr.bf16.mxu0 %v10424_v55  ;;  %v2037_v36 = vrot.slane %v11150_v52, %v11342_v63  ;;  %v10447_v55 = vld [vmem:[%s11770_s4 + $0x1a8] sm:$0xff]   ;;  %v10450_v52 = vld [vmem:[%s11770_s4 + $0x130] sm:$0xff]  }
 0x482   :  { %9849 = vmatprep.subr.bf16.mxu1 %v10425_v58  ;;  %v10449_v58 = vld [vmem:[%s11770_s4 + $0x1f0] sm:$0xff]  }
 0x483   :  { %6404 = vmatmul.mubr.bf16.vlgmr.msra.gmra.mrb[24].mxu0 %v5330_v40  ;;  %v10022_v42 = vadd.f32 %v11154_v35, %v2037_v36  ;;  %v10453_v40 = vld [vmem:[%s11770_s4 + $0x1f8] sm:$0xff]   ;;  %v10473_v36 = vld [vmem:[%s11770_s4 + $0x2e0] sm:$0xff]  }
 0x484   :  { %6444 = vmatmul.mubr.bf16.vlgmr.msra.gmra.mrb[24].mxu1 %v5332_v33  ;;  %9828 = vmatpush3.bf16.msra.mxu0 %v10426_v54  ;;  %v10452_v54 = vld [vmem:[%s11770_s4 + $0x178] sm:$0xff]  }
 0x485   :  { %6483 = vmatprep.mubr.bf16.mxu0 %v5335_v45  ;;  %9850 = vmatpush3.bf16.msra.mxu1 %v10427_v39  ;;  %v10454_v35 = vld [vmem:[%s11770_s4 + $0x138] sm:$0xff]   ;;  %v5318_v39 = vmax.f32 %v10022_v42, 0.0  ;;  %v5320_v45 = vmax.f32 %v11158_v43, 0.0  ;;  %v10460_v43 = vld [vmem:[%s11770_s4 + $0x248] sm:$0xff]  }
 0x486   :  { %6523 = vmatprep.mubr.bf16.mxu1 %v5337_v60  ;;  %9829 = vmatprep.subr.bf16.mxu0 %v10428_v37  ;;  %v10455_v33 = vld [vmem:[%s11770_s4 + $0x1b8] sm:$0xff]   ;;  %v10456_v37 = vld [vmem:[%s11770_s4 + $0x240] sm:$0xff]   ;;  %v10477_v42 = vld [vmem:[%s11770_s4 + $0x2e8] sm:$0xff]  }
 0x487   :  { %9851 = vmatprep.subr.bf16.mxu1 %v10429_v31  ;;  %v10457_v31 = vld [vmem:[%s11770_s4 + $0x2c0] sm:$0xff]  }
 0x488   :  { %9830 = vmatpush3.bf16.msra.mxu0 %v10430_v38  ;;  %v10458_v60 = vld [vmem:[%s11770_s4 + $0x200] sm:$0xff]   ;;  %v5334_v38 = vpack.c.bf16 %v5318_v39, %v5318_v39  ;;  %v10479_v39 = vld [vmem:[%s11770_s4 + $0x2a8] sm:$0xff]  }
 0x489   :  { %9852 = vmatpush3.bf16.msra.mxu1 %v10431_v22  ;;  %9831 = vmatprep.subr.bf16.mxu0 %v10432_v23  ;;  %v10459_v22 = vld [vmem:[%s11770_s4 + $0x280] sm:$0xff]   ;;  %v5336_v23 = vpack.c.bf16 %v5320_v45, %v5320_v45 }
 0x48a   :  { %9853 = vmatprep.subr.bf16.mxu1 %v10433_v6  ;;  %v10461_v6 = vld [vmem:[%s11770_s4 + $0x2c8] sm:$0xff]  }
 0x48c   :  { %9832 = vmatpush3.bf16.msra.mxu0 %v10434_v34  ;;  %v10462_v34 = vld [vmem:[%s11770_s4 + $0x208] sm:$0xff]  }
 0x48d   :  { %9854 = vmatpush3.bf16.msra.mxu1 %v10435_v44  ;;  %9833 = vmatprep.subr.bf16.mxu0 %v10436_v7  ;;  %v10463_v44 = vld [vmem:[%s11770_s4 + $0x288] sm:$0xff]   ;;  %v10464_v7 = vld [vmem:[%s11770_s4 + $0x250] sm:$0xff]  }
 0x48e   :  { %9855 = vmatprep.subr.bf16.mxu1 %v10437_v53  ;;  %v10465_v53 = vld [vmem:[%s11770_s4 + $0x2d0] sm:$0xff]  }
 0x490   :  { %9834 = vmatpush3.bf16.msra.mxu0 %v10438_v51  ;;  %v10466_v51 = vld [vmem:[%s11770_s4 + $0x210] sm:$0xff]  }
 0x491   :  { %9856 = vmatpush3.bf16.msra.mxu1 %v10439_v14  ;;  %9835 = vmatprep.subr.bf16.mxu0 %v10440_v30  ;;  %v10467_v14 = vld [vmem:[%s11770_s4 + $0x290] sm:$0xff]   ;;  %v10468_v30 = vld [vmem:[%s11770_s4 + $0x258] sm:$0xff]  }
 0x492   :  { %9857 = vmatprep.subr.bf16.mxu1 %v10441_v47  ;;  %v10469_v47 = vld [vmem:[%s11770_s4 + $0x2d8] sm:$0xff]  }
 0x494   :  { %9836 = vmatpush3.bf16.msra.mxu0 %v10442_v5  ;;  %v10470_v5 = vld [vmem:[%s11770_s4 + $0x218] sm:$0xff]  }
 0x495   :  { %9858 = vmatpush3.bf16.msra.mxu1 %v10443_v32  ;;  %9837 = vmatprep.subr.bf16.mxu0 %v10444_v21  ;;  %v10471_v32 = vld [vmem:[%s11770_s4 + $0x298] sm:$0xff]   ;;  %v10472_v21 = vld [vmem:[%s11770_s4 + $0x260] sm:$0xff]  }
 0x496   :  { %9859 = vmatprep.subr.bf16.mxu1 %v10445_v41  ;;  %v2013_v41 = vld [vmem:[#allocation14 + $0x42] ss:$8 sm:$0xf] }
 0x498   :  { %9838 = vmatpush3.bf16.msra.mxu0 %v10446_v56  ;;  %v2014_v56 = vld [vmem:[#allocation14 + $0x42] ss:$8 sm:$0xf0] }
 0x499   :  { %9860 = vmatpush3.bf16.msra.mxu1 %v10447_v55  ;;  %9839 = vmatprep.subr.bf16.mxu0 %v10448_v49  ;;  %v10474_v55 = vld [vmem:[%s11770_s4 + $0x220] sm:$0xff]   ;;  %v11444_v49 = vor.u32 %v2014_v56, %v2013_v41  ;;  %v10486_v56 = vld [vmem:[%s11770_s4 + $0x238] sm:$0xff]  }
 0x49a   :  { %9861 = vmatprep.subr.bf16.mxu1 %v10449_v58  ;;  %v10475_v58 = vld [vmem:[%s11770_s4 + $0x2a0] sm:$0xff]  }
 0x49b   :  { %v2061_v45 = vrot.slane %v11444_v49, %v11083_v50 }
 0x49c   :  { %9840 = vmatpush3.bf16.msra.mxu0 %v10450_v52  ;;  %v10476_v52 = vld [vmem:[%s11770_s4 + $0x268] sm:$0xff]  }
 0x49d   :  { %9862 = vmatpush3.bf16.msra.mxu1 %v10451_v61  ;;  %9841 = vmatprep.subr.bf16.mxu0 %v10452_v54  ;;  %v2057_v61 = vrot.slane %v11444_v49, %v11069_v59  ;;  %v10478_v54 = vld [vmem:[%s11770_s4 + $0x228] sm:$0xff]  }
 0x49e   :  { %9863 = vmatprep.subr.bf16.mxu1 %v10453_v40  ;;  %v2053_v40 = vrot.slane %v11444_v49, %v11064_v57 }
 0x4a0   :  { %9842 = vmatpush3.bf16.msra.mxu0 %v10454_v35  ;;  %v2065_v35 = vrot.slane %v11444_v49, %v11076_v62 }
 0x4a1   :  { %9864 = vmatpush3.bf16.msra.mxu1 %v10455_v33  ;;  %9871 = vmatprep.subr.bf16.mxu0 %v10456_v37  ;;  %v10480_v33 = vld [vmem:[%s11770_s4 + $0x270] sm:$0xff]  }
 0x4a2   :  { %9893 = vmatprep.subr.bf16.mxu1 %v10457_v31  ;;  %v10481_v31 = vld [vmem:[%s11770_s4 + $0x2f0] sm:$0xff]  }
 0x4a3   :  { %6484 = vmatmul.mubr.bf16.vlgmr.msra.gmra.mrb[28].mxu0 %v5334_v38 }
 0x4a4   :  { %6524 = vmatmul.mubr.bf16.vlgmr.msra.gmra.mrb[28].mxu1 %v5336_v23  ;;  %9872 = vmatpush3.bf16.msra.mxu0 %v10458_v60 }
 0x4a5   :  { %9894 = vmatpush3.bf16.msra.mxu1 %v10459_v22  ;;  %9873 = vmatprep.subr.bf16.mxu0 %v10460_v43 }
 0x4a6   :  { %9895 = vmatprep.subr.bf16.mxu1 %v10461_v6  ;;  %v10482_v6 = vld [vmem:[%s11770_s4 + $0x230] sm:$0xff]  }
 0x4a8   :  { %9874 = vmatpush3.bf16.msra.mxu0 %v10462_v34 }
 0x4a9   :  { %9896 = vmatpush3.bf16.msra.mxu1 %v10463_v44  ;;  %9875 = vmatprep.subr.bf16.mxu0 %v10464_v7 }
 0x4aa   :  { %9897 = vmatprep.subr.bf16.mxu1 %v10465_v53 }
 0x4ac   :  { %9876 = vmatpush3.bf16.msra.mxu0 %v10466_v51  ;;  %v10483_v51 = vld [vmem:[%s11770_s4 + $0x2b0] sm:$0xff]  }
 0x4ad   :  { %9898 = vmatpush3.bf16.msra.mxu1 %v10467_v14  ;;  %9877 = vmatprep.subr.bf16.mxu0 %v10468_v30  ;;  %v10484_v14 = vld [vmem:[%s11770_s4 + $0x278] sm:$0xff]  }
 0x4ae   :  { %9899 = vmatprep.subr.bf16.mxu1 %v10469_v47 }
 0x4b0   :  { %9878 = vmatpush3.bf16.msra.mxu0 %v10470_v5 }
 0x4b1   :  { %9900 = vmatpush3.bf16.msra.mxu1 %v10471_v32  ;;  %9879 = vmatprep.subr.bf16.mxu0 %v10472_v21  ;;  %v10485_v32 = vld [vmem:[%s11770_s4 + $0x2f8] sm:$0xff]  }
 0x4b2   :  { %9901 = vmatprep.subr.bf16.mxu1 %v10473_v36 }
 0x4b4   :  { %9880 = vmatpush3.bf16.msra.mxu0 %v10474_v55 }
 0x4b5   :  { %9902 = vmatpush3.bf16.msra.mxu1 %v10475_v58  ;;  %9881 = vmatprep.subr.bf16.mxu0 %v10476_v52  ;;  %v10487_v58 = vld [vmem:[%s11770_s4 + $0x2b8] sm:$0xff]   ;;  %v10488_v52 = vld [vmem:[%s11770_s4 + $0x340] sm:$0xff]  }
 0x4b6   :  { %v5061_v37 = vpop.f32.mrb[16].mxu0  ;;  %9903 = vmatprep.subr.bf16.mxu1 %v10477_v42 }
 0x4b7   :  { %v5143_v60 = vpop.f32.mrb[16].mxu1  ;;  %v5063_v38 = vpop.f32.mrb[17].mxu0  ;;  %v10026_v34 = vadd.f32 %v5061_v37, %v2053_v40  ;;  %v10493_v37 = vld [vmem:[%s11770_s4 + $0x3c8] sm:$0xff]  }
 0x4b8   :  { %v10027_v22 = vadd.f32 %v5063_v38, %v2057_v61  ;;  %v5145_v43 = vpop.f32.mrb[17].mxu1  ;;  %v5065_v23 = vpop.f32.mrb[18].mxu0  ;;  %9882 = vmatpush3.bf16.msra.mxu0 %v10478_v54  ;;  %v10028_v30 = vadd.f32 %v5143_v60, %v2061_v45  ;;  %v10489_v61 = vld [vmem:[%s11770_s4 + $0x3c0] sm:$0xff]   ;;  %v10494_v45 = vld [vmem:[%s11770_s4 + $0x308] sm:$0xff]   ;;  %v10496_v60 = vld [vmem:[%s11770_s4 + $0x350] sm:$0xff]  }
 0x4b9   :  { %v10029_v44 = vadd.f32 %v5145_v43, %v2065_v35  ;;  %v5147_v7 = vpop.f32.mrb[18].mxu1  ;;  %9904 = vmatpush3.bf16.msra.mxu1 %v10479_v39  ;;  %v5066_v53 = vpop.f32.mrb[19].mxu0  ;;  %9883 = vmatprep.subr.bf16.mxu0 %v10480_v33  ;;  %v5322_v36 = vmax.f32 %v10026_v34, 0.0  ;;  %v10490_v54 = vld [vmem:[%s11770_s4 + $0x300] sm:$0xff]   ;;  %v10492_v39 = vld [vmem:[%s11770_s4 + $0x348] sm:$0xff]   ;;  %v10497_v38 = vld [vmem:[%s11770_s4 + $0x3d0] sm:$0xff]  }
 0x4ba   :  { %v5323_v47 = vmax.f32 %v10027_v22, 0.0  ;;  %v5148_v5 = vpop.f32.mrb[19].mxu1  ;;  %9905 = vmatprep.subr.bf16.mxu1 %v10481_v31  ;;  %v5324_v42 = vmax.f32 %v10028_v30, 0.0  ;;  %v10491_v35 = vld [vmem:[%s11770_s4 + $0x380] sm:$0xff]   ;;  %v10495_v31 = vld [vmem:[%s11770_s4 + $0x388] sm:$0xff]   ;;  %v10498_v22 = vld [vmem:[%s11770_s4 + $0x310] sm:$0xff]  }
 0x4bb   :  { %v5325_v21 = vmax.f32 %v10029_v44, 0.0  ;;  %v5338_v40 = vpack.c.bf16 %v5322_v36, %v5322_v36  ;;  %v10499_v43 = vld [vmem:[%s11770_s4 + $0x390] sm:$0xff]   ;;  %v10500_v23 = vld [vmem:[%s11770_s4 + $0x358] sm:$0xff]   ;;  %v10504_v7 = vld [vmem:[%s11770_s4 + $0x360] sm:$0xff]  }
 0x4bc   :  { %v5339_v41 = vpack.c.bf16 %v5323_v47, %v5323_v47  ;;  %9884 = vmatpush3.bf16.msra.mxu0 %v10482_v6  ;;  %v5340_v33 = vpack.c.bf16 %v5324_v42, %v5324_v42  ;;  %v10501_v6 = vld [vmem:[%s11770_s4 + $0x3d8] sm:$0xff]   ;;  %v10505_v53 = vld [vmem:[%s11770_s4 + $0x3e0] sm:$0xff]   ;;  %v10508_v30 = vld [vmem:[%s11770_s4 + $0x368] sm:$0xff]  }
 0x4bd   :  { %v5341_v55 = vpack.c.bf16 %v5325_v21, %v5325_v21  ;;  %9906 = vmatpush3.bf16.msra.mxu1 %v10483_v51  ;;  %9885 = vmatprep.subr.bf16.mxu0 %v10484_v14  ;;  %v10502_v34 = vld [vmem:[%s11770_s4 + $0x318] sm:$0xff]   ;;  %v10506_v51 = vld [vmem:[%s11770_s4 + $0x320] sm:$0xff]   ;;  %v10509_v47 = vld [vmem:[%s11770_s4 + $0x3e8] sm:$0xff]  }
 0x4be   :  { %6563 = vmatprep.mubr.bf16.mxu0 %v5339_v41  ;;  %9907 = vmatprep.subr.bf16.mxu1 %v10485_v32  ;;  %v10503_v44 = vld [vmem:[%s11770_s4 + $0x398] sm:$0xff]   ;;  %v10507_v14 = vld [vmem:[%s11770_s4 + $0x3a0] sm:$0xff]   ;;  %v10510_v5 = vld [vmem:[%s11770_s4 + $0x328] sm:$0xff]  }
 0x4bf   :  { %6603 = vmatprep.mubr.bf16.mxu1 %v5341_v55  ;;  %v10511_v32 = vld [vmem:[%s11770_s4 + $0x3a8] sm:$0xff]   ;;  %v10512_v21 = vld [vmem:[%s11770_s4 + $0x370] sm:$0xff]   ;;  %v10516_v55 = vld [vmem:[%s11770_s4 + $0x378] sm:$0xff]  }
 0x4c0   :  { %9886 = vmatpush3.bf16.msra.mxu0 %v10486_v56  ;;  %v10513_v41 = vld [vmem:[%s11770_s4 + $0x3f0] sm:$0xff]   ;;  %v10519_v42 = vld [vmem:[%s11770_s4 + $0x3b8] sm:$0xff]  }
 0x4c1   :  { %9908 = vmatpush3.bf16.msra.mxu1 %v10487_v58  ;;  %9915 = vmatprep.subr.bf16.mxu0 %v10488_v52  ;;  %v10514_v56 = vld [vmem:[%s11770_s4 + $0x330] sm:$0xff]   ;;  %v10517_v58 = vld [vmem:[%s11770_s4 + $0x3f8] sm:$0xff]  }
 0x4c2   :  { %9937 = vmatprep.subr.bf16.mxu1 %v10489_v61  ;;  %v10515_v36 = vld [vmem:[%s11770_s4 + $0x3b0] sm:$0xff]   ;;  %v10518_v52 = vld [vmem:[%s11770_s4 + $0x338] sm:$0xff]   ;;  %v2069_v61 = vrot.slane %v11444_v49, %v11342_v63 }
 0x4c3   :  { %6564 = vmatmul.mubr.bf16.vlgmr.msra.gmra.mrb[32].mxu0 %v5338_v40  ;;  %v2073_v40 = vrot.slane %v11444_v49, %v11237_v48 }
 0x4c4   :  { %6604 = vmatmul.mubr.bf16.vlgmr.msra.gmra.mrb[32].mxu1 %v5340_v33  ;;  %9916 = vmatpush3.bf16.msra.mxu0 %v10490_v54  ;;  %v2077_v54 = vrot.slane %v11444_v49, %v11148_v46 }
 0x4c5   :  { %9938 = vmatpush3.bf16.msra.mxu1 %v10491_v35  ;;  %9917 = vmatprep.subr.bf16.mxu0 %v10492_v39  ;;  %v2081_v35 = vrot.slane %v11444_v49, %v11240_v15 }
 0x4c6   :  { %9939 = vmatprep.subr.bf16.mxu1 %v10493_v37 }
 0x4c8   :  { %9918 = vmatpush3.bf16.msra.mxu0 %v10494_v45 }
 0x4c9   :  { %9940 = vmatpush3.bf16.msra.mxu1 %v10495_v31  ;;  %9919 = vmatprep.subr.bf16.mxu0 %v10496_v60 }
 0x4ca   :  { %9941 = vmatprep.subr.bf16.mxu1 %v10497_v38 }
 0x4cc   :  { %9920 = vmatpush3.bf16.msra.mxu0 %v10498_v22 }
 0x4cd   :  { %9942 = vmatpush3.bf16.msra.mxu1 %v10499_v43  ;;  %9921 = vmatprep.subr.bf16.mxu0 %v10500_v23 }
 0x4ce   :  { %9943 = vmatprep.subr.bf16.mxu1 %v10501_v6 }
 0x4d0   :  { %9922 = vmatpush3.bf16.msra.mxu0 %v10502_v34 }
 0x4d1   :  { %9944 = vmatpush3.bf16.msra.mxu1 %v10503_v44  ;;  %9923 = vmatprep.subr.bf16.mxu0 %v10504_v7 }
 0x4d2   :  { %9945 = vmatprep.subr.bf16.mxu1 %v10505_v53 }
 0x4d4   :  { %9924 = vmatpush3.bf16.msra.mxu0 %v10506_v51 }
 0x4d5   :  { %9946 = vmatpush3.bf16.msra.mxu1 %v10507_v14  ;;  %9925 = vmatprep.subr.bf16.mxu0 %v10508_v30 }
 0x4d6   :  { %9947 = vmatprep.subr.bf16.mxu1 %v10509_v47 }
 0x4d8   :  { %9926 = vmatpush3.bf16.msra.mxu0 %v10510_v5 }
 0x4d9   :  { %9948 = vmatpush3.bf16.msra.mxu1 %v10511_v32  ;;  %9927 = vmatprep.subr.bf16.mxu0 %v10512_v21  ;;  %v5602_v21 = vld [vmem:[#allocation14 + $0x3] ss:$0 sm:$0xff] }
 0x4da   :  { %9949 = vmatprep.subr.bf16.mxu1 %v10513_v41 }
 0x4dc   :  { %9928 = vmatpush3.bf16.msra.mxu0 %v10514_v56 }
 0x4dd   :  { %9950 = vmatpush3.bf16.msra.mxu1 %v10515_v36  ;;  %9929 = vmatprep.subr.bf16.mxu0 %v10516_v55 }
 0x4de   :  { %9951 = vmatprep.subr.bf16.mxu1 %v10517_v58 }
 0x4e0   :  { %9930 = vmatpush3.bf16.msra.mxu0 %v10518_v52 }
 0x4e1   :  { %9952 = vmatpush3.bf16.msra.mxu1 %v10519_v42 }
 0x536   :  { %v5225_v39 = vpop.f32.mrb[20].mxu0 }
 0x537   :  { %v10030_v33 = vadd.f32 %v5225_v39, %v2069_v61  ;;  %v5307_v37 = vpop.f32.mrb[20].mxu1  ;;  %v5227_v45 = vpop.f32.mrb[21].mxu0 }
 0x538   :  { %v10032_v31 = vadd.f32 %v5307_v37, %v2077_v54  ;;  %v10031_v60 = vadd.f32 %v5227_v45, %v2073_v40  ;;  %v5309_v38 = vpop.f32.mrb[21].mxu1  ;;  %v5229_v22 = vpop.f32.mrb[22].mxu0 }
 0x539   :  { %v5326_v43 = vmax.f32 %v10030_v33, 0.0  ;;  %v10033_v23 = vadd.f32 %v5309_v38, %v2081_v35  ;;  %v5311_v6 = vpop.f32.mrb[22].mxu1  ;;  %v5230_v34 = vpop.f32.mrb[23].mxu0 }
 0x53a   :  { %v5328_v44 = vmax.f32 %v10032_v31, 0.0  ;;  %v5327_v7 = vmax.f32 %v10031_v60, 0.0  ;;  %v5312_v53 = vpop.f32.mrb[23].mxu1 }
 0x53b   :  { %v5329_v51 = vmax.f32 %v10033_v23, 0.0  ;;  %v5342_v30 = vpack.c.bf16 %v5326_v43, %v5326_v43 }
 0x53c   :  { %v5343_v14 = vpack.c.bf16 %v5327_v7, %v5327_v7  ;;  %v5344_v49 = vpack.c.bf16 %v5328_v44, %v5328_v44  ;;  %v6693_v44 = vld [vmem:[#allocation15] sm:$0xff]  ;;  %v6694_v7 = vld [vmem:[#allocation15 + $0x8] sm:$0xff] }
 0x53d   :  { %v5345_v47 = vpack.c.bf16 %v5329_v51, %v5329_v51 }
 0x53e   :  { %6643 = vmatprep.mubr.bf16.mxu0 %v5343_v14  ;;  %v6697_v14 = vpack.c.bf16 %v6694_v7, %v6693_v44  ;;  %v9770_v44 = vld [vmem:[#allocation15 + $0x20] ss:$0 sm:$0xff] }
 0x53f   :  { %6683 = vmatprep.mubr.bf16.mxu1 %v5345_v47  ;;  %6644 = vmatmul.mubr.bf16.vlgmr.msra.gmra.mrb[36].mxu0 %v5342_v30 }
 0x540   :  { %6684 = vmatmul.mubr.bf16.vlgmr.msra.gmra.mrb[36].mxu1 %v5344_v49 }
 0x556   :  { %v9799_v5 = vpop.f32.mrb[24].mxu0 }
 0x557   :  { %v9821_v32 = vpop.f32.mrb[24].mxu1  ;;  %v9800_v41 = vpop.f32.mrb[25].mxu0 }
 0x558   :  { %v9801_v56 = vadd.f32 %v9800_v41, %v9799_v5  ;;  %v9822_v36 = vpop.f32.mrb[25].mxu1  ;;  %v9802_v55 = vpop.f32.mrb[26].mxu0  ;;  %v10704_v5 = vmov 0.0  }
 0x559   :  { %v9823_v58 = vadd.f32 %v9822_v36, %v9821_v32  ;;  %v9824_v52 = vpop.f32.mrb[26].mxu1  ;;  %v9803_v42 = vpop.f32.mrb[27].mxu0  ;;  %10006 = vmatprep.subr.bf16.mxu0 %v10704_v5  ;;  %v6695_v55 = vld [vmem:[#allocation15 + $0x10] sm:$0xff]  ;;  %10010 = vmatprep.mubr.msk.bf16.mxu0 %vm10705_vm1, %v10704_v5 }
 0x55a   :  { %v6406_v61 = vadd.f32 %v9801_v56, %v5602_v21  ;;  %v9825_v54 = vpop.f32.mrb[27].mxu1  ;;  %10007 = vmatpush3.bf16.msra.mxu0 %v6697_v14 }
 0x55b   :  { %10008 = vmatprep.subr.bf16.mxu0 %v10704_v5 }
 0x55c   :  { %v6446_v40 = vadd.f32 %v9823_v58, %v6406_v61  ;;  %v6696_v58 = vld [vmem:[#allocation15 + $0x18] sm:$0xff] }
 0x55d   :  { %v6698_v52 = vpack.c.bf16 %v6696_v58, %v6695_v55 }
 0x55f   :  { %10009 = vmatpush3.bf16.msra.mxu0 %v6698_v52 }
 0x576   :  { %v9843_v35 = vpop.f32.mrb[28].mxu0 }
 0x577   :  { %v9865_v39 = vpop.f32.mrb[28].mxu1  ;;  %v9844_v33 = vpop.f32.mrb[29].mxu0 }
 0x578   :  { %v9845_v37 = vadd.f32 %v9844_v33, %v9843_v35  ;;  %v9866_v45 = vpop.f32.mrb[29].mxu1  ;;  %v9846_v31 = vpop.f32.mrb[30].mxu0 }
 0x579   :  { %v9867_v60 = vadd.f32 %v9866_v45, %v9865_v39  ;;  %v9868_v38 = vpop.f32.mrb[30].mxu1  ;;  %v9847_v22 = vpop.f32.mrb[31].mxu0 }
 0x57a   :  { %v6486_v43 = vadd.f32 %v9845_v37, %v6446_v40  ;;  %v9869_v23 = vpop.f32.mrb[31].mxu1 }
 0x57c   :  { %v6526_v6 = vadd.f32 %v9867_v60, %v6486_v43 }
 0x596   :  { %v9887_v34 = vpop.f32.mrb[32].mxu0 }
 0x597   :  { %v9909_v53 = vpop.f32.mrb[32].mxu1  ;;  %v9888_v51 = vpop.f32.mrb[33].mxu0 }
 0x598   :  { %v9889_v30 = vadd.f32 %v9888_v51, %v9887_v34  ;;  %v9910_v47 = vpop.f32.mrb[33].mxu1  ;;  %v9890_v49 = vpop.f32.mrb[34].mxu0 }
 0x599   :  { %v9911_v32 = vadd.f32 %v9910_v47, %v9909_v53  ;;  %v9912_v21 = vpop.f32.mrb[34].mxu1  ;;  %v9891_v41 = vpop.f32.mrb[35].mxu0 }
 0x59a   :  { %v6566_v56 = vadd.f32 %v9889_v30, %v6526_v6  ;;  %v9913_v36 = vpop.f32.mrb[35].mxu1 }
 0x59c   :  { %v6606_v42 = vadd.f32 %v9911_v32, %v6566_v56 }
 0x612   :  { %v9931_v61 = vpop.f32.mrb[36].mxu0 }
 0x613   :  { %v9953_v54 = vpop.f32.mrb[36].mxu1  ;;  %v9932_v40 = vpop.f32.mrb[37].mxu0 }
 0x614   :  { %v9933_v35 = vadd.f32 %v9932_v40, %v9931_v61  ;;  %v9954_v39 = vpop.f32.mrb[37].mxu1  ;;  %v9934_v33 = vpop.f32.mrb[38].mxu0 }
 0x615   :  { %v9955_v37 = vadd.f32 %v9954_v39, %v9953_v54  ;;  %v9956_v45 = vpop.f32.mrb[38].mxu1  ;;  %v9935_v31 = vpop.f32.mrb[39].mxu0 }
 0x616   :  { %v6646_v60 = vadd.f32 %v9933_v35, %v6606_v42  ;;  %v9957_v38 = vpop.f32.mrb[39].mxu1 }
 0x618   :  { %v6686_v22 = vadd.f32 %v9955_v37, %v6646_v60 }
 0x61a   :  { %v6691_v43 = vmax.f32 %v6686_v22, 0.0 }
 0x61c   :  { %v11597_v23 = vpack.c.bf16 %v6691_v43, %v6691_v43  ;;  %v6700_v6 = vmul.f32 %v6691_v43, %v6691_v43 }
 0x61e   :  { %10011 = vmatmul.mubr.msk.bf16.vlgmr.msra.gmra.mrb[40].mxu0 %vm6701_vm2, %v11597_v23  ;;  %v6702_v34 = vsel %vm6701_vm2, %v6700_v6, 0.0 }
 0x61f   :  { %6703 = vadd.xlane.f32.xlu0 %v6702_v34 }
 0x6ac   :  { %v6704_v7 = vpop.xlane.xlu0 %6703 }
 0x6ad   :  { %v6752_v51 = vadd.f32 %v9770_v44, %v6704_v7 }
 0x6f1   :  { %v6742_v53 = vpop.f32.mrb[40].mxu0 }
 0x6f2   :  { %v6753_v14 = vmul.f32 2.0, %v6742_v53  ;;  %v10012_v30 = vpop.f32.mrb[41].mxu0 }
 0x6f3   :  { %v6745_v47 = vpop.f32.mrb[42].mxu0 }
 0x6f4   :  { %v6754_v49 = vsub.f32 %v6752_v51, %v6753_v14  ;;  %v10013_v5 = vpop.f32.mrb[43].mxu0 }
 0x6f6   :  { %v6755_v32 = vmax.f32 %v6754_v49, 0.0 }
 0x6f8   :  { %v6756_v21 = vadd.f32 1.0, %v6755_v32 }
 0x6fa   :  { %10520 = vrcp.f32 %v6756_v21 }
 0x704   :  { %v10521_v41 = vpop.eup %10520 }
 0x705   :  { %v6760_v56 = vsel %vm6759_vm3, %v10521_v41, 0.0 }
 0x706   :  { %6761 = vadd.xlane.f32.xlu0 %v6760_v56 }
 0x793   :  { %v6762_v36 = vpop.xlane.xlu0 %6761 }
 0x794   :  { %10522 = vrcp.f32 %v6762_v36 }
 0x79e   :  { %v10523_v55 = vpop.eup %10522 }
 0x79f   :  { %v11603_v58 = vmul.f32 %v10523_v55, %v10521_v41 }
 0x7a1   :  { %v6765_v52 = vsel %vm6759_vm3, %v11603_v58, 0.0  ;;  %v6772_v35 = vmul.f32 1.442695, %v11603_v58 }
 0x7a2   :  { %v6766_v42 = vrot.slane %v6765_v52, 4 }
 0x7a3   :  { %10524 = vpow2.f32 %v6772_v35 }
 0x7a4   :  { %v6767_v61 = vadd.f32 %v6766_v42, %v6765_v52 }
 0x7a6   :  { %v6768_v54 = vrot.slane %v6767_v61, 2 }
 0x7a8   :  { %v6769_v40 = vadd.f32 %v6768_v54, %v6767_v61 }
 0x7aa   :  { %v6770_v39 = vrot.slane %v6769_v40, 1 }
 0x7ac   :  { %v6771_v33 = vadd.f32 %v6770_v39, %v6769_v40 }
 0x7ad   :  { %v10525_v37 = vpop.eup %10524 }
 0x7ae   :  { %10526 = vrcp.f32 %v6771_v33 }
 0x7b8   :  { %v10527_v45 = vpop.eup %10526 }
 0x7b9   :  { %v6775_v31 = vmul.f32 %v10527_v45, %v10525_v37 }
 0x7bb   :  { %v6776_v60 = vsel %vm6759_vm3, %v6775_v31, 0.0 }
 0x7bc   :  { %6777 = vadd.xlane.f32.xlu1 %v6776_v60 }
 0x849   :  { %v6778_v38 = vpop.xlane.xlu1 %6777 }
 0x84a   :  { %10528 = vrcp.f32 %v6778_v38 }
 0x854   :  { %v10529_v22 = vpop.eup %10528 }
 0x855   :  { %v11609_v6 = vmul.f32 %v10529_v22, %v6775_v31 }
 0x856   :  { %10670 = dma.done.wait [#allocation6], 4096 }
 0x857   :  { %10671 = vsyncadd [#allocation6], 4294963200 }
 0x858   :  { %10672 = dma.done.wait [#allocation6 + $0x1], 65536 }
 0x859   :  { %10673 = vsyncadd [#allocation6 + $0x1], 4294901760 }
 0x85a   :  { %10674 = dma.done.wait [#allocation6 + $0x2], 16384 }
 0x85b   :  { %10675 = vsyncadd [#allocation6 + $0x2], 4294950912 }
 0x85c   :  { %10676 = dma.done.wait [#allocation6 + $0x3], 4096 }
 0x85d   :  { %10677 = vsyncadd [#allocation6 + $0x3], 4294963200  ;;  %v11790_v34 = vmov 0   ;;  %8915 = vrot.lane.b32.xlu0 %v6691_v43, %s10683_s18  ;;  %v6797_v44 = vld [vmem:[#allocation2 + $0x8] sm:$0xff]  ;;  %v6796_v7 = vld [vmem:[#allocation2] sm:$0xff]  ;;  %s10706_s4 = smov 96  }
 0x85e   :  { %6950 = vmatprep.mubr.bf16.mxu1 %v11790_v34  ;;  %6991 = vmatprep.mubr.bf16.mxu0 %v11790_v34  ;;  %v6813_v53 = vld [vmem:[#allocation2 + $0x88] sm:$0xff]  ;;  %v6799_v51 = vld [vmem:[#allocation2 + $0x18] sm:$0xff]  ;;  %v6798_v14 = vld [vmem:[#allocation2 + $0x10] sm:$0xff]  ;;  %s10707_s18 = smov 106   ;;  %vm8927_vm4 = vcmask 785408   ;;  %vm8929_vm5 = vcmask 867328  }
 0x85f   :  { %6918 = vmatprep.subr.bf16.mxu1 %v6797_v44  ;;  %6959 = vmatprep.subr.bf16.mxu0 %v6799_v51  ;;  %v6815_v30 = vld [vmem:[#allocation2 + $0x98] sm:$0xff]  ;;  %v6812_v47 = vld [vmem:[#allocation2 + $0x80] sm:$0xff]  ;;  %v6814_v49 = vld [vmem:[#allocation2 + $0x90] sm:$0xff]  ;;  %vm8931_vm6 = vcmask 949248  }
 0x860   :  { %6919 = vmatpush1.bf16.msra.mxu1 %v6796_v7  ;;  %6960 = vmatpush1.bf16.msra.mxu0 %v6798_v14  ;;  %v6801_v5 = vld [vmem:[#allocation2 + $0x28] sm:$0xff]  ;;  %v6803_v32 = vld [vmem:[#allocation2 + $0x38] sm:$0xff]  ;;  %v6800_v43 = vld [vmem:[#allocation2 + $0x20] sm:$0xff] }
 0x861   :  { %6920 = vmatprep.subr.bf16.mxu1 %v6813_v53  ;;  %6961 = vmatprep.subr.bf16.mxu0 %v6815_v30  ;;  %v6817_v21 = vld [vmem:[#allocation2 + $0xa8] sm:$0xff]  ;;  %v6802_v41 = vld [vmem:[#allocation2 + $0x30] sm:$0xff]  ;;  %v6819_v56 = vld [vmem:[#allocation2 + $0xb8] sm:$0xff] }
 0x862   :  { %v6816_v36 = vld [vmem:[#allocation2 + $0xa0] sm:$0xff]  ;;  %v6805_v55 = vld [vmem:[#allocation2 + $0x48] sm:$0xff]  ;;  %v6818_v52 = vld [vmem:[#allocation2 + $0xb0] sm:$0xff]  ;;  %8919 = vrot.lane.b32.xlu0 %v11609_v6, %s10706_s4  ;;  %8923 = vrot.lane.b32.xlu1 %v11603_v58, %s10707_s18 }
 0x863   :  { %v6807_v42 = vld [vmem:[#allocation2 + $0x58] sm:$0xff]  ;;  %v6804_v61 = vld [vmem:[#allocation2 + $0x40] sm:$0xff]  ;;  %v6821_v54 = vld [vmem:[#allocation2 + $0xc8] sm:$0xff] }
 0x864   :  { %6921 = vmatpush1.bf16.msra.mxu1 %v6812_v47  ;;  %6962 = vmatpush1.bf16.msra.mxu0 %v6814_v49  ;;  %v6806_v40 = vld [vmem:[#allocation2 + $0x50] sm:$0xff]  ;;  %v6823_v35 = vld [vmem:[#allocation2 + $0xd8] sm:$0xff]  ;;  %v6820_v39 = vld [vmem:[#allocation2 + $0xc0] sm:$0xff] }
 0x865   :  { %7000 = vmatprep.subr.bf16.mxu1 %v6801_v5  ;;  %7041 = vmatprep.subr.bf16.mxu0 %v6803_v32  ;;  %v6809_v33 = vld [vmem:[#allocation2 + $0x68] sm:$0xff]  ;;  %v6822_v37 = vld [vmem:[#allocation2 + $0xd0] sm:$0xff]  ;;  %v6811_v45 = vld [vmem:[#allocation2 + $0x78] sm:$0xff] }
 0x866   :  { %v6808_v31 = vld [vmem:[#allocation2 + $0x60] sm:$0xff]  ;;  %v6825_v60 = vld [vmem:[#allocation2 + $0xe8] sm:$0xff]  ;;  %v6810_v38 = vld [vmem:[#allocation2 + $0x70] sm:$0xff] }
 0x867   :  { %9771 = vmatmul.mubr.msk.bf16.vlgmr.msra.gmra.mrb[40].mxu1 %vm6701_vm2, %v11597_v23  ;;  %9772 = vmatmul.mubr.msk.bf16.vlgmr.msra.gmra.mrb[44].mxu0 %vm6701_vm2, %v11597_v23  ;;  %v6827_v22 = vld [vmem:[#allocation2 + $0xf8] sm:$0xff]  ;;  %v6824_v44 = vld [vmem:[#allocation2 + $0xe0] sm:$0xff]  ;;  %v7279_v7 = vld [vmem:[#allocation3 + $0x8] sm:$0xff] }
 0x868   :  { %7001 = vmatpush1.bf16.msra.mxu1 %v6800_v43  ;;  %7032 = vmatprep.mubr.bf16.mxu1 %v11790_v34  ;;  %v6826_v53 = vld [vmem:[#allocation2 + $0xf0] sm:$0xff]  ;;  %v7281_v51 = vld [vmem:[#allocation3 + $0x18] sm:$0xff]  ;;  %v7278_v14 = vld [vmem:[#allocation3] sm:$0xff] }
 0x869   :  { %7002 = vmatprep.subr.bf16.mxu1 %v6817_v21  ;;  %7042 = vmatpush1.bf16.msra.mxu0 %v6802_v41  ;;  %v7283_v30 = vld [vmem:[#allocation3 + $0x28] sm:$0xff]  ;;  %v7280_v47 = vld [vmem:[#allocation3 + $0x10] sm:$0xff]  ;;  %v7285_v49 = vld [vmem:[#allocation3 + $0x38] sm:$0xff] }
 0x86a   :  { %7073 = vmatprep.mubr.bf16.mxu0 %v11790_v34  ;;  %7043 = vmatprep.subr.bf16.mxu0 %v6819_v56  ;;  %v7287_v5 = vld [vmem:[#allocation3 + $0x48] sm:$0xff]  ;;  %v7284_v32 = vld [vmem:[#allocation3 + $0x30] sm:$0xff]  ;;  %v7289_v43 = vld [vmem:[#allocation3 + $0x58] sm:$0xff] }
 0x86b   :  { %v7286_v21 = vld [vmem:[#allocation3 + $0x40] sm:$0xff]  ;;  %v7291_v41 = vld [vmem:[#allocation3 + $0x68] sm:$0xff]  ;;  %v7288_v56 = vld [vmem:[#allocation3 + $0x50] sm:$0xff] }
 0x86c   :  { %7003 = vmatpush1.bf16.msra.mxu1 %v6816_v36  ;;  %v7293_v36 = vld [vmem:[#allocation3 + $0x78] sm:$0xff] }
 0x86d   :  { %7082 = vmatprep.subr.bf16.mxu1 %v6805_v55  ;;  %7044 = vmatpush1.bf16.msra.mxu0 %v6818_v52  ;;  %v7290_v55 = vld [vmem:[#allocation3 + $0x60] sm:$0xff]  ;;  %v7292_v52 = vld [vmem:[#allocation3 + $0x70] sm:$0xff] }
 0x86e   :  { %7123 = vmatprep.subr.bf16.mxu0 %v6807_v42  ;;  %v7297_v42 = vld [vmem:[#allocation3 + $0x98] sm:$0xff] }
 0x86f   :  { %9773 = vmatmul.mubr.msk.bf16.vlgmr.msra.gmra.mrb[44].mxu1 %vm6701_vm2, %v11597_v23 }
 0x870   :  { %7083 = vmatpush1.bf16.msra.mxu1 %v6804_v61  ;;  %7114 = vmatprep.mubr.bf16.mxu1 %v11790_v34  ;;  %v7294_v61 = vld [vmem:[#allocation3 + $0x80] sm:$0xff] }
 0x871   :  { %9774 = vmatmul.mubr.msk.bf16.vlgmr.msra.gmra.mrb[48].mxu0 %vm6701_vm2, %v11597_v23  ;;  %7084 = vmatprep.subr.bf16.mxu1 %v6821_v54  ;;  %v7299_v54 = vld [vmem:[#allocation3 + $0xa8] sm:$0xff] }
 0x872   :  { %7124 = vmatpush1.bf16.msra.mxu0 %v6806_v40  ;;  %7155 = vmatprep.mubr.bf16.mxu0 %v11790_v34  ;;  %v7296_v40 = vld [vmem:[#allocation3 + $0x90] sm:$0xff] }
 0x873   :  { %7125 = vmatprep.subr.bf16.mxu0 %v6823_v35  ;;  %v7301_v35 = vld [vmem:[#allocation3 + $0xb8] sm:$0xff] }
 0x874   :  { %7085 = vmatpush1.bf16.msra.mxu1 %v6820_v39  ;;  %v7298_v39 = vld [vmem:[#allocation3 + $0xa0] sm:$0xff] }
 0x875   :  { %7164 = vmatprep.subr.bf16.mxu1 %v6809_v33  ;;  %v7303_v33 = vld [vmem:[#allocation3 + $0xc8] sm:$0xff] }
 0x876   :  { %7126 = vmatpush1.bf16.msra.mxu0 %v6822_v37  ;;  %v7300_v37 = vld [vmem:[#allocation3 + $0xb0] sm:$0xff] }
 0x877   :  { %9775 = vmatmul.mubr.msk.bf16.vlgmr.msra.gmra.mrb[48].mxu1 %vm6701_vm2, %v11597_v23  ;;  %7205 = vmatprep.subr.bf16.mxu0 %v6811_v45  ;;  %v7305_v45 = vld [vmem:[#allocation3 + $0xd8] sm:$0xff] }
 0x878   :  { %7165 = vmatpush1.bf16.msra.mxu1 %v6808_v31  ;;  %7196 = vmatprep.mubr.bf16.mxu1 %v11790_v34  ;;  %v7302_v31 = vld [vmem:[#allocation3 + $0xc0] sm:$0xff] }
 0x879   :  { %9776 = vmatmul.mubr.msk.bf16.vlgmr.msra.gmra.mrb[52].mxu0 %vm6701_vm2, %v11597_v23  ;;  %7166 = vmatprep.subr.bf16.mxu1 %v6825_v60  ;;  %v7307_v60 = vld [vmem:[#allocation3 + $0xe8] sm:$0xff] }
 0x87a   :  { %7206 = vmatpush1.bf16.msra.mxu0 %v6810_v38  ;;  %7237 = vmatprep.mubr.bf16.mxu0 %v11790_v34  ;;  %v7282_v34 = vld [vmem:[#allocation3 + $0x20] sm:$0xff]  ;;  %v7304_v38 = vld [vmem:[#allocation3 + $0xd0] sm:$0xff] }
 0x87b   :  { %7207 = vmatprep.subr.bf16.mxu0 %v6827_v22  ;;  %v7309_v22 = vld [vmem:[#allocation3 + $0xf8] sm:$0xff] }
 0x87c   :  { %7167 = vmatpush1.bf16.msra.mxu1 %v6824_v44  ;;  %v7306_v44 = vld [vmem:[#allocation3 + $0xe0] sm:$0xff] }
 0x87d   :  { %7813 = vmatprep.subr.bf16.mxu1 %v7279_v7  ;;  %v7311_v7 = vld [vmem:[#allocation3 + $0x108] sm:$0xff] }
 0x87e   :  { %7208 = vmatpush1.bf16.msra.mxu0 %v6826_v53  ;;  %v7308_v53 = vld [vmem:[#allocation3 + $0xf0] sm:$0xff] }
 0x87f   :  { %9777 = vmatmul.mubr.msk.bf16.vlgmr.msra.gmra.mrb[52].mxu1 %vm6701_vm2, %v11597_v23  ;;  %8141 = vmatprep.subr.bf16.mxu0 %v7281_v51  ;;  %v7313_v51 = vld [vmem:[#allocation3 + $0x118] sm:$0xff] }
 0x880   :  { %7814 = vmatpush1.bf16.msra.mxu1 %v7278_v14  ;;  %v7310_v14 = vld [vmem:[#allocation3 + $0x100] sm:$0xff] }
 0x881   :  { %9778 = vmatmul.mubr.msk.bf16.vlgmr.msra.gmra.mrb[56].mxu0 %vm6701_vm2, %v11597_v23  ;;  %7815 = vmatprep.subr.bf16.mxu1 %v7283_v30  ;;  %v7295_v23 = vld [vmem:[#allocation3 + $0x88] sm:$0xff] }
 0x882   :  { %8142 = vmatpush1.bf16.msra.mxu0 %v7280_v47  ;;  %v7315_v30 = vld [vmem:[#allocation3 + $0x128] sm:$0xff]  ;;  %v7312_v47 = vld [vmem:[#allocation3 + $0x110] sm:$0xff] }
 0x883   :  { %8143 = vmatprep.subr.bf16.mxu0 %v7285_v49  ;;  %v7317_v49 = vld [vmem:[#allocation3 + $0x138] sm:$0xff] }
 0x884   :  { %7816 = vmatpush1.bf16.msra.mxu1 %v7282_v34  ;;  %v7314_v34 = vld [vmem:[#allocation3 + $0x120] sm:$0xff] }
 0x885   :  { %7817 = vmatprep.subr.bf16.mxu1 %v7287_v5  ;;  %v7319_v5 = vld [vmem:[#allocation3 + $0x148] sm:$0xff] }
 0x886   :  { %8144 = vmatpush1.bf16.msra.mxu0 %v7284_v32  ;;  %v7316_v32 = vld [vmem:[#allocation3 + $0x130] sm:$0xff] }
 0x887   :  { %8145 = vmatprep.subr.bf16.mxu0 %v7289_v43  ;;  %v7321_v43 = vld [vmem:[#allocation3 + $0x158] sm:$0xff] }
 0x888   :  { %7818 = vmatpush1.bf16.msra.mxu1 %v7286_v21  ;;  %v7318_v21 = vld [vmem:[#allocation3 + $0x140] sm:$0xff] }
 0x889   :  { %7819 = vmatprep.subr.bf16.mxu1 %v7291_v41  ;;  %v7323_v41 = vld [vmem:[#allocation3 + $0x168] sm:$0xff] }
 0x88a   :  { %8146 = vmatpush1.bf16.msra.mxu0 %v7288_v56  ;;  %v7320_v56 = vld [vmem:[#allocation3 + $0x150] sm:$0xff] }
 0x88b   :  { %8147 = vmatprep.subr.bf16.mxu0 %v7293_v36  ;;  %v7325_v36 = vld [vmem:[#allocation3 + $0x178] sm:$0xff] }
 0x88c   :  { %7820 = vmatpush1.bf16.msra.mxu1 %v7290_v55  ;;  %v7322_v55 = vld [vmem:[#allocation3 + $0x160] sm:$0xff] }
 0x88d   :  { %7821 = vmatprep.subr.bf16.mxu1 %v7295_v23  ;;  %v7327_v23 = vld [vmem:[#allocation3 + $0x188] sm:$0xff] }
 0x88e   :  { %8148 = vmatpush1.bf16.msra.mxu0 %v7292_v52  ;;  %v7324_v52 = vld [vmem:[#allocation3 + $0x170] sm:$0xff] }
 0x88f   :  { %8149 = vmatprep.subr.bf16.mxu0 %v7297_v42  ;;  %v7329_v42 = vld [vmem:[#allocation3 + $0x198] sm:$0xff] }
 0x890   :  { %7822 = vmatpush1.bf16.msra.mxu1 %v7294_v61  ;;  %v7326_v61 = vld [vmem:[#allocation3 + $0x180] sm:$0xff] }
 0x891   :  { %7823 = vmatprep.subr.bf16.mxu1 %v7299_v54  ;;  %v7331_v54 = vld [vmem:[#allocation3 + $0x1a8] sm:$0xff] }
 0x892   :  { %8150 = vmatpush1.bf16.msra.mxu0 %v7296_v40  ;;  %v7328_v40 = vld [vmem:[#allocation3 + $0x190] sm:$0xff] }
 0x893   :  { %8151 = vmatprep.subr.bf16.mxu0 %v7301_v35  ;;  %v7333_v35 = vld [vmem:[#allocation3 + $0x1b8] sm:$0xff] }
 0x894   :  { %7824 = vmatpush1.bf16.msra.mxu1 %v7298_v39  ;;  %v7330_v39 = vld [vmem:[#allocation3 + $0x1a0] sm:$0xff] }
 0x895   :  { %7825 = vmatprep.subr.bf16.mxu1 %v7303_v33  ;;  %v7332_v33 = vld [vmem:[#allocation3 + $0x1b0] sm:$0xff] }
 0x896   :  { %8152 = vmatpush1.bf16.msra.mxu0 %v7300_v37  ;;  %v7335_v37 = vld [vmem:[#allocation3 + $0x1c8] sm:$0xff] }
 0x897   :  { %8153 = vmatprep.subr.bf16.mxu0 %v7305_v45  ;;  %v7337_v45 = vld [vmem:[#allocation3 + $0x1d8] sm:$0xff] }
 0x898   :  { %7826 = vmatpush1.bf16.msra.mxu1 %v7302_v31  ;;  %v7334_v31 = vld [vmem:[#allocation3 + $0x1c0] sm:$0xff] }
 0x899   :  { %7827 = vmatprep.subr.bf16.mxu1 %v7307_v60  ;;  %v7336_v60 = vld [vmem:[#allocation3 + $0x1d0] sm:$0xff] }
 0x89a   :  { %8154 = vmatpush1.bf16.msra.mxu0 %v7304_v38  ;;  %v7339_v38 = vld [vmem:[#allocation3 + $0x1e8] sm:$0xff] }
 0x89b   :  { %8155 = vmatprep.subr.bf16.mxu0 %v7309_v22  ;;  %v7341_v22 = vld [vmem:[#allocation3 + $0x1f8] sm:$0xff] }
 0x89c   :  { %7828 = vmatpush1.bf16.msra.mxu1 %v7306_v44  ;;  %v7338_v44 = vld [vmem:[#allocation3 + $0x1e0] sm:$0xff] }
 0x89d   :  { %7829 = vmatprep.subr.bf16.mxu1 %v7311_v7  ;;  %v7340_v7 = vld [vmem:[#allocation3 + $0x1f0] sm:$0xff] }
 0x89e   :  { %8156 = vmatpush1.bf16.msra.mxu0 %v7308_v53  ;;  %v7343_v53 = vld [vmem:[#allocation3 + $0x208] sm:$0xff] }
 0x89f   :  { %8157 = vmatprep.subr.bf16.mxu0 %v7313_v51  ;;  %v7345_v51 = vld [vmem:[#allocation3 + $0x218] sm:$0xff] }
 0x8a0   :  { %7830 = vmatpush1.bf16.msra.mxu1 %v7310_v14  ;;  %v6829_v14 = vld [vmem:[#allocation14 + $0x4] ss:$8 sm:$0xf] }
 0x8a1   :  { %7831 = vmatprep.subr.bf16.mxu1 %v7315_v30  ;;  %v6830_v30 = vld [vmem:[#allocation14 + $0x4] ss:$8 sm:$0xf0] }
 0x8a2   :  { %8158 = vmatpush1.bf16.msra.mxu0 %v7312_v47  ;;  %v11636_v47 = vor.u32 %v6830_v30, %v6829_v14  ;;  %v7351_v30 = vld [vmem:[#allocation3 + $0x248] sm:$0xff] }
 0x8a3   :  { %8159 = vmatprep.subr.bf16.mxu0 %v7317_v49 }
 0x8a4   :  { %7832 = vmatpush1.bf16.msra.mxu1 %v7314_v34  ;;  %v6841_v49 = vrot.slane %v11636_v47, %v11064_v57  ;;  %v6845_v34 = vrot.slane %v11636_v47, %v11069_v59 }
 0x8a5   :  { %7833 = vmatprep.subr.bf16.mxu1 %v7319_v5  ;;  %v6853_v5 = vrot.slane %v11636_v47, %v11076_v62 }
 0x8a6   :  { %8160 = vmatpush1.bf16.msra.mxu0 %v7316_v32 }
 0x8a7   :  { %8161 = vmatprep.subr.bf16.mxu0 %v7321_v43 }
 0x8a8   :  { %7834 = vmatpush1.bf16.msra.mxu1 %v7318_v21 }
 0x8a9   :  { %7835 = vmatprep.subr.bf16.mxu1 %v7323_v41 }
 0x8aa   :  { %8162 = vmatpush1.bf16.msra.mxu0 %v7320_v56 }
 0x8ab   :  { %8163 = vmatprep.subr.bf16.mxu0 %v7325_v36 }
 0x8ac   :  { %7836 = vmatpush1.bf16.msra.mxu1 %v7322_v55 }
 0x8ad   :  { %7837 = vmatprep.subr.bf16.mxu1 %v7327_v23 }
 0x8ae   :  { %8164 = vmatpush1.bf16.msra.mxu0 %v7324_v52 }
 0x8af   :  { %8165 = vmatprep.subr.bf16.mxu0 %v7329_v42 }
 0x8b0   :  { %7838 = vmatpush1.bf16.msra.mxu1 %v7326_v61 }
 0x8b1   :  { %7839 = vmatprep.subr.bf16.mxu1 %v7331_v54 }
 0x8b2   :  { %8166 = vmatpush1.bf16.msra.mxu0 %v7328_v40 }
 0x8b3   :  { %8167 = vmatprep.subr.bf16.mxu0 %v7333_v35 }
 0x8b4   :  { %7840 = vmatpush1.bf16.msra.mxu1 %v7330_v39 }
 0x8b5   :  { %7841 = vmatprep.subr.bf16.mxu1 %v7335_v37  ;;  %v7342_v37 = vld [vmem:[#allocation3 + $0x200] sm:$0xff] }
 0x8b6   :  { %8168 = vmatpush1.bf16.msra.mxu0 %v7332_v33 }
 0x8b7   :  { %8169 = vmatprep.subr.bf16.mxu0 %v7337_v45  ;;  %v7344_v45 = vld [vmem:[#allocation3 + $0x210] sm:$0xff] }
 0x8b8   :  { %7842 = vmatpush1.bf16.msra.mxu1 %v7334_v31  ;;  %v7347_v31 = vld [vmem:[#allocation3 + $0x228] sm:$0xff] }
 0x8b9   :  { %7843 = vmatprep.subr.bf16.mxu1 %v7339_v38 }
 0x8ba   :  { %8170 = vmatpush1.bf16.msra.mxu0 %v7336_v60  ;;  %v7349_v60 = vld [vmem:[#allocation3 + $0x238] sm:$0xff] }
 0x8bb   :  { %8171 = vmatprep.subr.bf16.mxu0 %v7341_v22 }
 0x8bc   :  { %7844 = vmatpush1.bf16.msra.mxu1 %v7338_v44 }
 0x8bd   :  { %7854 = vmatprep.subr.bf16.mxu1 %v7343_v53  ;;  %v7346_v53 = vld [vmem:[#allocation3 + $0x220] sm:$0xff] }
 0x8be   :  { %8172 = vmatpush1.bf16.msra.mxu0 %v7340_v7 }
 0x8bf   :  { %8182 = vmatprep.subr.bf16.mxu0 %v7345_v51  ;;  %v7348_v51 = vld [vmem:[#allocation3 + $0x230] sm:$0xff] }
 0x93a   :  { %v6952_v32 = vpop.f32.mrb[40].mxu1  ;;  %v11644_v41 = vpop.f32.mrb[44].mxu0 }
 0x93b   :  { %v6953_v43 = vadd.f32 %v6952_v32, %v6841_v49  ;;  %v6954_v21 = vpop.f32.mrb[41].mxu1  ;;  %v6995_v55 = vpop.f32.mrb[45].mxu0  ;;  %v7353_v49 = vld [vmem:[#allocation3 + $0x258] sm:$0xff]  ;;  %v7355_v32 = vld [vmem:[#allocation3 + $0x268] sm:$0xff] }
 0x93c   :  { %v6955_v56 = vadd.f32 %v6954_v21, %v6845_v34  ;;  %v6956_v36 = vpop.f32.mrb[42].mxu1  ;;  %v6996_v42 = vadd.f32 %v6995_v55, %v6853_v5  ;;  %v6997_v61 = vpop.f32.mrb[46].mxu0  ;;  %v7350_v34 = vld [vmem:[#allocation3 + $0x240] sm:$0xff]  ;;  %v7352_v5 = vld [vmem:[#allocation3 + $0x250] sm:$0xff] }
 0x93d   :  { %v7246_v23 = vmax.f32 %v6953_v43, 0.0  ;;  %v6957_v52 = vpop.f32.mrb[43].mxu1  ;;  %v6998_v40 = vpop.f32.mrb[47].mxu0  ;;  %v7357_v43 = vld [vmem:[#allocation3 + $0x278] sm:$0xff]  ;;  %v7354_v36 = vld [vmem:[#allocation3 + $0x260] sm:$0xff]  ;;  %v7356_v55 = vld [vmem:[#allocation3 + $0x270] sm:$0xff] }
 0x93e   :  { %v7247_v54 = vmax.f32 %v6955_v56, 0.0  ;;  %v7249_v35 = vmax.f32 %v6996_v42, 0.0  ;;  %v7359_v52 = vld [vmem:[#allocation3 + $0x288] sm:$0xff]  ;;  %v7361_v42 = vld [vmem:[#allocation3 + $0x298] sm:$0xff]  ;;  %v7360_v40 = vld [vmem:[#allocation3 + $0x290] sm:$0xff] }
 0x93f   :  { %v7262_v33 = vpack.c.bf16 %v7246_v23, %v7246_v23 }
 0x940   :  { %v7263_v39 = vpack.c.bf16 %v7247_v54, %v7247_v54  ;;  %v7265_v38 = vpack.c.bf16 %v7249_v35, %v7249_v35  ;;  %v7358_v54 = vld [vmem:[#allocation3 + $0x280] sm:$0xff]  ;;  %v7363_v35 = vld [vmem:[#allocation3 + $0x2a8] sm:$0xff] }
 0x942   :  { %7845 = vmatprep.mubr.bf16.mxu1 %v7263_v39  ;;  %8173 = vmatprep.mubr.bf16.mxu0 %v7263_v39  ;;  %v11646_v22 = vpop.f32.mrb[44].mxu1  ;;  %v7365_v39 = vld [vmem:[#allocation3 + $0x2b8] sm:$0xff] }
 0x943   :  { %7846 = vmatmul.mubr.bf16.vlgmr.msra.gmra.mrb[56].mxu1 %v7262_v33  ;;  %8174 = vmatmul.mubr.bf16.vlgmr.msra.gmra.mrb[60].mxu0 %v7262_v33  ;;  %v11648_v44 = vpop.f32.mrb[45].mxu1 }
 0x944   :  { %7855 = vmatpush1.bf16.msra.mxu1 %v7342_v37  ;;  %8183 = vmatpush1.bf16.msra.mxu0 %v7344_v45  ;;  %v7038_v7 = vpop.f32.mrb[46].mxu1  ;;  %v7362_v45 = vld [vmem:[#allocation3 + $0x2a0] sm:$0xff] }
 0x945   :  { %7856 = vmatprep.subr.bf16.mxu1 %v7347_v31  ;;  %8184 = vmatprep.subr.bf16.mxu0 %v7349_v60  ;;  %v7039_v14 = vpop.f32.mrb[47].mxu1  ;;  %v7364_v31 = vld [vmem:[#allocation3 + $0x2b0] sm:$0xff]  ;;  %v7369_v7 = vld [vmem:[#allocation3 + $0x2d8] sm:$0xff] }
 0x946   :  { %7886 = vmatprep.mubr.bf16.mxu1 %v7265_v38  ;;  %8214 = vmatprep.mubr.bf16.mxu0 %v7265_v38  ;;  %v7367_v38 = vld [vmem:[#allocation3 + $0x2c8] sm:$0xff]  ;;  %v7368_v14 = vld [vmem:[#allocation3 + $0x2d0] sm:$0xff] }
 0x948   :  { %7857 = vmatpush1.bf16.msra.mxu1 %v7346_v53  ;;  %8185 = vmatpush1.bf16.msra.mxu0 %v7348_v51  ;;  %v7366_v51 = vld [vmem:[#allocation3 + $0x2c0] sm:$0xff] }
 0x949   :  { %7858 = vmatprep.subr.bf16.mxu1 %v7351_v30  ;;  %8186 = vmatprep.subr.bf16.mxu0 %v7353_v49  ;;  %v7371_v30 = vld [vmem:[#allocation3 + $0x2e8] sm:$0xff]  ;;  %v7373_v49 = vld [vmem:[#allocation3 + $0x2f8] sm:$0xff] }
 0x94a   :  { %v11650_v21 = vpop.f32.mrb[48].mxu1 }
 0x94b   :  { %v11652_v56 = vpop.f32.mrb[49].mxu1 }
 0x94c   :  { %7859 = vmatpush1.bf16.msra.mxu1 %v7350_v34  ;;  %8187 = vmatpush1.bf16.msra.mxu0 %v7352_v5  ;;  %v7120_v23 = vpop.f32.mrb[50].mxu1  ;;  %v7370_v34 = vld [vmem:[#allocation3 + $0x2e0] sm:$0xff]  ;;  %v7372_v5 = vld [vmem:[#allocation3 + $0x2f0] sm:$0xff] }
 0x94d   :  { %7860 = vmatprep.subr.bf16.mxu1 %v7355_v32  ;;  %8188 = vmatprep.subr.bf16.mxu0 %v7357_v43  ;;  %v7121_v61 = vpop.f32.mrb[51].mxu1  ;;  %v7375_v32 = vld [vmem:[#allocation3 + $0x308] sm:$0xff]  ;;  %v7377_v43 = vld [vmem:[#allocation3 + $0x318] sm:$0xff] }
 0x94e   :  { %v7379_v23 = vld [vmem:[#allocation3 + $0x328] sm:$0xff]  ;;  %v7380_v61 = vld [vmem:[#allocation3 + $0x330] sm:$0xff] }
 0x950   :  { %7861 = vmatpush1.bf16.msra.mxu1 %v7354_v36  ;;  %8189 = vmatpush1.bf16.msra.mxu0 %v7356_v55  ;;  %v7374_v36 = vld [vmem:[#allocation3 + $0x300] sm:$0xff]  ;;  %v7376_v55 = vld [vmem:[#allocation3 + $0x310] sm:$0xff] }
 0x951   :  { %7862 = vmatprep.subr.bf16.mxu1 %v7359_v52  ;;  %8190 = vmatprep.subr.bf16.mxu0 %v7361_v42  ;;  %v7381_v52 = vld [vmem:[#allocation3 + $0x338] sm:$0xff]  ;;  %v7378_v42 = vld [vmem:[#allocation3 + $0x320] sm:$0xff] }
 0x952   :  { %v11654_v33 = vpop.f32.mrb[52].mxu1 }
 0x953   :  { %v11656_v37 = vpop.f32.mrb[53].mxu1 }
 0x954   :  { %7863 = vmatpush1.bf16.msra.mxu1 %v7358_v54  ;;  %8191 = vmatpush1.bf16.msra.mxu0 %v7360_v40  ;;  %v7202_v60 = vpop.f32.mrb[54].mxu1  ;;  %v7383_v54 = vld [vmem:[#allocation3 + $0x348] sm:$0xff]  ;;  %v7385_v40 = vld [vmem:[#allocation3 + $0x358] sm:$0xff] }
 0x955   :  { %7864 = vmatprep.subr.bf16.mxu1 %v7363_v35  ;;  %8192 = vmatprep.subr.bf16.mxu0 %v7365_v39  ;;  %v7203_v53 = vpop.f32.mrb[55].mxu1  ;;  %v7382_v35 = vld [vmem:[#allocation3 + $0x340] sm:$0xff]  ;;  %v7384_v39 = vld [vmem:[#allocation3 + $0x350] sm:$0xff] }
 0x956   :  { %v7386_v60 = vld [vmem:[#allocation3 + $0x360] sm:$0xff]  ;;  %v7393_v53 = vld [vmem:[#allocation3 + $0x398] sm:$0xff] }
 0x958   :  { %7865 = vmatpush1.bf16.msra.mxu1 %v7362_v45  ;;  %8193 = vmatpush1.bf16.msra.mxu0 %v7364_v31  ;;  %v7387_v45 = vld [vmem:[#allocation3 + $0x368] sm:$0xff]  ;;  %v7389_v31 = vld [vmem:[#allocation3 + $0x378] sm:$0xff] }
 0x959   :  { %7866 = vmatprep.subr.bf16.mxu1 %v7367_v38  ;;  %8194 = vmatprep.subr.bf16.mxu0 %v7369_v7  ;;  %v7388_v38 = vld [vmem:[#allocation3 + $0x370] sm:$0xff]  ;;  %v7391_v7 = vld [vmem:[#allocation3 + $0x388] sm:$0xff] }
 0x95c   :  { %7867 = vmatpush1.bf16.msra.mxu1 %v7366_v51  ;;  %8195 = vmatpush1.bf16.msra.mxu0 %v7368_v14  ;;  %v7390_v51 = vld [vmem:[#allocation3 + $0x380] sm:$0xff]  ;;  %v7392_v14 = vld [vmem:[#allocation3 + $0x390] sm:$0xff] }
 0x95d   :  { %7868 = vmatprep.subr.bf16.mxu1 %v7371_v30  ;;  %8196 = vmatprep.subr.bf16.mxu0 %v7373_v49  ;;  %v7395_v30 = vld [vmem:[#allocation3 + $0x3a8] sm:$0xff]  ;;  %v7397_v49 = vld [vmem:[#allocation3 + $0x3b8] sm:$0xff] }
 0x960   :  { %7869 = vmatpush1.bf16.msra.mxu1 %v7370_v34  ;;  %8197 = vmatpush1.bf16.msra.mxu0 %v7372_v5  ;;  %v6849_v34 = vrot.slane %v11636_v47, %v11083_v50  ;;  %v7394_v5 = vld [vmem:[#allocation3 + $0x3a0] sm:$0xff] }
 0x961   :  { %7870 = vmatprep.subr.bf16.mxu1 %v7375_v32  ;;  %8198 = vmatprep.subr.bf16.mxu0 %v7377_v43  ;;  %v7396_v32 = vld [vmem:[#allocation3 + $0x3b0] sm:$0xff]  ;;  %v11660_v43 = vpop.f32.mrb[48].mxu0 }
 0x964   :  { %7871 = vmatpush1.bf16.msra.mxu1 %v7374_v36  ;;  %8199 = vmatpush1.bf16.msra.mxu0 %v7376_v55  ;;  %v7399_v36 = vld [vmem:[#allocation3 + $0x3c8] sm:$0xff]  ;;  %v7401_v55 = vld [vmem:[#allocation3 + $0x3d8] sm:$0xff] }
 0x965   :  { %7872 = vmatprep.subr.bf16.mxu1 %v7379_v23  ;;  %8200 = vmatprep.subr.bf16.mxu0 %v7381_v52  ;;  %v6861_v23 = vrot.slane %v11636_v47, %v11237_v48  ;;  %v6994_v52 = vadd.f32 %v11644_v41, %v6849_v34  ;;  %v7402_v41 = vld [vmem:[#allocation3 + $0x3e0] sm:$0xff]  ;;  %v7411_v34 = vld [vmem:[#allocation3 + $0x428] sm:$0xff] }
 0x968   :  { %7873 = vmatpush1.bf16.msra.mxu1 %v7378_v42  ;;  %8201 = vmatpush1.bf16.msra.mxu0 %v7380_v61  ;;  %v11665_v42 = vpop.f32.mrb[49].mxu0  ;;  %v7398_v61 = vld [vmem:[#allocation3 + $0x3c0] sm:$0xff] }
 0x969   :  { %7874 = vmatprep.subr.bf16.mxu1 %v7383_v54  ;;  %8202 = vmatprep.subr.bf16.mxu0 %v7385_v40  ;;  %v7400_v54 = vld [vmem:[#allocation3 + $0x3d0] sm:$0xff]  ;;  %v7079_v40 = vpop.f32.mrb[50].mxu0 }
 0x96a   :  { %v7419_v40 = vld [vmem:[#allocation3 + $0x468] sm:$0xff] }
 0x96c   :  { %7875 = vmatpush1.bf16.msra.mxu1 %v7382_v35  ;;  %8203 = vmatpush1.bf16.msra.mxu0 %v7384_v39  ;;  %v7403_v35 = vld [vmem:[#allocation3 + $0x3e8] sm:$0xff]  ;;  %v7405_v39 = vld [vmem:[#allocation3 + $0x3f8] sm:$0xff] }
 0x96d   :  { %7876 = vmatprep.subr.bf16.mxu1 %v7387_v45  ;;  %8204 = vmatprep.subr.bf16.mxu0 %v7389_v31  ;;  %v7037_v45 = vadd.f32 %v11648_v44, %v6861_v23  ;;  %v7080_v31 = vpop.f32.mrb[51].mxu0  ;;  %v7413_v44 = vld [vmem:[#allocation3 + $0x438] sm:$0xff] }
 0x96e   :  { %v7417_v23 = vld [vmem:[#allocation3 + $0x458] sm:$0xff] }
 0x970   :  { %7877 = vmatpush1.bf16.msra.mxu1 %v7386_v60  ;;  %8205 = vmatpush1.bf16.msra.mxu0 %v7388_v38  ;;  %v7248_v60 = vmax.f32 %v6994_v52, 0.0  ;;  %v7404_v38 = vld [vmem:[#allocation3 + $0x3f0] sm:$0xff]  ;;  %v7414_v52 = vld [vmem:[#allocation3 + $0x440] sm:$0xff] }
 0x971   :  { %7878 = vmatprep.subr.bf16.mxu1 %v7391_v7  ;;  %8206 = vmatprep.subr.bf16.mxu0 %v7393_v53  ;;  %v7407_v7 = vld [vmem:[#allocation3 + $0x408] sm:$0xff]  ;;  %v7409_v53 = vld [vmem:[#allocation3 + $0x418] sm:$0xff] }
 0x974   :  { %7879 = vmatpush1.bf16.msra.mxu1 %v7390_v51  ;;  %8207 = vmatpush1.bf16.msra.mxu0 %v7392_v14  ;;  %v7251_v51 = vmax.f32 %v7037_v45, 0.0  ;;  %v7264_v14 = vpack.c.bf16 %v7248_v60, %v7248_v60  ;;  %v7418_v60 = vld [vmem:[#allocation3 + $0x460] sm:$0xff] }
 0x975   :  { %7880 = vmatprep.subr.bf16.mxu1 %v7395_v30  ;;  %8208 = vmatprep.subr.bf16.mxu0 %v7397_v49  ;;  %v7406_v30 = vld [vmem:[#allocation3 + $0x400] sm:$0xff]  ;;  %v7408_v49 = vld [vmem:[#allocation3 + $0x410] sm:$0xff] }
 0x978   :  { %7881 = vmatpush1.bf16.msra.mxu1 %v7394_v5  ;;  %8209 = vmatpush1.bf16.msra.mxu0 %v7396_v32  ;;  %v7267_v5 = vpack.c.bf16 %v7251_v51, %v7251_v51  ;;  %v7410_v32 = vld [vmem:[#allocation3 + $0x420] sm:$0xff]  ;;  %v7424_v51 = vld [vmem:[#allocation3 + $0x490] sm:$0xff] }
 0x979   :  { %7882 = vmatprep.subr.bf16.mxu1 %v7399_v36  ;;  %8210 = vmatprep.subr.bf16.mxu0 %v7401_v55  ;;  %v7412_v36 = vld [vmem:[#allocation3 + $0x430] sm:$0xff]  ;;  %v7415_v55 = vld [vmem:[#allocation3 + $0x448] sm:$0xff] }
 0x97c   :  { %7883 = vmatpush1.bf16.msra.mxu1 %v7398_v61  ;;  %8211 = vmatpush1.bf16.msra.mxu0 %v7400_v54  ;;  %v7416_v61 = vld [vmem:[#allocation3 + $0x450] sm:$0xff]  ;;  %v11668_v54 = vpop.f32.mrb[52].mxu0 }
 0x97d   :  { %7884 = vmatprep.subr.bf16.mxu1 %v7403_v35  ;;  %8212 = vmatprep.subr.bf16.mxu0 %v7405_v39  ;;  %v7421_v35 = vld [vmem:[#allocation3 + $0x478] sm:$0xff]  ;;  %v11670_v39 = vpop.f32.mrb[53].mxu0 }
 0x97e   :  { %v7161_v45 = vpop.f32.mrb[54].mxu0 }
 0x97f   :  { %v7162_v31 = vpop.f32.mrb[55].mxu0  ;;  %v7434_v45 = vld [vmem:[#allocation3 + $0x4e0] sm:$0xff] }
 0x980   :  { %7885 = vmatpush1.bf16.msra.mxu1 %v7402_v41  ;;  %8213 = vmatpush1.bf16.msra.mxu0 %v7404_v38  ;;  %v7420_v41 = vld [vmem:[#allocation3 + $0x470] sm:$0xff]  ;;  %v7423_v38 = vld [vmem:[#allocation3 + $0x488] sm:$0xff] }
 0x981   :  { %7895 = vmatprep.subr.bf16.mxu1 %v7407_v7  ;;  %8223 = vmatprep.subr.bf16.mxu0 %v7409_v53  ;;  %v7425_v7 = vld [vmem:[#allocation3 + $0x498] sm:$0xff]  ;;  %v7422_v53 = vld [vmem:[#allocation3 + $0x480] sm:$0xff]  ;;  %v7436_v31 = vld [vmem:[#allocation3 + $0x4f0] sm:$0xff] }
 0x983   :  { %7887 = vmatmul.mubr.bf16.vlgmr.msra.gmra.mrb[56].mxu1 %v7264_v14  ;;  %8215 = vmatmul.mubr.bf16.vlgmr.msra.gmra.mrb[60].mxu0 %v7264_v14  ;;  %v11672_v14 = vpop.f32.mrb[56].mxu0 }
 0x984   :  { %7896 = vmatpush1.bf16.msra.mxu1 %v7406_v30  ;;  %8224 = vmatpush1.bf16.msra.mxu0 %v7408_v49  ;;  %v7427_v30 = vld [vmem:[#allocation3 + $0x4a8] sm:$0xff]  ;;  %v7429_v49 = vld [vmem:[#allocation3 + $0x4b8] sm:$0xff] }
 0x985   :  { %7897 = vmatprep.subr.bf16.mxu1 %v7411_v34  ;;  %8225 = vmatprep.subr.bf16.mxu0 %v7413_v44  ;;  %v11674_v34 = vpop.f32.mrb[57].mxu0 }
 0x986   :  { %7927 = vmatprep.mubr.bf16.mxu1 %v7267_v5  ;;  %8255 = vmatprep.mubr.bf16.mxu0 %v7267_v5  ;;  %v7243_v44 = vpop.f32.mrb[58].mxu0 }
 0x987   :  { %v7244_v5 = vpop.f32.mrb[59].mxu0  ;;  %v7447_v44 = vld [vmem:[#allocation3 + $0x548] sm:$0xff] }
 0x988   :  { %7898 = vmatpush1.bf16.msra.mxu1 %v7410_v32  ;;  %8226 = vmatpush1.bf16.msra.mxu0 %v7412_v36  ;;  %v7426_v32 = vld [vmem:[#allocation3 + $0x4a0] sm:$0xff]  ;;  %v7428_v36 = vld [vmem:[#allocation3 + $0x4b0] sm:$0xff]  ;;  %v7449_v5 = vld [vmem:[#allocation3 + $0x558] sm:$0xff] }
 0x989   :  { %7899 = vmatprep.subr.bf16.mxu1 %v7415_v55  ;;  %8227 = vmatprep.subr.bf16.mxu0 %v7417_v23  ;;  %v7431_v55 = vld [vmem:[#allocation3 + $0x4c8] sm:$0xff]  ;;  %v7433_v23 = vld [vmem:[#allocation3 + $0x4d8] sm:$0xff] }
 0x98c   :  { %7900 = vmatpush1.bf16.msra.mxu1 %v7414_v52  ;;  %8228 = vmatpush1.bf16.msra.mxu0 %v7416_v61  ;;  %v7430_v52 = vld [vmem:[#allocation3 + $0x4c0] sm:$0xff]  ;;  %v7432_v61 = vld [vmem:[#allocation3 + $0x4d0] sm:$0xff] }
 0x98d   :  { %7901 = vmatprep.subr.bf16.mxu1 %v7419_v40  ;;  %8229 = vmatprep.subr.bf16.mxu0 %v7421_v35  ;;  %v7435_v40 = vld [vmem:[#allocation3 + $0x4e8] sm:$0xff]  ;;  %v7437_v35 = vld [vmem:[#allocation3 + $0x4f8] sm:$0xff] }
 0x990   :  { %7902 = vmatpush1.bf16.msra.mxu1 %v7418_v60  ;;  %8230 = vmatpush1.bf16.msra.mxu0 %v7420_v41  ;;  %v7439_v60 = vld [vmem:[#allocation3 + $0x508] sm:$0xff]  ;;  %v7441_v41 = vld [vmem:[#allocation3 + $0x518] sm:$0xff] }
 0x991   :  { %7903 = vmatprep.subr.bf16.mxu1 %v7423_v38  ;;  %8231 = vmatprep.subr.bf16.mxu0 %v7425_v7  ;;  %v7438_v38 = vld [vmem:[#allocation3 + $0x500] sm:$0xff]  ;;  %v7440_v7 = vld [vmem:[#allocation3 + $0x510] sm:$0xff] }
 0x994   :  { %7904 = vmatpush1.bf16.msra.mxu1 %v7422_v53  ;;  %8232 = vmatpush1.bf16.msra.mxu0 %v7424_v51  ;;  %v7443_v53 = vld [vmem:[#allocation3 + $0x528] sm:$0xff]  ;;  %v7445_v51 = vld [vmem:[#allocation3 + $0x538] sm:$0xff] }
 0x995   :  { %7905 = vmatprep.subr.bf16.mxu1 %v7427_v30  ;;  %8233 = vmatprep.subr.bf16.mxu0 %v7429_v49  ;;  %v7442_v30 = vld [vmem:[#allocation3 + $0x520] sm:$0xff]  ;;  %v7444_v49 = vld [vmem:[#allocation3 + $0x530] sm:$0xff] }
 0x998   :  { %7906 = vmatpush1.bf16.msra.mxu1 %v7426_v32  ;;  %8234 = vmatpush1.bf16.msra.mxu0 %v7428_v36  ;;  %v7446_v32 = vld [vmem:[#allocation3 + $0x540] sm:$0xff]  ;;  %v7448_v36 = vld [vmem:[#allocation3 + $0x550] sm:$0xff] }
 0x999   :  { %7907 = vmatprep.subr.bf16.mxu1 %v7431_v55  ;;  %8235 = vmatprep.subr.bf16.mxu0 %v7433_v23  ;;  %v7451_v55 = vld [vmem:[#allocation3 + $0x568] sm:$0xff]  ;;  %v7453_v23 = vld [vmem:[#allocation3 + $0x578] sm:$0xff] }
 0x99c   :  { %7908 = vmatpush1.bf16.msra.mxu1 %v7430_v52  ;;  %8236 = vmatpush1.bf16.msra.mxu0 %v7432_v61  ;;  %v7450_v52 = vld [vmem:[#allocation3 + $0x560] sm:$0xff]  ;;  %v7452_v61 = vld [vmem:[#allocation3 + $0x570] sm:$0xff] }
 0x99d   :  { %7909 = vmatprep.subr.bf16.mxu1 %v7435_v40  ;;  %8237 = vmatprep.subr.bf16.mxu0 %v7437_v35  ;;  %v7455_v40 = vld [vmem:[#allocation3 + $0x588] sm:$0xff]  ;;  %v7457_v35 = vld [vmem:[#allocation3 + $0x598] sm:$0xff] }
 0x9a0   :  { %7910 = vmatpush1.bf16.msra.mxu1 %v7434_v45  ;;  %8238 = vmatpush1.bf16.msra.mxu0 %v7436_v31  ;;  %v7454_v45 = vld [vmem:[#allocation3 + $0x580] sm:$0xff]  ;;  %v7456_v31 = vld [vmem:[#allocation3 + $0x590] sm:$0xff] }
 0x9a1   :  { %7911 = vmatprep.subr.bf16.mxu1 %v7439_v60  ;;  %8239 = vmatprep.subr.bf16.mxu0 %v7441_v41  ;;  %v7459_v60 = vld [vmem:[#allocation3 + $0x5a8] sm:$0xff]  ;;  %v7461_v41 = vld [vmem:[#allocation3 + $0x5b8] sm:$0xff] }
 0x9a4   :  { %7912 = vmatpush1.bf16.msra.mxu1 %v7438_v38  ;;  %8240 = vmatpush1.bf16.msra.mxu0 %v7440_v7  ;;  %v6857_v38 = vrot.slane %v11636_v47, %v11342_v63  ;;  %v7458_v7 = vld [vmem:[#allocation3 + $0x5a0] sm:$0xff] }
 0x9a5   :  { %7913 = vmatprep.subr.bf16.mxu1 %v7443_v53  ;;  %8241 = vmatprep.subr.bf16.mxu0 %v7445_v51  ;;  %v7460_v53 = vld [vmem:[#allocation3 + $0x5b0] sm:$0xff]  ;;  %v7463_v51 = vld [vmem:[#allocation3 + $0x5c8] sm:$0xff] }
 0x9a8   :  { %7914 = vmatpush1.bf16.msra.mxu1 %v7442_v30  ;;  %8242 = vmatpush1.bf16.msra.mxu0 %v7444_v49  ;;  %v7465_v30 = vld [vmem:[#allocation3 + $0x5d8] sm:$0xff]  ;;  %v6869_v49 = vrot.slane %v11636_v47, %v11240_v15 }
 0x9a9   :  { %7915 = vmatprep.subr.bf16.mxu1 %v7447_v44  ;;  %8243 = vmatprep.subr.bf16.mxu0 %v7449_v5  ;;  %v7035_v44 = vadd.f32 %v11646_v22, %v6857_v38  ;;  %v7462_v5 = vld [vmem:[#allocation3 + $0x5c0] sm:$0xff]  ;;  %v7475_v38 = vld [vmem:[#allocation3 + $0x628] sm:$0xff] }
 0x9ac   :  { %7916 = vmatpush1.bf16.msra.mxu1 %v7446_v32  ;;  %8244 = vmatpush1.bf16.msra.mxu0 %v7448_v36  ;;  %v7464_v32 = vld [vmem:[#allocation3 + $0x5d0] sm:$0xff]  ;;  %v7467_v36 = vld [vmem:[#allocation3 + $0x5e8] sm:$0xff] }
 0x9ad   :  { %7917 = vmatprep.subr.bf16.mxu1 %v7451_v55  ;;  %8245 = vmatprep.subr.bf16.mxu0 %v7453_v23  ;;  %v7469_v55 = vld [vmem:[#allocation3 + $0x5f8] sm:$0xff]  ;;  %v7078_v23 = vadd.f32 %v11665_v42, %v6869_v49 }
 0x9ae   :  { %v7481_v49 = vld [vmem:[#allocation3 + $0x658] sm:$0xff] }
 0x9af   :  { %v7253_v22 = vmax.f32 %v7078_v23, 0.0  ;;  %v7484_v23 = vld [vmem:[#allocation3 + $0x670] sm:$0xff] }
 0x9b0   :  { %7918 = vmatpush1.bf16.msra.mxu1 %v7450_v52  ;;  %8246 = vmatpush1.bf16.msra.mxu0 %v7452_v61  ;;  %v7250_v52 = vmax.f32 %v7035_v44, 0.0  ;;  %v7466_v61 = vld [vmem:[#allocation3 + $0x5e0] sm:$0xff] }
 0x9b1   :  { %7919 = vmatprep.subr.bf16.mxu1 %v7455_v40  ;;  %8247 = vmatprep.subr.bf16.mxu0 %v7457_v35  ;;  %v7468_v40 = vld [vmem:[#allocation3 + $0x5f0] sm:$0xff]  ;;  %v7471_v35 = vld [vmem:[#allocation3 + $0x608] sm:$0xff]  ;;  %v7269_v42 = vpack.c.bf16 %v7253_v22, %v7253_v22  ;;  %v7478_v44 = vld [vmem:[#allocation3 + $0x640] sm:$0xff] }
 0x9b2   :  { %v7493_v22 = vld [vmem:[#allocation3 + $0x6b8] sm:$0xff] }
 0x9b4   :  { %7920 = vmatpush1.bf16.msra.mxu1 %v7454_v45  ;;  %8248 = vmatpush1.bf16.msra.mxu0 %v7456_v31  ;;  %v7473_v45 = vld [vmem:[#allocation3 + $0x618] sm:$0xff]  ;;  %v7266_v31 = vpack.c.bf16 %v7250_v52, %v7250_v52  ;;  %v7487_v52 = vld [vmem:[#allocation3 + $0x688] sm:$0xff] }
 0x9b5   :  { %7921 = vmatprep.subr.bf16.mxu1 %v7459_v60  ;;  %8249 = vmatprep.subr.bf16.mxu0 %v7461_v41  ;;  %v7470_v60 = vld [vmem:[#allocation3 + $0x600] sm:$0xff]  ;;  %v7472_v41 = vld [vmem:[#allocation3 + $0x610] sm:$0xff] }
 0x9b8   :  { %7922 = vmatpush1.bf16.msra.mxu1 %v7458_v7  ;;  %8250 = vmatpush1.bf16.msra.mxu0 %v7460_v53  ;;  %v7477_v7 = vld [vmem:[#allocation3 + $0x638] sm:$0xff]  ;;  %v7474_v53 = vld [vmem:[#allocation3 + $0x620] sm:$0xff] }
 0x9b9   :  { %7923 = vmatprep.subr.bf16.mxu1 %v7463_v51  ;;  %8251 = vmatprep.subr.bf16.mxu0 %v7465_v30  ;;  %v7476_v51 = vld [vmem:[#allocation3 + $0x630] sm:$0xff]  ;;  %v7479_v30 = vld [vmem:[#allocation3 + $0x648] sm:$0xff] }
 0x9bc   :  { %7924 = vmatpush1.bf16.msra.mxu1 %v7462_v5  ;;  %8252 = vmatpush1.bf16.msra.mxu0 %v7464_v32  ;;  %v7480_v5 = vld [vmem:[#allocation3 + $0x650] sm:$0xff]  ;;  %v7483_v32 = vld [vmem:[#allocation3 + $0x668] sm:$0xff] }
 0x9bd   :  { %7925 = vmatprep.subr.bf16.mxu1 %v7467_v36  ;;  %8253 = vmatprep.subr.bf16.mxu0 %v7469_v55  ;;  %v7485_v36 = vld [vmem:[#allocation3 + $0x678] sm:$0xff]  ;;  %v7482_v55 = vld [vmem:[#allocation3 + $0x660] sm:$0xff] }
 0x9c0   :  { %7926 = vmatpush1.bf16.msra.mxu1 %v7466_v61  ;;  %8254 = vmatpush1.bf16.msra.mxu0 %v7468_v40  ;;  %v7489_v61 = vld [vmem:[#allocation3 + $0x698] sm:$0xff]  ;;  %v7486_v40 = vld [vmem:[#allocation3 + $0x680] sm:$0xff] }
 0x9c1   :  { %7936 = vmatprep.subr.bf16.mxu1 %v7471_v35  ;;  %8264 = vmatprep.subr.bf16.mxu0 %v7473_v45  ;;  %v7488_v35 = vld [vmem:[#allocation3 + $0x690] sm:$0xff]  ;;  %v7491_v45 = vld [vmem:[#allocation3 + $0x6a8] sm:$0xff] }
 0x9c3   :  { %7928 = vmatmul.mubr.bf16.vlgmr.msra.gmra.mrb[56].mxu1 %v7266_v31  ;;  %8256 = vmatmul.mubr.bf16.vlgmr.msra.gmra.mrb[60].mxu0 %v7266_v31  ;;  %v7490_v31 = vld [vmem:[#allocation3 + $0x6a0] sm:$0xff] }
 0x9c4   :  { %7937 = vmatpush1.bf16.msra.mxu1 %v7470_v60  ;;  %8265 = vmatpush1.bf16.msra.mxu0 %v7472_v41  ;;  %v7492_v60 = vld [vmem:[#allocation3 + $0x6b0] sm:$0xff]  ;;  %v7495_v41 = vld [vmem:[#allocation3 + $0x6c8] sm:$0xff] }
 0x9c5   :  { %7938 = vmatprep.subr.bf16.mxu1 %v7475_v38  ;;  %8266 = vmatprep.subr.bf16.mxu0 %v7477_v7  ;;  %v7497_v38 = vld [vmem:[#allocation3 + $0x6d8] sm:$0xff]  ;;  %v7494_v7 = vld [vmem:[#allocation3 + $0x6c0] sm:$0xff] }
 0x9c6   :  { %7968 = vmatprep.mubr.bf16.mxu1 %v7269_v42  ;;  %8296 = vmatprep.mubr.bf16.mxu0 %v7269_v42  ;;  %v7496_v42 = vld [vmem:[#allocation3 + $0x6d0] sm:$0xff] }
 0x9c8   :  { %7939 = vmatpush1.bf16.msra.mxu1 %v7474_v53  ;;  %8267 = vmatpush1.bf16.msra.mxu0 %v7476_v51  ;;  %v7499_v53 = vld [vmem:[#allocation3 + $0x6e8] sm:$0xff]  ;;  %v7501_v51 = vld [vmem:[#allocation3 + $0x6f8] sm:$0xff] }
 0x9c9   :  { %7940 = vmatprep.subr.bf16.mxu1 %v7479_v30  ;;  %8268 = vmatprep.subr.bf16.mxu0 %v7481_v49  ;;  %v7498_v30 = vld [vmem:[#allocation3 + $0x6e0] sm:$0xff]  ;;  %v7500_v49 = vld [vmem:[#allocation3 + $0x6f0] sm:$0xff] }
 0x9cc   :  { %7941 = vmatpush1.bf16.msra.mxu1 %v7478_v44  ;;  %8269 = vmatpush1.bf16.msra.mxu0 %v7480_v5  ;;  %v7503_v44 = vld [vmem:[#allocation3 + $0x708] sm:$0xff]  ;;  %v7505_v5 = vld [vmem:[#allocation3 + $0x718] sm:$0xff] }
 0x9cd   :  { %7942 = vmatprep.subr.bf16.mxu1 %v7483_v32  ;;  %8270 = vmatprep.subr.bf16.mxu0 %v7485_v36  ;;  %v7502_v32 = vld [vmem:[#allocation3 + $0x700] sm:$0xff]  ;;  %v7504_v36 = vld [vmem:[#allocation3 + $0x710] sm:$0xff] }
 0x9d0   :  { %7943 = vmatpush1.bf16.msra.mxu1 %v7482_v55  ;;  %8271 = vmatpush1.bf16.msra.mxu0 %v7484_v23  ;;  %v7507_v55 = vld [vmem:[#allocation3 + $0x728] sm:$0xff]  ;;  %v7509_v23 = vld [vmem:[#allocation3 + $0x738] sm:$0xff] }
 0x9d1   :  { %7944 = vmatprep.subr.bf16.mxu1 %v7487_v52  ;;  %8272 = vmatprep.subr.bf16.mxu0 %v7489_v61  ;;  %v7506_v52 = vld [vmem:[#allocation3 + $0x720] sm:$0xff]  ;;  %v7508_v61 = vld [vmem:[#allocation3 + $0x730] sm:$0xff] }
 0x9d4   :  { %7945 = vmatpush1.bf16.msra.mxu1 %v7486_v40  ;;  %8273 = vmatpush1.bf16.msra.mxu0 %v7488_v35  ;;  %v7511_v40 = vld [vmem:[#allocation3 + $0x748] sm:$0xff]  ;;  %v7513_v35 = vld [vmem:[#allocation3 + $0x758] sm:$0xff] }
 0x9d5   :  { %7946 = vmatprep.subr.bf16.mxu1 %v7491_v45  ;;  %8274 = vmatprep.subr.bf16.mxu0 %v7493_v22  ;;  %v7510_v45 = vld [vmem:[#allocation3 + $0x740] sm:$0xff]  ;;  %v7512_v22 = vld [vmem:[#allocation3 + $0x750] sm:$0xff] }
 0x9d8   :  { %7947 = vmatpush1.bf16.msra.mxu1 %v7490_v31  ;;  %8275 = vmatpush1.bf16.msra.mxu0 %v7492_v60  ;;  %v7515_v31 = vld [vmem:[#allocation3 + $0x768] sm:$0xff]  ;;  %v7517_v60 = vld [vmem:[#allocation3 + $0x778] sm:$0xff] }
 0x9d9   :  { %7948 = vmatprep.subr.bf16.mxu1 %v7495_v41  ;;  %8276 = vmatprep.subr.bf16.mxu0 %v7497_v38  ;;  %v7514_v41 = vld [vmem:[#allocation3 + $0x760] sm:$0xff]  ;;  %v7516_v38 = vld [vmem:[#allocation3 + $0x770] sm:$0xff] }
 0x9dc   :  { %7949 = vmatpush1.bf16.msra.mxu1 %v7494_v7  ;;  %8277 = vmatpush1.bf16.msra.mxu0 %v7496_v42  ;;  %v7519_v7 = vld [vmem:[#allocation3 + $0x788] sm:$0xff]  ;;  %v7521_v42 = vld [vmem:[#allocation3 + $0x798] sm:$0xff] }
 0x9dd   :  { %7950 = vmatprep.subr.bf16.mxu1 %v7499_v53  ;;  %8278 = vmatprep.subr.bf16.mxu0 %v7501_v51  ;;  %v6833_v53 = vld [vmem:[#allocation14 + $0x44] ss:$8 sm:$0xf] }
 0x9de   :  { %v6834_v51 = vld [vmem:[#allocation14 + $0x44] ss:$8 sm:$0xf0] }
 0x9e0   :  { %7951 = vmatpush1.bf16.msra.mxu1 %v7498_v30  ;;  %8279 = vmatpush1.bf16.msra.mxu0 %v7500_v49  ;;  %v7518_v30 = vld [vmem:[#allocation3 + $0x780] sm:$0xff]  ;;  %v7520_v49 = vld [vmem:[#allocation3 + $0x790] sm:$0xff] }
 0x9e1   :  { %7952 = vmatprep.subr.bf16.mxu1 %v7503_v44  ;;  %8280 = vmatprep.subr.bf16.mxu0 %v7505_v5  ;;  %v11682_v44 = vor.u32 %v6834_v51, %v6833_v53  ;;  %v7523_v5 = vld [vmem:[#allocation3 + $0x7a8] sm:$0xff] }
 0x9e2   :  { %v7535_v53 = vld [vmem:[#allocation3 + $0x808] sm:$0xff] }
 0x9e4   :  { %7953 = vmatpush1.bf16.msra.mxu1 %v7502_v32  ;;  %8281 = vmatpush1.bf16.msra.mxu0 %v7504_v36  ;;  %v7525_v32 = vld [vmem:[#allocation3 + $0x7b8] sm:$0xff]  ;;  %v6865_v36 = vrot.slane %v11636_v47, %v11148_v46 }
 0x9e5   :  { %7954 = vmatprep.subr.bf16.mxu1 %v7507_v55  ;;  %8282 = vmatprep.subr.bf16.mxu0 %v7509_v23  ;;  %v7522_v55 = vld [vmem:[#allocation3 + $0x7a0] sm:$0xff]  ;;  %v7524_v23 = vld [vmem:[#allocation3 + $0x7b0] sm:$0xff] }
 0x9e8   :  { %7955 = vmatpush1.bf16.msra.mxu1 %v7506_v52  ;;  %8283 = vmatpush1.bf16.msra.mxu0 %v7508_v61  ;;  %v6877_v52 = vrot.slane %v11682_v44, %v11069_v59  ;;  %v7527_v61 = vld [vmem:[#allocation3 + $0x7c8] sm:$0xff] }
 0x9e9   :  { %7956 = vmatprep.subr.bf16.mxu1 %v7511_v40  ;;  %8284 = vmatprep.subr.bf16.mxu0 %v7513_v35  ;;  %v7529_v40 = vld [vmem:[#allocation3 + $0x7d8] sm:$0xff]  ;;  %v7076_v35 = vadd.f32 %v11660_v43, %v6865_v36  ;;  %v7538_v36 = vld [vmem:[#allocation3 + $0x820] sm:$0xff] }
 0x9ea   :  { %v7119_v47 = vadd.f32 %v11652_v56, %v6877_v52  ;;  %v7537_v43 = vld [vmem:[#allocation3 + $0x818] sm:$0xff]  ;;  %v7536_v56 = vld [vmem:[#allocation3 + $0x810] sm:$0xff] }
 0x9eb   :  { %v7545_v52 = vld [vmem:[#allocation3 + $0x858] sm:$0xff] }
 0x9ec   :  { %7957 = vmatpush1.bf16.msra.mxu1 %v7510_v45  ;;  %8285 = vmatpush1.bf16.msra.mxu0 %v7512_v22  ;;  %v7526_v45 = vld [vmem:[#allocation3 + $0x7c0] sm:$0xff]  ;;  %v7528_v22 = vld [vmem:[#allocation3 + $0x7d0] sm:$0xff] }
 0x9ed   :  { %7958 = vmatprep.subr.bf16.mxu1 %v7515_v31  ;;  %8286 = vmatprep.subr.bf16.mxu0 %v7517_v60  ;;  %v7531_v31 = vld [vmem:[#allocation3 + $0x7e8] sm:$0xff]  ;;  %v7533_v60 = vld [vmem:[#allocation3 + $0x7f8] sm:$0xff] }
 0x9f0   :  { %7959 = vmatpush1.bf16.msra.mxu1 %v7514_v41  ;;  %8287 = vmatpush1.bf16.msra.mxu0 %v7516_v38  ;;  %v7252_v41 = vmax.f32 %v7076_v35, 0.0  ;;  %v7530_v38 = vld [vmem:[#allocation3 + $0x7e0] sm:$0xff]  ;;  %v7547_v35 = vld [vmem:[#allocation3 + $0x868] sm:$0xff] }
 0x9f1   :  { %7960 = vmatprep.subr.bf16.mxu1 %v7519_v7  ;;  %8288 = vmatprep.subr.bf16.mxu0 %v7521_v42  ;;  %v7532_v7 = vld [vmem:[#allocation3 + $0x7f0] sm:$0xff]  ;;  %v7255_v42 = vmax.f32 %v7119_v47, 0.0 }
 0x9f2   :  { %v7268_v51 = vpack.c.bf16 %v7252_v41, %v7252_v41  ;;  %v7548_v47 = vld [vmem:[#allocation3 + $0x870] sm:$0xff]  ;;  %v7550_v41 = vld [vmem:[#allocation3 + $0x880] sm:$0xff] }
 0x9f4   :  { %7961 = vmatpush1.bf16.msra.mxu1 %v7518_v30  ;;  %8289 = vmatpush1.bf16.msra.mxu0 %v7520_v49  ;;  %v7534_v30 = vld [vmem:[#allocation3 + $0x800] sm:$0xff]  ;;  %v7271_v49 = vpack.c.bf16 %v7255_v42, %v7255_v42  ;;  %v7557_v42 = vld [vmem:[#allocation3 + $0x8b8] sm:$0xff] }
 0x9f5   :  { %7962 = vmatprep.subr.bf16.mxu1 %v7523_v5  ;;  %8290 = vmatprep.subr.bf16.mxu0 %v7525_v32  ;;  %v7539_v5 = vld [vmem:[#allocation3 + $0x828] sm:$0xff]  ;;  %v7541_v32 = vld [vmem:[#allocation3 + $0x838] sm:$0xff] }
 0x9f8   :  { %7963 = vmatpush1.bf16.msra.mxu1 %v7522_v55  ;;  %8291 = vmatpush1.bf16.msra.mxu0 %v7524_v23  ;;  %v7540_v55 = vld [vmem:[#allocation3 + $0x830] sm:$0xff]  ;;  %v7543_v23 = vld [vmem:[#allocation3 + $0x848] sm:$0xff] }
 0x9f9   :  { %7964 = vmatprep.subr.bf16.mxu1 %v7527_v61  ;;  %8292 = vmatprep.subr.bf16.mxu0 %v7529_v40  ;;  %v7542_v61 = vld [vmem:[#allocation3 + $0x840] sm:$0xff]  ;;  %v7544_v40 = vld [vmem:[#allocation3 + $0x850] sm:$0xff] }
 0x9fc   :  { %7965 = vmatpush1.bf16.msra.mxu1 %v7526_v45  ;;  %8293 = vmatpush1.bf16.msra.mxu0 %v7528_v22  ;;  %v7549_v45 = vld [vmem:[#allocation3 + $0x878] sm:$0xff]  ;;  %v7546_v22 = vld [vmem:[#allocation3 + $0x860] sm:$0xff] }
 0x9fd   :  { %7966 = vmatprep.subr.bf16.mxu1 %v7531_v31  ;;  %8294 = vmatprep.subr.bf16.mxu0 %v7533_v60  ;;  %v7551_v31 = vld [vmem:[#allocation3 + $0x888] sm:$0xff]  ;;  %v7553_v60 = vld [vmem:[#allocation3 + $0x898] sm:$0xff] }
 0xa00   :  { %7967 = vmatpush1.bf16.msra.mxu1 %v7530_v38  ;;  %8295 = vmatpush1.bf16.msra.mxu0 %v7532_v7  ;;  %v7552_v38 = vld [vmem:[#allocation3 + $0x890] sm:$0xff]  ;;  %v7555_v7 = vld [vmem:[#allocation3 + $0x8a8] sm:$0xff] }
 0xa01   :  { %7977 = vmatprep.subr.bf16.mxu1 %v7535_v53  ;;  %8305 = vmatprep.subr.bf16.mxu0 %v7537_v43  ;;  %v7554_v53 = vld [vmem:[#allocation3 + $0x8a0] sm:$0xff]  ;;  %v7556_v43 = vld [vmem:[#allocation3 + $0x8b0] sm:$0xff] }
 0xa03   :  { %7969 = vmatmul.mubr.bf16.vlgmr.msra.gmra.mrb[56].mxu1 %v7268_v51  ;;  %8297 = vmatmul.mubr.bf16.vlgmr.msra.gmra.mrb[60].mxu0 %v7268_v51  ;;  %v7559_v51 = vld [vmem:[#allocation3 + $0x8c8] sm:$0xff] }
 0xa04   :  { %7978 = vmatpush1.bf16.msra.mxu1 %v7534_v30  ;;  %8009 = vmatprep.mubr.bf16.mxu1 %v7271_v49  ;;  %v7561_v30 = vld [vmem:[#allocation3 + $0x8d8] sm:$0xff] }
 0xa05   :  { %8306 = vmatpush1.bf16.msra.mxu0 %v7536_v56  ;;  %8337 = vmatprep.mubr.bf16.mxu0 %v7271_v49  ;;  %v7558_v49 = vld [vmem:[#allocation3 + $0x8c0] sm:$0xff]  ;;  %v7560_v56 = vld [vmem:[#allocation3 + $0x8d0] sm:$0xff] }
 0xa06   :  { %7979 = vmatprep.subr.bf16.mxu1 %v7539_v5  ;;  %8307 = vmatprep.subr.bf16.mxu0 %v7541_v32  ;;  %v7563_v5 = vld [vmem:[#allocation3 + $0x8e8] sm:$0xff]  ;;  %v7565_v32 = vld [vmem:[#allocation3 + $0x8f8] sm:$0xff] }
 0xa08   :  { %7980 = vmatpush1.bf16.msra.mxu1 %v7538_v36  ;;  %v7562_v36 = vld [vmem:[#allocation3 + $0x8e0] sm:$0xff] }
 0xa09   :  { %8308 = vmatpush1.bf16.msra.mxu0 %v7540_v55  ;;  %7981 = vmatprep.subr.bf16.mxu1 %v7543_v23  ;;  %v7564_v55 = vld [vmem:[#allocation3 + $0x8f0] sm:$0xff]  ;;  %v7567_v23 = vld [vmem:[#allocation3 + $0x908] sm:$0xff] }
 0xa0a   :  { %8309 = vmatprep.subr.bf16.mxu0 %v7545_v52  ;;  %v7569_v52 = vld [vmem:[#allocation3 + $0x918] sm:$0xff] }
 0xa0c   :  { %7982 = vmatpush1.bf16.msra.mxu1 %v7542_v61  ;;  %v7566_v61 = vld [vmem:[#allocation3 + $0x900] sm:$0xff] }
 0xa0d   :  { %8310 = vmatpush1.bf16.msra.mxu0 %v7544_v40  ;;  %7983 = vmatprep.subr.bf16.mxu1 %v7547_v35  ;;  %v7568_v40 = vld [vmem:[#allocation3 + $0x910] sm:$0xff]  ;;  %v7571_v35 = vld [vmem:[#allocation3 + $0x928] sm:$0xff] }
 0xa0e   :  { %8311 = vmatprep.subr.bf16.mxu0 %v7549_v45  ;;  %v7573_v45 = vld [vmem:[#allocation3 + $0x938] sm:$0xff] }
 0xa10   :  { %7984 = vmatpush1.bf16.msra.mxu1 %v7546_v22  ;;  %v7570_v22 = vld [vmem:[#allocation3 + $0x920] sm:$0xff] }
 0xa11   :  { %8312 = vmatpush1.bf16.msra.mxu0 %v7548_v47  ;;  %7985 = vmatprep.subr.bf16.mxu1 %v7551_v31  ;;  %v7572_v47 = vld [vmem:[#allocation3 + $0x930] sm:$0xff]  ;;  %v7575_v31 = vld [vmem:[#allocation3 + $0x948] sm:$0xff] }
 0xa12   :  { %8313 = vmatprep.subr.bf16.mxu0 %v7553_v60  ;;  %v7577_v60 = vld [vmem:[#allocation3 + $0x958] sm:$0xff] }
 0xa14   :  { %7986 = vmatpush1.bf16.msra.mxu1 %v7550_v41  ;;  %v7574_v41 = vld [vmem:[#allocation3 + $0x940] sm:$0xff] }
 0xa15   :  { %8314 = vmatpush1.bf16.msra.mxu0 %v7552_v38  ;;  %7987 = vmatprep.subr.bf16.mxu1 %v7555_v7  ;;  %v7576_v38 = vld [vmem:[#allocation3 + $0x950] sm:$0xff]  ;;  %v7579_v7 = vld [vmem:[#allocation3 + $0x968] sm:$0xff] }
 0xa16   :  { %8315 = vmatprep.subr.bf16.mxu0 %v7557_v42  ;;  %v7581_v42 = vld [vmem:[#allocation3 + $0x978] sm:$0xff] }
 0xa18   :  { %7988 = vmatpush1.bf16.msra.mxu1 %v7554_v53  ;;  %v7578_v53 = vld [vmem:[#allocation3 + $0x960] sm:$0xff] }
 0xa19   :  { %8316 = vmatpush1.bf16.msra.mxu0 %v7556_v43  ;;  %7989 = vmatprep.subr.bf16.mxu1 %v7559_v51  ;;  %v7580_v43 = vld [vmem:[#allocation3 + $0x970] sm:$0xff]  ;;  %v7583_v51 = vld [vmem:[#allocation3 + $0x988] sm:$0xff] }
 0xa1a   :  { %8317 = vmatprep.subr.bf16.mxu0 %v7561_v30  ;;  %v7585_v30 = vld [vmem:[#allocation3 + $0x998] sm:$0xff] }
 0xa1c   :  { %7990 = vmatpush1.bf16.msra.mxu1 %v7558_v49  ;;  %v7582_v49 = vld [vmem:[#allocation3 + $0x980] sm:$0xff] }
 0xa1d   :  { %8318 = vmatpush1.bf16.msra.mxu0 %v7560_v56  ;;  %7991 = vmatprep.subr.bf16.mxu1 %v7563_v5  ;;  %v7584_v56 = vld [vmem:[#allocation3 + $0x990] sm:$0xff]  ;;  %v7587_v5 = vld [vmem:[#allocation3 + $0x9a8] sm:$0xff] }
 0xa1e   :  { %8319 = vmatprep.subr.bf16.mxu0 %v7565_v32  ;;  %v7589_v32 = vld [vmem:[#allocation3 + $0x9b8] sm:$0xff] }
 0xa20   :  { %7992 = vmatpush1.bf16.msra.mxu1 %v7562_v36  ;;  %v6873_v36 = vrot.slane %v11682_v44, %v11064_v57 }
 0xa21   :  { %8320 = vmatpush1.bf16.msra.mxu0 %v7564_v55  ;;  %7993 = vmatprep.subr.bf16.mxu1 %v7567_v23  ;;  %v7586_v55 = vld [vmem:[#allocation3 + $0x9a0] sm:$0xff]  ;;  %v7588_v23 = vld [vmem:[#allocation3 + $0x9b0] sm:$0xff] }
 0xa22   :  { %8321 = vmatprep.subr.bf16.mxu0 %v7569_v52  ;;  %v7591_v52 = vld [vmem:[#allocation3 + $0x9c8] sm:$0xff] }
 0xa24   :  { %7994 = vmatpush1.bf16.msra.mxu1 %v7566_v61  ;;  %v6885_v61 = vrot.slane %v11682_v44, %v11076_v62 }
 0xa25   :  { %8322 = vmatpush1.bf16.msra.mxu0 %v7568_v40  ;;  %7995 = vmatprep.subr.bf16.mxu1 %v7571_v35  ;;  %v7593_v40 = vld [vmem:[#allocation3 + $0x9d8] sm:$0xff]  ;;  %v7117_v35 = vadd.f32 %v11650_v21, %v6873_v36  ;;  %v7607_v36 = vld [vmem:[#allocation3 + $0xa48] sm:$0xff] }
 0xa26   :  { %8323 = vmatprep.subr.bf16.mxu0 %v7573_v45  ;;  %v7590_v45 = vld [vmem:[#allocation3 + $0x9c0] sm:$0xff] }
 0xa28   :  { %7996 = vmatpush1.bf16.msra.mxu1 %v7570_v22  ;;  %v7592_v22 = vld [vmem:[#allocation3 + $0x9d0] sm:$0xff] }
 0xa29   :  { %8324 = vmatpush1.bf16.msra.mxu0 %v7572_v47  ;;  %7997 = vmatprep.subr.bf16.mxu1 %v7575_v31  ;;  %v7595_v47 = vld [vmem:[#allocation3 + $0x9e8] sm:$0xff]  ;;  %v7160_v31 = vadd.f32 %v11670_v39, %v6885_v61 }
 0xa2a   :  { %8325 = vmatprep.subr.bf16.mxu0 %v7577_v60  ;;  %v7597_v60 = vld [vmem:[#allocation3 + $0x9f8] sm:$0xff]  ;;  %v7603_v39 = vld [vmem:[#allocation3 + $0xa28] sm:$0xff] }
 0xa2b   :  { %v7611_v61 = vld [vmem:[#allocation3 + $0xa68] sm:$0xff] }
 0xa2c   :  { %7998 = vmatpush1.bf16.msra.mxu1 %v7574_v41  ;;  %v7254_v41 = vmax.f32 %v7117_v35, 0.0  ;;  %v7610_v35 = vld [vmem:[#allocation3 + $0xa60] sm:$0xff] }
 0xa2d   :  { %8326 = vmatpush1.bf16.msra.mxu0 %v7576_v38  ;;  %7999 = vmatprep.subr.bf16.mxu1 %v7579_v7  ;;  %v7594_v38 = vld [vmem:[#allocation3 + $0x9e0] sm:$0xff]  ;;  %v7596_v7 = vld [vmem:[#allocation3 + $0x9f0] sm:$0xff] }
 0xa2e   :  { %8327 = vmatprep.subr.bf16.mxu0 %v7581_v42  ;;  %v7599_v42 = vld [vmem:[#allocation3 + $0xa08] sm:$0xff]  ;;  %v7270_v21 = vpack.c.bf16 %v7254_v41, %v7254_v41 }
 0xa2f   :  { %v7619_v41 = vld [vmem:[#allocation3 + $0xaa8] sm:$0xff] }
 0xa30   :  { %8000 = vmatpush1.bf16.msra.mxu1 %v7578_v53  ;;  %v7257_v53 = vmax.f32 %v7160_v31, 0.0  ;;  %v7614_v31 = vld [vmem:[#allocation3 + $0xa80] sm:$0xff] }
 0xa31   :  { %8328 = vmatpush1.bf16.msra.mxu0 %v7580_v43  ;;  %8001 = vmatprep.subr.bf16.mxu1 %v7583_v51  ;;  %v7601_v43 = vld [vmem:[#allocation3 + $0xa18] sm:$0xff]  ;;  %v7598_v51 = vld [vmem:[#allocation3 + $0xa00] sm:$0xff] }
 0xa32   :  { %8329 = vmatprep.subr.bf16.mxu0 %v7585_v30  ;;  %v7600_v30 = vld [vmem:[#allocation3 + $0xa10] sm:$0xff] }
 0xa34   :  { %8002 = vmatpush1.bf16.msra.mxu1 %v7582_v49  ;;  %v7273_v49 = vpack.c.bf16 %v7257_v53, %v7257_v53  ;;  %v7623_v53 = vld [vmem:[#allocation3 + $0xac8] sm:$0xff] }
 0xa35   :  { %8330 = vmatpush1.bf16.msra.mxu0 %v7584_v56  ;;  %8003 = vmatprep.subr.bf16.mxu1 %v7587_v5  ;;  %v7605_v56 = vld [vmem:[#allocation3 + $0xa38] sm:$0xff]  ;;  %v7602_v5 = vld [vmem:[#allocation3 + $0xa20] sm:$0xff] }
 0xa36   :  { %8331 = vmatprep.subr.bf16.mxu0 %v7589_v32  ;;  %v7604_v32 = vld [vmem:[#allocation3 + $0xa30] sm:$0xff] }
 0xa38   :  { %8004 = vmatpush1.bf16.msra.mxu1 %v7586_v55  ;;  %v7609_v55 = vld [vmem:[#allocation3 + $0xa58] sm:$0xff] }
 0xa39   :  { %8332 = vmatpush1.bf16.msra.mxu0 %v7588_v23  ;;  %8005 = vmatprep.subr.bf16.mxu1 %v7591_v52  ;;  %v7606_v23 = vld [vmem:[#allocation3 + $0xa40] sm:$0xff]  ;;  %v7608_v52 = vld [vmem:[#allocation3 + $0xa50] sm:$0xff] }
 0xa3a   :  { %8333 = vmatprep.subr.bf16.mxu0 %v7593_v40  ;;  %v7613_v40 = vld [vmem:[#allocation3 + $0xa78] sm:$0xff] }
 0xa3c   :  { %8006 = vmatpush1.bf16.msra.mxu1 %v7590_v45  ;;  %v7612_v45 = vld [vmem:[#allocation3 + $0xa70] sm:$0xff] }
 0xa3d   :  { %8334 = vmatpush1.bf16.msra.mxu0 %v7592_v22  ;;  %8007 = vmatprep.subr.bf16.mxu1 %v7595_v47  ;;  %v7615_v22 = vld [vmem:[#allocation3 + $0xa88] sm:$0xff]  ;;  %v7617_v47 = vld [vmem:[#allocation3 + $0xa98] sm:$0xff] }
 0xa3e   :  { %8335 = vmatprep.subr.bf16.mxu0 %v7597_v60  ;;  %v7616_v60 = vld [vmem:[#allocation3 + $0xa90] sm:$0xff] }
 0xa40   :  { %8008 = vmatpush1.bf16.msra.mxu1 %v7594_v38  ;;  %v7621_v38 = vld [vmem:[#allocation3 + $0xab8] sm:$0xff] }
 0xa41   :  { %8336 = vmatpush1.bf16.msra.mxu0 %v7596_v7  ;;  %8018 = vmatprep.subr.bf16.mxu1 %v7599_v42  ;;  %v7618_v7 = vld [vmem:[#allocation3 + $0xaa0] sm:$0xff]  ;;  %v7620_v42 = vld [vmem:[#allocation3 + $0xab0] sm:$0xff] }
 0xa42   :  { %8346 = vmatprep.subr.bf16.mxu0 %v7601_v43  ;;  %v7625_v43 = vld [vmem:[#allocation3 + $0xad8] sm:$0xff] }
 0xa43   :  { %8010 = vmatmul.mubr.bf16.vlgmr.msra.gmra.mrb[56].mxu1 %v7270_v21 }
 0xa44   :  { %8338 = vmatmul.mubr.bf16.vlgmr.msra.gmra.mrb[60].mxu0 %v7270_v21  ;;  %8019 = vmatpush1.bf16.msra.mxu1 %v7598_v51  ;;  %v7622_v21 = vld [vmem:[#allocation3 + $0xac0] sm:$0xff]  ;;  %v7624_v51 = vld [vmem:[#allocation3 + $0xad0] sm:$0xff] }
 0xa45   :  { %8050 = vmatprep.mubr.bf16.mxu1 %v7273_v49  ;;  %8347 = vmatpush1.bf16.msra.mxu0 %v7600_v30  ;;  %v7627_v30 = vld [vmem:[#allocation3 + $0xae8] sm:$0xff] }
 0xa46   :  { %8378 = vmatprep.mubr.bf16.mxu0 %v7273_v49  ;;  %8020 = vmatprep.subr.bf16.mxu1 %v7603_v39  ;;  %v7629_v49 = vld [vmem:[#allocation3 + $0xaf8] sm:$0xff]  ;;  %v7626_v39 = vld [vmem:[#allocation3 + $0xae0] sm:$0xff] }
 0xa47   :  { %8348 = vmatprep.subr.bf16.mxu0 %v7605_v56  ;;  %v7628_v56 = vld [vmem:[#allocation3 + $0xaf0] sm:$0xff] }
 0xa48   :  { %8021 = vmatpush1.bf16.msra.mxu1 %v7602_v5  ;;  %v7631_v5 = vld [vmem:[#allocation3 + $0xb08] sm:$0xff] }
 0xa49   :  { %8349 = vmatpush1.bf16.msra.mxu0 %v7604_v32  ;;  %8022 = vmatprep.subr.bf16.mxu1 %v7607_v36  ;;  %v7633_v32 = vld [vmem:[#allocation3 + $0xb18] sm:$0xff]  ;;  %v7630_v36 = vld [vmem:[#allocation3 + $0xb00] sm:$0xff] }
 0xa4a   :  { %8350 = vmatprep.subr.bf16.mxu0 %v7609_v55  ;;  %v7632_v55 = vld [vmem:[#allocation3 + $0xb10] sm:$0xff] }
 0xa4c   :  { %8023 = vmatpush1.bf16.msra.mxu1 %v7606_v23  ;;  %v7635_v23 = vld [vmem:[#allocation3 + $0xb28] sm:$0xff] }
 0xa4d   :  { %8351 = vmatpush1.bf16.msra.mxu0 %v7608_v52  ;;  %8024 = vmatprep.subr.bf16.mxu1 %v7611_v61  ;;  %v7637_v52 = vld [vmem:[#allocation3 + $0xb38] sm:$0xff]  ;;  %v7634_v61 = vld [vmem:[#allocation3 + $0xb20] sm:$0xff] }
 0xa4e   :  { %8352 = vmatprep.subr.bf16.mxu0 %v7613_v40  ;;  %v7636_v40 = vld [vmem:[#allocation3 + $0xb30] sm:$0xff] }
 0xa50   :  { %8025 = vmatpush1.bf16.msra.mxu1 %v7610_v35  ;;  %v7639_v35 = vld [vmem:[#allocation3 + $0xb48] sm:$0xff] }
 0xa51   :  { %8353 = vmatpush1.bf16.msra.mxu0 %v7612_v45  ;;  %8026 = vmatprep.subr.bf16.mxu1 %v7615_v22  ;;  %v7641_v45 = vld [vmem:[#allocation3 + $0xb58] sm:$0xff]  ;;  %v7638_v22 = vld [vmem:[#allocation3 + $0xb40] sm:$0xff] }
 0xa52   :  { %8354 = vmatprep.subr.bf16.mxu0 %v7617_v47  ;;  %v7640_v47 = vld [vmem:[#allocation3 + $0xb50] sm:$0xff] }
 0xa54   :  { %8027 = vmatpush1.bf16.msra.mxu1 %v7614_v31  ;;  %v7643_v31 = vld [vmem:[#allocation3 + $0xb68] sm:$0xff] }
 0xa55   :  { %8355 = vmatpush1.bf16.msra.mxu0 %v7616_v60  ;;  %8028 = vmatprep.subr.bf16.mxu1 %v7619_v41  ;;  %v7645_v60 = vld [vmem:[#allocation3 + $0xb78] sm:$0xff]  ;;  %v7642_v41 = vld [vmem:[#allocation3 + $0xb60] sm:$0xff] }
 0xa56   :  { %8356 = vmatprep.subr.bf16.mxu0 %v7621_v38  ;;  %v7644_v38 = vld [vmem:[#allocation3 + $0xb70] sm:$0xff] }
 0xa58   :  { %8029 = vmatpush1.bf16.msra.mxu1 %v7618_v7  ;;  %v7647_v7 = vld [vmem:[#allocation3 + $0xb88] sm:$0xff] }
 0xa59   :  { %8357 = vmatpush1.bf16.msra.mxu0 %v7620_v42  ;;  %8030 = vmatprep.subr.bf16.mxu1 %v7623_v53  ;;  %v7649_v42 = vld [vmem:[#allocation3 + $0xb98] sm:$0xff]  ;;  %v7646_v53 = vld [vmem:[#allocation3 + $0xb80] sm:$0xff] }
 0xa5a   :  { %8358 = vmatprep.subr.bf16.mxu0 %v7625_v43  ;;  %v7648_v43 = vld [vmem:[#allocation3 + $0xb90] sm:$0xff] }
 0xa5c   :  { %8031 = vmatpush1.bf16.msra.mxu1 %v7622_v21  ;;  %v7651_v21 = vld [vmem:[#allocation3 + $0xba8] sm:$0xff] }
 0xa5d   :  { %8359 = vmatpush1.bf16.msra.mxu0 %v7624_v51  ;;  %8032 = vmatprep.subr.bf16.mxu1 %v7627_v30  ;;  %v7653_v51 = vld [vmem:[#allocation3 + $0xbb8] sm:$0xff]  ;;  %v6881_v30 = vrot.slane %v11682_v44, %v11083_v50 }
 0xa5e   :  { %8360 = vmatprep.subr.bf16.mxu0 %v7629_v49  ;;  %v7650_v49 = vld [vmem:[#allocation3 + $0xba0] sm:$0xff] }
 0xa60   :  { %8033 = vmatpush1.bf16.msra.mxu1 %v7626_v39  ;;  %v7652_v39 = vld [vmem:[#allocation3 + $0xbb0] sm:$0xff] }
 0xa61   :  { %8361 = vmatpush1.bf16.msra.mxu0 %v7628_v56  ;;  %8034 = vmatprep.subr.bf16.mxu1 %v7631_v5  ;;  %v7655_v56 = vld [vmem:[#allocation3 + $0xbc8] sm:$0xff]  ;;  %v6893_v5 = vrot.slane %v11682_v44, %v11237_v48  ;;  %v7660_v48 = vld [vmem:[#allocation3 + $0xbf0] sm:$0xff] }
 0xa62   :  { %8362 = vmatprep.subr.bf16.mxu0 %v7633_v32  ;;  %v7657_v32 = vld [vmem:[#allocation3 + $0xbd8] sm:$0xff] }
 0xa64   :  { %8035 = vmatpush1.bf16.msra.mxu1 %v7630_v36  ;;  %v7158_v36 = vadd.f32 %v11668_v54, %v6881_v30  ;;  %v7672_v30 = vld [vmem:[#allocation3 + $0xc50] sm:$0xff] }
 0xa65   :  { %8363 = vmatpush1.bf16.msra.mxu0 %v7632_v55  ;;  %8036 = vmatprep.subr.bf16.mxu1 %v7635_v23  ;;  %v7654_v55 = vld [vmem:[#allocation3 + $0xbc0] sm:$0xff]  ;;  %v7656_v23 = vld [vmem:[#allocation3 + $0xbd0] sm:$0xff] }
 0xa66   :  { %8364 = vmatprep.subr.bf16.mxu0 %v7637_v52  ;;  %v7659_v52 = vld [vmem:[#allocation3 + $0xbe8] sm:$0xff] }
 0xa68   :  { %8037 = vmatpush1.bf16.msra.mxu1 %v7634_v61  ;;  %v7201_v61 = vadd.f32 %v11656_v37, %v6893_v5  ;;  %v7667_v37 = vld [vmem:[#allocation3 + $0xc28] sm:$0xff]  ;;  %v7676_v5 = vld [vmem:[#allocation3 + $0xc70] sm:$0xff] }
 0xa69   :  { %8365 = vmatpush1.bf16.msra.mxu0 %v7636_v40  ;;  %8038 = vmatprep.subr.bf16.mxu1 %v7639_v35  ;;  %v7661_v40 = vld [vmem:[#allocation3 + $0xbf8] sm:$0xff]  ;;  %v7256_v35 = vmax.f32 %v7158_v36, 0.0 }
 0xa6a   :  { %8366 = vmatprep.subr.bf16.mxu0 %v7641_v45  ;;  %v7658_v45 = vld [vmem:[#allocation3 + $0xbe0] sm:$0xff]  ;;  %v7681_v36 = vld [vmem:[#allocation3 + $0xc98] sm:$0xff] }
 0xa6b   :  { %v7272_v54 = vpack.c.bf16 %v7256_v35, %v7256_v35  ;;  %v7684_v35 = vld [vmem:[#allocation3 + $0xcb0] sm:$0xff] }
 0xa6c   :  { %8039 = vmatpush1.bf16.msra.mxu1 %v7638_v22  ;;  %v7663_v22 = vld [vmem:[#allocation3 + $0xc08] sm:$0xff] }
 0xa6d   :  { %8367 = vmatpush1.bf16.msra.mxu0 %v7640_v47  ;;  %8040 = vmatprep.subr.bf16.mxu1 %v7643_v31  ;;  %v7259_v47 = vmax.f32 %v7201_v61, 0.0  ;;  %v7665_v31 = vld [vmem:[#allocation3 + $0xc18] sm:$0xff] }
 0xa6e   :  { %8368 = vmatprep.subr.bf16.mxu0 %v7645_v60  ;;  %v7662_v60 = vld [vmem:[#allocation3 + $0xc00] sm:$0xff]  ;;  %v7685_v61 = vld [vmem:[#allocation3 + $0xcb8] sm:$0xff] }
 0xa70   :  { %8041 = vmatpush1.bf16.msra.mxu1 %v7642_v41  ;;  %v7664_v41 = vld [vmem:[#allocation3 + $0xc10] sm:$0xff] }
 0xa71   :  { %8369 = vmatpush1.bf16.msra.mxu0 %v7644_v38  ;;  %8042 = vmatprep.subr.bf16.mxu1 %v7647_v7  ;;  %v7275_v38 = vpack.c.bf16 %v7259_v47, %v7259_v47  ;;  %v7669_v7 = vld [vmem:[#allocation3 + $0xc38] sm:$0xff]  ;;  %v7688_v47 = vld [vmem:[#allocation3 + $0xcd0] sm:$0xff] }
 0xa72   :  { %8370 = vmatprep.subr.bf16.mxu0 %v7649_v42  ;;  %v7666_v42 = vld [vmem:[#allocation3 + $0xc20] sm:$0xff] }
 0xa74   :  { %8043 = vmatpush1.bf16.msra.mxu1 %v7646_v53  ;;  %v7668_v53 = vld [vmem:[#allocation3 + $0xc30] sm:$0xff] }
 0xa75   :  { %8371 = vmatpush1.bf16.msra.mxu0 %v7648_v43  ;;  %8044 = vmatprep.subr.bf16.mxu1 %v7651_v21  ;;  %v7671_v43 = vld [vmem:[#allocation3 + $0xc48] sm:$0xff]  ;;  %v7673_v21 = vld [vmem:[#allocation3 + $0xc58] sm:$0xff] }
 0xa76   :  { %8372 = vmatprep.subr.bf16.mxu0 %v7653_v51  ;;  %v7670_v51 = vld [vmem:[#allocation3 + $0xc40] sm:$0xff] }
 0xa78   :  { %8045 = vmatpush1.bf16.msra.mxu1 %v7650_v49  ;;  %v7675_v49 = vld [vmem:[#allocation3 + $0xc68] sm:$0xff] }
 0xa79   :  { %8373 = vmatpush1.bf16.msra.mxu0 %v7652_v39  ;;  %8046 = vmatprep.subr.bf16.mxu1 %v7655_v56  ;;  %v7677_v39 = vld [vmem:[#allocation3 + $0xc78] sm:$0xff]  ;;  %v7674_v56 = vld [vmem:[#allocation3 + $0xc60] sm:$0xff] }
 0xa7a   :  { %8374 = vmatprep.subr.bf16.mxu0 %v7657_v32  ;;  %v7679_v32 = vld [vmem:[#allocation3 + $0xc88] sm:$0xff] }
 0xa7c   :  { %8047 = vmatpush1.bf16.msra.mxu1 %v7654_v55  ;;  %v7678_v55 = vld [vmem:[#allocation3 + $0xc80] sm:$0xff] }
 0xa7d   :  { %8375 = vmatpush1.bf16.msra.mxu0 %v7656_v23  ;;  %8048 = vmatprep.subr.bf16.mxu1 %v7659_v52  ;;  %v7680_v23 = vld [vmem:[#allocation3 + $0xc90] sm:$0xff]  ;;  %v7683_v52 = vld [vmem:[#allocation3 + $0xca8] sm:$0xff] }
 0xa7e   :  { %8376 = vmatprep.subr.bf16.mxu0 %v7661_v40  ;;  %v7682_v40 = vld [vmem:[#allocation3 + $0xca0] sm:$0xff] }
 0xa80   :  { %8049 = vmatpush1.bf16.msra.mxu1 %v7658_v45  ;;  %v7687_v45 = vld [vmem:[#allocation3 + $0xcc8] sm:$0xff] }
 0xa81   :  { %8377 = vmatpush1.bf16.msra.mxu0 %v7660_v48  ;;  %8059 = vmatprep.subr.bf16.mxu1 %v7663_v22  ;;  %v7689_v48 = vld [vmem:[#allocation3 + $0xcd8] sm:$0xff]  ;;  %v7686_v22 = vld [vmem:[#allocation3 + $0xcc0] sm:$0xff] }
 0xa82   :  { %8387 = vmatprep.subr.bf16.mxu0 %v7665_v31  ;;  %v7691_v31 = vld [vmem:[#allocation3 + $0xce8] sm:$0xff] }
 0xa83   :  { %8051 = vmatmul.mubr.bf16.vlgmr.msra.gmra.mrb[56].mxu1 %v7272_v54 }
 0xa84   :  { %8379 = vmatmul.mubr.bf16.vlgmr.msra.gmra.mrb[60].mxu0 %v7272_v54  ;;  %8060 = vmatpush1.bf16.msra.mxu1 %v7662_v60  ;;  %v7693_v54 = vld [vmem:[#allocation3 + $0xcf8] sm:$0xff]  ;;  %v7690_v60 = vld [vmem:[#allocation3 + $0xce0] sm:$0xff] }
 0xa85   :  { %8091 = vmatprep.mubr.bf16.mxu1 %v7275_v38  ;;  %8388 = vmatpush1.bf16.msra.mxu0 %v7664_v41  ;;  %v7692_v41 = vld [vmem:[#allocation3 + $0xcf0] sm:$0xff] }
 0xa86   :  { %8419 = vmatprep.mubr.bf16.mxu0 %v7275_v38  ;;  %8061 = vmatprep.subr.bf16.mxu1 %v7667_v37  ;;  %v7695_v38 = vld [vmem:[#allocation3 + $0xd08] sm:$0xff]  ;;  %v7697_v37 = vld [vmem:[#allocation3 + $0xd18] sm:$0xff] }
 0xa87   :  { %8389 = vmatprep.subr.bf16.mxu0 %v7669_v7  ;;  %v7694_v7 = vld [vmem:[#allocation3 + $0xd00] sm:$0xff] }
 0xa88   :  { %8062 = vmatpush1.bf16.msra.mxu1 %v7666_v42  ;;  %v7696_v42 = vld [vmem:[#allocation3 + $0xd10] sm:$0xff] }
 0xa89   :  { %8390 = vmatpush1.bf16.msra.mxu0 %v7668_v53  ;;  %8063 = vmatprep.subr.bf16.mxu1 %v7671_v43  ;;  %v7699_v53 = vld [vmem:[#allocation3 + $0xd28] sm:$0xff]  ;;  %v7701_v43 = vld [vmem:[#allocation3 + $0xd38] sm:$0xff] }
 0xa8a   :  { %8391 = vmatprep.subr.bf16.mxu0 %v7673_v21  ;;  %v7698_v21 = vld [vmem:[#allocation3 + $0xd20] sm:$0xff] }
 0xa8c   :  { %8064 = vmatpush1.bf16.msra.mxu1 %v7670_v51  ;;  %v7700_v51 = vld [vmem:[#allocation3 + $0xd30] sm:$0xff] }
 0xa8d   :  { %8392 = vmatpush1.bf16.msra.mxu0 %v7672_v30  ;;  %8065 = vmatprep.subr.bf16.mxu1 %v7675_v49  ;;  %v7703_v30 = vld [vmem:[#allocation3 + $0xd48] sm:$0xff]  ;;  %v7705_v49 = vld [vmem:[#allocation3 + $0xd58] sm:$0xff] }
 0xa8e   :  { %8393 = vmatprep.subr.bf16.mxu0 %v7677_v39  ;;  %v7702_v39 = vld [vmem:[#allocation3 + $0xd40] sm:$0xff] }
 0xa90   :  { %8066 = vmatpush1.bf16.msra.mxu1 %v7674_v56  ;;  %v7704_v56 = vld [vmem:[#allocation3 + $0xd50] sm:$0xff] }
 0xa91   :  { %8394 = vmatpush1.bf16.msra.mxu0 %v7676_v5  ;;  %8067 = vmatprep.subr.bf16.mxu1 %v7679_v32  ;;  %v7707_v5 = vld [vmem:[#allocation3 + $0xd68] sm:$0xff]  ;;  %v7709_v32 = vld [vmem:[#allocation3 + $0xd78] sm:$0xff] }
 0xa92   :  { %8395 = vmatprep.subr.bf16.mxu0 %v7681_v36  ;;  %v7706_v36 = vld [vmem:[#allocation3 + $0xd60] sm:$0xff] }
 0xa94   :  { %8068 = vmatpush1.bf16.msra.mxu1 %v7678_v55  ;;  %v7708_v55 = vld [vmem:[#allocation3 + $0xd70] sm:$0xff] }
 0xa95   :  { %8396 = vmatpush1.bf16.msra.mxu0 %v7680_v23  ;;  %8069 = vmatprep.subr.bf16.mxu1 %v7683_v52  ;;  %v7711_v23 = vld [vmem:[#allocation3 + $0xd88] sm:$0xff]  ;;  %v7713_v52 = vld [vmem:[#allocation3 + $0xd98] sm:$0xff] }
 0xa96   :  { %8397 = vmatprep.subr.bf16.mxu0 %v7685_v61  ;;  %v7710_v61 = vld [vmem:[#allocation3 + $0xd80] sm:$0xff] }
 0xa98   :  { %8070 = vmatpush1.bf16.msra.mxu1 %v7682_v40  ;;  %v7712_v40 = vld [vmem:[#allocation3 + $0xd90] sm:$0xff] }
 0xa99   :  { %8398 = vmatpush1.bf16.msra.mxu0 %v7684_v35  ;;  %8071 = vmatprep.subr.bf16.mxu1 %v7687_v45  ;;  %v7715_v35 = vld [vmem:[#allocation3 + $0xda8] sm:$0xff]  ;;  %v7717_v45 = vld [vmem:[#allocation3 + $0xdb8] sm:$0xff] }
 0xa9a   :  { %8399 = vmatprep.subr.bf16.mxu0 %v7689_v48  ;;  %v6889_v48 = vrot.slane %v11682_v44, %v11342_v63 }
 0xa9c   :  { %8072 = vmatpush1.bf16.msra.mxu1 %v7686_v22  ;;  %v7714_v22 = vld [vmem:[#allocation3 + $0xda0] sm:$0xff] }
 0xa9d   :  { %8400 = vmatpush1.bf16.msra.mxu0 %v7688_v47  ;;  %8073 = vmatprep.subr.bf16.mxu1 %v7691_v31  ;;  %v7716_v47 = vld [vmem:[#allocation3 + $0xdb0] sm:$0xff]  ;;  %v7719_v31 = vld [vmem:[#allocation3 + $0xdc8] sm:$0xff] }
 0xa9e   :  { %8401 = vmatprep.subr.bf16.mxu0 %v7693_v54  ;;  %v6901_v54 = vrot.slane %v11682_v44, %v11240_v15  ;;  %v7724_v15 = vld [vmem:[#allocation3 + $0xdf0] sm:$0xff] }
 0xaa0   :  { %8074 = vmatpush1.bf16.msra.mxu1 %v7690_v60  ;;  %v7721_v60 = vld [vmem:[#allocation3 + $0xdd8] sm:$0xff]  ;;  %v7242_v63 = vadd.f32 %v11674_v34, %v6901_v54  ;;  %v7731_v34 = vld [vmem:[#allocation3 + $0xe28] sm:$0xff]  ;;  %v7744_v54 = vld [vmem:[#allocation3 + $0xe90] sm:$0xff] }
 0xaa1   :  { %8402 = vmatpush1.bf16.msra.mxu0 %v7692_v41  ;;  %8075 = vmatprep.subr.bf16.mxu1 %v7695_v38  ;;  %v7199_v41 = vadd.f32 %v11654_v33, %v6889_v48  ;;  %v7718_v38 = vld [vmem:[#allocation3 + $0xdc0] sm:$0xff]  ;;  %v7740_v48 = vld [vmem:[#allocation3 + $0xe70] sm:$0xff] }
 0xaa2   :  { %8403 = vmatprep.subr.bf16.mxu0 %v7697_v37  ;;  %v7720_v37 = vld [vmem:[#allocation3 + $0xdd0] sm:$0xff] }
 0xaa4   :  { %8076 = vmatpush1.bf16.msra.mxu1 %v7694_v7  ;;  %v7723_v7 = vld [vmem:[#allocation3 + $0xde8] sm:$0xff] }
 0xaa5   :  { %8404 = vmatpush1.bf16.msra.mxu0 %v7696_v42  ;;  %8077 = vmatprep.subr.bf16.mxu1 %v7699_v53  ;;  %v7725_v42 = vld [vmem:[#allocation3 + $0xdf8] sm:$0xff]  ;;  %v7258_v53 = vmax.f32 %v7199_v41, 0.0 }
 0xaa6   :  { %8405 = vmatprep.subr.bf16.mxu0 %v7701_v43  ;;  %v7722_v43 = vld [vmem:[#allocation3 + $0xde0] sm:$0xff]  ;;  %v7749_v41 = vld [vmem:[#allocation3 + $0xeb8] sm:$0xff] }
 0xaa7   :  { %v7274_v33 = vpack.c.bf16 %v7258_v53, %v7258_v53  ;;  %v7752_v53 = vld [vmem:[#allocation3 + $0xed0] sm:$0xff] }
 0xaa8   :  { %8078 = vmatpush1.bf16.msra.mxu1 %v7698_v21  ;;  %v7727_v21 = vld [vmem:[#allocation3 + $0xe08] sm:$0xff] }
 0xaa9   :  { %8406 = vmatpush1.bf16.msra.mxu0 %v7700_v51  ;;  %8079 = vmatprep.subr.bf16.mxu1 %v7703_v30  ;;  %v7261_v51 = vmax.f32 %v7242_v63, 0.0  ;;  %v7729_v30 = vld [vmem:[#allocation3 + $0xe18] sm:$0xff] }
 0xaaa   :  { %8407 = vmatprep.subr.bf16.mxu0 %v7705_v49  ;;  %v7726_v49 = vld [vmem:[#allocation3 + $0xe00] sm:$0xff]  ;;  %v7753_v63 = vld [vmem:[#allocation3 + $0xed8] sm:$0xff] }
 0xaac   :  { %8080 = vmatpush1.bf16.msra.mxu1 %v7702_v39  ;;  %v7728_v39 = vld [vmem:[#allocation3 + $0xe10] sm:$0xff] }
 0xaad   :  { %8408 = vmatpush1.bf16.msra.mxu0 %v7704_v56  ;;  %8081 = vmatprep.subr.bf16.mxu1 %v7707_v5  ;;  %v7277_v56 = vpack.c.bf16 %v7261_v51, %v7261_v51  ;;  %v7733_v5 = vld [vmem:[#allocation3 + $0xe38] sm:$0xff]  ;;  %v7756_v51 = vld [vmem:[#allocation3 + $0xef0] sm:$0xff] }
 0xaae   :  { %8409 = vmatprep.subr.bf16.mxu0 %v7709_v32  ;;  %v7730_v32 = vld [vmem:[#allocation3 + $0xe20] sm:$0xff] }
 0xab0   :  { %8082 = vmatpush1.bf16.msra.mxu1 %v7706_v36  ;;  %v7732_v36 = vld [vmem:[#allocation3 + $0xe30] sm:$0xff] }
 0xab1   :  { %8410 = vmatpush1.bf16.msra.mxu0 %v7708_v55  ;;  %8083 = vmatprep.subr.bf16.mxu1 %v7711_v23  ;;  %v7735_v55 = vld [vmem:[#allocation3 + $0xe48] sm:$0xff]  ;;  %v7737_v23 = vld [vmem:[#allocation3 + $0xe58] sm:$0xff] }
 0xab2   :  { %8411 = vmatprep.subr.bf16.mxu0 %v7713_v52  ;;  %v7734_v52 = vld [vmem:[#allocation3 + $0xe40] sm:$0xff] }
 0xab4   :  { %8084 = vmatpush1.bf16.msra.mxu1 %v7710_v61  ;;  %v7736_v61 = vld [vmem:[#allocation3 + $0xe50] sm:$0xff] }
 0xab5   :  { %8412 = vmatpush1.bf16.msra.mxu0 %v7712_v40  ;;  %8085 = vmatprep.subr.bf16.mxu1 %v7715_v35  ;;  %v7739_v40 = vld [vmem:[#allocation3 + $0xe68] sm:$0xff]  ;;  %v7741_v35 = vld [vmem:[#allocation3 + $0xe78] sm:$0xff] }
 0xab6   :  { %8413 = vmatprep.subr.bf16.mxu0 %v7717_v45  ;;  %v7738_v45 = vld [vmem:[#allocation3 + $0xe60] sm:$0xff] }
 0xab8   :  { %8086 = vmatpush1.bf16.msra.mxu1 %v7714_v22  ;;  %v7743_v22 = vld [vmem:[#allocation3 + $0xe88] sm:$0xff] }
 0xab9   :  { %8414 = vmatpush1.bf16.msra.mxu0 %v7716_v47  ;;  %8087 = vmatprep.subr.bf16.mxu1 %v7719_v31  ;;  %v7745_v47 = vld [vmem:[#allocation3 + $0xe98] sm:$0xff]  ;;  %v7742_v31 = vld [vmem:[#allocation3 + $0xe80] sm:$0xff] }
 0xaba   :  { %8415 = vmatprep.subr.bf16.mxu0 %v7721_v60  ;;  %v7747_v60 = vld [vmem:[#allocation3 + $0xea8] sm:$0xff] }
 0xabc   :  { %8088 = vmatpush1.bf16.msra.mxu1 %v7718_v38  ;;  %v7746_v38 = vld [vmem:[#allocation3 + $0xea0] sm:$0xff] }
 0xabd   :  { %8416 = vmatpush1.bf16.msra.mxu0 %v7720_v37  ;;  %8089 = vmatprep.subr.bf16.mxu1 %v7723_v7  ;;  %v7748_v37 = vld [vmem:[#allocation3 + $0xeb0] sm:$0xff]  ;;  %v7751_v7 = vld [vmem:[#allocation3 + $0xec8] sm:$0xff] }
 0xabe   :  { %8417 = vmatprep.subr.bf16.mxu0 %v7725_v42  ;;  %v7750_v42 = vld [vmem:[#allocation3 + $0xec0] sm:$0xff] }
 0xac0   :  { %8090 = vmatpush1.bf16.msra.mxu1 %v7722_v43  ;;  %v7755_v43 = vld [vmem:[#allocation3 + $0xee8] sm:$0xff] }
 0xac1   :  { %8418 = vmatpush1.bf16.msra.mxu0 %v7724_v15  ;;  %8100 = vmatprep.subr.bf16.mxu1 %v7727_v21  ;;  %v7757_v15 = vld [vmem:[#allocation3 + $0xef8] sm:$0xff]  ;;  %v7754_v21 = vld [vmem:[#allocation3 + $0xee0] sm:$0xff] }
 0xac2   :  { %8428 = vmatprep.subr.bf16.mxu0 %v7729_v30  ;;  %v7759_v30 = vld [vmem:[#allocation3 + $0xf08] sm:$0xff] }
 0xac3   :  { %8092 = vmatmul.mubr.bf16.vlgmr.msra.gmra.mrb[56].mxu1 %v7274_v33 }
 0xac4   :  { %8420 = vmatmul.mubr.bf16.vlgmr.msra.gmra.mrb[60].mxu0 %v7274_v33  ;;  %8101 = vmatpush1.bf16.msra.mxu1 %v7726_v49  ;;  %v7761_v33 = vld [vmem:[#allocation3 + $0xf18] sm:$0xff]  ;;  %v7758_v49 = vld [vmem:[#allocation3 + $0xf00] sm:$0xff] }
 0xac5   :  { %8132 = vmatprep.mubr.bf16.mxu1 %v7277_v56  ;;  %8429 = vmatpush1.bf16.msra.mxu0 %v7728_v39  ;;  %v7760_v39 = vld [vmem:[#allocation3 + $0xf10] sm:$0xff] }
 0xac6   :  { %8460 = vmatprep.mubr.bf16.mxu0 %v7277_v56  ;;  %8102 = vmatprep.subr.bf16.mxu1 %v7731_v34  ;;  %v7763_v56 = vld [vmem:[#allocation3 + $0xf28] sm:$0xff]  ;;  %v7765_v34 = vld [vmem:[#allocation3 + $0xf38] sm:$0xff] }
 0xac7   :  { %8430 = vmatprep.subr.bf16.mxu0 %v7733_v5  ;;  %v7762_v5 = vld [vmem:[#allocation3 + $0xf20] sm:$0xff] }
 0xac8   :  { %8103 = vmatpush1.bf16.msra.mxu1 %v7730_v32  ;;  %v7764_v32 = vld [vmem:[#allocation3 + $0xf30] sm:$0xff] }
 0xac9   :  { %8431 = vmatpush1.bf16.msra.mxu0 %v7732_v36  ;;  %8104 = vmatprep.subr.bf16.mxu1 %v7735_v55  ;;  %v7767_v36 = vld [vmem:[#allocation3 + $0xf48] sm:$0xff]  ;;  %v7769_v55 = vld [vmem:[#allocation3 + $0xf58] sm:$0xff] }
 0xaca   :  { %8432 = vmatprep.subr.bf16.mxu0 %v7737_v23  ;;  %v7766_v23 = vld [vmem:[#allocation3 + $0xf40] sm:$0xff] }
 0xacc   :  { %8105 = vmatpush1.bf16.msra.mxu1 %v7734_v52  ;;  %v7768_v52 = vld [vmem:[#allocation3 + $0xf50] sm:$0xff] }
 0xacd   :  { %8433 = vmatpush1.bf16.msra.mxu0 %v7736_v61  ;;  %8106 = vmatprep.subr.bf16.mxu1 %v7739_v40  ;;  %v7771_v61 = vld [vmem:[#allocation3 + $0xf68] sm:$0xff]  ;;  %v7773_v40 = vld [vmem:[#allocation3 + $0xf78] sm:$0xff] }
 0xace   :  { %8434 = vmatprep.subr.bf16.mxu0 %v7741_v35  ;;  %v7770_v35 = vld [vmem:[#allocation3 + $0xf60] sm:$0xff] }
 0xad0   :  { %8107 = vmatpush1.bf16.msra.mxu1 %v7738_v45  ;;  %v7772_v45 = vld [vmem:[#allocation3 + $0xf70] sm:$0xff] }
 0xad1   :  { %8435 = vmatpush1.bf16.msra.mxu0 %v7740_v48  ;;  %8108 = vmatprep.subr.bf16.mxu1 %v7743_v22  ;;  %v7775_v48 = vld [vmem:[#allocation3 + $0xf88] sm:$0xff]  ;;  %v7777_v22 = vld [vmem:[#allocation3 + $0xf98] sm:$0xff] }
 0xad2   :  { %8436 = vmatprep.subr.bf16.mxu0 %v7745_v47  ;;  %v7774_v47 = vld [vmem:[#allocation3 + $0xf80] sm:$0xff] }
 0xad4   :  { %8109 = vmatpush1.bf16.msra.mxu1 %v7742_v31  ;;  %v7776_v31 = vld [vmem:[#allocation3 + $0xf90] sm:$0xff] }
 0xad5   :  { %8437 = vmatpush1.bf16.msra.mxu0 %v7744_v54  ;;  %8110 = vmatprep.subr.bf16.mxu1 %v7747_v60  ;;  %v7779_v54 = vld [vmem:[#allocation3 + $0xfa8] sm:$0xff]  ;;  %v7781_v60 = vld [vmem:[#allocation3 + $0xfb8] sm:$0xff] }
 0xad6   :  { %8438 = vmatprep.subr.bf16.mxu0 %v7749_v41  ;;  %v6897_v41 = vrot.slane %v11682_v44, %v11148_v46  ;;  %v7786_v46 = vld [vmem:[#allocation3 + $0xfe0] sm:$0xff]  ;;  %v7788_v44 = vld [vmem:[#allocation3 + $0xff0] sm:$0xff] }
 0xad8   :  { %8111 = vmatpush1.bf16.msra.mxu1 %v7746_v38  ;;  %v7778_v38 = vld [vmem:[#allocation3 + $0xfa0] sm:$0xff] }
 0xad9   :  { %8439 = vmatpush1.bf16.msra.mxu0 %v7748_v37  ;;  %8112 = vmatprep.subr.bf16.mxu1 %v7751_v7  ;;  %v7780_v37 = vld [vmem:[#allocation3 + $0xfb0] sm:$0xff]  ;;  %v7783_v7 = vld [vmem:[#allocation3 + $0xfc8] sm:$0xff] }
 0xada   :  { %8440 = vmatprep.subr.bf16.mxu0 %v7753_v63  ;;  %v7785_v63 = vld [vmem:[#allocation3 + $0xfd8] sm:$0xff] }
 0xadc   :  { %8113 = vmatpush1.bf16.msra.mxu1 %v7750_v42  ;;  %v7240_v42 = vadd.f32 %v11672_v14, %v6897_v41  ;;  %v8477_v14 = vld [vmem:[#allocation4] sm:$0xff] }
 0xadd   :  { %8441 = vmatpush1.bf16.msra.mxu0 %v7752_v53  ;;  %8114 = vmatprep.subr.bf16.mxu1 %v7755_v43  ;;  %v7782_v53 = vld [vmem:[#allocation3 + $0xfc0] sm:$0xff]  ;;  %v7784_v43 = vld [vmem:[#allocation3 + $0xfd0] sm:$0xff] }
 0xade   :  { %8442 = vmatprep.subr.bf16.mxu0 %v7757_v15  ;;  %v7787_v15 = vld [vmem:[#allocation3 + $0xfe8] sm:$0xff]  ;;  %v8497_v41 = vld [vmem:[#allocation4 + $0xa0] sm:$0xff] }
 0xae0   :  { %8115 = vmatpush1.bf16.msra.mxu1 %v7754_v21  ;;  %v7789_v21 = vld [vmem:[#allocation3 + $0xff8] sm:$0xff] }
 0xae1   :  { %8443 = vmatpush1.bf16.msra.mxu0 %v7756_v51  ;;  %8116 = vmatprep.subr.bf16.mxu1 %v7759_v30  ;;  %v7260_v51 = vmax.f32 %v7240_v42, 0.0  ;;  %v8478_v30 = vld [vmem:[#allocation4 + $0x8] sm:$0xff]  ;;  %v8503_v42 = vld [vmem:[#allocation4 + $0xd0] sm:$0xff] }
 0xae2   :  { %8444 = vmatprep.subr.bf16.mxu0 %v7761_v33  ;;  %v8480_v33 = vld [vmem:[#allocation4 + $0x18] sm:$0xff] }
 0xae4   :  { %8117 = vmatpush1.bf16.msra.mxu1 %v7758_v49  ;;  %v7276_v49 = vpack.c.bf16 %v7260_v51, %v7260_v51  ;;  %v8510_v51 = vld [vmem:[#allocation4 + $0x108] sm:$0xff] }
 0xae5   :  { %8445 = vmatpush1.bf16.msra.mxu0 %v7760_v39  ;;  %8118 = vmatprep.subr.bf16.mxu1 %v7763_v56  ;;  %v8479_v39 = vld [vmem:[#allocation4 + $0x10] sm:$0xff]  ;;  %v8482_v56 = vld [vmem:[#allocation4 + $0x28] sm:$0xff] }
 0xae6   :  { %8446 = vmatprep.subr.bf16.mxu0 %v7765_v34  ;;  %v8484_v34 = vld [vmem:[#allocation4 + $0x38] sm:$0xff] }
 0xae8   :  { %8119 = vmatpush1.bf16.msra.mxu1 %v7762_v5  ;;  %v8481_v5 = vld [vmem:[#allocation4 + $0x20] sm:$0xff] }
 0xae9   :  { %8447 = vmatpush1.bf16.msra.mxu0 %v7764_v32  ;;  %8120 = vmatprep.subr.bf16.mxu1 %v7767_v36  ;;  %v8483_v32 = vld [vmem:[#allocation4 + $0x30] sm:$0xff]  ;;  %v8486_v36 = vld [vmem:[#allocation4 + $0x48] sm:$0xff] }
 0xaea   :  { %8448 = vmatprep.subr.bf16.mxu0 %v7769_v55  ;;  %v8488_v55 = vld [vmem:[#allocation4 + $0x58] sm:$0xff] }
 0xaec   :  { %8121 = vmatpush1.bf16.msra.mxu1 %v7766_v23  ;;  %v8485_v23 = vld [vmem:[#allocation4 + $0x40] sm:$0xff] }
 0xaed   :  { %8449 = vmatpush1.bf16.msra.mxu0 %v7768_v52  ;;  %8122 = vmatprep.subr.bf16.mxu1 %v7771_v61  ;;  %v8487_v52 = vld [vmem:[#allocation4 + $0x50] sm:$0xff]  ;;  %v8490_v61 = vld [vmem:[#allocation4 + $0x68] sm:$0xff] }
 0xaee   :  { %8450 = vmatprep.subr.bf16.mxu0 %v7773_v40  ;;  %v8492_v40 = vld [vmem:[#allocation4 + $0x78] sm:$0xff] }
 0xaf0   :  { %8123 = vmatpush1.bf16.msra.mxu1 %v7770_v35  ;;  %v8489_v35 = vld [vmem:[#allocation4 + $0x60] sm:$0xff] }
 0xaf1   :  { %8451 = vmatpush1.bf16.msra.mxu0 %v7772_v45  ;;  %8124 = vmatprep.subr.bf16.mxu1 %v7775_v48  ;;  %v8491_v45 = vld [vmem:[#allocation4 + $0x70] sm:$0xff]  ;;  %v8494_v48 = vld [vmem:[#allocation4 + $0x88] sm:$0xff] }
 0xaf2   :  { %8452 = vmatprep.subr.bf16.mxu0 %v7777_v22  ;;  %v8496_v22 = vld [vmem:[#allocation4 + $0x98] sm:$0xff] }
 0xaf4   :  { %8125 = vmatpush1.bf16.msra.mxu1 %v7774_v47  ;;  %v8493_v47 = vld [vmem:[#allocation4 + $0x80] sm:$0xff] }
 0xaf5   :  { %8453 = vmatpush1.bf16.msra.mxu0 %v7776_v31  ;;  %8126 = vmatprep.subr.bf16.mxu1 %v7779_v54  ;;  %v8495_v31 = vld [vmem:[#allocation4 + $0x90] sm:$0xff]  ;;  %v8498_v54 = vld [vmem:[#allocation4 + $0xa8] sm:$0xff] }
 0xaf6   :  { %8454 = vmatprep.subr.bf16.mxu0 %v7781_v60  ;;  %v8500_v60 = vld [vmem:[#allocation4 + $0xb8] sm:$0xff] }
 0xaf8   :  { %8127 = vmatpush1.bf16.msra.mxu1 %v7778_v38  ;;  %v8499_v38 = vld [vmem:[#allocation4 + $0xb0] sm:$0xff] }
 0xaf9   :  { %8455 = vmatpush1.bf16.msra.mxu0 %v7780_v37  ;;  %8128 = vmatprep.subr.bf16.mxu1 %v7783_v7  ;;  %v8502_v37 = vld [vmem:[#allocation4 + $0xc8] sm:$0xff]  ;;  %v8504_v7 = vld [vmem:[#allocation4 + $0xd8] sm:$0xff] }
 0xafa   :  { %8456 = vmatprep.subr.bf16.mxu0 %v7785_v63  ;;  %v8501_v63 = vld [vmem:[#allocation4 + $0xc0] sm:$0xff] }
 0xafc   :  { %8129 = vmatpush1.bf16.msra.mxu1 %v7782_v53  ;;  %v8506_v53 = vld [vmem:[#allocation4 + $0xe8] sm:$0xff] }
 0xafd   :  { %8457 = vmatpush1.bf16.msra.mxu0 %v7784_v43  ;;  %8130 = vmatprep.subr.bf16.mxu1 %v7787_v15  ;;  %v8508_v43 = vld [vmem:[#allocation4 + $0xf8] sm:$0xff]  ;;  %v8505_v15 = vld [vmem:[#allocation4 + $0xe0] sm:$0xff] }
 0xafe   :  { %8458 = vmatprep.subr.bf16.mxu0 %v7789_v21  ;;  %v8507_v21 = vld [vmem:[#allocation4 + $0xf0] sm:$0xff] }
 0xb00   :  { %8131 = vmatpush1.bf16.msra.mxu1 %v7786_v46  ;;  %v8512_v46 = vld [vmem:[#allocation4 + $0x118] sm:$0xff] }
 0xb01   :  { %8459 = vmatpush1.bf16.msra.mxu0 %v7788_v44  ;;  %8628 = vmatprep.subr.bf16.mxu1 %v8478_v30  ;;  %v8509_v44 = vld [vmem:[#allocation4 + $0x100] sm:$0xff]  ;;  %v8511_v30 = vld [vmem:[#allocation4 + $0x110] sm:$0xff] }
 0xb02   :  { %8710 = vmatprep.subr.bf16.mxu0 %v8480_v33  ;;  %v8514_v33 = vld [vmem:[#allocation4 + $0x128] sm:$0xff] }
 0xb03   :  { %8133 = vmatmul.mubr.bf16.vlgmr.msra.gmra.mrb[56].mxu1 %v7276_v49 }
 0xb04   :  { %8461 = vmatmul.mubr.bf16.vlgmr.msra.gmra.mrb[60].mxu0 %v7276_v49  ;;  %8629 = vmatpush1.bf16.msra.mxu1 %v8477_v14  ;;  %v8516_v49 = vld [vmem:[#allocation4 + $0x138] sm:$0xff]  ;;  %v8513_v14 = vld [vmem:[#allocation4 + $0x120] sm:$0xff] }
 0xb05   :  { %8711 = vmatpush1.bf16.msra.mxu0 %v8479_v39  ;;  %8630 = vmatprep.subr.bf16.mxu1 %v8482_v56  ;;  %v8515_v39 = vld [vmem:[#allocation4 + $0x130] sm:$0xff]  ;;  %v8518_v56 = vld [vmem:[#allocation4 + $0x148] sm:$0xff] }
 0xb06   :  { %8712 = vmatprep.subr.bf16.mxu0 %v8484_v34  ;;  %v8520_v34 = vld [vmem:[#allocation4 + $0x158] sm:$0xff] }
 0xb08   :  { %8631 = vmatpush1.bf16.msra.mxu1 %v8481_v5  ;;  %v8517_v5 = vld [vmem:[#allocation4 + $0x140] sm:$0xff] }
 0xb09   :  { %8713 = vmatpush1.bf16.msra.mxu0 %v8483_v32  ;;  %8632 = vmatprep.subr.bf16.mxu1 %v8486_v36  ;;  %v8519_v32 = vld [vmem:[#allocation4 + $0x150] sm:$0xff]  ;;  %v8522_v36 = vld [vmem:[#allocation4 + $0x168] sm:$0xff] }
 0xb0a   :  { %8714 = vmatprep.subr.bf16.mxu0 %v8488_v55  ;;  %v8524_v55 = vld [vmem:[#allocation4 + $0x178] sm:$0xff] }
 0xb0c   :  { %8633 = vmatpush1.bf16.msra.mxu1 %v8485_v23  ;;  %v8521_v23 = vld [vmem:[#allocation4 + $0x160] sm:$0xff] }
 0xb0d   :  { %8715 = vmatpush1.bf16.msra.mxu0 %v8487_v52  ;;  %8634 = vmatprep.subr.bf16.mxu1 %v8490_v61  ;;  %v8523_v52 = vld [vmem:[#allocation4 + $0x170] sm:$0xff]  ;;  %v8526_v61 = vld [vmem:[#allocation4 + $0x188] sm:$0xff] }
 0xb0e   :  { %8716 = vmatprep.subr.bf16.mxu0 %v8492_v40  ;;  %v8528_v40 = vld [vmem:[#allocation4 + $0x198] sm:$0xff] }
 0xb10   :  { %8635 = vmatpush1.bf16.msra.mxu1 %v8489_v35  ;;  %v8525_v35 = vld [vmem:[#allocation4 + $0x180] sm:$0xff] }
 0xb11   :  { %8717 = vmatpush1.bf16.msra.mxu0 %v8491_v45  ;;  %8636 = vmatprep.subr.bf16.mxu1 %v8494_v48  ;;  %v8527_v45 = vld [vmem:[#allocation4 + $0x190] sm:$0xff]  ;;  %v8530_v48 = vld [vmem:[#allocation4 + $0x1a8] sm:$0xff] }
 0xb12   :  { %8718 = vmatprep.subr.bf16.mxu0 %v8496_v22  ;;  %v8532_v22 = vld [vmem:[#allocation4 + $0x1b8] sm:$0xff] }
 0xb14   :  { %8637 = vmatpush1.bf16.msra.mxu1 %v8493_v47  ;;  %v8529_v47 = vld [vmem:[#allocation4 + $0x1a0] sm:$0xff] }
 0xb15   :  { %8719 = vmatpush1.bf16.msra.mxu0 %v8495_v31  ;;  %8638 = vmatprep.subr.bf16.mxu1 %v8498_v54  ;;  %v8531_v31 = vld [vmem:[#allocation4 + $0x1b0] sm:$0xff]  ;;  %v8534_v54 = vld [vmem:[#allocation4 + $0x1c8] sm:$0xff] }
 0xb16   :  { %8720 = vmatprep.subr.bf16.mxu0 %v8500_v60  ;;  %v8536_v60 = vld [vmem:[#allocation4 + $0x1d8] sm:$0xff] }
 0xb18   :  { %8639 = vmatpush1.bf16.msra.mxu1 %v8497_v41  ;;  %v8533_v41 = vld [vmem:[#allocation4 + $0x1c0] sm:$0xff] }
 0xb19   :  { %8721 = vmatpush1.bf16.msra.mxu0 %v8499_v38  ;;  %8640 = vmatprep.subr.bf16.mxu1 %v8502_v37  ;;  %v8535_v38 = vld [vmem:[#allocation4 + $0x1d0] sm:$0xff]  ;;  %v8538_v37 = vld [vmem:[#allocation4 + $0x1e8] sm:$0xff] }
 0xb1a   :  { %8722 = vmatprep.subr.bf16.mxu0 %v8504_v7  ;;  %v8540_v7 = vld [vmem:[#allocation4 + $0x1f8] sm:$0xff] }
 0xb1c   :  { %8641 = vmatpush1.bf16.msra.mxu1 %v8501_v63  ;;  %v8537_v63 = vld [vmem:[#allocation4 + $0x1e0] sm:$0xff] }
 0xb1d   :  { %8723 = vmatpush1.bf16.msra.mxu0 %v8503_v42  ;;  %8642 = vmatprep.subr.bf16.mxu1 %v8506_v53  ;;  %v8539_v42 = vld [vmem:[#allocation4 + $0x1f0] sm:$0xff]  ;;  %v8542_v53 = vld [vmem:[#allocation4 + $0x208] sm:$0xff] }
 0xb1e   :  { %8724 = vmatprep.subr.bf16.mxu0 %v8508_v43  ;;  %v8544_v43 = vld [vmem:[#allocation4 + $0x218] sm:$0xff] }
 0xb20   :  { %8643 = vmatpush1.bf16.msra.mxu1 %v8505_v15  ;;  %v11711_v15 = vld [vmem:[#allocation14 + $0x5] ss:$8 sm:$0xf] }
 0xb21   :  { %8725 = vmatpush1.bf16.msra.mxu0 %v8507_v21  ;;  %8644 = vmatprep.subr.bf16.mxu1 %v8510_v51  ;;  %v7796_v21 = vrot.slane %v11711_v15, %v11064_v57  ;;  %v7800_v51 = vrot.slane %v11711_v15, %v11069_v59 }
 0xb22   :  { %8726 = vmatprep.subr.bf16.mxu0 %v8512_v46  ;;  %v7808_v46 = vrot.slane %v11711_v15, %v11076_v62 }
 0xb24   :  { %8645 = vmatpush1.bf16.msra.mxu1 %v8509_v44 }
 0xb25   :  { %8727 = vmatpush1.bf16.msra.mxu0 %v8511_v30  ;;  %8646 = vmatprep.subr.bf16.mxu1 %v8514_v33 }
 0xb26   :  { %8728 = vmatprep.subr.bf16.mxu0 %v8516_v49 }
 0xb28   :  { %8647 = vmatpush1.bf16.msra.mxu1 %v8513_v14 }
 0xb29   :  { %8729 = vmatpush1.bf16.msra.mxu0 %v8515_v39  ;;  %8648 = vmatprep.subr.bf16.mxu1 %v8518_v56 }
 0xb2a   :  { %8730 = vmatprep.subr.bf16.mxu0 %v8520_v34 }
 0xb2c   :  { %8649 = vmatpush1.bf16.msra.mxu1 %v8517_v5 }
 0xb2d   :  { %8731 = vmatpush1.bf16.msra.mxu0 %v8519_v32  ;;  %8650 = vmatprep.subr.bf16.mxu1 %v8522_v36 }
 0xb2e   :  { %8732 = vmatprep.subr.bf16.mxu0 %v8524_v55 }
 0xb30   :  { %8651 = vmatpush1.bf16.msra.mxu1 %v8521_v23 }
 0xb31   :  { %8733 = vmatpush1.bf16.msra.mxu0 %v8523_v52  ;;  %8652 = vmatprep.subr.bf16.mxu1 %v8526_v61 }
 0xb32   :  { %8734 = vmatprep.subr.bf16.mxu0 %v8528_v40 }
 0xb34   :  { %8653 = vmatpush1.bf16.msra.mxu1 %v8525_v35  ;;  %v8541_v35 = vld [vmem:[#allocation4 + $0x200] sm:$0xff] }
 0xb35   :  { %8735 = vmatpush1.bf16.msra.mxu0 %v8527_v45  ;;  %8654 = vmatprep.subr.bf16.mxu1 %v8530_v48  ;;  %v8543_v45 = vld [vmem:[#allocation4 + $0x210] sm:$0xff] }
 0xb36   :  { %8736 = vmatprep.subr.bf16.mxu0 %v8532_v22  ;;  %v8546_v22 = vld [vmem:[#allocation4 + $0x228] sm:$0xff] }
 0xb38   :  { %8655 = vmatpush1.bf16.msra.mxu1 %v8529_v47  ;;  %v8548_v47 = vld [vmem:[#allocation4 + $0x238] sm:$0xff] }
 0xb39   :  { %8737 = vmatpush1.bf16.msra.mxu0 %v8531_v31  ;;  %8656 = vmatprep.subr.bf16.mxu1 %v8534_v54  ;;  %v8545_v31 = vld [vmem:[#allocation4 + $0x220] sm:$0xff]  ;;  %v8547_v54 = vld [vmem:[#allocation4 + $0x230] sm:$0xff] }
 0xb3a   :  { %8738 = vmatprep.subr.bf16.mxu0 %v8536_v60  ;;  %v8550_v60 = vld [vmem:[#allocation4 + $0x248] sm:$0xff] }
 0xb3c   :  { %8657 = vmatpush1.bf16.msra.mxu1 %v8533_v41  ;;  %v8552_v41 = vld [vmem:[#allocation4 + $0x258] sm:$0xff] }
 0xb3d   :  { %8739 = vmatpush1.bf16.msra.mxu0 %v8535_v38  ;;  %8658 = vmatprep.subr.bf16.mxu1 %v8538_v37  ;;  %v8549_v38 = vld [vmem:[#allocation4 + $0x240] sm:$0xff]  ;;  %v8551_v37 = vld [vmem:[#allocation4 + $0x250] sm:$0xff] }
 0xb3e   :  { %8740 = vmatprep.subr.bf16.mxu0 %v8540_v7  ;;  %v8554_v7 = vld [vmem:[#allocation4 + $0x268] sm:$0xff] }
 0xb40   :  { %8659 = vmatpush1.bf16.msra.mxu1 %v8537_v63  ;;  %v8556_v63 = vld [vmem:[#allocation4 + $0x278] sm:$0xff] }
 0xb41   :  { %8741 = vmatpush1.bf16.msra.mxu0 %v8539_v42  ;;  %8669 = vmatprep.subr.bf16.mxu1 %v8542_v53  ;;  %v8553_v42 = vld [vmem:[#allocation4 + $0x260] sm:$0xff]  ;;  %v8555_v53 = vld [vmem:[#allocation4 + $0x270] sm:$0xff] }
 0xb42   :  { %8751 = vmatprep.subr.bf16.mxu0 %v8544_v43  ;;  %v8558_v43 = vld [vmem:[#allocation4 + $0x288] sm:$0xff] }
 0xbd6   :  { %v8134_v44 = vpop.f32.mrb[56].mxu1 }
 0xbd7   :  { %v10034_v30 = vadd.f32 %v8134_v44, %v7796_v21  ;;  %v11719_v33 = vpop.f32.mrb[60].mxu0  ;;  %v8136_v49 = vpop.f32.mrb[57].mxu1  ;;  %v8560_v21 = vld [vmem:[#allocation4 + $0x298] sm:$0xff]  ;;  %v8562_v44 = vld [vmem:[#allocation4 + $0x2a8] sm:$0xff] }
 0xbd8   :  { %v10035_v14 = vadd.f32 %v8136_v49, %v7800_v51  ;;  %v8464_v39 = vpop.f32.mrb[61].mxu0  ;;  %v8138_v56 = vpop.f32.mrb[58].mxu1  ;;  %v8557_v51 = vld [vmem:[#allocation4 + $0x280] sm:$0xff] }
 0xbd9   :  { %v8469_v34 = vmax.f32 %v10034_v30, 0.0  ;;  %v10037_v5 = vadd.f32 %v8464_v39, %v7808_v46  ;;  %v8466_v32 = vpop.f32.mrb[62].mxu0  ;;  %v8139_v36 = vpop.f32.mrb[59].mxu1  ;;  %v8559_v46 = vld [vmem:[#allocation4 + $0x290] sm:$0xff]  ;;  %v8564_v30 = vld [vmem:[#allocation4 + $0x2b8] sm:$0xff]  ;;  %v8561_v49 = vld [vmem:[#allocation4 + $0x2a0] sm:$0xff] }
 0xbda   :  { %v8470_v55 = vmax.f32 %v10035_v14, 0.0  ;;  %v8467_v23 = vpop.f32.mrb[63].mxu0  ;;  %v8563_v14 = vld [vmem:[#allocation4 + $0x2b0] sm:$0xff]  ;;  %v8566_v39 = vld [vmem:[#allocation4 + $0x2c8] sm:$0xff]  ;;  %v8568_v56 = vld [vmem:[#allocation4 + $0x2d8] sm:$0xff] }
 0xbdb   :  { %v8472_v52 = vmax.f32 %v10037_v5, 0.0  ;;  %v8473_v40 = vpack.c.bf16 %v8469_v34, %v8469_v34  ;;  %v8565_v34 = vld [vmem:[#allocation4 + $0x2c0] sm:$0xff]  ;;  %v8567_v5 = vld [vmem:[#allocation4 + $0x2d0] sm:$0xff]  ;;  %v8570_v32 = vld [vmem:[#allocation4 + $0x2e8] sm:$0xff] }
 0xbdc   :  { %v8474_v61 = vpack.c.bf16 %v8470_v55, %v8470_v55  ;;  %v8572_v36 = vld [vmem:[#allocation4 + $0x2f8] sm:$0xff]  ;;  %v8569_v55 = vld [vmem:[#allocation4 + $0x2e0] sm:$0xff]  ;;  %v8571_v23 = vld [vmem:[#allocation4 + $0x2f0] sm:$0xff] }
 0xbdd   :  { %v8476_v48 = vpack.c.bf16 %v8472_v52, %v8472_v52  ;;  %v8574_v52 = vld [vmem:[#allocation4 + $0x308] sm:$0xff] }
 0xbde   :  { %8660 = vmatprep.mubr.bf16.mxu1 %v8474_v61  ;;  %8742 = vmatprep.mubr.bf16.mxu0 %v8474_v61  ;;  %v8576_v61 = vld [vmem:[#allocation4 + $0x318] sm:$0xff] }
 0xbdf   :  { %8661 = vmatmul.mubr.bf16.vlgmr.msra.gmra.mrb[60].mxu1 %v8473_v40  ;;  %8743 = vmatmul.mubr.bf16.vlgmr.msra.gmra.mrb[64].mxu0 %v8473_v40  ;;  %v8573_v40 = vld [vmem:[#allocation4 + $0x300] sm:$0xff] }
 0xbe0   :  { %8670 = vmatpush1.bf16.msra.mxu1 %v8541_v35  ;;  %8752 = vmatpush1.bf16.msra.mxu0 %v8543_v45  ;;  %v8575_v35 = vld [vmem:[#allocation4 + $0x310] sm:$0xff]  ;;  %v8578_v45 = vld [vmem:[#allocation4 + $0x328] sm:$0xff] }
 0xbe1   :  { %8701 = vmatprep.mubr.bf16.mxu1 %v8476_v48  ;;  %8783 = vmatprep.mubr.bf16.mxu0 %v8476_v48  ;;  %v8580_v48 = vld [vmem:[#allocation4 + $0x338] sm:$0xff] }
 0xbe2   :  { %8671 = vmatprep.subr.bf16.mxu1 %v8546_v22  ;;  %8753 = vmatprep.subr.bf16.mxu0 %v8548_v47  ;;  %v8577_v22 = vld [vmem:[#allocation4 + $0x320] sm:$0xff]  ;;  %v8579_v47 = vld [vmem:[#allocation4 + $0x330] sm:$0xff] }
 0xbe4   :  { %8672 = vmatpush1.bf16.msra.mxu1 %v8545_v31  ;;  %8754 = vmatpush1.bf16.msra.mxu0 %v8547_v54  ;;  %v8582_v31 = vld [vmem:[#allocation4 + $0x348] sm:$0xff]  ;;  %v8584_v54 = vld [vmem:[#allocation4 + $0x358] sm:$0xff] }
 0xbe5   :  { %8673 = vmatprep.subr.bf16.mxu1 %v8550_v60  ;;  %8755 = vmatprep.subr.bf16.mxu0 %v8552_v41  ;;  %v8581_v60 = vld [vmem:[#allocation4 + $0x340] sm:$0xff]  ;;  %v8583_v41 = vld [vmem:[#allocation4 + $0x350] sm:$0xff] }
 0xbe8   :  { %8674 = vmatpush1.bf16.msra.mxu1 %v8549_v38  ;;  %8756 = vmatpush1.bf16.msra.mxu0 %v8551_v37  ;;  %v8586_v38 = vld [vmem:[#allocation4 + $0x368] sm:$0xff]  ;;  %v8588_v37 = vld [vmem:[#allocation4 + $0x378] sm:$0xff] }
 0xbe9   :  { %8675 = vmatprep.subr.bf16.mxu1 %v8554_v7  ;;  %8757 = vmatprep.subr.bf16.mxu0 %v8556_v63  ;;  %v8585_v7 = vld [vmem:[#allocation4 + $0x360] sm:$0xff]  ;;  %v8587_v63 = vld [vmem:[#allocation4 + $0x370] sm:$0xff] }
 0xbec   :  { %8676 = vmatpush1.bf16.msra.mxu1 %v8553_v42  ;;  %8758 = vmatpush1.bf16.msra.mxu0 %v8555_v53  ;;  %v8590_v42 = vld [vmem:[#allocation4 + $0x388] sm:$0xff]  ;;  %v8592_v53 = vld [vmem:[#allocation4 + $0x398] sm:$0xff] }
 0xbed   :  { %8677 = vmatprep.subr.bf16.mxu1 %v8558_v43  ;;  %8759 = vmatprep.subr.bf16.mxu0 %v8560_v21  ;;  %v8589_v43 = vld [vmem:[#allocation4 + $0x380] sm:$0xff]  ;;  %v8591_v21 = vld [vmem:[#allocation4 + $0x390] sm:$0xff] }
 0xbf0   :  { %8678 = vmatpush1.bf16.msra.mxu1 %v8557_v51  ;;  %8760 = vmatpush1.bf16.msra.mxu0 %v8559_v46  ;;  %v8594_v51 = vld [vmem:[#allocation4 + $0x3a8] sm:$0xff]  ;;  %v8596_v46 = vld [vmem:[#allocation4 + $0x3b8] sm:$0xff] }
 0xbf1   :  { %8679 = vmatprep.subr.bf16.mxu1 %v8562_v44  ;;  %8761 = vmatprep.subr.bf16.mxu0 %v8564_v30  ;;  %v7804_v44 = vrot.slane %v11711_v15, %v11083_v50  ;;  %v8593_v30 = vld [vmem:[#allocation4 + $0x3a0] sm:$0xff] }
 0xbf2   :  { %v8601_v15 = vld [vmem:[#allocation4 + $0x3e0] sm:$0xff] }
 0xbf4   :  { %8680 = vmatpush1.bf16.msra.mxu1 %v8561_v49  ;;  %8762 = vmatpush1.bf16.msra.mxu0 %v8563_v14  ;;  %v8595_v49 = vld [vmem:[#allocation4 + $0x3b0] sm:$0xff]  ;;  %v8598_v14 = vld [vmem:[#allocation4 + $0x3c8] sm:$0xff] }
 0xbf5   :  { %8681 = vmatprep.subr.bf16.mxu1 %v8566_v39  ;;  %8763 = vmatprep.subr.bf16.mxu0 %v8568_v56  ;;  %v8600_v39 = vld [vmem:[#allocation4 + $0x3d8] sm:$0xff]  ;;  %v10036_v56 = vadd.f32 %v11719_v33, %v7804_v44 }
 0xbf8   :  { %8682 = vmatpush1.bf16.msra.mxu1 %v8565_v34  ;;  %8764 = vmatpush1.bf16.msra.mxu0 %v8567_v5  ;;  %v8597_v34 = vld [vmem:[#allocation4 + $0x3c0] sm:$0xff]  ;;  %v8599_v5 = vld [vmem:[#allocation4 + $0x3d0] sm:$0xff] }
 0xbf9   :  { %8683 = vmatprep.subr.bf16.mxu1 %v8570_v32  ;;  %8765 = vmatprep.subr.bf16.mxu0 %v8572_v36  ;;  %v8602_v32 = vld [vmem:[#allocation4 + $0x3e8] sm:$0xff]  ;;  %v8604_v36 = vld [vmem:[#allocation4 + $0x3f8] sm:$0xff] }
 0xbfc   :  { %8684 = vmatpush1.bf16.msra.mxu1 %v8569_v55  ;;  %8766 = vmatpush1.bf16.msra.mxu0 %v8571_v23  ;;  %v8471_v55 = vmax.f32 %v10036_v56, 0.0  ;;  %v8603_v23 = vld [vmem:[#allocation4 + $0x3f0] sm:$0xff] }
 0xbfd   :  { %8685 = vmatprep.subr.bf16.mxu1 %v8574_v52  ;;  %8767 = vmatprep.subr.bf16.mxu0 %v8576_v61 }
 0xbfe   :  { %v8475_v52 = vpack.c.bf16 %v8471_v55, %v8471_v55 }
 0xc00   :  { %8686 = vmatpush1.bf16.msra.mxu1 %v8573_v40  ;;  %8768 = vmatpush1.bf16.msra.mxu0 %v8575_v35 }
 0xc01   :  { %8687 = vmatprep.subr.bf16.mxu1 %v8578_v45  ;;  %8769 = vmatprep.subr.bf16.mxu0 %v8580_v48 }
 0xc04   :  { %8688 = vmatpush1.bf16.msra.mxu1 %v8577_v22  ;;  %8770 = vmatpush1.bf16.msra.mxu0 %v8579_v47  ;;  %v8916_v47 = vpop.permute.xlu0 %8915 }
 0xc05   :  { %8689 = vmatprep.subr.bf16.mxu1 %v8582_v31  ;;  %8771 = vmatprep.subr.bf16.mxu0 %v8584_v54 }
 0xc08   :  { %8690 = vmatpush1.bf16.msra.mxu1 %v8581_v60  ;;  %8772 = vmatpush1.bf16.msra.mxu0 %v8583_v41  ;;  %v8832_v60 = vld [vmem:[#allocation14 + $0x7] ss:$0 sm:$0xff]  ;;  %v8920_v44 = vpop.permute.xlu0 %8919 }
 0xc09   :  { %8691 = vmatprep.subr.bf16.mxu1 %v8586_v38  ;;  %8773 = vmatprep.subr.bf16.mxu0 %v8588_v37 }
 0xc0c   :  { %8692 = vmatpush1.bf16.msra.mxu1 %v8585_v7  ;;  %8774 = vmatpush1.bf16.msra.mxu0 %v8587_v63 }
 0xc0d   :  { %8693 = vmatprep.subr.bf16.mxu1 %v8590_v42  ;;  %8775 = vmatprep.subr.bf16.mxu0 %v8592_v53 }
 0xc10   :  { %8694 = vmatpush1.bf16.msra.mxu1 %v8589_v43  ;;  %8776 = vmatpush1.bf16.msra.mxu0 %v8591_v21 }
 0xc11   :  { %8695 = vmatprep.subr.bf16.mxu1 %v8594_v51  ;;  %8777 = vmatprep.subr.bf16.mxu0 %v8596_v46 }
 0xc14   :  { %8696 = vmatpush1.bf16.msra.mxu1 %v8593_v30  ;;  %8778 = vmatpush1.bf16.msra.mxu0 %v8595_v49  ;;  %v8924_v30 = vpop.permute.xlu1 %8923 }
 0xc15   :  { %8697 = vmatprep.subr.bf16.mxu1 %v8598_v14  ;;  %8779 = vmatprep.subr.bf16.mxu0 %v8600_v39 }
 0xc18   :  { %8698 = vmatpush1.bf16.msra.mxu1 %v8597_v34  ;;  %8780 = vmatpush1.bf16.msra.mxu0 %v8599_v5 }
 0xc19   :  { %8699 = vmatprep.subr.bf16.mxu1 %v8602_v32  ;;  %8781 = vmatprep.subr.bf16.mxu0 %v8604_v36 }
 0xc1c   :  { %8700 = vmatpush1.bf16.msra.mxu1 %v8601_v15  ;;  %8782 = vmatpush1.bf16.msra.mxu0 %v8603_v23 }
 0xc1d   :  { %9962 = vmatprep.subr.bf16.mxu1 %v10940_v8  ;;  %9984 = vmatprep.subr.bf16.mxu0 %v11020_v24  ;;  %v11795_v8 = vld [vmem:[#allocation33_spill] sm:$0xff] }
 0xc1f   :  { %8702 = vmatmul.mubr.bf16.vlgmr.msra.gmra.mrb[60].mxu1 %v8475_v52  ;;  %8784 = vmatmul.mubr.bf16.vlgmr.msra.gmra.mrb[64].mxu0 %v8475_v52 }
 0xc20   :  { %9963 = vmatpush3.bf16.msra.mxu1 %v10900_v0  ;;  %9985 = vmatpush3.bf16.msra.mxu0 %v10980_v16  ;;  %v11791_v0 = vld [vmem:[#allocation32_spill] sm:$0xff] }
 0xc21   :  { %9964 = vmatprep.subr.bf16.mxu1 %v10945_v9  ;;  %9986 = vmatprep.subr.bf16.mxu0 %v11025_v25  ;;  %v11796_v9 = vld [vmem:[#allocation38_spill] sm:$0xff] }
 0xc24   :  { %9965 = vmatpush3.bf16.msra.mxu1 %v10905_v1  ;;  %9987 = vmatpush3.bf16.msra.mxu0 %v10985_v17  ;;  %v11792_v1 = vld [vmem:[#allocation37_spill] sm:$0xff] }
 0xc25   :  { %9966 = vmatprep.subr.bf16.mxu1 %v10950_v10  ;;  %9988 = vmatprep.subr.bf16.mxu0 %v11030_v26  ;;  %v11797_v10 = vld [vmem:[#allocation36_spill] sm:$0xff] }
 0xc28   :  { %9967 = vmatpush3.bf16.msra.mxu1 %v10910_v2  ;;  %9989 = vmatpush3.bf16.msra.mxu0 %v10990_v18  ;;  %v11793_v2 = vld [vmem:[#allocation35_spill] sm:$0xff] }
 0xc29   :  { %9968 = vmatprep.subr.bf16.mxu1 %v10955_v11  ;;  %9990 = vmatprep.subr.bf16.mxu0 %v11035_v27  ;;  %v11799_v11 = vld [vmem:[#allocation34_spill] sm:$0xff] }
 0xc2c   :  { %9969 = vmatpush3.bf16.msra.mxu1 %v10915_v3  ;;  %9991 = vmatpush3.bf16.msra.mxu0 %v10995_v19  ;;  %v11794_v3 = vld [vmem:[#allocation40_spill] sm:$0xff] }
 0xc2d   :  { %9970 = vmatprep.subr.bf16.mxu1 %v10960_v12  ;;  %9992 = vmatprep.subr.bf16.mxu0 %v11040_v28  ;;  %v11800_v12 = vld [vmem:[#allocation39_spill] sm:$0xff] }
 0xc30   :  { %9971 = vmatpush3.bf16.msra.mxu1 %v10920_v4  ;;  %9993 = vmatpush3.bf16.msra.mxu0 %v11000_v20  ;;  %v11798_v4 = vld [vmem:[#allocation41_spill] sm:$0xff] }
 0xc31   :  { %9972 = vmatprep.subr.bf16.mxu1 %v10965_v13  ;;  %9994 = vmatprep.subr.bf16.mxu0 %v11045_v29  ;;  %v8606_v13 = vld [vmem:[#allocation14 + $0x6] ss:$8 sm:$0xf] }
 0xc32   :  { %v8611_v16 = vrot.slane %v8606_v13, %v11064_v57  ;;  %v8619_v17 = vrot.slane %v8606_v13, %v11083_v50  ;;  %v8615_v18 = vrot.slane %v8606_v13, %v11069_v59  ;;  %v8623_v19 = vrot.slane %v8606_v13, %v11076_v62 }
 0xc34   :  { %9973 = vmatpush3.bf16.msra.mxu1 %v11791_v0  ;;  %9995 = vmatpush3.bf16.msra.mxu0 %v11792_v1 }
 0xc35   :  { %9974 = vmatprep.subr.bf16.mxu1 %v11793_v2  ;;  %9996 = vmatprep.subr.bf16.mxu0 %v11794_v3 }
 0xc38   :  { %9975 = vmatpush3.bf16.msra.mxu1 %v11795_v8  ;;  %9997 = vmatpush3.bf16.msra.mxu0 %v11796_v9 }
 0xc39   :  { %9976 = vmatprep.subr.bf16.mxu1 %v11797_v10  ;;  %9998 = vmatprep.subr.bf16.mxu0 %v11798_v4 }
 0xc3c   :  { %9977 = vmatpush3.bf16.msra.mxu1 %v11799_v11  ;;  %9999 = vmatpush3.bf16.msra.mxu0 %v11800_v12 }
 0xcf2   :  { %v8703_v20 = vpop.f32.mrb[60].mxu1  ;;  %v8785_v24 = vpop.f32.mrb[64].mxu0 }
 0xcf3   :  { %v10038_v25 = vadd.f32 %v8703_v20, %v8611_v16  ;;  %v10040_v26 = vadd.f32 %v8785_v24, %v8619_v17  ;;  %v8705_v27 = vpop.f32.mrb[61].mxu1  ;;  %v8787_v28 = vpop.f32.mrb[65].mxu0 }
 0xcf4   :  { %v10039_v29 = vadd.f32 %v8705_v27, %v8615_v18  ;;  %v10041_v6 = vadd.f32 %v8787_v28, %v8623_v19  ;;  %v8707_v33 = vpop.f32.mrb[62].mxu1  ;;  %v8789_v61 = vpop.f32.mrb[66].mxu0 }
 0xcf5   :  { %v8792_v58 = vmax.f32 %v10038_v25, 0.0  ;;  %v8794_v40 = vmax.f32 %v10040_v26, 0.0  ;;  %v8708_v35 = vpop.f32.mrb[63].mxu1  ;;  %v8790_v57 = vpop.f32.mrb[67].mxu0 }
 0xcf6   :  { %v8793_v45 = vmax.f32 %v10039_v29, 0.0  ;;  %v8795_v50 = vmax.f32 %v10041_v6, 0.0 }
 0xcf7   :  { %v8796_v22 = vpack.c.bf16 %v8792_v58, %v8792_v58  ;;  %v8798_v62 = vpack.c.bf16 %v8794_v40, %v8794_v40 }
 0xcf8   :  { %v8797_v48 = vpack.c.bf16 %v8793_v45, %v8793_v45  ;;  %v8799_v59 = vpack.c.bf16 %v8795_v50, %v8795_v50 }
 0xcfa   :  { %8865 = vmatprep.mubr.bf16.mxu1 %v8797_v48  ;;  %8905 = vmatprep.mubr.bf16.mxu0 %v8799_v59 }
 0xcfb   :  { %8866 = vmatmul.mubr.bf16.vlgmr.msra.gmra.mrb[64].mxu1 %v8796_v22  ;;  %8906 = vmatmul.mubr.bf16.vlgmr.msra.gmra.mrb[68].mxu0 %v8798_v62 }
 0xdce   :  { %v9978_v31 = vpop.f32.mrb[64].mxu1  ;;  %v10000_v54 = vpop.f32.mrb[68].mxu0 }
 0xdcf   :  { %v9979_v41 = vpop.f32.mrb[65].mxu1  ;;  %v10001_v38 = vpop.f32.mrb[69].mxu0 }
 0xdd0   :  { %v9980_v37 = vadd.f32 %v9979_v41, %v9978_v31  ;;  %v10002_v7 = vadd.f32 %v10001_v38, %v10000_v54  ;;  %v9981_v63 = vpop.f32.mrb[66].mxu1  ;;  %v10003_v42 = vpop.f32.mrb[70].mxu0 }
 0xdd1   :  { %v9982_v53 = vpop.f32.mrb[67].mxu1  ;;  %v10004_v43 = vpop.f32.mrb[71].mxu0 }
 0xdd2   :  { %v8868_v21 = vadd.f32 %v9980_v37, %v8832_v60 }
 0xdd4   :  { %v8908_v51 = vadd.f32 %v10002_v7, %v8868_v21 }
 0xdd6   :  { %v8913_v46 = vmax.f32 %v8908_v51, 0.0 }
 0xdd8   :  { %v8926_v49 = vsel %vm439_vm0, %v8913_v46, %v8916_v47 }
 0xdd9   :  { %v8928_v14 = vsel %vm8927_vm4, %v8926_v49, %v8920_v44 }
 0xdda   :  { %v8930_v39 = vsel %vm8929_vm5, %v8928_v14, %v8924_v30 }
 0xddb   :  { %v8932_v56 = vsel %vm8931_vm6, %v8930_v39, 0.0 }
 0xddc   :  { %8933 = vst [vmem:[%s11777_s11] sm:$0xff] %v8932_v56 }
 0xddd   :  { %8938 = vsyncpa [#allocation8], 1 }
 0xdde   :  { %8939 = vsyncpa [#allocation10], 1 }
 0xddf   :  { %8940 = vsyncpa [#allocation13], 1 }
 0xde0   :  { %8941 = vsyncpa [#allocation16], 1 }
 0xde1   :  { %8942 = vsyncmov [#allocation6] }
 0xde4   :  { %s8943_s15 = vpop.sfrf %8942 }
 0xde5   :  { %p9779_p6 = scmp.ne.s32.totalorder %s8943_s15, 0 }
 0xde7   :  { %8947 = shalt.err (%p9779_p6)  }
 0xde8   :  { %8949 = vsyncmov [#allocation6 + $0x1] }
 0xdeb   :  { %s8950_s0 = vpop.sfrf %8949 }
 0xdec   :  { %p9780_p7 = scmp.ne.s32.totalorder %s8950_s0, 0 }
 0xdee   :  { %8954 = shalt.err (%p9780_p7)  }
 0xdef   :  { %8956 = vsyncmov [#allocation6 + $0x2] }
 0xdf2   :  { %s8957_s7 = vpop.sfrf %8956 }
 0xdf3   :  { %p9781_p8 = scmp.ne.s32.totalorder %s8957_s7, 0 }
 0xdf5   :  { %8961 = shalt.err (%p9781_p8)  }
 0xdf6   :  { %8963 = vsyncmov [#allocation6 + $0x3] }
 0xdf9   :  { %s8964_s26 = vpop.sfrf %8963 }
 0xdfa   :  { %p9782_p9 = scmp.ne.s32.totalorder %s8964_s26, 0 }
 0xdfc   :  { %8968 = shalt.err (%p9782_p9)  }

</bundles_post_ra>
